<compile_context>
chip_gen: v7x
topology: tpu7x:2x2x1
jax: 0.10.0
libtpu: 0.0.40
codegen_flags: <defaults>
</compile_context>

<pallas_src>
import jax
import jax.numpy as jnp
from jax.experimental import pallas as pl
from jax.experimental.pallas import tpu as pltpu


_VMEM_LIMIT = 48 * 1024 * 1024  # above v5e/v6e scoped defaults, below v7x physical (64 MiB)


# ----------------------------------------------------------------------------
# Kernel helpers (all operate on VMEM-resident tiles)
# ----------------------------------------------------------------------------
def _bn_relu_pool(acc, scale, shift, y_scr):
    """Folded BN (+conv bias) + ReLU + 2x2 max-pool.

    acc:   [TB*H*W, Cout] f32 conv accumulator, rows ordered (b, h, w)
    scale: [1, Cout] f32 = gamma / sqrt(var + eps)
    shift: [1, Cout] f32 = beta + scale * (conv_bias - mean)
    y_scr: VMEM scratch [TB, H, W, Cout] f32 (pre-pool activation, enables strided pool reads)
    returns pooled activation [TB, H//2, W//2, Cout] f32
    """
    TB, H, W, Cout = y_scr.shape
    Hh, Wh = H // 2, W // 2
    y_scr[...] = jnp.maximum(acc * scale + shift, 0.0).reshape(TB, H, W, Cout)
    # W-phase pool via sublane-strided ref reads, H-phase via a leading-dim split + max.
    a = y_scr[:, :, pl.ds(0, Wh, stride=2), :]
    b = y_scr[:, :, pl.ds(1, Wh, stride=2), :]
    m = jnp.maximum(a, b).reshape(TB, Hh, 2, Wh, Cout)
    return jnp.maximum(m[:, :, 0, :, :], m[:, :, 1, :, :])


def _conv3x3_bn_relu_pool(x, w_ref, scale, shift, y_scr):
    """3x3 same-padded conv (dx taps packed into K) + BN + ReLU + 2x2 max-pool, all in VMEM.

    x:     [TB, H, W, Cin] f32 un-padded input tile (VMEM-resident value)
    w_ref: [3, 3*Cin, Cout] bf16 ref; w_ref[dy] rows ordered (dx, cin)
    """
    TB, H, W, Cin = x.shape
    Cout = w_ref.shape[2]
    # Build the dx-packed, H-padded input once (halo handled in-kernel, no HBM pad roundtrip).
    zcol = jnp.zeros((TB, H, 1, Cin), x.dtype)
    left = jnp.concatenate([zcol, x[:, :, :W - 1, :]], axis=2)       # column w-1  (dx = 0 tap)
    right = jnp.concatenate([x[:, :, 1:, :], zcol], axis=2)          # column w+1  (dx = 2 tap)
    packed = jnp.concatenate([left, x, right], axis=-1)              # [TB, H, W, 3*Cin]
    zrow = jnp.zeros((TB, 1, W, 3 * Cin), x.dtype)
    pp = jnp.concatenate([zrow, packed, zrow], axis=1)               # [TB, H+2, W, 3*Cin]
    pp = pp.astype(jnp.bfloat16)                                     # bf16 matmul operand

    # 3 matmuls of K = 3*Cin instead of 9 of K = Cin; M = TB*H*W packs batch into the MXU M dim.
    acc = jnp.zeros((TB * H * W, Cout), jnp.float32)
    for dy in range(3):
        lhs = pp[:, dy:dy + H, :, :].reshape(TB * H * W, 3 * Cin)
        acc = acc + jnp.dot(lhs, w_ref[dy], preferred_element_type=jnp.float32)
    return _bn_relu_pool(acc, scale, shift, y_scr)


def _fused_cnn_kernel(x_ref, w1_ref, sc1_ref, sh1_ref,
                      w2_ref, sc2_ref, sh2_ref,
                      w3_ref, sc3_ref, sh3_ref,
                      fc1w_ref, fc1b_ref, fc2w_ref, fc2b_ref,
                      o_ref, s1, s2, s3):
    """Whole SimpleCNN forward for one batch tile, everything VMEM-resident."""
    TB = x_ref.shape[0]

    # conv1: wrapper-side im2col -> a single K=27 matmul (lane-sparse Cin=3 never enters VMEM).
    lhs1 = x_ref[...].reshape(TB * 32 * 32, 27)
    acc1 = jnp.dot(lhs1, w1_ref[...], preferred_element_type=jnp.float32)
    p1 = _bn_relu_pool(acc1, sc1_ref[...], sh1_ref[...], s1)                 # [TB,16,16, 32]

    p2 = _conv3x3_bn_relu_pool(p1, w2_ref, sc2_ref[...], sh2_ref[...], s2)   # [TB, 8, 8, 64]
    p3 = _conv3x3_bn_relu_pool(p2, w3_ref, sc3_ref[...], sh3_ref[...], s3)   # [TB, 4, 4,128]

    # TODO(synk): dropout = identity (eval-mode); training-mode RNG dropout not implemented.
    # fc1 accumulated over the 16 (h, w) positions (weight rows pre-permuted to (h, w, c)):
    # no flatten scratch, no activation transpose.
    p3b = p3.astype(jnp.bfloat16)
    h = jnp.zeros((TB, fc1b_ref.shape[1]), jnp.float32) + fc1b_ref[...]
    for i in range(4):
        for j in range(4):
            w_blk = fc1w_ref[pl.ds((i * 4 + j) * 128, 128), :]               # [128, 512] bf16
            h = h + jnp.dot(p3b[:, i, j, :], w_blk, preferred_element_type=jnp.float32)
    h = jnp.maximum(h, 0.0).astype(jnp.bfloat16)

    # fc2 padded to 128 output columns -> lane-dense store; wrapper slices [:, :10].
    o_ref[...] = (jnp.dot(h, fc2w_ref[...], preferred_element_type=jnp.float32)
                  + fc2b_ref[...]).astype(o_ref.dtype)


# ----------------------------------------------------------------------------
# pallas_call wrapper
# ----------------------------------------------------------------------------
def _const_spec(arr):
    nd = arr.ndim
    return pl.BlockSpec(arr.shape, lambda b, _nd=nd: (0,) * _nd)


def _batch_tiling(B):
    """(padded_batch, tile). TB=8 keeps VMEM ~20MB and the batch block 8-aligned; batches
    <= 8 use a single full-batch tile so block dims equal the array dims."""
    if B > 8:
        return ((B + 7) // 8) * 8, 8
    return B, B


@jax.jit
def simple_cnn_forward(x_nchw, q):
    B = x_nchw.shape[0]
    Bp, TB = _batch_tiling(B)

    # NCHW -> NHWC, then a one-time im2col of the (tiny) network input: [B, 32, 32, 27] with
    # columns ordered (dy, dx, cin).  This packs conv1's 9 taps into K=27 and removes its
    # 3/128 lane sparsity; conv2/conv3 halos are built inside the kernel instead.
    x = jnp.transpose(x_nchw, (0, 2, 3, 1))
    xp = jnp.pad(x, ((0, 0), (1, 1), (1, 1), (0, 0)))
    x_im2col = jnp.concatenate(
        [xp[:, dy:dy + 32, dx:dx + 32, :] for dy in range(3) for dx in range(3)],
        axis=-1).astype(jnp.bfloat16)                                        # [B, 32, 32, 27]
    if Bp != B:
        x_im2col = jnp.pad(x_im2col, ((0, Bp - B), (0, 0), (0, 0), (0, 0)))

    # Weights total ~2.4 MB in bf16, so default double-buffering of the constant-index blocks
    # costs < 5 MB and Buffered(1) is not needed even on v7x's 64 MiB VMEM.
    logits = pl.pallas_call(
        _fused_cnn_kernel,
        out_shape=jax.ShapeDtypeStruct((Bp, 128), jnp.float32),
        grid=(Bp // TB,),
        in_specs=[
            pl.BlockSpec((TB, 32, 32, 27), lambda b: (b, 0, 0, 0)),
            _const_spec(q["conv1_w"]), _const_spec(q["scale1"]), _const_spec(q["shift1"]),
            _const_spec(q["conv2_w"]), _const_spec(q["scale2"]), _const_spec(q["shift2"]),
            _const_spec(q["conv3_w"]), _const_spec(q["scale3"]), _const_spec(q["shift3"]),
            _const_spec(q["fc1_w"]), _const_spec(q["fc1_b"]),
            _const_spec(q["fc2_w"]), _const_spec(q["fc2_b"]),
        ],
        out_specs=pl.BlockSpec((TB, 128), lambda b: (b, 0)),
        scratch_shapes=[pltpu.VMEM((TB, 32, 32, 32), jnp.float32),   # conv1 pre-pool
                        pltpu.VMEM((TB, 16, 16, 64), jnp.float32),   # conv2 pre-pool
                        pltpu.VMEM((TB, 8, 8, 128), jnp.float32)],   # conv3 pre-pool
        compiler_params=pltpu.CompilerParams(
            dimension_semantics=("parallel",),       # shards batch tiles over v7x's 2 TCs
            vmem_limit_bytes=_VMEM_LIMIT),
    )(x_im2col,
      q["conv1_w"], q["scale1"], q["shift1"],
      q["conv2_w"], q["scale2"], q["shift2"],
      q["conv3_w"], q["scale3"], q["shift3"],
      q["fc1_w"], q["fc1_b"], q["fc2_w"], q["fc2_b"])
    return logits[:B, :10]


# ----------------------------------------------------------------------------
# Parameters (PyTorch layout conventions) + one-time packing for the kernel
# ----------------------------------------------------------------------------
def init_params(key):
    ks = jax.random.split(key, 10)

    def conv_p(k, cout, cin):
        w = jax.random.normal(k, (cout, cin, 3, 3), jnp.float32) * (0.3 / jnp.sqrt(cin * 9.0))
        b = jnp.zeros((cout,), jnp.float32)
        return w, b

    def bn_p(c):
        # fresh nn.BatchNorm2d defaults (eval mode): gamma=1, beta=0, mean=0, var=1
        return (jnp.ones((c,), jnp.float32), jnp.zeros((c,), jnp.float32),
                jnp.zeros((c,), jnp.float32), jnp.ones((c,), jnp.float32))

    p = {}
    p["conv1_w"], p["conv1_b"] = conv_p(ks[0], 32, 3)
    p["bn1"] = bn_p(32)
    p["conv2_w"], p["conv2_b"] = conv_p(ks[1], 64, 32)
    p["bn2"] = bn_p(64)
    p["conv3_w"], p["conv3_b"] = conv_p(ks[2], 128, 64)
    p["bn3"] = bn_p(128)
    p["fc1_w"] = jax.random.normal(ks[3], (512, 128 * 4 * 4), jnp.float32) * 0.02  # [out, in]
    p["fc1_b"] = jax.random.normal(ks[4], (512,), jnp.float32) * 0.01
    p["fc2_w"] = jax.random.normal(ks[5], (10, 512), jnp.float32) * 0.05
    p["fc2_b"] = jax.random.normal(ks[6], (10,), jnp.float32) * 0.01
    return p


def prepare_params(p, eps=1e-5):
    """One-time repack of PyTorch-layout params into kernel-friendly (bf16 matmul) layouts."""
    def fold(bn, bias):
        gamma, beta, mean, var = bn
        scale = gamma / jnp.sqrt(var + eps)
        shift = beta + scale * (bias - mean)
        return scale.reshape(1, -1).astype(jnp.float32), shift.reshape(1, -1).astype(jnp.float32)

    q = {}
    # conv1: OIHW -> im2col weight [27, 32], row order (dy, dx, cin) matching wrapper im2col.
    w1 = jnp.transpose(p["conv1_w"], (2, 3, 1, 0))                  # (dy, dx, cin, cout)
    q["conv1_w"] = w1.reshape(27, 32).astype(jnp.bfloat16)
    q["scale1"], q["shift1"] = fold(p["bn1"], p["conv1_b"])
    # conv2/conv3: OIHW -> [3 (dy), 3*Cin (dx, cin), Cout] for the dx-packed in-kernel matmuls.
    for i, cin, cout in ((2, 32, 64), (3, 64, 128)):
        w = jnp.transpose(p[f"conv{i}_w"], (2, 3, 1, 0))            # (dy, dx, cin, cout)
        q[f"conv{i}_w"] = w.reshape(3, 3 * cin, cout).astype(jnp.bfloat16)
        q[f"scale{i}"], q[f"shift{i}"] = fold(p[f"bn{i}"], p[f"conv{i}_b"])
    # fc1: PyTorch flattens NCHW -> columns in (c, h, w) order; permute rows to (h, w, c) so the
    # kernel can accumulate directly over its NHWC tile (no activation transpose).
    w1fc = p["fc1_w"].reshape(512, 128, 4, 4)                       # (out, c, h, w)
    w1fc = jnp.transpose(w1fc, (2, 3, 1, 0)).reshape(4 * 4 * 128, 512)
    q["fc1_w"] = w1fc.astype(jnp.bfloat16)
    q["fc1_b"] = p["fc1_b"].reshape(1, -1).astype(jnp.float32)
    # fc2: pad 10 -> 128 output columns for a lane-dense store (wrapper slices [:, :10]).
    q["fc2_w"] = jnp.pad(p["fc2_w"].T, ((0, 0), (0, 128 - 10))).astype(jnp.bfloat16)
    q["fc2_b"] = jnp.pad(p["fc2_b"], (0, 128 - 10)).reshape(1, -1).astype(jnp.float32)
    return q


# ----------------------------------------------------------------------------
# Pure-JAX reference (mirrors PyTorch eval-mode forward) for a sanity check
# ----------------------------------------------------------------------------
def reference_forward(x_nchw, p, eps=1e-5):
    def conv(x, w, b):
        y = jax.lax.conv_general_dilated(
            x, w, (1, 1), ((1, 1), (1, 1)),
            dimension_numbers=("NCHW", "OIHW", "NCHW"),
            precision=jax.lax.Precision.HIGHEST)
        return y + b[None, :, None, None]

    def bn(x, stats):
        gamma, beta, mean, var = stats
        return (x - mean[None, :, None, None]) / jnp.sqrt(var[None, :, None, None] + eps) \
            * gamma[None, :, None, None] + beta[None, :, None, None]

    def pool(x):
        B, C, H, W = x.shape
        return jnp.max(x.reshape(B, C, H // 2, 2, W // 2, 2), axis=(3, 5))

    x = pool(jax.nn.relu(bn(conv(x_nchw, p["conv1_w"], p["conv1_b"]), p["bn1"])))
    x = pool(jax.nn.relu(bn(conv(x, p["conv2_w"], p["conv2_b"]), p["bn2"])))
    x = pool(jax.nn.relu(bn(conv(x, p["conv3_w"], p["conv3_b"]), p["bn3"])))
    x = x.reshape(x.shape[0], -1)
    x = jax.nn.relu(x @ p["fc1_w"].T + p["fc1_b"])
    return x @ p["fc2_w"].T + p["fc2_b"]


if __name__ == "__main__":
    key = jax.random.PRNGKey(0)
    k_x, k_p = jax.random.split(key)

    # SimpleCNN implies CIFAR-sized input: the 128*4*4 flatten requires 32x32 spatial.
    x = jax.random.normal(k_x, (2, 3, 32, 32), jnp.float32)
    params = init_params(k_p)
    packed = prepare_params(params)

    out = jax.block_until_ready(simple_cnn_forward(x, packed))
    ref = reference_forward(x, params)

    assert out.shape == (2, 10), out.shape
    # Tolerance accounts for bf16 matmul operands (f32 accumulation) vs the HIGHEST-precision
    # f32 XLA reference; expected max abs diff is ~1e-3 at these weight scales.
    err = jnp.max(jnp.abs(out - ref))
    assert jnp.allclose(out, ref, rtol=2e-2, atol=2e-2), f"mismatch: max abs diff {err}"

    print("KERNEL_OK")
</pallas_src>

<mosaic_0001>
module attributes {stable_mosaic.version = 11 : i64} {
  func.func @_fused_cnn_kernel(%arg0: i32, %arg1: memref<2x32x32x27xbf16, #tpu.memory_space<vmem>>, %arg2: memref<27x32xbf16, #tpu.memory_space<vmem>>, %arg3: memref<1x32xf32, #tpu.memory_space<vmem>>, %arg4: memref<1x32xf32, #tpu.memory_space<vmem>>, %arg5: memref<3x96x64xbf16, #tpu.memory_space<vmem>>, %arg6: memref<1x64xf32, #tpu.memory_space<vmem>>, %arg7: memref<1x64xf32, #tpu.memory_space<vmem>>, %arg8: memref<3x192x128xbf16, #tpu.memory_space<vmem>>, %arg9: memref<1x128xf32, #tpu.memory_space<vmem>>, %arg10: memref<1x128xf32, #tpu.memory_space<vmem>>, %arg11: memref<2048x512xbf16, #tpu.memory_space<vmem>>, %arg12: memref<1x512xf32, #tpu.memory_space<vmem>>, %arg13: memref<512x128xbf16, #tpu.memory_space<vmem>>, %arg14: memref<1x128xf32, #tpu.memory_space<vmem>>, %arg15: memref<2x128xf32, #tpu.memory_space<vmem>>, %arg16: memref<2x32x32x32xf32, #tpu.memory_space<vmem>>, %arg17: memref<2x16x16x64xf32, #tpu.memory_space<vmem>>, %arg18: memref<2x8x8x128xf32, #tpu.memory_space<vmem>>) attributes {dimension_semantics = [#tpu.dimension_semantics<parallel>], iteration_bounds = array<i64: 1>, scalar_prefetch = 0 : i64, scratch_operands = 3 : i64, tpu.core_type = #tpu.core_type<tc>, window_params = [{transform_indices = @transform_0, window_bounds = array<i64: 2, 32, 32, 27>}, {pipeline_mode = #tpu.pipeline_mode<synchronous>, transform_indices = @transform_1, window_bounds = array<i64: 27, 32>}, {pipeline_mode = #tpu.pipeline_mode<synchronous>, transform_indices = @transform_2, window_bounds = array<i64: 1, 32>}, {pipeline_mode = #tpu.pipeline_mode<synchronous>, transform_indices = @transform_3, window_bounds = array<i64: 1, 32>}, {pipeline_mode = #tpu.pipeline_mode<synchronous>, transform_indices = @transform_4, window_bounds = array<i64: 3, 96, 64>}, {pipeline_mode = #tpu.pipeline_mode<synchronous>, transform_indices = @transform_5, window_bounds = array<i64: 1, 64>}, {pipeline_mode = #tpu.pipeline_mode<synchronous>, transform_indices = @transform_6, window_bounds = array<i64: 1, 64>}, {pipeline_mode = #tpu.pipeline_mode<synchronous>, transform_indices = @transform_7, window_bounds = array<i64: 3, 192, 128>}, {pipeline_mode = #tpu.pipeline_mode<synchronous>, transform_indices = @transform_8, window_bounds = array<i64: 1, 128>}, {pipeline_mode = #tpu.pipeline_mode<synchronous>, transform_indices = @transform_9, window_bounds = array<i64: 1, 128>}, {pipeline_mode = #tpu.pipeline_mode<synchronous>, transform_indices = @transform_10, window_bounds = array<i64: 2048, 512>}, {pipeline_mode = #tpu.pipeline_mode<synchronous>, transform_indices = @transform_11, window_bounds = array<i64: 1, 512>}, {pipeline_mode = #tpu.pipeline_mode<synchronous>, transform_indices = @transform_12, window_bounds = array<i64: 512, 128>}, {pipeline_mode = #tpu.pipeline_mode<synchronous>, transform_indices = @transform_13, window_bounds = array<i64: 1, 128>}, {transform_indices = @transform_14, window_bounds = array<i64: 2, 128>}]} {
    %c0 = arith.constant 0 : index
    %c0_0 = arith.constant 0 : index
    %c0_1 = arith.constant 0 : index
    %c0_2 = arith.constant 0 : index
    %0 = vector.load %arg1[%c0, %c0_0, %c0_1, %c0_2] : memref<2x32x32x27xbf16, #tpu.memory_space<vmem>>, vector<2x32x32x27xbf16>
    %1 = vector.shape_cast %0 : vector<2x32x32x27xbf16> to vector<2048x27xbf16>
    %c0_3 = arith.constant 0 : index
    %c0_4 = arith.constant 0 : index
    %2 = vector.load %arg2[%c0_3, %c0_4] : memref<27x32xbf16, #tpu.memory_space<vmem>>, vector<27x32xbf16>
    %cst = arith.constant dense<0.000000e+00> : vector<2048x32xf32>
    %3 = tpu.matmul %1, %2, %cst {dimension_numbers = #tpu.dot_dimension_numbers<[1], [0], [0], [1], [0, 0, 1, 1], [], []>} : vector<2048x27xbf16>, vector<27x32xbf16>, vector<2048x32xf32> -> vector<2048x32xf32>
    %c0_5 = arith.constant 0 : index
    %c0_6 = arith.constant 0 : index
    %4 = vector.load %arg3[%c0_5, %c0_6] : memref<1x32xf32, #tpu.memory_space<vmem>>, vector<1x32xf32>
    %c0_7 = arith.constant 0 : index
    %c0_8 = arith.constant 0 : index
    %5 = vector.load %arg4[%c0_7, %c0_8] : memref<1x32xf32, #tpu.memory_space<vmem>>, vector<1x32xf32>
    %6 = vector.broadcast %4 : vector<1x32xf32> to vector<2048x32xf32>
    %7 = arith.mulf %3, %6 : vector<2048x32xf32>
    %8 = vector.broadcast %5 : vector<1x32xf32> to vector<2048x32xf32>
    %9 = arith.addf %7, %8 : vector<2048x32xf32>
    %cst_9 = arith.constant 0.000000e+00 : f32
    %10 = vector.broadcast %cst_9 : f32 to vector<2048x32xf32>
    %11 = arith.maximumf %9, %10 : vector<2048x32xf32>
    %12 = vector.shape_cast %11 : vector<2048x32xf32> to vector<2x32x32x32xf32>
    %c0_10 = arith.constant 0 : index
    %c0_11 = arith.constant 0 : index
    %c0_12 = arith.constant 0 : index
    %c0_13 = arith.constant 0 : index
    %13 = vector.load %arg16[%c0_10, %c0_11, %c0_12, %c0_13] : memref<2x32x32x32xf32, #tpu.memory_space<vmem>>, vector<2x32x32x32xf32>
    tpu.vector_store %arg16[%c0_10, %c0_11, %c0_12, %c0_13], %12 {strides = array<i32>} : memref<2x32x32x32xf32, #tpu.memory_space<vmem>>, vector<2x32x32x32xf32>,
    %c0_14 = arith.constant 0 : index
    %c0_15 = arith.constant 0 : index
    %c0_16 = arith.constant 0 : index
    %c0_17 = arith.constant 0 : index
    %14 = tpu.strided_load %arg16[%c0_14, %c0_15, %c0_16, %c0_17] {strides = array<i32: 1, 1, 2, 1>} : memref<2x32x32x32xf32, #tpu.memory_space<vmem>>, vector<2x32x16x32xf32>
    %c0_18 = arith.constant 0 : index
    %c0_19 = arith.constant 0 : index
    %c1 = arith.constant 1 : index
    %c0_20 = arith.constant 0 : index
    %15 = tpu.strided_load %arg16[%c0_18, %c0_19, %c1, %c0_20] {strides = array<i32: 1, 1, 2, 1>} : memref<2x32x32x32xf32, #tpu.memory_space<vmem>>, vector<2x32x16x32xf32>
    %16 = arith.maximumf %14, %15 : vector<2x32x16x32xf32>
    %17 = vector.shape_cast %16 : vector<2x32x16x32xf32> to vector<2x16x2x16x32xf32>
    %18 = vector.extract_strided_slice %17 {offsets = [0, 0, 0, 0, 0], sizes = [2, 16, 1, 16, 32], strides = [1, 1, 1, 1, 1]} : vector<2x16x2x16x32xf32> to vector<2x16x1x16x32xf32>
    %19 = vector.shape_cast %18 : vector<2x16x1x16x32xf32> to vector<2x16x16x32xf32>
    %20 = vector.extract_strided_slice %17 {offsets = [0, 0, 1, 0, 0], sizes = [2, 16, 1, 16, 32], strides = [1, 1, 1, 1, 1]} : vector<2x16x2x16x32xf32> to vector<2x16x1x16x32xf32>
    %21 = vector.shape_cast %20 : vector<2x16x1x16x32xf32> to vector<2x16x16x32xf32>
    %22 = arith.maximumf %19, %21 : vector<2x16x16x32xf32>
    %c0_21 = arith.constant 0 : index
    %c0_22 = arith.constant 0 : index
    %23 = vector.load %arg6[%c0_21, %c0_22] : memref<1x64xf32, #tpu.memory_space<vmem>>, vector<1x64xf32>
    %c0_23 = arith.constant 0 : index
    %c0_24 = arith.constant 0 : index
    %24 = vector.load %arg7[%c0_23, %c0_24] : memref<1x64xf32, #tpu.memory_space<vmem>>, vector<1x64xf32>
    %cst_25 = arith.constant 0.000000e+00 : f32
    %25 = vector.broadcast %cst_25 : f32 to vector<2x16x1x32xf32>
    %26 = vector.extract_strided_slice %22 {offsets = [0, 0, 0, 0], sizes = [2, 16, 15, 32], strides = [1, 1, 1, 1]} : vector<2x16x16x32xf32> to vector<2x16x15x32xf32>
    %27 = tpu.concatenate %25, %26 in 2 : vector<2x16x1x32xf32>, vector<2x16x15x32xf32> -> vector<2x16x16x32xf32>
    %28 = vector.extract_strided_slice %22 {offsets = [0, 0, 1, 0], sizes = [2, 16, 15, 32], strides = [1, 1, 1, 1]} : vector<2x16x16x32xf32> to vector<2x16x15x32xf32>
    %29 = tpu.concatenate %28, %25 in 2 : vector<2x16x15x32xf32>, vector<2x16x1x32xf32> -> vector<2x16x16x32xf32>
    %30 = tpu.concatenate %27, %22, %29 in 3 : vector<2x16x16x32xf32>, vector<2x16x16x32xf32>, vector<2x16x16x32xf32> -> vector<2x16x16x96xf32>
    %cst_26 = arith.constant 0.000000e+00 : f32
    %31 = vector.broadcast %cst_26 : f32 to vector<2x1x16x96xf32>
    %32 = tpu.concatenate %31, %30, %31 in 1 : vector<2x1x16x96xf32>, vector<2x16x16x96xf32>, vector<2x1x16x96xf32> -> vector<2x18x16x96xf32>
    %33 = arith.truncf %32 : vector<2x18x16x96xf32> to vector<2x18x16x96xbf16>
    %cst_27 = arith.constant 0.000000e+00 : f32
    %34 = vector.broadcast %cst_27 : f32 to vector<512x64xf32>
    %35 = vector.extract_strided_slice %33 {offsets = [0, 0, 0, 0], sizes = [2, 16, 16, 96], strides = [1, 1, 1, 1]} : vector<2x18x16x96xbf16> to vector<2x16x16x96xbf16>
    %36 = vector.shape_cast %35 : vector<2x16x16x96xbf16> to vector<512x96xbf16>
    %c0_28 = arith.constant 0 : index
    %c0_29 = arith.constant 0 : index
    %c0_30 = arith.constant 0 : index
    %37 = vector.load %arg5[%c0_28, %c0_29, %c0_30] : memref<3x96x64xbf16, #tpu.memory_space<vmem>>, vector<1x96x64xbf16>
    %38 = vector.shape_cast %37 : vector<1x96x64xbf16> to vector<96x64xbf16>
    %cst_31 = arith.constant dense<0.000000e+00> : vector<512x64xf32>
    %39 = tpu.matmul %36, %38, %cst_31 {dimension_numbers = #tpu.dot_dimension_numbers<[1], [0], [0], [1], [0, 0, 1, 1], [], []>} : vector<512x96xbf16>, vector<96x64xbf16>, vector<512x64xf32> -> vector<512x64xf32>
    %40 = arith.addf %34, %39 : vector<512x64xf32>
    %41 = vector.extract_strided_slice %33 {offsets = [0, 1, 0, 0], sizes = [2, 16, 16, 96], strides = [1, 1, 1, 1]} : vector<2x18x16x96xbf16> to vector<2x16x16x96xbf16>
    %42 = vector.shape_cast %41 : vector<2x16x16x96xbf16> to vector<512x96xbf16>
    %c1_32 = arith.constant 1 : index
    %c0_33 = arith.constant 0 : index
    %c0_34 = arith.constant 0 : index
    %43 = vector.load %arg5[%c1_32, %c0_33, %c0_34] : memref<3x96x64xbf16, #tpu.memory_space<vmem>>, vector<1x96x64xbf16>
    %44 = vector.shape_cast %43 : vector<1x96x64xbf16> to vector<96x64xbf16>
    %cst_35 = arith.constant dense<0.000000e+00> : vector<512x64xf32>
    %45 = tpu.matmul %42, %44, %cst_35 {dimension_numbers = #tpu.dot_dimension_numbers<[1], [0], [0], [1], [0, 0, 1, 1], [], []>} : vector<512x96xbf16>, vector<96x64xbf16>, vector<512x64xf32> -> vector<512x64xf32>
    %46 = arith.addf %40, %45 : vector<512x64xf32>
    %47 = vector.extract_strided_slice %33 {offsets = [0, 2, 0, 0], sizes = [2, 16, 16, 96], strides = [1, 1, 1, 1]} : vector<2x18x16x96xbf16> to vector<2x16x16x96xbf16>
    %48 = vector.shape_cast %47 : vector<2x16x16x96xbf16> to vector<512x96xbf16>
    %c2 = arith.constant 2 : index
    %c0_36 = arith.constant 0 : index
    %c0_37 = arith.constant 0 : index
    %49 = vector.load %arg5[%c2, %c0_36, %c0_37] : memref<3x96x64xbf16, #tpu.memory_space<vmem>>, vector<1x96x64xbf16>
    %50 = vector.shape_cast %49 : vector<1x96x64xbf16> to vector<96x64xbf16>
    %cst_38 = arith.constant dense<0.000000e+00> : vector<512x64xf32>
    %51 = tpu.matmul %48, %50, %cst_38 {dimension_numbers = #tpu.dot_dimension_numbers<[1], [0], [0], [1], [0, 0, 1, 1], [], []>} : vector<512x96xbf16>, vector<96x64xbf16>, vector<512x64xf32> -> vector<512x64xf32>
    %52 = arith.addf %46, %51 : vector<512x64xf32>
    %53 = vector.broadcast %23 : vector<1x64xf32> to vector<512x64xf32>
    %54 = arith.mulf %52, %53 : vector<512x64xf32>
    %55 = vector.broadcast %24 : vector<1x64xf32> to vector<512x64xf32>
    %56 = arith.addf %54, %55 : vector<512x64xf32>
    %cst_39 = arith.constant 0.000000e+00 : f32
    %57 = vector.broadcast %cst_39 : f32 to vector<512x64xf32>
    %58 = arith.maximumf %56, %57 : vector<512x64xf32>
    %59 = vector.shape_cast %58 : vector<512x64xf32> to vector<2x16x16x64xf32>
    %c0_40 = arith.constant 0 : index
    %c0_41 = arith.constant 0 : index
    %c0_42 = arith.constant 0 : index
    %c0_43 = arith.constant 0 : index
    %60 = vector.load %arg17[%c0_40, %c0_41, %c0_42, %c0_43] : memref<2x16x16x64xf32, #tpu.memory_space<vmem>>, vector<2x16x16x64xf32>
    tpu.vector_store %arg17[%c0_40, %c0_41, %c0_42, %c0_43], %59 {strides = array<i32>} : memref<2x16x16x64xf32, #tpu.memory_space<vmem>>, vector<2x16x16x64xf32>,
    %c0_44 = arith.constant 0 : index
    %c0_45 = arith.constant 0 : index
    %c0_46 = arith.constant 0 : index
    %c0_47 = arith.constant 0 : index
    %61 = tpu.strided_load %arg17[%c0_44, %c0_45, %c0_46, %c0_47] {strides = array<i32: 1, 1, 2, 1>} : memref<2x16x16x64xf32, #tpu.memory_space<vmem>>, vector<2x16x8x64xf32>
    %c0_48 = arith.constant 0 : index
    %c0_49 = arith.constant 0 : index
    %c1_50 = arith.constant 1 : index
    %c0_51 = arith.constant 0 : index
    %62 = tpu.strided_load %arg17[%c0_48, %c0_49, %c1_50, %c0_51] {strides = array<i32: 1, 1, 2, 1>} : memref<2x16x16x64xf32, #tpu.memory_space<vmem>>, vector<2x16x8x64xf32>
    %63 = arith.maximumf %61, %62 : vector<2x16x8x64xf32>
    %64 = vector.shape_cast %63 : vector<2x16x8x64xf32> to vector<2x8x2x8x64xf32>
    %65 = vector.extract_strided_slice %64 {offsets = [0, 0, 0, 0, 0], sizes = [2, 8, 1, 8, 64], strides = [1, 1, 1, 1, 1]} : vector<2x8x2x8x64xf32> to vector<2x8x1x8x64xf32>
    %66 = vector.shape_cast %65 : vector<2x8x1x8x64xf32> to vector<2x8x8x64xf32>
    %67 = vector.extract_strided_slice %64 {offsets = [0, 0, 1, 0, 0], sizes = [2, 8, 1, 8, 64], strides = [1, 1, 1, 1, 1]} : vector<2x8x2x8x64xf32> to vector<2x8x1x8x64xf32>
    %68 = vector.shape_cast %67 : vector<2x8x1x8x64xf32> to vector<2x8x8x64xf32>
    %69 = arith.maximumf %66, %68 : vector<2x8x8x64xf32>
    %c0_52 = arith.constant 0 : index
    %c0_53 = arith.constant 0 : index
    %70 = vector.load %arg9[%c0_52, %c0_53] : memref<1x128xf32, #tpu.memory_space<vmem>>, vector<1x128xf32>
    %c0_54 = arith.constant 0 : index
    %c0_55 = arith.constant 0 : index
    %71 = vector.load %arg10[%c0_54, %c0_55] : memref<1x128xf32, #tpu.memory_space<vmem>>, vector<1x128xf32>
    %cst_56 = arith.constant 0.000000e+00 : f32
    %72 = vector.broadcast %cst_56 : f32 to vector<2x8x1x64xf32>
    %73 = vector.extract_strided_slice %69 {offsets = [0, 0, 0, 0], sizes = [2, 8, 7, 64], strides = [1, 1, 1, 1]} : vector<2x8x8x64xf32> to vector<2x8x7x64xf32>
    %74 = tpu.concatenate %72, %73 in 2 : vector<2x8x1x64xf32>, vector<2x8x7x64xf32> -> vector<2x8x8x64xf32>
    %75 = vector.extract_strided_slice %69 {offsets = [0, 0, 1, 0], sizes = [2, 8, 7, 64], strides = [1, 1, 1, 1]} : vector<2x8x8x64xf32> to vector<2x8x7x64xf32>
    %76 = tpu.concatenate %75, %72 in 2 : vector<2x8x7x64xf32>, vector<2x8x1x64xf32> -> vector<2x8x8x64xf32>
    %77 = tpu.concatenate %74, %69, %76 in 3 : vector<2x8x8x64xf32>, vector<2x8x8x64xf32>, vector<2x8x8x64xf32> -> vector<2x8x8x192xf32>
    %cst_57 = arith.constant 0.000000e+00 : f32
    %78 = vector.broadcast %cst_57 : f32 to vector<2x1x8x192xf32>
    %79 = tpu.concatenate %78, %77, %78 in 1 : vector<2x1x8x192xf32>, vector<2x8x8x192xf32>, vector<2x1x8x192xf32> -> vector<2x10x8x192xf32>
    %80 = arith.truncf %79 : vector<2x10x8x192xf32> to vector<2x10x8x192xbf16>
    %cst_58 = arith.constant 0.000000e+00 : f32
    %81 = vector.broadcast %cst_58 : f32 to vector<128x128xf32>
    %82 = vector.extract_strided_slice %80 {offsets = [0, 0, 0, 0], sizes = [2, 8, 8, 192], strides = [1, 1, 1, 1]} : vector<2x10x8x192xbf16> to vector<2x8x8x192xbf16>
    %83 = vector.shape_cast %82 : vector<2x8x8x192xbf16> to vector<128x192xbf16>
    %c0_59 = arith.constant 0 : index
    %c0_60 = arith.constant 0 : index
    %c0_61 = arith.constant 0 : index
    %84 = vector.load %arg8[%c0_59, %c0_60, %c0_61] : memref<3x192x128xbf16, #tpu.memory_space<vmem>>, vector<1x192x128xbf16>
    %85 = vector.shape_cast %84 : vector<1x192x128xbf16> to vector<192x128xbf16>
    %cst_62 = arith.constant dense<0.000000e+00> : vector<128x128xf32>
    %86 = tpu.matmul %83, %85, %cst_62 {dimension_numbers = #tpu.dot_dimension_numbers<[1], [0], [0], [1], [0, 0, 1, 1], [], []>} : vector<128x192xbf16>, vector<192x128xbf16>, vector<128x128xf32> -> vector<128x128xf32>
    %87 = arith.addf %81, %86 : vector<128x128xf32>
    %88 = vector.extract_strided_slice %80 {offsets = [0, 1, 0, 0], sizes = [2, 8, 8, 192], strides = [1, 1, 1, 1]} : vector<2x10x8x192xbf16> to vector<2x8x8x192xbf16>
    %89 = vector.shape_cast %88 : vector<2x8x8x192xbf16> to vector<128x192xbf16>
    %c1_63 = arith.constant 1 : index
    %c0_64 = arith.constant 0 : index
    %c0_65 = arith.constant 0 : index
    %90 = vector.load %arg8[%c1_63, %c0_64, %c0_65] : memref<3x192x128xbf16, #tpu.memory_space<vmem>>, vector<1x192x128xbf16>
    %91 = vector.shape_cast %90 : vector<1x192x128xbf16> to vector<192x128xbf16>
    %cst_66 = arith.constant dense<0.000000e+00> : vector<128x128xf32>
    %92 = tpu.matmul %89, %91, %cst_66 {dimension_numbers = #tpu.dot_dimension_numbers<[1], [0], [0], [1], [0, 0, 1, 1], [], []>} : vector<128x192xbf16>, vector<192x128xbf16>, vector<128x128xf32> -> vector<128x128xf32>
    %93 = arith.addf %87, %92 : vector<128x128xf32>
    %94 = vector.extract_strided_slice %80 {offsets = [0, 2, 0, 0], sizes = [2, 8, 8, 192], strides = [1, 1, 1, 1]} : vector<2x10x8x192xbf16> to vector<2x8x8x192xbf16>
    %95 = vector.shape_cast %94 : vector<2x8x8x192xbf16> to vector<128x192xbf16>
    %c2_67 = arith.constant 2 : index
    %c0_68 = arith.constant 0 : index
    %c0_69 = arith.constant 0 : index
    %96 = vector.load %arg8[%c2_67, %c0_68, %c0_69] : memref<3x192x128xbf16, #tpu.memory_space<vmem>>, vector<1x192x128xbf16>
    %97 = vector.shape_cast %96 : vector<1x192x128xbf16> to vector<192x128xbf16>
    %cst_70 = arith.constant dense<0.000000e+00> : vector<128x128xf32>
    %98 = tpu.matmul %95, %97, %cst_70 {dimension_numbers = #tpu.dot_dimension_numbers<[1], [0], [0], [1], [0, 0, 1, 1], [], []>} : vector<128x192xbf16>, vector<192x128xbf16>, vector<128x128xf32> -> vector<128x128xf32>
    %99 = arith.addf %93, %98 : vector<128x128xf32>
    %100 = vector.broadcast %70 : vector<1x128xf32> to vector<128x128xf32>
    %101 = arith.mulf %99, %100 : vector<128x128xf32>
    %102 = vector.broadcast %71 : vector<1x128xf32> to vector<128x128xf32>
    %103 = arith.addf %101, %102 : vector<128x128xf32>
    %cst_71 = arith.constant 0.000000e+00 : f32
    %104 = vector.broadcast %cst_71 : f32 to vector<128x128xf32>
    %105 = arith.maximumf %103, %104 : vector<128x128xf32>
    %106 = vector.shape_cast %105 : vector<128x128xf32> to vector<2x8x8x128xf32>
    %c0_72 = arith.constant 0 : index
    %c0_73 = arith.constant 0 : index
    %c0_74 = arith.constant 0 : index
    %c0_75 = arith.constant 0 : index
    %107 = vector.load %arg18[%c0_72, %c0_73, %c0_74, %c0_75] : memref<2x8x8x128xf32, #tpu.memory_space<vmem>>, vector<2x8x8x128xf32>
    tpu.vector_store %arg18[%c0_72, %c0_73, %c0_74, %c0_75], %106 {strides = array<i32>} : memref<2x8x8x128xf32, #tpu.memory_space<vmem>>, vector<2x8x8x128xf32>,
    %c0_76 = arith.constant 0 : index
    %c0_77 = arith.constant 0 : index
    %c0_78 = arith.constant 0 : index
    %c0_79 = arith.constant 0 : index
    %108 = tpu.strided_load %arg18[%c0_76, %c0_77, %c0_78, %c0_79] {strides = array<i32: 1, 1, 2, 1>} : memref<2x8x8x128xf32, #tpu.memory_space<vmem>>, vector<2x8x4x128xf32>
    %c0_80 = arith.constant 0 : index
    %c0_81 = arith.constant 0 : index
    %c1_82 = arith.constant 1 : index
    %c0_83 = arith.constant 0 : index
    %109 = tpu.strided_load %arg18[%c0_80, %c0_81, %c1_82, %c0_83] {strides = array<i32: 1, 1, 2, 1>} : memref<2x8x8x128xf32, #tpu.memory_space<vmem>>, vector<2x8x4x128xf32>
    %110 = arith.maximumf %108, %109 : vector<2x8x4x128xf32>
    %111 = vector.shape_cast %110 : vector<2x8x4x128xf32> to vector<2x4x2x4x128xf32>
    %112 = vector.extract_strided_slice %111 {offsets = [0, 0, 0, 0, 0], sizes = [2, 4, 1, 4, 128], strides = [1, 1, 1, 1, 1]} : vector<2x4x2x4x128xf32> to vector<2x4x1x4x128xf32>
    %113 = vector.shape_cast %112 : vector<2x4x1x4x128xf32> to vector<2x4x4x128xf32>
    %114 = vector.extract_strided_slice %111 {offsets = [0, 0, 1, 0, 0], sizes = [2, 4, 1, 4, 128], strides = [1, 1, 1, 1, 1]} : vector<2x4x2x4x128xf32> to vector<2x4x1x4x128xf32>
    %115 = vector.shape_cast %114 : vector<2x4x1x4x128xf32> to vector<2x4x4x128xf32>
    %116 = arith.maximumf %113, %115 : vector<2x4x4x128xf32>
    %117 = arith.truncf %116 : vector<2x4x4x128xf32> to vector<2x4x4x128xbf16>
    %cst_84 = arith.constant 0.000000e+00 : f32
    %118 = vector.broadcast %cst_84 : f32 to vector<2x512xf32>
    %c0_85 = arith.constant 0 : index
    %c0_86 = arith.constant 0 : index
    %119 = vector.load %arg12[%c0_85, %c0_86] : memref<1x512xf32, #tpu.memory_space<vmem>>, vector<1x512xf32>
    %120 = vector.broadcast %119 : vector<1x512xf32> to vector<2x512xf32>
    %121 = arith.addf %118, %120 : vector<2x512xf32>
    %c0_87 = arith.constant 0 : index
    %c0_88 = arith.constant 0 : index
    %122 = vector.load %arg11[%c0_87, %c0_88] : memref<2048x512xbf16, #tpu.memory_space<vmem>>, vector<128x512xbf16>
    %123 = vector.extract_strided_slice %117 {offsets = [0, 0, 0, 0], sizes = [2, 1, 1, 128], strides = [1, 1, 1, 1]} : vector<2x4x4x128xbf16> to vector<2x1x1x128xbf16>
    %124 = vector.shape_cast %123 : vector<2x1x1x128xbf16> to vector<2x128xbf16>
    %cst_89 = arith.constant dense<0.000000e+00> : vector<2x512xf32>
    %125 = tpu.matmul %124, %122, %cst_89 {dimension_numbers = #tpu.dot_dimension_numbers<[1], [0], [0], [1], [0, 0, 1, 1], [], []>} : vector<2x128xbf16>, vector<128x512xbf16>, vector<2x512xf32> -> vector<2x512xf32>
    %126 = arith.addf %121, %125 : vector<2x512xf32>
    %c128 = arith.constant 128 : index
    %c0_90 = arith.constant 0 : index
    %127 = vector.load %arg11[%c128, %c0_90] : memref<2048x512xbf16, #tpu.memory_space<vmem>>, vector<128x512xbf16>
    %128 = vector.extract_strided_slice %117 {offsets = [0, 0, 1, 0], sizes = [2, 1, 1, 128], strides = [1, 1, 1, 1]} : vector<2x4x4x128xbf16> to vector<2x1x1x128xbf16>
    %129 = vector.shape_cast %128 : vector<2x1x1x128xbf16> to vector<2x128xbf16>
    %cst_91 = arith.constant dense<0.000000e+00> : vector<2x512xf32>
    %130 = tpu.matmul %129, %127, %cst_91 {dimension_numbers = #tpu.dot_dimension_numbers<[1], [0], [0], [1], [0, 0, 1, 1], [], []>} : vector<2x128xbf16>, vector<128x512xbf16>, vector<2x512xf32> -> vector<2x512xf32>
    %131 = arith.addf %126, %130 : vector<2x512xf32>
    %c256 = arith.constant 256 : index
    %c0_92 = arith.constant 0 : index
    %132 = vector.load %arg11[%c256, %c0_92] : memref<2048x512xbf16, #tpu.memory_space<vmem>>, vector<128x512xbf16>
    %133 = vector.extract_strided_slice %117 {offsets = [0, 0, 2, 0], sizes = [2, 1, 1, 128], strides = [1, 1, 1, 1]} : vector<2x4x4x128xbf16> to vector<2x1x1x128xbf16>
    %134 = vector.shape_cast %133 : vector<2x1x1x128xbf16> to vector<2x128xbf16>
    %cst_93 = arith.constant dense<0.000000e+00> : vector<2x512xf32>
    %135 = tpu.matmul %134, %132, %cst_93 {dimension_numbers = #tpu.dot_dimension_numbers<[1], [0], [0], [1], [0, 0, 1, 1], [], []>} : vector<2x128xbf16>, vector<128x512xbf16>, vector<2x512xf32> -> vector<2x512xf32>
    %136 = arith.addf %131, %135 : vector<2x512xf32>
    %c384 = arith.constant 384 : index
    %c0_94 = arith.constant 0 : index
    %137 = vector.load %arg11[%c384, %c0_94] : memref<2048x512xbf16, #tpu.memory_space<vmem>>, vector<128x512xbf16>
    %138 = vector.extract_strided_slice %117 {offsets = [0, 0, 3, 0], sizes = [2, 1, 1, 128], strides = [1, 1, 1, 1]} : vector<2x4x4x128xbf16> to vector<2x1x1x128xbf16>
    %139 = vector.shape_cast %138 : vector<2x1x1x128xbf16> to vector<2x128xbf16>
    %cst_95 = arith.constant dense<0.000000e+00> : vector<2x512xf32>
    %140 = tpu.matmul %139, %137, %cst_95 {dimension_numbers = #tpu.dot_dimension_numbers<[1], [0], [0], [1], [0, 0, 1, 1], [], []>} : vector<2x128xbf16>, vector<128x512xbf16>, vector<2x512xf32> -> vector<2x512xf32>
    %141 = arith.addf %136, %140 : vector<2x512xf32>
    %c512 = arith.constant 512 : index
    %c0_96 = arith.constant 0 : index
    %142 = vector.load %arg11[%c512, %c0_96] : memref<2048x512xbf16, #tpu.memory_space<vmem>>, vector<128x512xbf16>
    %143 = vector.extract_strided_slice %117 {offsets = [0, 1, 0, 0], sizes = [2, 1, 1, 128], strides = [1, 1, 1, 1]} : vector<2x4x4x128xbf16> to vector<2x1x1x128xbf16>
    %144 = vector.shape_cast %143 : vector<2x1x1x128xbf16> to vector<2x128xbf16>
    %cst_97 = arith.constant dense<0.000000e+00> : vector<2x512xf32>
    %145 = tpu.matmul %144, %142, %cst_97 {dimension_numbers = #tpu.dot_dimension_numbers<[1], [0], [0], [1], [0, 0, 1, 1], [], []>} : vector<2x128xbf16>, vector<128x512xbf16>, vector<2x512xf32> -> vector<2x512xf32>
    %146 = arith.addf %141, %145 : vector<2x512xf32>
    %c640 = arith.constant 640 : index
    %c0_98 = arith.constant 0 : index
    %147 = vector.load %arg11[%c640, %c0_98] : memref<2048x512xbf16, #tpu.memory_space<vmem>>, vector<128x512xbf16>
    %148 = vector.extract_strided_slice %117 {offsets = [0, 1, 1, 0], sizes = [2, 1, 1, 128], strides = [1, 1, 1, 1]} : vector<2x4x4x128xbf16> to vector<2x1x1x128xbf16>
    %149 = vector.shape_cast %148 : vector<2x1x1x128xbf16> to vector<2x128xbf16>
    %cst_99 = arith.constant dense<0.000000e+00> : vector<2x512xf32>
    %150 = tpu.matmul %149, %147, %cst_99 {dimension_numbers = #tpu.dot_dimension_numbers<[1], [0], [0], [1], [0, 0, 1, 1], [], []>} : vector<2x128xbf16>, vector<128x512xbf16>, vector<2x512xf32> -> vector<2x512xf32>
    %151 = arith.addf %146, %150 : vector<2x512xf32>
    %c768 = arith.constant 768 : index
    %c0_100 = arith.constant 0 : index
    %152 = vector.load %arg11[%c768, %c0_100] : memref<2048x512xbf16, #tpu.memory_space<vmem>>, vector<128x512xbf16>
    %153 = vector.extract_strided_slice %117 {offsets = [0, 1, 2, 0], sizes = [2, 1, 1, 128], strides = [1, 1, 1, 1]} : vector<2x4x4x128xbf16> to vector<2x1x1x128xbf16>
    %154 = vector.shape_cast %153 : vector<2x1x1x128xbf16> to vector<2x128xbf16>
    %cst_101 = arith.constant dense<0.000000e+00> : vector<2x512xf32>
    %155 = tpu.matmul %154, %152, %cst_101 {dimension_numbers = #tpu.dot_dimension_numbers<[1], [0], [0], [1], [0, 0, 1, 1], [], []>} : vector<2x128xbf16>, vector<128x512xbf16>, vector<2x512xf32> -> vector<2x512xf32>
    %156 = arith.addf %151, %155 : vector<2x512xf32>
    %c896 = arith.constant 896 : index
    %c0_102 = arith.constant 0 : index
    %157 = vector.load %arg11[%c896, %c0_102] : memref<2048x512xbf16, #tpu.memory_space<vmem>>, vector<128x512xbf16>
    %158 = vector.extract_strided_slice %117 {offsets = [0, 1, 3, 0], sizes = [2, 1, 1, 128], strides = [1, 1, 1, 1]} : vector<2x4x4x128xbf16> to vector<2x1x1x128xbf16>
    %159 = vector.shape_cast %158 : vector<2x1x1x128xbf16> to vector<2x128xbf16>
    %cst_103 = arith.constant dense<0.000000e+00> : vector<2x512xf32>
    %160 = tpu.matmul %159, %157, %cst_103 {dimension_numbers = #tpu.dot_dimension_numbers<[1], [0], [0], [1], [0, 0, 1, 1], [], []>} : vector<2x128xbf16>, vector<128x512xbf16>, vector<2x512xf32> -> vector<2x512xf32>
    %161 = arith.addf %156, %160 : vector<2x512xf32>
    %c1024 = arith.constant 1024 : index
    %c0_104 = arith.constant 0 : index
    %162 = vector.load %arg11[%c1024, %c0_104] : memref<2048x512xbf16, #tpu.memory_space<vmem>>, vector<128x512xbf16>
    %163 = vector.extract_strided_slice %117 {offsets = [0, 2, 0, 0], sizes = [2, 1, 1, 128], strides = [1, 1, 1, 1]} : vector<2x4x4x128xbf16> to vector<2x1x1x128xbf16>
    %164 = vector.shape_cast %163 : vector<2x1x1x128xbf16> to vector<2x128xbf16>
    %cst_105 = arith.constant dense<0.000000e+00> : vector<2x512xf32>
    %165 = tpu.matmul %164, %162, %cst_105 {dimension_numbers = #tpu.dot_dimension_numbers<[1], [0], [0], [1], [0, 0, 1, 1], [], []>} : vector<2x128xbf16>, vector<128x512xbf16>, vector<2x512xf32> -> vector<2x512xf32>
    %166 = arith.addf %161, %165 : vector<2x512xf32>
    %c1152 = arith.constant 1152 : index
    %c0_106 = arith.constant 0 : index
    %167 = vector.load %arg11[%c1152, %c0_106] : memref<2048x512xbf16, #tpu.memory_space<vmem>>, vector<128x512xbf16>
    %168 = vector.extract_strided_slice %117 {offsets = [0, 2, 1, 0], sizes = [2, 1, 1, 128], strides = [1, 1, 1, 1]} : vector<2x4x4x128xbf16> to vector<2x1x1x128xbf16>
    %169 = vector.shape_cast %168 : vector<2x1x1x128xbf16> to vector<2x128xbf16>
    %cst_107 = arith.constant dense<0.000000e+00> : vector<2x512xf32>
    %170 = tpu.matmul %169, %167, %cst_107 {dimension_numbers = #tpu.dot_dimension_numbers<[1], [0], [0], [1], [0, 0, 1, 1], [], []>} : vector<2x128xbf16>, vector<128x512xbf16>, vector<2x512xf32> -> vector<2x512xf32>
    %171 = arith.addf %166, %170 : vector<2x512xf32>
    %c1280 = arith.constant 1280 : index
    %c0_108 = arith.constant 0 : index
    %172 = vector.load %arg11[%c1280, %c0_108] : memref<2048x512xbf16, #tpu.memory_space<vmem>>, vector<128x512xbf16>
    %173 = vector.extract_strided_slice %117 {offsets = [0, 2, 2, 0], sizes = [2, 1, 1, 128], strides = [1, 1, 1, 1]} : vector<2x4x4x128xbf16> to vector<2x1x1x128xbf16>
    %174 = vector.shape_cast %173 : vector<2x1x1x128xbf16> to vector<2x128xbf16>
    %cst_109 = arith.constant dense<0.000000e+00> : vector<2x512xf32>
    %175 = tpu.matmul %174, %172, %cst_109 {dimension_numbers = #tpu.dot_dimension_numbers<[1], [0], [0], [1], [0, 0, 1, 1], [], []>} : vector<2x128xbf16>, vector<128x512xbf16>, vector<2x512xf32> -> vector<2x512xf32>
    %176 = arith.addf %171, %175 : vector<2x512xf32>
    %c1408 = arith.constant 1408 : index
    %c0_110 = arith.constant 0 : index
    %177 = vector.load %arg11[%c1408, %c0_110] : memref<2048x512xbf16, #tpu.memory_space<vmem>>, vector<128x512xbf16>
    %178 = vector.extract_strided_slice %117 {offsets = [0, 2, 3, 0], sizes = [2, 1, 1, 128], strides = [1, 1, 1, 1]} : vector<2x4x4x128xbf16> to vector<2x1x1x128xbf16>
    %179 = vector.shape_cast %178 : vector<2x1x1x128xbf16> to vector<2x128xbf16>
    %cst_111 = arith.constant dense<0.000000e+00> : vector<2x512xf32>
    %180 = tpu.matmul %179, %177, %cst_111 {dimension_numbers = #tpu.dot_dimension_numbers<[1], [0], [0], [1], [0, 0, 1, 1], [], []>} : vector<2x128xbf16>, vector<128x512xbf16>, vector<2x512xf32> -> vector<2x512xf32>
    %181 = arith.addf %176, %180 : vector<2x512xf32>
    %c1536 = arith.constant 1536 : index
    %c0_112 = arith.constant 0 : index
    %182 = vector.load %arg11[%c1536, %c0_112] : memref<2048x512xbf16, #tpu.memory_space<vmem>>, vector<128x512xbf16>
    %183 = vector.extract_strided_slice %117 {offsets = [0, 3, 0, 0], sizes = [2, 1, 1, 128], strides = [1, 1, 1, 1]} : vector<2x4x4x128xbf16> to vector<2x1x1x128xbf16>
    %184 = vector.shape_cast %183 : vector<2x1x1x128xbf16> to vector<2x128xbf16>
    %cst_113 = arith.constant dense<0.000000e+00> : vector<2x512xf32>
    %185 = tpu.matmul %184, %182, %cst_113 {dimension_numbers = #tpu.dot_dimension_numbers<[1], [0], [0], [1], [0, 0, 1, 1], [], []>} : vector<2x128xbf16>, vector<128x512xbf16>, vector<2x512xf32> -> vector<2x512xf32>
    %186 = arith.addf %181, %185 : vector<2x512xf32>
    %c1664 = arith.constant 1664 : index
    %c0_114 = arith.constant 0 : index
    %187 = vector.load %arg11[%c1664, %c0_114] : memref<2048x512xbf16, #tpu.memory_space<vmem>>, vector<128x512xbf16>
    %188 = vector.extract_strided_slice %117 {offsets = [0, 3, 1, 0], sizes = [2, 1, 1, 128], strides = [1, 1, 1, 1]} : vector<2x4x4x128xbf16> to vector<2x1x1x128xbf16>
    %189 = vector.shape_cast %188 : vector<2x1x1x128xbf16> to vector<2x128xbf16>
    %cst_115 = arith.constant dense<0.000000e+00> : vector<2x512xf32>
    %190 = tpu.matmul %189, %187, %cst_115 {dimension_numbers = #tpu.dot_dimension_numbers<[1], [0], [0], [1], [0, 0, 1, 1], [], []>} : vector<2x128xbf16>, vector<128x512xbf16>, vector<2x512xf32> -> vector<2x512xf32>
    %191 = arith.addf %186, %190 : vector<2x512xf32>
    %c1792 = arith.constant 1792 : index
    %c0_116 = arith.constant 0 : index
    %192 = vector.load %arg11[%c1792, %c0_116] : memref<2048x512xbf16, #tpu.memory_space<vmem>>, vector<128x512xbf16>
    %193 = vector.extract_strided_slice %117 {offsets = [0, 3, 2, 0], sizes = [2, 1, 1, 128], strides = [1, 1, 1, 1]} : vector<2x4x4x128xbf16> to vector<2x1x1x128xbf16>
    %194 = vector.shape_cast %193 : vector<2x1x1x128xbf16> to vector<2x128xbf16>
    %cst_117 = arith.constant dense<0.000000e+00> : vector<2x512xf32>
    %195 = tpu.matmul %194, %192, %cst_117 {dimension_numbers = #tpu.dot_dimension_numbers<[1], [0], [0], [1], [0, 0, 1, 1], [], []>} : vector<2x128xbf16>, vector<128x512xbf16>, vector<2x512xf32> -> vector<2x512xf32>
    %196 = arith.addf %191, %195 : vector<2x512xf32>
    %c1920 = arith.constant 1920 : index
    %c0_118 = arith.constant 0 : index
    %197 = vector.load %arg11[%c1920, %c0_118] : memref<2048x512xbf16, #tpu.memory_space<vmem>>, vector<128x512xbf16>
    %198 = vector.extract_strided_slice %117 {offsets = [0, 3, 3, 0], sizes = [2, 1, 1, 128], strides = [1, 1, 1, 1]} : vector<2x4x4x128xbf16> to vector<2x1x1x128xbf16>
    %199 = vector.shape_cast %198 : vector<2x1x1x128xbf16> to vector<2x128xbf16>
    %cst_119 = arith.constant dense<0.000000e+00> : vector<2x512xf32>
    %200 = tpu.matmul %199, %197, %cst_119 {dimension_numbers = #tpu.dot_dimension_numbers<[1], [0], [0], [1], [0, 0, 1, 1], [], []>} : vector<2x128xbf16>, vector<128x512xbf16>, vector<2x512xf32> -> vector<2x512xf32>
    %201 = arith.addf %196, %200 : vector<2x512xf32>
    %cst_120 = arith.constant 0.000000e+00 : f32
    %202 = vector.broadcast %cst_120 : f32 to vector<2x512xf32>
    %203 = arith.maximumf %201, %202 : vector<2x512xf32>
    %204 = arith.truncf %203 : vector<2x512xf32> to vector<2x512xbf16>
    %c0_121 = arith.constant 0 : index
    %c0_122 = arith.constant 0 : index
    %205 = vector.load %arg13[%c0_121, %c0_122] : memref<512x128xbf16, #tpu.memory_space<vmem>>, vector<512x128xbf16>
    %cst_123 = arith.constant dense<0.000000e+00> : vector<2x128xf32>
    %206 = tpu.matmul %204, %205, %cst_123 {dimension_numbers = #tpu.dot_dimension_numbers<[1], [0], [0], [1], [0, 0, 1, 1], [], []>} : vector<2x512xbf16>, vector<512x128xbf16>, vector<2x128xf32> -> vector<2x128xf32>
    %c0_124 = arith.constant 0 : index
    %c0_125 = arith.constant 0 : index
    %207 = vector.load %arg14[%c0_124, %c0_125] : memref<1x128xf32, #tpu.memory_space<vmem>>, vector<1x128xf32>
    %208 = vector.broadcast %207 : vector<1x128xf32> to vector<2x128xf32>
    %209 = arith.addf %206, %208 : vector<2x128xf32>
    %c0_126 = arith.constant 0 : index
    %c0_127 = arith.constant 0 : index
    %210 = vector.load %arg15[%c0_126, %c0_127] : memref<2x128xf32, #tpu.memory_space<vmem>>, vector<2x128xf32>
    tpu.vector_store %arg15[%c0_126, %c0_127], %209 {strides = array<i32>} : memref<2x128xf32, #tpu.memory_space<vmem>>, vector<2x128xf32>,
    return
  }
  func.func @transform_0(%arg0: i32) -> (i32, i32, i32, i32) {
    %c0_i32 = arith.constant 0 : i32
    %c0_i32_0 = arith.constant 0 : i32
    %c0_i32_1 = arith.constant 0 : i32
    %c0_i32_2 = arith.constant 0 : i32
    return %arg0, %c0_i32, %c0_i32_0, %c0_i32_1 : i32, i32, i32, i32
  }
  func.func @transform_1(%arg0: i32) -> (i32, i32) {
    %c0_i32 = arith.constant 0 : i32
    %c0_i32_0 = arith.constant 0 : i32
    %c0_i32_1 = arith.constant 0 : i32
    return %c0_i32, %c0_i32_0 : i32, i32
  }
  func.func @transform_2(%arg0: i32) -> (i32, i32) {
    %c0_i32 = arith.constant 0 : i32
    %c0_i32_0 = arith.constant 0 : i32
    %c0_i32_1 = arith.constant 0 : i32
    return %c0_i32, %c0_i32_0 : i32, i32
  }
  func.func @transform_3(%arg0: i32) -> (i32, i32) {
    %c0_i32 = arith.constant 0 : i32
    %c0_i32_0 = arith.constant 0 : i32
    %c0_i32_1 = arith.constant 0 : i32
    return %c0_i32, %c0_i32_0 : i32, i32
  }
  func.func @transform_4(%arg0: i32) -> (i32, i32, i32) {
    %c0_i32 = arith.constant 0 : i32
    %c0_i32_0 = arith.constant 0 : i32
    %c0_i32_1 = arith.constant 0 : i32
    %c0_i32_2 = arith.constant 0 : i32
    return %c0_i32, %c0_i32_0, %c0_i32_1 : i32, i32, i32
  }
  func.func @transform_5(%arg0: i32) -> (i32, i32) {
    %c0_i32 = arith.constant 0 : i32
    %c0_i32_0 = arith.constant 0 : i32
    %c0_i32_1 = arith.constant 0 : i32
    return %c0_i32, %c0_i32_0 : i32, i32
  }
  func.func @transform_6(%arg0: i32) -> (i32, i32) {
    %c0_i32 = arith.constant 0 : i32
    %c0_i32_0 = arith.constant 0 : i32
    %c0_i32_1 = arith.constant 0 : i32
    return %c0_i32, %c0_i32_0 : i32, i32
  }
  func.func @transform_7(%arg0: i32) -> (i32, i32, i32) {
    %c0_i32 = arith.constant 0 : i32
    %c0_i32_0 = arith.constant 0 : i32
    %c0_i32_1 = arith.constant 0 : i32
    %c0_i32_2 = arith.constant 0 : i32
    return %c0_i32, %c0_i32_0, %c0_i32_1 : i32, i32, i32
  }
  func.func @transform_8(%arg0: i32) -> (i32, i32) {
    %c0_i32 = arith.constant 0 : i32
    %c0_i32_0 = arith.constant 0 : i32
    %c0_i32_1 = arith.constant 0 : i32
    return %c0_i32, %c0_i32_0 : i32, i32
  }
  func.func @transform_9(%arg0: i32) -> (i32, i32) {
    %c0_i32 = arith.constant 0 : i32
    %c0_i32_0 = arith.constant 0 : i32
    %c0_i32_1 = arith.constant 0 : i32
    return %c0_i32, %c0_i32_0 : i32, i32
  }
  func.func @transform_10(%arg0: i32) -> (i32, i32) {
    %c0_i32 = arith.constant 0 : i32
    %c0_i32_0 = arith.constant 0 : i32
    %c0_i32_1 = arith.constant 0 : i32
    return %c0_i32, %c0_i32_0 : i32, i32
  }
  func.func @transform_11(%arg0: i32) -> (i32, i32) {
    %c0_i32 = arith.constant 0 : i32
    %c0_i32_0 = arith.constant 0 : i32
    %c0_i32_1 = arith.constant 0 : i32
    return %c0_i32, %c0_i32_0 : i32, i32
  }
  func.func @transform_12(%arg0: i32) -> (i32, i32) {
    %c0_i32 = arith.constant 0 : i32
    %c0_i32_0 = arith.constant 0 : i32
    %c0_i32_1 = arith.constant 0 : i32
    return %c0_i32, %c0_i32_0 : i32, i32
  }
  func.func @transform_13(%arg0: i32) -> (i32, i32) {
    %c0_i32 = arith.constant 0 : i32
    %c0_i32_0 = arith.constant 0 : i32
    %c0_i32_1 = arith.constant 0 : i32
    return %c0_i32, %c0_i32_0 : i32, i32
  }
  func.func @transform_14(%arg0: i32) -> (i32, i32) {
    %c0_i32 = arith.constant 0 : i32
    %c0_i32_0 = arith.constant 0 : i32
    return %arg0, %c0_i32 : i32, i32
  }
}

</mosaic_0001>

<bundles_post_ra>
// kernel: simple_cnn_forward.1
= control target key start
LH: loop header
LB: loop body
LE: loop exit
PB: predicated region body
PF: predicated region fallthrough
CT: control target
= control target key end

     0   :  { %vm1345_vm0 = vcmask 1044480   ;;  %vm1346_vm1 = vcmask 1045504   ;;  %v16445_v2 = vmov 65535   ;;  %vm960_vm2 = vcmask 220160   ;;  %s16446_s19 = smov 32   ;;  %s16447_s15 = smov 64   ;;  %s21645_s0 = inlined_call_operand.vmem [shape: bf16[2,32,32,27], index: 0, kind: input, shape index: {}]   ;;  %s21646_s1 = inlined_call_operand.vmem [shape: bf16[27,32], index: 1, kind: input, shape index: {}]   ;;  %s21647_s2 = inlined_call_operand.vmem [shape: f32[1,32], index: 2, kind: input, shape index: {}]   ;;  %s21648_s3 = inlined_call_operand.vmem [shape: f32[1,32], index: 3, kind: input, shape index: {}]   ;;  %s21649_s4 = inlined_call_operand.vmem [shape: bf16[3,96,64], index: 4, kind: input, shape index: {}]   ;;  %s21650_s5 = inlined_call_operand.vmem [shape: f32[1,64], index: 5, kind: input, shape index: {}]   ;;  %s21651_s6 = inlined_call_operand.vmem [shape: f32[1,64], index: 6, kind: input, shape index: {}]   ;;  %s21652_s7 = inlined_call_operand.vmem [shape: bf16[3,192,128], index: 7, kind: input, shape index: {}]   ;;  %s21653_s8 = inlined_call_operand.vmem [shape: f32[1,128], index: 8, kind: input, shape index: {}]   ;;  %s21654_s9 = inlined_call_operand.vmem [shape: f32[1,128], index: 9, kind: input, shape index: {}]   ;;  %s21655_s10 = inlined_call_operand.vmem [shape: bf16[2048,512], index: 10, kind: input, shape index: {}]   ;;  %s21656_s11 = inlined_call_operand.vmem [shape: f32[1,512], index: 11, kind: input, shape index: {}]   ;;  %s21657_s12 = inlined_call_operand.vmem [shape: bf16[512,128], index: 12, kind: input, shape index: {}]   ;;  %s21658_s13 = inlined_call_operand.vmem [shape: f32[1,128], index: 13, kind: input, shape index: {}]   ;;  %s21659_s14 = inlined_call_operand.hbm [shape: f32[2,128], index: 14, kind: output, shape index: {}]  }
   0x1   :  { %v15427_v0 = vld [vmem:[%s21646_s1] sm:$0xff]   ;;  %v15428_v1 = vld [vmem:[%s21646_s1 + $0x8] sm:$0x3f]   ;;  %v1347_v3 = vsel %vm1345_vm0, 4294967295, %v16445_v2  ;;  %v15433_v10 = vld [vmem:[%s21645_s0 + $0x10] sm:$0xff]   ;;  %vm3191_vm3 = vcmask 261120  }
   0x2   :  { %14253 = vmatprep.subr.bf16.mxu0 %v15427_v0  ;;  %14741 = vmatprep.subr.bf16.mxu1 %v15427_v0  ;;  %v15429_v4 = vld [vmem:[%s21645_s0] sm:$0xff]   ;;  %v1348_v6 = vsel %vm1346_vm1, %v1347_v3, 0  ;;  %v15431_v8 = vld [vmem:[%s21645_s0 + $0x8] sm:$0xff]   ;;  %v15434_v11 = vld [vmem:[%s21645_s0 + $0x90] sm:$0xff]   ;;  %vm4410_vm4 = vcmask 1046528   ;;  %vm4217_vm5 = vcmask 1040384  }
   0x3   :  { %14254 = vmatpush3.bf16.msra.mxu0 %v15427_v0  ;;  %14743 = vmatpush3.bf16.msra.mxu1 %v15427_v0  ;;  %v15430_v5 = vld [vmem:[%s21645_s0 + $0x80] sm:$0xff]   ;;  %v1350_v7 = vand.u32 %v15428_v1, %v1348_v6  ;;  %v15432_v9 = vld [vmem:[%s21645_s0 + $0x88] sm:$0xff]   ;;  %v15435_v12 = vld [vmem:[%s21645_s0 + $0x18] sm:$0xff]   ;;  %vm5051_vm6 = vcmask 523264  }
   0x4   :  { %14257 = vmatprep.mubr.msk.bf16.mxu0 %vm960_vm2, %v15429_v4  ;;  %14289 = vmatprep.mubr.msk.bf16.mxu1 %vm960_vm2, %v15430_v5  ;;  %v15436_v13 = vld [vmem:[%s21645_s0 + $0x98] sm:$0xff]   ;;  %v15437_v14 = vld [vmem:[%s21645_s0 + $0x20] sm:$0xff]   ;;  %v15439_v16 = vld [vmem:[%s21645_s0 + $0x28] sm:$0xff]  }
   0x5   :  { %14255 = vmatprep.subr.bf16.mxu0 %v1350_v7  ;;  %14742 = vmatprep.subr.bf16.mxu1 %v1350_v7  ;;  %v15438_v15 = vld [vmem:[%s21645_s0 + $0xa0] sm:$0xff]   ;;  %v15440_v17 = vld [vmem:[%s21645_s0 + $0xa8] sm:$0xff]   ;;  %v15441_v18 = vld [vmem:[%s21645_s0 + $0x30] sm:$0xff]  }
   0x6   :  { %v15442_v19 = vld [vmem:[%s21645_s0 + $0xb0] sm:$0xff]   ;;  %v15443_v20 = vld [vmem:[%s21645_s0 + $0x38] sm:$0xff]   ;;  %v15445_v22 = vld [vmem:[%s21645_s0 + $0x40] sm:$0xff]  }
   0x7   :  { %14256 = vmatpush3.bf16.msra.mxu0 %v1350_v7  ;;  %14744 = vmatpush3.bf16.msra.mxu1 %v1350_v7  ;;  %v15444_v21 = vld [vmem:[%s21645_s0 + $0xb8] sm:$0xff]   ;;  %v15446_v23 = vld [vmem:[%s21645_s0 + $0xc0] sm:$0xff]   ;;  %v15447_v24 = vld [vmem:[%s21645_s0 + $0x48] sm:$0xff]  }
   0x8   :  { %v15448_v25 = vld [vmem:[%s21645_s0 + $0xc8] sm:$0xff]   ;;  %v15449_v26 = vld [vmem:[%s21645_s0 + $0x50] sm:$0xff]   ;;  %v15451_v28 = vld [vmem:[%s21645_s0 + $0x58] sm:$0xff]  }
   0x9   :  { %v15450_v27 = vld [vmem:[%s21645_s0 + $0xd0] sm:$0xff]   ;;  %v15452_v29 = vld [vmem:[%s21645_s0 + $0xd8] sm:$0xff]   ;;  %v15453_v30 = vld [vmem:[%s21645_s0 + $0x60] sm:$0xff]  }
   0xa   :  { %14258 = vmatmul.mubr.msk.bf16.vlgmr.msra.gmra.mrb[0].mxu0 %vm960_vm2, %v15431_v8  ;;  %14290 = vmatmul.mubr.msk.bf16.vlgmr.msra.gmra.mrb[0].mxu1 %vm960_vm2, %v15432_v9  ;;  %v15454_v31 = vld [vmem:[%s21645_s0 + $0xe0] sm:$0xff]   ;;  %v15455_v32 = vld [vmem:[%s21645_s0 + $0x68] sm:$0xff]   ;;  %v15457_v34 = vld [vmem:[%s21645_s0 + $0x70] sm:$0xff]  }
   0xb   :  { %14261 = vmatprep.mubr.msk.bf16.mxu0 %vm960_vm2, %v15433_v10  ;;  %14293 = vmatprep.mubr.msk.bf16.mxu1 %vm960_vm2, %v15434_v11  ;;  %v15456_v33 = vld [vmem:[%s21645_s0 + $0xe8] sm:$0xff]   ;;  %v15458_v35 = vld [vmem:[%s21645_s0 + $0xf0] sm:$0xff]   ;;  %v15459_v36 = vld [vmem:[%s21645_s0 + $0x78] sm:$0xff]  }
   0xc   :  { %v15460_v37 = vld [vmem:[%s21645_s0 + $0xf8] sm:$0xff]   ;;  %v15461_v38 = vld [vmem:[%s21645_s0 + $0x100] sm:$0xff]   ;;  %v15462_v39 = vld [vmem:[%s21645_s0 + $0x108] sm:$0xff]  }
   0xd   :  { %v15463_v40 = vld [vmem:[%s21645_s0 + $0x110] sm:$0xff]   ;;  %v15464_v41 = vld [vmem:[%s21645_s0 + $0x118] sm:$0xff]   ;;  %v15465_v42 = vld [vmem:[%s21645_s0 + $0x120] sm:$0xff]  }
   0xe   :  { %v15466_v43 = vld [vmem:[%s21645_s0 + $0x128] sm:$0xff]   ;;  %v15467_v44 = vld [vmem:[%s21645_s0 + $0x130] sm:$0xff]   ;;  %v15468_v45 = vld [vmem:[%s21645_s0 + $0x138] sm:$0xff]  }
   0xf   :  { %v15469_v46 = vld [vmem:[%s21645_s0 + $0x140] sm:$0xff]   ;;  %v15470_v47 = vld [vmem:[%s21645_s0 + $0x148] sm:$0xff]   ;;  %v15471_v48 = vld [vmem:[%s21645_s0 + $0x150] sm:$0xff]  }
  0x10   :  { %v15472_v49 = vld [vmem:[%s21645_s0 + $0x158] sm:$0xff]   ;;  %v15473_v50 = vld [vmem:[%s21645_s0 + $0x160] sm:$0xff]   ;;  %v15474_v51 = vld [vmem:[%s21645_s0 + $0x168] sm:$0xff]  }
  0x11   :  { %v15475_v52 = vld [vmem:[%s21645_s0 + $0x170] sm:$0xff]   ;;  %v15476_v54 = vld [vmem:[%s21645_s0 + $0x178] sm:$0xff]   ;;  %v15477_v55 = vld [vmem:[%s21645_s0 + $0x180] sm:$0xff]  }
  0x12   :  { %14262 = vmatmul.mubr.msk.bf16.gmra.mrb[4].mxu0 %vm960_vm2, %v15435_v12  ;;  %14294 = vmatmul.mubr.msk.bf16.gmra.mrb[4].mxu1 %vm960_vm2, %v15436_v13  ;;  %v15503_v53 = vld [vmem:[%s21649_s4 + $0x30] sm:$0xff]   ;;  %v15478_v56 = vld [vmem:[%s21645_s0 + $0x188] sm:$0xff]   ;;  %v15480_v58 = vld [vmem:[%s21645_s0 + $0x198] sm:$0xff]  }
  0x13   :  { %14265 = vmatprep.mubr.msk.bf16.mxu0 %vm960_vm2, %v15437_v14  ;;  %14297 = vmatprep.mubr.msk.bf16.mxu1 %vm960_vm2, %v15438_v15  ;;  %v15479_v57 = vld [vmem:[%s21645_s0 + $0x190] sm:$0xff]   ;;  %v15481_v59 = vld [vmem:[%s21645_s0 + $0x1a0] sm:$0xff]   ;;  %v15482_v60 = vld [vmem:[%s21645_s0 + $0x1a8] sm:$0xff]  }
  0x14   :  { %14513 = vmatprep.subr.bf16.mxu1 %v15503_v53  ;;  %v15483_v61 = vld [vmem:[%s21645_s0 + $0x1b0] sm:$0xff]   ;;  %v15484_v62 = vld [vmem:[%s21645_s0 + $0x1b8] sm:$0xff]   ;;  %v15485_v63 = vld [vmem:[%s21645_s0 + $0x1c0] sm:$0xff]  }
  0x15   :  { %14514 = vmatpush3.bf16.msra.mxu1 %v15503_v53  ;;  %v15486_v0 = vld [vmem:[%s21645_s0 + $0x1c8] sm:$0xff]   ;;  %v15487_v1 = vld [vmem:[%s21645_s0 + $0x1d0] sm:$0xff]   ;;  %v15488_v2 = vld [vmem:[%s21645_s0 + $0x1d8] sm:$0xff]  }
  0x16   :  { %v15489_v3 = vld [vmem:[%s21645_s0 + $0x1e0] sm:$0xff]   ;;  %v15490_v4 = vld [vmem:[%s21645_s0 + $0x1e8] sm:$0xff]   ;;  %v15491_v5 = vld [vmem:[%s21645_s0 + $0x1f0] sm:$0xff]  }
  0x17   :  { %v15492_v6 = vld [vmem:[%s21645_s0 + $0x1f8] sm:$0xff]   ;;  %v15493_v7 = vld [vmem:[%s21645_s0 + $0x200] sm:$0xff]   ;;  %v15494_v9 = vld [vmem:[%s21645_s0 + $0x208] sm:$0xff]  }
  0x18   :  { %v15524_v8 = vld [vmem:[%s21649_s4 + $0x38] sm:$0xff]   ;;  %v15495_v10 = vld [vmem:[%s21645_s0 + $0x210] sm:$0xff]   ;;  %v15497_v12 = vld [vmem:[%s21645_s0 + $0x220] sm:$0xff]  }
  0x19   :  { %14515 = vmatprep.subr.bf16.mxu1 %v15524_v8  ;;  %v15496_v11 = vld [vmem:[%s21645_s0 + $0x218] sm:$0xff]   ;;  %v15498_v13 = vld [vmem:[%s21645_s0 + $0x228] sm:$0xff]   ;;  %v15499_v14 = vld [vmem:[%s21645_s0 + $0x230] sm:$0xff]  }
  0x1a   :  { %14266 = vmatmul.mubr.msk.bf16.gmra.mrb[8].mxu0 %vm960_vm2, %v15439_v16  ;;  %14298 = vmatmul.mubr.msk.bf16.gmra.mrb[8].mxu1 %vm960_vm2, %v15440_v17  ;;  %v16823_v15 = vld [vmem:[%s21647_s2] ss:$0 sm:$0xff]  ;;  %v15500_v17 = vld [vmem:[%s21645_s0 + $0x238] sm:$0xff]  }
  0x1b   :  { %14269 = vmatprep.mubr.msk.bf16.mxu0 %vm960_vm2, %v15441_v18  ;;  %14301 = vmatprep.mubr.msk.bf16.mxu1 %vm960_vm2, %v15442_v19  ;;  %v16829_v16 = vld [vmem:[%s21648_s3] ss:$0 sm:$0xff] }
  0x1c   :  { %14516 = vmatpush3.bf16.msra.mxu1 %v15524_v8 }
  0x22   :  { %14270 = vmatmul.mubr.msk.bf16.gmra.mrb[12].mxu0 %vm960_vm2, %v15443_v20  ;;  %14302 = vmatmul.mubr.msk.bf16.gmra.mrb[12].mxu1 %vm960_vm2, %v15444_v21 }
  0x23   :  { %14273 = vmatprep.mubr.msk.bf16.mxu0 %vm960_vm2, %v15445_v22  ;;  %14305 = vmatprep.mubr.msk.bf16.mxu1 %vm960_vm2, %v15446_v23 }
  0x2a   :  { %14274 = vmatmul.mubr.msk.bf16.gmra.mrb[16].mxu0 %vm960_vm2, %v15447_v24  ;;  %14306 = vmatmul.mubr.msk.bf16.gmra.mrb[16].mxu1 %vm960_vm2, %v15448_v25 }
  0x2b   :  { %14277 = vmatprep.mubr.msk.bf16.mxu0 %vm960_vm2, %v15449_v26  ;;  %14309 = vmatprep.mubr.msk.bf16.mxu1 %vm960_vm2, %v15450_v27  ;;  %v15501_v26 = vld [vmem:[%s21645_s0 + $0x240] sm:$0xff]  }
  0x32   :  { %14278 = vmatmul.mubr.msk.bf16.gmra.mrb[20].mxu0 %vm960_vm2, %v15451_v28  ;;  %14310 = vmatmul.mubr.msk.bf16.gmra.mrb[20].mxu1 %vm960_vm2, %v15452_v29 }
  0x33   :  { %14281 = vmatprep.mubr.msk.bf16.mxu0 %vm960_vm2, %v15453_v30  ;;  %14313 = vmatprep.mubr.msk.bf16.mxu1 %vm960_vm2, %v15454_v31 }
  0x3a   :  { %14282 = vmatmul.mubr.msk.bf16.gmra.mrb[24].mxu0 %vm960_vm2, %v15455_v32  ;;  %14314 = vmatmul.mubr.msk.bf16.gmra.mrb[24].mxu1 %vm960_vm2, %v15456_v33 }
  0x3b   :  { %14285 = vmatprep.mubr.msk.bf16.mxu0 %vm960_vm2, %v15457_v34  ;;  %14317 = vmatprep.mubr.msk.bf16.mxu1 %vm960_vm2, %v15458_v35 }
  0x42   :  { %14286 = vmatmul.mubr.msk.bf16.gmra.mrb[28].mxu0 %vm960_vm2, %v15459_v36  ;;  %14318 = vmatmul.mubr.msk.bf16.gmra.mrb[28].mxu1 %vm960_vm2, %v15460_v37 }
  0x43   :  { %14321 = vmatprep.mubr.msk.bf16.mxu1 %vm960_vm2, %v15461_v38 }
  0x4a   :  { %14322 = vmatmul.mubr.msk.bf16.gmra.mrb[32].mxu1 %vm960_vm2, %v15462_v39 }
  0x4b   :  { %14325 = vmatprep.mubr.msk.bf16.mxu1 %vm960_vm2, %v15463_v40 }
  0x52   :  { %14326 = vmatmul.mubr.msk.bf16.gmra.mrb[36].mxu1 %vm960_vm2, %v15464_v41 }
  0x53   :  { %14329 = vmatprep.mubr.msk.bf16.mxu1 %vm960_vm2, %v15465_v42 }
  0x5a   :  { %14330 = vmatmul.mubr.msk.bf16.gmra.mrb[40].mxu1 %vm960_vm2, %v15466_v43 }
  0x5b   :  { %14333 = vmatprep.mubr.msk.bf16.mxu1 %vm960_vm2, %v15467_v44 }
  0x62   :  { %14334 = vmatmul.mubr.msk.bf16.gmra.mrb[44].mxu1 %vm960_vm2, %v15468_v45 }
  0x63   :  { %14337 = vmatprep.mubr.msk.bf16.mxu1 %vm960_vm2, %v15469_v46 }
  0x6a   :  { %14338 = vmatmul.mubr.msk.bf16.gmra.mrb[48].mxu1 %vm960_vm2, %v15470_v47 }
  0x6b   :  { %14341 = vmatprep.mubr.msk.bf16.mxu1 %vm960_vm2, %v15471_v48  ;;  %v15502_v48 = vld [vmem:[%s21645_s0 + $0x248] sm:$0xff]  }
  0x72   :  { %14342 = vmatmul.mubr.msk.bf16.gmra.mrb[52].mxu1 %vm960_vm2, %v15472_v49 }
  0x73   :  { %14345 = vmatprep.mubr.msk.bf16.mxu1 %vm960_vm2, %v15473_v50 }
  0x7a   :  { %14346 = vmatmul.mubr.msk.bf16.gmra.mrb[56].mxu1 %vm960_vm2, %v15474_v51 }
  0x7b   :  { %14349 = vmatprep.mubr.msk.bf16.mxu1 %vm960_vm2, %v15475_v52 }
  0x82   :  { %14350 = vmatmul.mubr.msk.bf16.gmra.mrb[60].mxu1 %vm960_vm2, %v15476_v54 }
  0x83   :  { %14353 = vmatprep.mubr.msk.bf16.mxu1 %vm960_vm2, %v15477_v55 }
  0x8a   :  { %14354 = vmatmul.mubr.msk.bf16.gmra.mrb[64].mxu1 %vm960_vm2, %v15478_v56 }
  0x8b   :  { %14357 = vmatprep.mubr.msk.bf16.mxu1 %vm960_vm2, %v15479_v57 }
  0x92   :  { %14358 = vmatmul.mubr.msk.bf16.gmra.mrb[68].mxu1 %vm960_vm2, %v15480_v58 }
  0x93   :  { %14361 = vmatprep.mubr.msk.bf16.mxu1 %vm960_vm2, %v15481_v59 }
  0x9a   :  { %14362 = vmatmul.mubr.msk.bf16.gmra.mrb[72].mxu1 %vm960_vm2, %v15482_v60  ;;  %v15504_v60 = vld [vmem:[%s21645_s0 + $0x250] sm:$0xff]  }
  0x9b   :  { %14365 = vmatprep.mubr.msk.bf16.mxu1 %vm960_vm2, %v15483_v61 }
  0xa2   :  { %14366 = vmatmul.mubr.msk.bf16.gmra.mrb[76].mxu1 %vm960_vm2, %v15484_v62 }
  0xa3   :  { %14369 = vmatprep.mubr.msk.bf16.mxu1 %vm960_vm2, %v15485_v63 }
  0xaa   :  { %14370 = vmatmul.mubr.msk.bf16.gmra.mrb[80].mxu1 %vm960_vm2, %v15486_v0 }
  0xab   :  { %14373 = vmatprep.mubr.msk.bf16.mxu1 %vm960_vm2, %v15487_v1 }
  0xb2   :  { %14374 = vmatmul.mubr.msk.bf16.gmra.mrb[84].mxu1 %vm960_vm2, %v15488_v2 }
  0xb3   :  { %14377 = vmatprep.mubr.msk.bf16.mxu1 %vm960_vm2, %v15489_v3 }
  0xba   :  { %14378 = vmatmul.mubr.msk.bf16.gmra.mrb[88].mxu1 %vm960_vm2, %v15490_v4 }
  0xbb   :  { %14381 = vmatprep.mubr.msk.bf16.mxu1 %vm960_vm2, %v15491_v5 }
  0xc2   :  { %14382 = vmatmul.mubr.msk.bf16.gmra.mrb[92].mxu1 %vm960_vm2, %v15492_v6 }
  0xc3   :  { %14385 = vmatprep.mubr.msk.bf16.mxu1 %vm960_vm2, %v15493_v7 }
  0xca   :  { %14386 = vmatmul.mubr.msk.bf16.gmra.mrb[96].mxu1 %vm960_vm2, %v15494_v9 }
  0xcb   :  { %14389 = vmatprep.mubr.msk.bf16.mxu1 %vm960_vm2, %v15495_v10 }
  0xd2   :  { %14390 = vmatmul.mubr.msk.bf16.gmra.mrb[100].mxu1 %vm960_vm2, %v15496_v11 }
  0xd3   :  { %14393 = vmatprep.mubr.msk.bf16.mxu1 %vm960_vm2, %v15497_v12 }
  0xda   :  { %14394 = vmatmul.mubr.msk.bf16.gmra.mrb[104].mxu1 %vm960_vm2, %v15498_v13 }
  0xdb   :  { %14397 = vmatprep.mubr.msk.bf16.mxu1 %vm960_vm2, %v15499_v14 }
  0xdd   :  { %v14291_v18 = vpop.f32.mrb[0].mxu1  ;;  %v14259_v19 = vpop.f32.mrb[0].mxu0 }
  0xde   :  { %v2451_v20 = vmul.f32 %v14291_v18, %v16823_v15  ;;  %v1514_v21 = vpop.f32.mrb[1].mxu1  ;;  %v2419_v22 = vmul.f32 %v14259_v19, %v16823_v15  ;;  %v1386_v23 = vpop.f32.mrb[1].mxu0 }
  0xdf   :  { %v2449_v24 = vmul.f32 %v16823_v15, %v1514_v21  ;;  %v14292_v25 = vpop.f32.mrb[2].mxu1  ;;  %v2417_v27 = vmul.f32 %v16823_v15, %v1386_v23  ;;  %v14260_v28 = vpop.f32.mrb[2].mxu0 }
  0xe0   :  { %v2713_v29 = vadd.f32 %v16829_v16, %v2451_v20  ;;  %v2452_v30 = vmul.f32 %v14292_v25, %v16823_v15  ;;  %v1517_v31 = vpop.f32.mrb[3].mxu1  ;;  %v2681_v32 = vadd.f32 %v16829_v16, %v2419_v22  ;;  %v2420_v33 = vmul.f32 %v14260_v28, %v16823_v15  ;;  %v1389_v34 = vpop.f32.mrb[3].mxu0 }
  0xe1   :  { %v2711_v35 = vadd.f32 %v16829_v16, %v2449_v24  ;;  %v2450_v36 = vmul.f32 %v16823_v15, %v1517_v31  ;;  %v2679_v37 = vadd.f32 %v16829_v16, %v2417_v27  ;;  %v2418_v38 = vmul.f32 %v16823_v15, %v1389_v34  ;;  %v15505_v27 = vld [vmem:[%s21645_s0 + $0x258] sm:$0xff]  }
  0xe2   :  { %v2969_v39 = vmax.f32 %v2713_v29, 0.0  ;;  %v2714_v40 = vadd.f32 %v16829_v16, %v2452_v30  ;;  %14398 = vmatmul.mubr.msk.bf16.gmra.mrb[108].mxu1 %vm960_vm2, %v15500_v17  ;;  %v2937_v41 = vmax.f32 %v2681_v32, 0.0  ;;  %v2682_v42 = vadd.f32 %v16829_v16, %v2420_v33  ;;  %v15506_v32 = vld [vmem:[%s21645_s0 + $0x260] sm:$0xff]  }
  0xe3   :  { %v2967_v43 = vmax.f32 %v2711_v35, 0.0  ;;  %v2712_v44 = vadd.f32 %v16829_v16, %v2450_v36  ;;  %14401 = vmatprep.mubr.msk.bf16.mxu1 %vm960_vm2, %v15501_v26  ;;  %v2935_v45 = vmax.f32 %v2679_v37, 0.0  ;;  %v2680_v46 = vadd.f32 %v16829_v16, %v2418_v38 }
  0xe4   :  { %3226 = vst.msk [vmem:[#allocation2 + $0x110] sm:$0xff] %vm3191_vm3, %v2969_v39  ;;  %v2970_v47 = vmax.f32 %v2714_v40, 0.0  ;;  %3194 = vst.msk [vmem:[#allocation2 + $0x10] sm:$0xff] %vm3191_vm3, %v2937_v41  ;;  %v2938_v49 = vmax.f32 %v2682_v42, 0.0 }
  0xe5   :  { %3224 = vst.msk [vmem:[#allocation2 + $0x100] sm:$0xff] %vm3191_vm3, %v2967_v43  ;;  %v2968_v50 = vmax.f32 %v2712_v44, 0.0  ;;  %v14295_v51 = vpop.f32.mrb[4].mxu1  ;;  %3192 = vst.msk [vmem:[#allocation2] sm:$0xff] %vm3191_vm3, %v2935_v45  ;;  %v2936_v52 = vmax.f32 %v2680_v46, 0.0  ;;  %v14263_v53 = vpop.f32.mrb[4].mxu0 }
  0xe6   :  { %3227 = vst.msk [vmem:[#allocation2 + $0x118] sm:$0xff] %vm3191_vm3, %v2970_v47  ;;  %v2455_v54 = vmul.f32 %v14295_v51, %v16823_v15  ;;  %v1530_v55 = vpop.f32.mrb[5].mxu1  ;;  %3195 = vst.msk [vmem:[#allocation2 + $0x18] sm:$0xff] %vm3191_vm3, %v2938_v49  ;;  %v2423_v56 = vmul.f32 %v14263_v53, %v16823_v15  ;;  %v1402_v57 = vpop.f32.mrb[5].mxu0 }
  0xe7   :  { %3225 = vst.msk [vmem:[#allocation2 + $0x108] sm:$0xff] %vm3191_vm3, %v2968_v50  ;;  %v2453_v58 = vmul.f32 %v16823_v15, %v1530_v55  ;;  %v14296_v59 = vpop.f32.mrb[6].mxu1  ;;  %3193 = vst.msk [vmem:[#allocation2 + $0x8] sm:$0xff] %vm3191_vm3, %v2936_v52  ;;  %v2421_v61 = vmul.f32 %v16823_v15, %v1402_v57  ;;  %v14264_v62 = vpop.f32.mrb[6].mxu0 }
  0xe8   :  { %v2717_v63 = vadd.f32 %v16829_v16, %v2455_v54  ;;  %v2456_v0 = vmul.f32 %v14296_v59, %v16823_v15  ;;  %v1533_v1 = vpop.f32.mrb[7].mxu1  ;;  %v2685_v2 = vadd.f32 %v16829_v16, %v2423_v56  ;;  %v2424_v3 = vmul.f32 %v14264_v62, %v16823_v15  ;;  %v1405_v4 = vpop.f32.mrb[7].mxu0 }
  0xe9   :  { %v2715_v5 = vadd.f32 %v16829_v16, %v2453_v58  ;;  %v2454_v6 = vmul.f32 %v16823_v15, %v1533_v1  ;;  %v2683_v7 = vadd.f32 %v16829_v16, %v2421_v61  ;;  %v2422_v8 = vmul.f32 %v16823_v15, %v1405_v4  ;;  %v15507_v61 = vld [vmem:[%s21645_s0 + $0x268] sm:$0xff]  }
  0xea   :  { %v2973_v9 = vmax.f32 %v2717_v63, 0.0  ;;  %v2718_v10 = vadd.f32 %v16829_v16, %v2456_v0  ;;  %14402 = vmatmul.mubr.msk.bf16.gmra.mrb[112].mxu1 %vm960_vm2, %v15502_v48  ;;  %v2941_v11 = vmax.f32 %v2685_v2, 0.0  ;;  %v2686_v12 = vadd.f32 %v16829_v16, %v2424_v3 }
  0xeb   :  { %v2971_v13 = vmax.f32 %v2715_v5, 0.0  ;;  %v2716_v14 = vadd.f32 %v16829_v16, %v2454_v6  ;;  %14405 = vmatprep.mubr.msk.bf16.mxu1 %vm960_vm2, %v15504_v60  ;;  %v2939_v17 = vmax.f32 %v2683_v7, 0.0  ;;  %v2684_v18 = vadd.f32 %v16829_v16, %v2422_v8 }
  0xec   :  { %3230 = vst.msk [vmem:[#allocation2 + $0x130] sm:$0xff] %vm3191_vm3, %v2973_v9  ;;  %v2974_v19 = vmax.f32 %v2718_v10, 0.0  ;;  %3198 = vst.msk [vmem:[#allocation2 + $0x30] sm:$0xff] %vm3191_vm3, %v2941_v11  ;;  %v2942_v20 = vmax.f32 %v2686_v12, 0.0  ;;  %v15508_v11 = vld [vmem:[%s21645_s0 + $0x270] sm:$0xff]  }
  0xed   :  { %3228 = vst.msk [vmem:[#allocation2 + $0x120] sm:$0xff] %vm3191_vm3, %v2971_v13  ;;  %v2972_v21 = vmax.f32 %v2716_v14, 0.0  ;;  %v14299_v22 = vpop.f32.mrb[8].mxu1  ;;  %3196 = vst.msk [vmem:[#allocation2 + $0x20] sm:$0xff] %vm3191_vm3, %v2939_v17  ;;  %v2940_v23 = vmax.f32 %v2684_v18, 0.0  ;;  %v14267_v24 = vpop.f32.mrb[8].mxu0 }
  0xee   :  { %3231 = vst.msk [vmem:[#allocation2 + $0x138] sm:$0xff] %vm3191_vm3, %v2974_v19  ;;  %v2459_v25 = vmul.f32 %v14299_v22, %v16823_v15  ;;  %v1546_v26 = vpop.f32.mrb[9].mxu1  ;;  %3199 = vst.msk [vmem:[#allocation2 + $0x38] sm:$0xff] %vm3191_vm3, %v2942_v20  ;;  %v2427_v28 = vmul.f32 %v14267_v24, %v16823_v15  ;;  %v1418_v29 = vpop.f32.mrb[9].mxu0  ;;  %v16914_v45 = vld [vmem:[#allocation2] ss:$2 sm:$0xff] }
  0xef   :  { %3229 = vst.msk [vmem:[#allocation2 + $0x128] sm:$0xff] %vm3191_vm3, %v2972_v21  ;;  %v2457_v30 = vmul.f32 %v16823_v15, %v1546_v26  ;;  %v14300_v31 = vpop.f32.mrb[10].mxu1  ;;  %3197 = vst.msk [vmem:[#allocation2 + $0x28] sm:$0xff] %vm3191_vm3, %v2940_v23  ;;  %v2425_v33 = vmul.f32 %v16823_v15, %v1418_v29  ;;  %v14268_v34 = vpop.f32.mrb[10].mxu0  ;;  %v16916_v46 = vld [vmem:[#allocation2 + $0x1] ss:$2 sm:$0xff] }
  0xf0   :  { %v2721_v35 = vadd.f32 %v16829_v16, %v2459_v25  ;;  %v2460_v36 = vmul.f32 %v14300_v31, %v16823_v15  ;;  %v1549_v37 = vpop.f32.mrb[11].mxu1  ;;  %v2689_v38 = vadd.f32 %v16829_v16, %v2427_v28  ;;  %v2428_v39 = vmul.f32 %v14268_v34, %v16823_v15  ;;  %v1421_v40 = vpop.f32.mrb[11].mxu0  ;;  %v16921_v51 = vld [vmem:[#allocation2 + $0x10] ss:$2 sm:$0xff]  ;;  %v16923_v52 = vld [vmem:[#allocation2 + $0x11] ss:$2 sm:$0xff] }
  0xf1   :  { %v2719_v41 = vadd.f32 %v16829_v16, %v2457_v30  ;;  %v2458_v42 = vmul.f32 %v16823_v15, %v1549_v37  ;;  %v2687_v43 = vadd.f32 %v16829_v16, %v2425_v33  ;;  %v2426_v44 = vmul.f32 %v16823_v15, %v1421_v40  ;;  %v16964_v28 = vld [vmem:[#allocation2 + $0x100] ss:$2 sm:$0xff]  ;;  %v16966_v29 = vld [vmem:[#allocation2 + $0x110] ss:$2 sm:$0xff]  ;;  %v16968_v30 = vld [vmem:[#allocation2 + $0x101] ss:$2 sm:$0xff] }
  0xf2   :  { %v2977_v47 = vmax.f32 %v2721_v35, 0.0  ;;  %v2722_v48 = vadd.f32 %v16829_v16, %v2460_v36  ;;  %14406 = vmatmul.mubr.msk.bf16.gmra.mrb[116].mxu1 %vm960_vm2, %v15505_v27  ;;  %v2945_v49 = vmax.f32 %v2689_v38, 0.0  ;;  %v2690_v50 = vadd.f32 %v16829_v16, %v2428_v39  ;;  %v16970_v31 = vld [vmem:[#allocation2 + $0x111] ss:$2 sm:$0xff] }
  0xf3   :  { %v2975_v53 = vmax.f32 %v2719_v41, 0.0  ;;  %v2720_v54 = vadd.f32 %v16829_v16, %v2458_v42  ;;  %14409 = vmatprep.mubr.msk.bf16.mxu1 %vm960_vm2, %v15506_v32  ;;  %v2943_v55 = vmax.f32 %v2687_v43, 0.0  ;;  %v2688_v56 = vadd.f32 %v16829_v16, %v2426_v44 }
  0xf4   :  { %3234 = vst.msk [vmem:[#allocation2 + $0x150] sm:$0xff] %vm3191_vm3, %v2977_v47  ;;  %v2978_v57 = vmax.f32 %v2722_v48, 0.0  ;;  %3202 = vst.msk [vmem:[#allocation2 + $0x50] sm:$0xff] %vm3191_vm3, %v2945_v49  ;;  %v2946_v58 = vmax.f32 %v2690_v50, 0.0  ;;  %v3959_v6 = vmax.f32 %v16914_v45, %v16916_v46  ;;  %v3960_v12 = vmax.f32 %v16921_v51, %v16923_v52 }
  0xf5   :  { %3232 = vst.msk [vmem:[#allocation2 + $0x140] sm:$0xff] %vm3191_vm3, %v2975_v53  ;;  %v2976_v59 = vmax.f32 %v2720_v54, 0.0  ;;  %v14303_v60 = vpop.f32.mrb[12].mxu1  ;;  %3200 = vst.msk [vmem:[#allocation2 + $0x40] sm:$0xff] %vm3191_vm3, %v2943_v55  ;;  %v2944_v62 = vmax.f32 %v2688_v56, 0.0  ;;  %v14271_v63 = vpop.f32.mrb[12].mxu0  ;;  %v3975_v54 = vmax.f32 %v16964_v28, %v16968_v30  ;;  %v3976_v55 = vmax.f32 %v16966_v29, %v16970_v31 }
  0xf6   :  { %3235 = vst.msk [vmem:[#allocation2 + $0x158] sm:$0xff] %vm3191_vm3, %v2978_v57  ;;  %v2463_v0 = vmul.f32 %v14303_v60, %v16823_v15  ;;  %v1562_v1 = vpop.f32.mrb[13].mxu1  ;;  %3203 = vst.msk [vmem:[#allocation2 + $0x58] sm:$0xff] %vm3191_vm3, %v2946_v58  ;;  %v2431_v2 = vmul.f32 %v14271_v63, %v16823_v15  ;;  %v1434_v3 = vpop.f32.mrb[13].mxu0  ;;  %v16939_v4 = vld [vmem:[#allocation2 + $0x20] ss:$2 sm:$0xff] }
  0xf7   :  { %v16941_v5 = vld [vmem:[#allocation2 + $0x21] ss:$2 sm:$0xff]  ;;  %3233 = vst.msk [vmem:[#allocation2 + $0x148] sm:$0xff] %vm3191_vm3, %v2976_v59  ;;  %v2461_v7 = vmul.f32 %v16823_v15, %v1562_v1  ;;  %v14304_v8 = vpop.f32.mrb[14].mxu1  ;;  %3201 = vst.msk [vmem:[#allocation2 + $0x48] sm:$0xff] %vm3191_vm3, %v2944_v62  ;;  %v2429_v9 = vmul.f32 %v16823_v15, %v1434_v3  ;;  %v14272_v10 = vpop.f32.mrb[14].mxu0 }
  0xf8   :  { %v3961_v13 = vmax.f32 %v16939_v4, %v16941_v5  ;;  %v2725_v14 = vadd.f32 %v16829_v16, %v2463_v0  ;;  %v2464_v17 = vmul.f32 %v14304_v8, %v16823_v15  ;;  %v1565_v18 = vpop.f32.mrb[15].mxu1  ;;  %v2693_v19 = vadd.f32 %v16829_v16, %v2431_v2  ;;  %v1437_v21 = vpop.f32.mrb[15].mxu0  ;;  %v3454_v26 = vld [vmem:[#allocation2 + $0x30] ss:$2 sm:$0xff]  ;;  %v3710_v27 = vld [vmem:[#allocation2 + $0x31] ss:$2 sm:$0xff] }
  0xf9   :  { %v2432_v20 = vmul.f32 %v14272_v10, %v16823_v15  ;;  %v2723_v22 = vadd.f32 %v16829_v16, %v2461_v7  ;;  %v2462_v23 = vmul.f32 %v16823_v15, %v1565_v18  ;;  %v2691_v24 = vadd.f32 %v16829_v16, %v2429_v9  ;;  %v15509_v53 = vld [vmem:[%s21645_s0 + $0x278] sm:$0xff]   ;;  %v15510_v60 = vld [vmem:[%s21645_s0 + $0x280] sm:$0xff]  }
  0xfa   :  { %v2430_v25 = vmul.f32 %v16823_v15, %v1437_v21  ;;  %v2981_v32 = vmax.f32 %v2725_v14, 0.0  ;;  %v2726_v33 = vadd.f32 %v16829_v16, %v2464_v17  ;;  %14410 = vmatmul.mubr.msk.bf16.gmra.mrb[120].mxu1 %vm960_vm2, %v15507_v61  ;;  %v2949_v34 = vmax.f32 %v2693_v19, 0.0  ;;  %v17007_v63 = vld [vmem:[#allocation2 + $0x120] ss:$2 sm:$0xff]  ;;  %v17013_v7 = vld [vmem:[#allocation2 + $0x130] ss:$2 sm:$0xff] }
  0xfb   :  { %v2694_v35 = vadd.f32 %v16829_v16, %v2432_v20  ;;  %v2979_v36 = vmax.f32 %v2723_v22, 0.0  ;;  %v2724_v37 = vadd.f32 %v16829_v16, %v2462_v23  ;;  %v2947_v38 = vmax.f32 %v2691_v24, 0.0  ;;  %14413 = vmatprep.mubr.msk.bf16.mxu1 %vm960_vm2, %v15508_v11  ;;  %v17015_v8 = vld [vmem:[#allocation2 + $0x121] ss:$2 sm:$0xff]  ;;  %v17017_v45 = vld [vmem:[#allocation2 + $0x131] ss:$2 sm:$0xff] }
  0xfc   :  { %v2692_v39 = vadd.f32 %v16829_v16, %v2430_v25  ;;  %3238 = vst.msk [vmem:[#allocation2 + $0x170] sm:$0xff] %vm3191_vm3, %v2981_v32  ;;  %v2982_v40 = vmax.f32 %v2726_v33, 0.0  ;;  %3206 = vst.msk [vmem:[#allocation2 + $0x70] sm:$0xff] %vm3191_vm3, %v2949_v34  ;;  %v3962_v42 = vmax.f32 %v3454_v26, %v3710_v27  ;;  %v17003_v61 = vmax.f32 %v3959_v6, %v3961_v13 }
  0xfd   :  { %v2950_v41 = vmax.f32 %v2694_v35, 0.0  ;;  %3236 = vst.msk [vmem:[#allocation2 + $0x160] sm:$0xff] %vm3191_vm3, %v2979_v36  ;;  %v2980_v43 = vmax.f32 %v2724_v37, 0.0  ;;  %v14307_v44 = vpop.f32.mrb[16].mxu1  ;;  %3204 = vst.msk [vmem:[#allocation2 + $0x60] sm:$0xff] %vm3191_vm3, %v2947_v38  ;;  %v14275_v48 = vpop.f32.mrb[16].mxu0  ;;  %v3977_v32 = vmax.f32 %v17007_v63, %v17015_v8 }
  0xfe   :  { %v2948_v47 = vmax.f32 %v2692_v39, 0.0  ;;  %3239 = vst.msk [vmem:[#allocation2 + $0x178] sm:$0xff] %vm3191_vm3, %v2982_v40  ;;  %v2467_v49 = vmul.f32 %v14307_v44, %v16823_v15  ;;  %v1578_v50 = vpop.f32.mrb[17].mxu1  ;;  %v2435_v51 = vmul.f32 %v14275_v48, %v16823_v15  ;;  %v1450_v52 = vpop.f32.mrb[17].mxu0  ;;  %v17005_v62 = vmax.f32 %v3960_v12, %v3962_v42  ;;  %v17023_v11 = vld [vmem:[#allocation2 + $0x40] ss:$2 sm:$0xff] }
  0xff   :  { %3207 = vst.msk [vmem:[#allocation2 + $0x78] sm:$0xff] %vm3191_vm3, %v2950_v41  ;;  %3237 = vst.msk [vmem:[#allocation2 + $0x168] sm:$0xff] %vm3191_vm3, %v2980_v43  ;;  %v2465_v56 = vmul.f32 %v16823_v15, %v1578_v50  ;;  %v14308_v57 = vpop.f32.mrb[18].mxu1  ;;  %v2433_v58 = vmul.f32 %v16823_v15, %v1450_v52  ;;  %v14276_v59 = vpop.f32.mrb[18].mxu0  ;;  %v17025_v12 = vld [vmem:[#allocation2 + $0x50] ss:$2 sm:$0xff]  ;;  %v3978_v39 = vmax.f32 %v17013_v7, %v17017_v45 }
 0x100   :  { %3205 = vst.msk [vmem:[#allocation2 + $0x68] sm:$0xff] %vm3191_vm3, %v2948_v47  ;;  %v2729_v0 = vadd.f32 %v16829_v16, %v2467_v49  ;;  %v2468_v1 = vmul.f32 %v14308_v57, %v16823_v15  ;;  %v1581_v2 = vpop.f32.mrb[19].mxu1  ;;  %v2697_v3 = vadd.f32 %v16829_v16, %v2435_v51  ;;  %v2436_v4 = vmul.f32 %v14276_v59, %v16823_v15  ;;  %v1453_v5 = vpop.f32.mrb[19].mxu0  ;;  %v17027_v13 = vld [vmem:[#allocation2 + $0x41] ss:$2 sm:$0xff] }
 0x101   :  { %v2727_v46 = vadd.f32 %v16829_v16, %v2465_v56  ;;  %v2466_v6 = vmul.f32 %v16823_v15, %v1581_v2  ;;  %v2695_v9 = vadd.f32 %v16829_v16, %v2433_v58  ;;  %v2434_v10 = vmul.f32 %v16823_v15, %v1453_v5  ;;  %v17029_v14 = vld [vmem:[#allocation2 + $0x51] ss:$2 sm:$0xff]  ;;  %v15511_v37 = vld [vmem:[%s21645_s0 + $0x288] sm:$0xff]  }
 0x102   :  { %v2985_v17 = vmax.f32 %v2729_v0, 0.0  ;;  %v2730_v18 = vadd.f32 %v16829_v16, %v2468_v1  ;;  %v2953_v19 = vmax.f32 %v2697_v3, 0.0  ;;  %14414 = vmatmul.mubr.msk.bf16.gmra.mrb[124].mxu1 %vm960_vm2, %v15509_v53  ;;  %v2698_v20 = vadd.f32 %v16829_v16, %v2436_v4  ;;  %v15512_v56 = vld [vmem:[%s21645_s0 + $0x290] sm:$0xff]   ;;  %v17072_v3 = vld [vmem:[#allocation2 + $0x140] ss:$2 sm:$0xff] }
 0x103   :  { %v2983_v21 = vmax.f32 %v2727_v46, 0.0  ;;  %v2728_v22 = vadd.f32 %v16829_v16, %v2466_v6  ;;  %v2951_v23 = vmax.f32 %v2695_v9, 0.0  ;;  %v2696_v24 = vadd.f32 %v16829_v16, %v2434_v10  ;;  %14417 = vmatprep.mubr.msk.bf16.mxu1 %vm960_vm2, %v15510_v60  ;;  %v17078_v6 = vld [vmem:[#allocation2 + $0x141] ss:$2 sm:$0xff] }
 0x104   :  { %3242 = vst.msk [vmem:[#allocation2 + $0x190] sm:$0xff] %vm3191_vm3, %v2985_v17  ;;  %v2986_v25 = vmax.f32 %v2730_v18, 0.0  ;;  %3210 = vst.msk [vmem:[#allocation2 + $0x90] sm:$0xff] %vm3191_vm3, %v2953_v19  ;;  %v2954_v26 = vmax.f32 %v2698_v20, 0.0  ;;  %v15067_v27 = vpack.i.bf16 %v17005_v62, %v17003_v61  ;;  %v4411_v38 = vrot.slane %v17003_v61, 1 }
 0x105   :  { %3240 = vst.msk [vmem:[#allocation2 + $0x180] sm:$0xff] %vm3191_vm3, %v2983_v21  ;;  %v2984_v33 = vmax.f32 %v2728_v22, 0.0  ;;  %3208 = vst.msk [vmem:[#allocation2 + $0x80] sm:$0xff] %vm3191_vm3, %v2951_v23  ;;  %v2952_v34 = vmax.f32 %v2696_v24, 0.0  ;;  %v14279_v35 = vpop.f32.mrb[20].mxu0  ;;  %v14311_v36 = vpop.f32.mrb[20].mxu1  ;;  %v3963_v48 = vmax.f32 %v17023_v11, %v17027_v13  ;;  %v3964_v49 = vmax.f32 %v17025_v12, %v17029_v14 }
 0x106   :  { %3243 = vst.msk [vmem:[#allocation2 + $0x198] sm:$0xff] %vm3191_vm3, %v2986_v25  ;;  %3211 = vst.msk [vmem:[#allocation2 + $0x98] sm:$0xff] %vm3191_vm3, %v2954_v26  ;;  %v2439_v40 = vmul.f32 %v14279_v35, %v16823_v15  ;;  %v2471_v41 = vmul.f32 %v14311_v36, %v16823_v15  ;;  %v1466_v42 = vpop.f32.mrb[21].mxu0  ;;  %v1594_v43 = vpop.f32.mrb[21].mxu1  ;;  %15068 = vrot.lane.b32.xlu0 %v15067_v27, %s16446_s19  ;;  %v4412_v58 = vrot.slane %v17005_v62, 1  ;;  %v15513_v36 = vld [vmem:[%s21645_s0 + $0x298] sm:$0xff]  }
 0x107   :  { %v3460_v44 = vld [vmem:[#allocation2 + $0x60] ss:$2 sm:$0xff]  ;;  %v3716_v47 = vld [vmem:[#allocation2 + $0x61] ss:$2 sm:$0xff]  ;;  %3241 = vst.msk [vmem:[#allocation2 + $0x188] sm:$0xff] %vm3191_vm3, %v2984_v33  ;;  %3209 = vst.msk [vmem:[#allocation2 + $0x88] sm:$0xff] %vm3191_vm3, %v2952_v34  ;;  %v2437_v50 = vmul.f32 %v16823_v15, %v1466_v42  ;;  %v2469_v51 = vmul.f32 %v16823_v15, %v1594_v43  ;;  %v17091_v24 = vmax.f32 %v3975_v54, %v3977_v32 }
 0x108   :  { %v14280_v52 = vpop.f32.mrb[22].mxu0  ;;  %v14312_v53 = vpop.f32.mrb[22].mxu1  ;;  %v3965_v57 = vmax.f32 %v3460_v44, %v3716_v47  ;;  %v2701_v59 = vadd.f32 %v16829_v16, %v2439_v40  ;;  %v2733_v60 = vadd.f32 %v16829_v16, %v2471_v41  ;;  %v3462_v45 = vld [vmem:[#allocation2 + $0x70] ss:$2 sm:$0xff]  ;;  %v3718_v46 = vld [vmem:[#allocation2 + $0x71] ss:$2 sm:$0xff]  ;;  %v17098_v34 = vmax.f32 %v3976_v55, %v3978_v39 }
 0x109   :  { %v2440_v63 = vmul.f32 %v14280_v52, %v16823_v15  ;;  %v2472_v0 = vmul.f32 %v14312_v53, %v16823_v15  ;;  %v1469_v1 = vpop.f32.mrb[23].mxu0  ;;  %v1597_v2 = vpop.f32.mrb[23].mxu1  ;;  %v2699_v4 = vadd.f32 %v16829_v16, %v2437_v50  ;;  %v2731_v5 = vadd.f32 %v16829_v16, %v2469_v51  ;;  %v15514_v41 = vld [vmem:[%s21645_s0 + $0x2a0] sm:$0xff]   ;;  %v17138_v12 = vld [vmem:[#allocation2 + $0x150] ss:$2 sm:$0xff] }
 0x10a   :  { %v2438_v7 = vmul.f32 %v16823_v15, %v1469_v1  ;;  %v2470_v8 = vmul.f32 %v16823_v15, %v1597_v2  ;;  %v2957_v9 = vmax.f32 %v2701_v59, 0.0  ;;  %v2989_v10 = vmax.f32 %v2733_v60, 0.0  ;;  %14418 = vmatmul.mubr.msk.bf16.gmra.mrb[128].mxu1 %vm960_vm2, %v15511_v37  ;;  %v15543_v43 = vld [vmem:[%s21649_s4 + $0x40] sm:$0xff]   ;;  %v17140_v14 = vld [vmem:[#allocation2 + $0x151] ss:$2 sm:$0xff] }
 0x10b   :  { %v2702_v11 = vadd.f32 %v16829_v16, %v2440_v63  ;;  %v2734_v13 = vadd.f32 %v16829_v16, %v2472_v0  ;;  %v2955_v17 = vmax.f32 %v2699_v4, 0.0  ;;  %v2987_v18 = vmax.f32 %v2731_v5, 0.0  ;;  %14421 = vmatprep.mubr.msk.bf16.mxu1 %vm960_vm2, %v15512_v56  ;;  %14517 = vmatprep.subr.bf16.mxu1 %v15543_v43 }
 0x10c   :  { %v2700_v19 = vadd.f32 %v16829_v16, %v2438_v7  ;;  %v2732_v20 = vadd.f32 %v16829_v16, %v2470_v8  ;;  %3214 = vst.msk [vmem:[#allocation2 + $0xb0] sm:$0xff] %vm3191_vm3, %v2957_v9  ;;  %3246 = vst.msk [vmem:[#allocation2 + $0x1b0] sm:$0xff] %vm3191_vm3, %v2989_v10  ;;  %v3966_v23 = vmax.f32 %v3462_v45, %v3718_v46  ;;  %14518 = vmatpush3.bf16.msra.mxu1 %v15543_v43 }
 0x10d   :  { %v2958_v21 = vmax.f32 %v2702_v11, 0.0  ;;  %v2990_v22 = vmax.f32 %v2734_v13, 0.0  ;;  %3212 = vst.msk [vmem:[#allocation2 + $0xa0] sm:$0xff] %vm3191_vm3, %v2955_v17  ;;  %3244 = vst.msk [vmem:[#allocation2 + $0x1a0] sm:$0xff] %vm3191_vm3, %v2987_v18  ;;  %v14315_v27 = vpop.f32.mrb[24].mxu1  ;;  %v14283_v33 = vpop.f32.mrb[24].mxu0  ;;  %v3979_v35 = vmax.f32 %v17072_v3, %v17078_v6  ;;  %v17109_v29 = vmax.f32 %v3963_v48, %v3965_v57 }
 0x10e   :  { %v2956_v25 = vmax.f32 %v2700_v19, 0.0  ;;  %v2988_v26 = vmax.f32 %v2732_v20, 0.0  ;;  %v2475_v28 = vmul.f32 %v14315_v27, %v16823_v15  ;;  %v1610_v30 = vpop.f32.mrb[25].mxu1  ;;  %v2443_v54 = vmul.f32 %v14283_v33, %v16823_v15  ;;  %v1482_v32 = vpop.f32.mrb[25].mxu0  ;;  %v17148_v59 = vld [vmem:[#allocation2 + $0x90] ss:$2 sm:$0xff] }
 0x10f   :  { %3215 = vst.msk [vmem:[#allocation2 + $0xb8] sm:$0xff] %vm3191_vm3, %v2958_v21  ;;  %3247 = vst.msk [vmem:[#allocation2 + $0x1b8] sm:$0xff] %vm3191_vm3, %v2990_v22  ;;  %v17114_v31 = vsel %vm4410_vm4, %v4411_v38, %v4412_v58  ;;  %v2473_v55 = vmul.f32 %v16823_v15, %v1610_v30  ;;  %v14316_v37 = vpop.f32.mrb[26].mxu1  ;;  %v2441_v39 = vmul.f32 %v16823_v15, %v1482_v32  ;;  %v14284_v40 = vpop.f32.mrb[26].mxu0  ;;  %v17129_v38 = vsel %vm4410_vm4, %v4412_v58, 0.0  ;;  %v15515_v20 = vld [vmem:[%s21645_s0 + $0x2a8] sm:$0xff]  }
 0x110   :  { %3213 = vst.msk [vmem:[#allocation2 + $0xa8] sm:$0xff] %vm3191_vm3, %v2956_v25  ;;  %3245 = vst.msk [vmem:[#allocation2 + $0x1a8] sm:$0xff] %vm3191_vm3, %v2988_v26  ;;  %v17126_v42 = vmax.f32 %v3964_v49, %v3966_v23  ;;  %v2737_v44 = vadd.f32 %v16829_v16, %v2475_v28  ;;  %v2476_v47 = vmul.f32 %v14316_v37, %v16823_v15  ;;  %v1613_v48 = vpop.f32.mrb[27].mxu1  ;;  %v1485_v52 = vpop.f32.mrb[27].mxu0  ;;  %v17146_v58 = vld [vmem:[#allocation2 + $0x80] ss:$2 sm:$0xff] }
 0x111   :  { %v2705_v50 = vadd.f32 %v16829_v16, %v2443_v54  ;;  %v2444_v51 = vmul.f32 %v14284_v40, %v16823_v15  ;;  %v2735_v49 = vadd.f32 %v16829_v16, %v2473_v55  ;;  %v2474_v53 = vmul.f32 %v16823_v15, %v1613_v48  ;;  %v17150_v60 = vld [vmem:[#allocation2 + $0x81] ss:$2 sm:$0xff]  ;;  %v17155_v4 = vld [vmem:[#allocation2 + $0x91] ss:$2 sm:$0xff] }
 0x112   :  { %v2703_v56 = vadd.f32 %v16829_v16, %v2441_v39  ;;  %v2442_v57 = vmul.f32 %v16823_v15, %v1485_v52  ;;  %v2993_v63 = vmax.f32 %v2737_v44, 0.0  ;;  %v2738_v0 = vadd.f32 %v16829_v16, %v2476_v47  ;;  %14422 = vmatmul.mubr.msk.bf16.gmra.mrb[132].mxu1 %vm960_vm2, %v15513_v36  ;;  %v15516_v39 = vld [vmem:[%s21645_s0 + $0x2b0] sm:$0xff]  }
 0x113   :  { %v2961_v1 = vmax.f32 %v2705_v50, 0.0  ;;  %v2706_v2 = vadd.f32 %v16829_v16, %v2444_v51  ;;  %v2991_v5 = vmax.f32 %v2735_v49, 0.0  ;;  %v2736_v7 = vadd.f32 %v16829_v16, %v2474_v53  ;;  %14425 = vmatprep.mubr.msk.bf16.mxu1 %vm960_vm2, %v15514_v41 }
 0x114   :  { %v2959_v8 = vmax.f32 %v2703_v56, 0.0  ;;  %v2704_v45 = vadd.f32 %v16829_v16, %v2442_v57  ;;  %3250 = vst.msk [vmem:[#allocation2 + $0x1d0] sm:$0xff] %vm3191_vm3, %v2993_v63  ;;  %v2994_v46 = vmax.f32 %v2738_v0, 0.0  ;;  %v15077_v10 = vpack.i.bf16 %v17126_v42, %v17109_v29 }
 0x115   :  { %3218 = vst.msk [vmem:[#allocation2 + $0xd0] sm:$0xff] %vm3191_vm3, %v2961_v1  ;;  %v2962_v9 = vmax.f32 %v2706_v2, 0.0  ;;  %v15097_v11 = vpack.i.bf16 %v17098_v34, %v17091_v24  ;;  %3248 = vst.msk [vmem:[#allocation2 + $0x1c0] sm:$0xff] %vm3191_vm3, %v2991_v5  ;;  %v2992_v13 = vmax.f32 %v2736_v7, 0.0  ;;  %v14319_v18 = vpop.f32.mrb[28].mxu1  ;;  %v14287_v19 = vpop.f32.mrb[28].mxu0  ;;  %v15072_v21 = vpack.i.bf16 %v17129_v38, %v17114_v31 }
 0x116   :  { %3216 = vst.msk [vmem:[#allocation2 + $0xc0] sm:$0xff] %vm3191_vm3, %v2959_v8  ;;  %v2960_v17 = vmax.f32 %v2704_v45, 0.0  ;;  %v3980_v22 = vmax.f32 %v17138_v12, %v17140_v14  ;;  %3251 = vst.msk [vmem:[#allocation2 + $0x1d8] sm:$0xff] %vm3191_vm3, %v2994_v46  ;;  %v2479_v23 = vmul.f32 %v14319_v18, %v16823_v15  ;;  %v2447_v25 = vmul.f32 %v14287_v19, %v16823_v15  ;;  %v1498_v26 = vpop.f32.mrb[29].mxu0  ;;  %v1626_v27 = vpop.f32.mrb[29].mxu1  ;;  %v15517_v46 = vld [vmem:[%s21645_s0 + $0x2b8] sm:$0xff]  }
 0x117   :  { %3219 = vst.msk [vmem:[#allocation2 + $0xd8] sm:$0xff] %vm3191_vm3, %v2962_v9  ;;  %15078 = vrot.lane.b32.xlu0 %v15077_v10, %s16446_s19  ;;  %v3468_v33 = vld [vmem:[#allocation2 + $0xa0] ss:$2 sm:$0xff]  ;;  %v3724_v28 = vld [vmem:[#allocation2 + $0xa1] ss:$2 sm:$0xff]  ;;  %v3967_v30 = vmax.f32 %v17146_v58, %v17150_v60  ;;  %v3968_v54 = vmax.f32 %v17148_v59, %v17155_v4  ;;  %3249 = vst.msk [vmem:[#allocation2 + $0x1c8] sm:$0xff] %vm3191_vm3, %v2992_v13  ;;  %v2445_v32 = vmul.f32 %v16823_v15, %v1498_v26 }
 0x118   :  { %3217 = vst.msk [vmem:[#allocation2 + $0xc8] sm:$0xff] %vm3191_vm3, %v2960_v17  ;;  %v2477_v36 = vmul.f32 %v16823_v15, %v1626_v27  ;;  %v14288_v31 = vpop.f32.mrb[30].mxu0  ;;  %v14320_v55 = vpop.f32.mrb[30].mxu1  ;;  %v3969_v37 = vmax.f32 %v3468_v33, %v3724_v28  ;;  %15073 = vrot.lane.b32.xlu1 %v15072_v21, %s16447_s15  ;;  %v4414_v40 = vrot.slane %v17109_v29, 1  ;;  %v2741_v41 = vadd.f32 %v16829_v16, %v2479_v23  ;;  %v3470_v53 = vld [vmem:[#allocation2 + $0xb0] ss:$2 sm:$0xff] }
 0x119   :  { %v2709_v38 = vadd.f32 %v16829_v16, %v2447_v25  ;;  %v2448_v43 = vmul.f32 %v14288_v31, %v16823_v15  ;;  %v2480_v44 = vmul.f32 %v14320_v55, %v16823_v15  ;;  %v1501_v47 = vpop.f32.mrb[31].mxu0  ;;  %v1629_v48 = vpop.f32.mrb[31].mxu1  ;;  %v2707_v50 = vadd.f32 %v16829_v16, %v2445_v32  ;;  %v3726_v56 = vld [vmem:[#allocation2 + $0xb1] ss:$2 sm:$0xff]  ;;  %v17204_v63 = vld [vmem:[#allocation2 + $0x1a0] ss:$2 sm:$0xff] }
 0x11a   :  { %v2739_v51 = vadd.f32 %v16829_v16, %v2477_v36  ;;  %v2446_v52 = vmul.f32 %v16823_v15, %v1501_v47  ;;  %v2478_v49 = vmul.f32 %v16823_v15, %v1629_v48  ;;  %v2997_v57 = vmax.f32 %v2741_v41, 0.0  ;;  %14426 = vmatmul.mubr.msk.bf16.gmra.mrb[136].mxu1 %vm960_vm2, %v15515_v20  ;;  %v17206_v0 = vld [vmem:[#allocation2 + $0x1a1] ss:$2 sm:$0xff]  ;;  %v17211_v15 = vld [vmem:[%s21648_s3] ss:$0 sm:$0xff] }
 0x11b   :  { %v2965_v58 = vmax.f32 %v2709_v38, 0.0  ;;  %v2710_v59 = vadd.f32 %v16829_v16, %v2448_v43  ;;  %v2742_v60 = vadd.f32 %v16829_v16, %v2480_v44  ;;  %v2963_v1 = vmax.f32 %v2707_v50, 0.0  ;;  %14429 = vmatprep.mubr.msk.bf16.mxu1 %vm960_vm2, %v15516_v39  ;;  %v3496_v9 = vld [vmem:[#allocation2 + $0x180] ss:$2 sm:$0xff]  ;;  %v3752_v28 = vld [vmem:[#allocation2 + $0x181] ss:$2 sm:$0xff] }
 0x11c   :  { %v2995_v2 = vmax.f32 %v2739_v51, 0.0  ;;  %v2708_v4 = vadd.f32 %v17211_v15, %v2446_v52  ;;  %v2740_v5 = vadd.f32 %v17211_v15, %v2478_v49  ;;  %3254 = vst.msk [vmem:[#allocation2 + $0x1f0] sm:$0xff] %vm3191_vm3, %v2997_v57  ;;  %v3970_v8 = vmax.f32 %v3470_v53, %v3726_v56  ;;  %v15518_v18 = vld [vmem:[%s21645_s0 + $0x2c0] sm:$0xff]   ;;  %v3498_v55 = vld [vmem:[#allocation2 + $0x190] ss:$2 sm:$0xff] }
 0x11d   :  { %3222 = vst.msk [vmem:[#allocation2 + $0xf0] sm:$0xff] %vm3191_vm3, %v2965_v58  ;;  %v2966_v16 = vmax.f32 %v2710_v59, 0.0  ;;  %v2998_v7 = vmax.f32 %v2742_v60, 0.0  ;;  %v17218_v45 = vmax.f32 %v3967_v30, %v3969_v37  ;;  %3220 = vst.msk [vmem:[#allocation2 + $0xe0] sm:$0xff] %vm3191_vm3, %v2963_v1  ;;  %v14323_v17 = vpop.f32.mrb[32].mxu1  ;;  %v4415_v19 = vrot.slane %v17126_v42, 1 }
 0x11e   :  { %3252 = vst.msk [vmem:[#allocation2 + $0x1e0] sm:$0xff] %vm3191_vm3, %v2995_v2  ;;  %v2964_v10 = vmax.f32 %v2708_v4, 0.0  ;;  %v2996_v13 = vmax.f32 %v2740_v5, 0.0  ;;  %v4423_v20 = vrot.slane %v17091_v24, 1  ;;  %v17235_v21 = vld [vmem:[%s21647_s2] ss:$0 sm:$0xff]  ;;  %v17238_v25 = vmax.f32 %v3968_v54, %v3970_v8 }
 0x11f   :  { %3223 = vst.msk [vmem:[#allocation2 + $0xf8] sm:$0xff] %vm3191_vm3, %v2966_v16  ;;  %3255 = vst.msk [vmem:[#allocation2 + $0x1f8] sm:$0xff] %vm3191_vm3, %v2998_v7  ;;  %v2483_v23 = vmul.f32 %v17235_v21, %v14323_v17  ;;  %v1642_v26 = vpop.f32.mrb[33].mxu1  ;;  %v4417_v27 = vrot.slane %v17218_v45, 1  ;;  %v4424_v33 = vrot.slane %v17098_v34, 1  ;;  %v4416_v36 = vsel %vm4410_vm4, %v4414_v40, %v4415_v19 }
 0x120   :  { %3221 = vst.msk [vmem:[#allocation2 + $0xe8] sm:$0xff] %vm3191_vm3, %v2964_v10  ;;  %3253 = vst.msk [vmem:[#allocation2 + $0x1e8] sm:$0xff] %vm3191_vm3, %v2996_v13  ;;  %v2481_v30 = vmul.f32 %v17235_v21, %v1642_v26  ;;  %v14324_v32 = vpop.f32.mrb[34].mxu1  ;;  %v4540_v31 = vsel %vm4410_vm4, %v4415_v19, 0.0  ;;  %v3754_v54 = vld [vmem:[#allocation2 + $0x191] ss:$2 sm:$0xff]  ;;  %v3985_v37 = vmax.f32 %v17204_v63, %v17206_v0  ;;  %v15087_v43 = vpack.i.bf16 %v17238_v25, %v17218_v45 }
 0x121   :  { %v17249_v39 = vld [vmem:[#allocation2 + $0x160] ss:$2 sm:$0xff]  ;;  %v17251_v41 = vld [vmem:[#allocation2 + $0x161] ss:$2 sm:$0xff]  ;;  %v2745_v38 = vadd.f32 %v17211_v15, %v2483_v23  ;;  %v2484_v44 = vmul.f32 %v17235_v21, %v14324_v32  ;;  %v1645_v47 = vpop.f32.mrb[35].mxu1  ;;  %v4418_v40 = vrot.slane %v17238_v25, 1  ;;  %v15082_v56 = vpack.i.bf16 %v4540_v31, %v4416_v36 }
 0x122   :  { %v3502_v48 = vld [vmem:[#allocation2 + $0x1b0] ss:$2 sm:$0xff]  ;;  %v3758_v50 = vld [vmem:[#allocation2 + $0x1b1] ss:$2 sm:$0xff]  ;;  %v2743_v49 = vadd.f32 %v17211_v15, %v2481_v30  ;;  %v2482_v53 = vmul.f32 %v17235_v21, %v1645_v47  ;;  %v3983_v57 = vmax.f32 %v3496_v9, %v3752_v28  ;;  %v3472_v58 = vld [vmem:[#allocation2 + $0xc0] ss:$2 sm:$0xff]  ;;  %15088 = vrot.lane.b32.xlu0 %v15087_v43, %s16446_s19  ;;  %14430 = vmatmul.mubr.msk.bf16.gmra.mrb[140].mxu1 %vm960_vm2, %v15517_v46 }
 0x123   :  { %v3494_v51 = vld [vmem:[#allocation2 + $0x170] ss:$2 sm:$0xff]  ;;  %v3750_v52 = vld [vmem:[#allocation2 + $0x171] ss:$2 sm:$0xff]  ;;  %v3728_v60 = vld [vmem:[#allocation2 + $0xc1] ss:$2 sm:$0xff]  ;;  %v2746_v0 = vadd.f32 %v17211_v15, %v2484_v44  ;;  %v4419_v1 = vsel %vm4410_vm4, %v4417_v27, %v4418_v40  ;;  %14433 = vmatprep.mubr.msk.bf16.mxu1 %vm960_vm2, %v15518_v18  ;;  %15083 = vrot.lane.b32.xlu1 %v15082_v56, %s16447_s15  ;;  %v3984_v8 = vmax.f32 %v3498_v55, %v3754_v54 }
 0x124   :  { %v3474_v59 = vld [vmem:[#allocation2 + $0xd0] ss:$2 sm:$0xff]  ;;  %v3001_v63 = vmax.f32 %v2745_v38, 0.0  ;;  %v4541_v2 = vsel %vm4410_vm4, %v4418_v40, 0.0  ;;  %v3730_v4 = vld [vmem:[#allocation2 + $0xd1] ss:$2 sm:$0xff]  ;;  %v2744_v16 = vadd.f32 %v17211_v15, %v2482_v53  ;;  %v3986_v10 = vmax.f32 %v3502_v48, %v3758_v50 }
 0x125   :  { %v2999_v5 = vmax.f32 %v2743_v49, 0.0  ;;  %v15092_v7 = vpack.i.bf16 %v4541_v2, %v4419_v1  ;;  %v3002_v9 = vmax.f32 %v2746_v0, 0.0  ;;  %v17269_v13 = vmax.f32 %v3983_v57, %v3985_v37  ;;  %v14327_v19 = vpop.f32.mrb[36].mxu1  ;;  %v15519_v31 = vld [vmem:[%s21645_s0 + $0x2c8] sm:$0xff]  }
 0x126   :  { %3258 = vst.msk [vmem:[#allocation2 + $0x210] sm:$0xff] %vm3191_vm3, %v3001_v63  ;;  %v3981_v17 = vmax.f32 %v17249_v39, %v17251_v41  ;;  %v3000_v46 = vmax.f32 %v2744_v16, 0.0  ;;  %v3478_v23 = vld [vmem:[#allocation2 + $0xf0] ss:$2 sm:$0xff]  ;;  %v3734_v26 = vld [vmem:[#allocation2 + $0xf1] ss:$2 sm:$0xff]  ;;  %v3971_v27 = vmax.f32 %v3472_v58, %v3728_v60  ;;  %v3972_v18 = vmax.f32 %v3474_v59, %v3730_v4 }
 0x127   :  { %3256 = vst.msk [vmem:[#allocation2 + $0x200] sm:$0xff] %vm3191_vm3, %v2999_v5  ;;  %v3982_v28 = vmax.f32 %v3494_v51, %v3750_v52  ;;  %3259 = vst.msk [vmem:[#allocation2 + $0x218] sm:$0xff] %vm3191_vm3, %v3002_v9  ;;  %15093 = vrot.lane.b32.xlu0 %v15092_v7, %s16447_s15  ;;  %v2487_v30 = vmul.f32 %v17235_v21, %v14327_v19  ;;  %v1658_v32 = vpop.f32.mrb[37].mxu1  ;;  %v4425_v36 = vsel %vm4410_vm4, %v4423_v20, %v4424_v33  ;;  %v3476_v54 = vld [vmem:[#allocation2 + $0xe0] ss:$2 sm:$0xff]  ;;  %v15520_v20 = vld [vmem:[%s21645_s0 + $0x2d0] sm:$0xff]  }
 0x128   :  { %v17285_v55 = vmax.f32 %v3984_v8, %v3986_v10  ;;  %v3732_v37 = vld [vmem:[#allocation2 + $0xe1] ss:$2 sm:$0xff]  ;;  %v3974_v39 = vmax.f32 %v3478_v23, %v3734_v26  ;;  %3257 = vst.msk [vmem:[#allocation2 + $0x208] sm:$0xff] %vm3191_vm3, %v3000_v46  ;;  %v2485_v41 = vmul.f32 %v17235_v21, %v1658_v32  ;;  %v14328_v38 = vpop.f32.mrb[38].mxu1  ;;  %v4543_v43 = vsel %vm4410_vm4, %v4424_v33, 0.0  ;;  %v15521_v5 = vld [vmem:[%s21645_s0 + $0x2d8] sm:$0xff]  }
 0x129   :  { %v3973_v44 = vmax.f32 %v3476_v54, %v3732_v37  ;;  %v4429_v47 = vrot.slane %v17269_v13, 1  ;;  %v2749_v40 = vadd.f32 %v17211_v15, %v2487_v30  ;;  %v2488_v48 = vmul.f32 %v17235_v21, %v14328_v38  ;;  %v1661_v50 = vpop.f32.mrb[39].mxu1  ;;  %v17322_v58 = vld [vmem:[#allocation2 + $0x1c0] ss:$2 sm:$0xff]  ;;  %v17324_v59 = vld [vmem:[#allocation2 + $0x1c1] ss:$2 sm:$0xff] }
 0x12a   :  { %v17298_v51 = vmax.f32 %v3972_v18, %v3974_v39  ;;  %v17303_v52 = vmax.f32 %v3979_v35, %v3981_v17  ;;  %v2747_v33 = vadd.f32 %v17211_v15, %v2485_v41  ;;  %v2486_v49 = vmul.f32 %v17235_v21, %v1661_v50  ;;  %14434 = vmatmul.mubr.msk.bf16.gmra.mrb[144].mxu1 %vm960_vm2, %v15519_v31  ;;  %v17331_v60 = vld [vmem:[#allocation2 + $0x1d0] ss:$2 sm:$0xff]  ;;  %v3762_v63 = vld [vmem:[#allocation2 + $0x1d1] ss:$2 sm:$0xff]  ;;  %v15522_v8 = vld [vmem:[%s21645_s0 + $0x2e0] sm:$0xff]  }
 0x12b   :  { %v17307_v53 = vmax.f32 %v3971_v27, %v3973_v44  ;;  %v17312_v56 = vmax.f32 %v3980_v22, %v3982_v28  ;;  %v3005_v57 = vmax.f32 %v2749_v40, 0.0  ;;  %15098 = vrot.lane.b32.xlu0 %v15097_v11, %s16446_s19  ;;  %v2750_v3 = vadd.f32 %v17211_v15, %v2488_v48  ;;  %14437 = vmatprep.mubr.msk.bf16.mxu1 %vm960_vm2, %v15520_v20  ;;  %v3508_v17 = vld [vmem:[#allocation2 + $0x1e0] ss:$2 sm:$0xff]  ;;  %v3510_v18 = vld [vmem:[#allocation2 + $0x1f0] ss:$2 sm:$0xff] }
 0x12c   :  { %v4430_v6 = vrot.slane %v17285_v55, 1  ;;  %v4421_v35 = vrot.slane %v17298_v51, 1  ;;  %v4219_v12 = vrot.slane %v17005_v62, 7  ;;  %v3003_v14 = vmax.f32 %v2747_v33, 0.0  ;;  %v3764_v28 = vld [vmem:[#allocation2 + $0x1e1] ss:$2 sm:$0xff] }
 0x12d   :  { %v2748_v22 = vadd.f32 %v17211_v15, %v2486_v49  ;;  %v15102_v11 = vpack.i.bf16 %v17298_v51, %v17307_v53  ;;  %3262 = vst.msk [vmem:[#allocation2 + $0x230] sm:$0xff] %vm3191_vm3, %v3005_v57  ;;  %v3006_v0 = vmax.f32 %v2750_v3, 0.0  ;;  %v15117_v1 = vpack.i.bf16 %v4543_v43, %v4425_v36  ;;  %v14331_v7 = vpop.f32.mrb[40].mxu1  ;;  %v3766_v54 = vld [vmem:[#allocation2 + $0x1f1] ss:$2 sm:$0xff] }
 0x12e   :  { %v4420_v2 = vrot.slane %v17307_v53, 1  ;;  %v4542_v4 = vsel %vm4410_vm4, %v4421_v35, 0.0  ;;  %3260 = vst.msk [vmem:[#allocation2 + $0x220] sm:$0xff] %vm3191_vm3, %v3003_v14  ;;  %v4426_v9 = vrot.slane %v17303_v52, 1  ;;  %v4427_v10 = vrot.slane %v17312_v56, 1  ;;  %v1674_v23 = vpop.f32.mrb[41].mxu1 }
 0x12f   :  { %v3004_v16 = vmax.f32 %v2748_v22, 0.0  ;;  %15103 = vrot.lane.b32.xlu1 %v15102_v11, %s16446_s19  ;;  %3263 = vst.msk [vmem:[#allocation2 + $0x238] sm:$0xff] %vm3191_vm3, %v3006_v0  ;;  %15118 = vrot.lane.b32.xlu0 %v15117_v1, %s16447_s15  ;;  %v2491_v46 = vmul.f32 %v17235_v21, %v14331_v7  ;;  %v15127_v19 = vpack.i.bf16 %v17285_v55, %v17269_v13  ;;  %v14332_v32 = vpop.f32.mrb[42].mxu1  ;;  %v4545_v36 = vsel %vm4410_vm4, %v4430_v6, 0.0  ;;  %v3512_v44 = vld [vmem:[#allocation2 + $0x200] ss:$2 sm:$0xff] }
 0x130   :  { %v4431_v26 = vsel %vm4410_vm4, %v4429_v47, %v4430_v6  ;;  %v4422_v27 = vsel %vm4410_vm4, %v4420_v2, %v4421_v35  ;;  %v2489_v30 = vmul.f32 %v17235_v21, %v1674_v23  ;;  %v3987_v37 = vmax.f32 %v17322_v58, %v17324_v59  ;;  %v1677_v38 = vpop.f32.mrb[43].mxu1  ;;  %v3514_v50 = vld [vmem:[#allocation2 + $0x210] ss:$2 sm:$0xff]  ;;  %v3768_v33 = vld [vmem:[#allocation2 + $0x201] ss:$2 sm:$0xff] }
 0x131   :  { %3261 = vst.msk [vmem:[#allocation2 + $0x228] sm:$0xff] %vm3191_vm3, %v3004_v16  ;;  %v15107_v31 = vpack.i.bf16 %v4542_v4, %v4422_v27  ;;  %v2753_v39 = vadd.f32 %v17211_v15, %v2491_v46  ;;  %v2492_v41 = vmul.f32 %v17235_v21, %v14332_v32  ;;  %v4428_v43 = vsel %vm4410_vm4, %v4426_v9, %v4427_v10  ;;  %v3770_v49 = vld [vmem:[#allocation2 + $0x211] ss:$2 sm:$0xff]  ;;  %v15523_v0 = vld [vmem:[%s21645_s0 + $0x2e8] sm:$0xff]  }
 0x132   :  { %v3988_v20 = vmax.f32 %v17331_v60, %v3762_v63  ;;  %v2751_v47 = vadd.f32 %v17211_v15, %v2489_v30  ;;  %v2490_v40 = vmul.f32 %v17235_v21, %v1677_v38  ;;  %v4544_v48 = vsel %vm4410_vm4, %v4427_v10, 0.0  ;;  %14438 = vmatmul.mubr.msk.bf16.gmra.mrb[148].mxu1 %vm960_vm2, %v15521_v5  ;;  %v15525_v10 = vld [vmem:[%s21645_s0 + $0x2f0] sm:$0xff]  }
 0x133   :  { %15108 = vrot.lane.b32.xlu1 %v15107_v31, %s16447_s15  ;;  %v3989_v57 = vmax.f32 %v3508_v17, %v3764_v28  ;;  %v3009_v3 = vmax.f32 %v2753_v39, 0.0  ;;  %15128 = vrot.lane.b32.xlu0 %v15127_v19, %s16446_s19  ;;  %v2754_v6 = vadd.f32 %v17211_v15, %v2492_v41  ;;  %v3990_v35 = vmax.f32 %v3510_v18, %v3766_v54 }
 0x134   :  { %v4218_v58 = vrot.slane %v17003_v61, 7  ;;  %v3007_v59 = vmax.f32 %v2751_v47, 0.0  ;;  %v2752_v14 = vadd.f32 %v17211_v15, %v2490_v40  ;;  %v15112_v22 = vpack.i.bf16 %v17312_v56, %v17303_v52  ;;  %14441 = vmatprep.mubr.msk.bf16.mxu1 %vm960_vm2, %v15522_v8 }
 0x135   :  { %v17374_v11 = vmax.f32 %v3987_v37, %v3989_v57  ;;  %3266 = vst.msk [vmem:[#allocation2 + $0x250] sm:$0xff] %vm3191_vm3, %v3009_v3  ;;  %v3010_v60 = vmax.f32 %v2754_v6, 0.0  ;;  %v15137_v63 = vpack.i.bf16 %v4545_v36, %v4431_v26  ;;  %v17380_v1 = vmax.f32 %v3988_v20, %v3990_v35  ;;  %v14335_v5 = vpop.f32.mrb[44].mxu1 }
 0x136   :  { %v17387_v2 = vsel %vm4217_vm5, %v4218_v58, %v4219_v12  ;;  %3264 = vst.msk [vmem:[#allocation2 + $0x240] sm:$0xff] %vm3191_vm3, %v3007_v59  ;;  %v3008_v4 = vmax.f32 %v2752_v14, 0.0  ;;  %v15122_v16 = vpack.i.bf16 %v4544_v48, %v4428_v43  ;;  %v3518_v7 = vld [vmem:[#allocation2 + $0x230] ss:$2 sm:$0xff]  ;;  %v3774_v8 = vld [vmem:[#allocation2 + $0x231] ss:$2 sm:$0xff]  ;;  %v3991_v9 = vmax.f32 %v3512_v44, %v3768_v33 }
 0x137   :  { %15113 = vrot.lane.b32.xlu1 %v15112_v22, %s16446_s19  ;;  %3267 = vst.msk [vmem:[#allocation2 + $0x258] sm:$0xff] %vm3191_vm3, %v3010_v60  ;;  %15138 = vrot.lane.b32.xlu0 %v15137_v63, %s16447_s15  ;;  %v2495_v62 = vmul.f32 %v17235_v21, %v14335_v5  ;;  %v1690_v12 = vpop.f32.mrb[45].mxu1  ;;  %v3992_v19 = vmax.f32 %v3514_v50, %v3770_v49  ;;  %v4432_v26 = vrot.slane %v17374_v11, 1  ;;  %v4433_v30 = vrot.slane %v17380_v1, 1  ;;  %v15526_v5 = vld [vmem:[%s21645_s0 + $0x2f8] sm:$0xff]  }
 0x138   :  { %v3516_v17 = vld [vmem:[#allocation2 + $0x220] ss:$2 sm:$0xff]  ;;  %v3772_v46 = vld [vmem:[#allocation2 + $0x221] ss:$2 sm:$0xff]  ;;  %v3994_v23 = vmax.f32 %v3518_v7, %v3774_v8  ;;  %3265 = vst.msk [vmem:[#allocation2 + $0x248] sm:$0xff] %vm3191_vm3, %v3008_v4  ;;  %v2493_v27 = vmul.f32 %v17235_v21, %v1690_v12  ;;  %v14336_v18 = vpop.f32.mrb[46].mxu1 }
 0x139   :  { %v3993_v28 = vmax.f32 %v3516_v17, %v3772_v46  ;;  %v4222_v32 = vrot.slane %v17126_v42, 7  ;;  %v2757_v36 = vadd.f32 %v17211_v15, %v2495_v62  ;;  %v2496_v31 = vmul.f32 %v17235_v21, %v14336_v18  ;;  %v1693_v54 = vpop.f32.mrb[47].mxu1 }
 0x13a   :  { %v17404_v37 = vmax.f32 %v3992_v19, %v3994_v23  ;;  %v4221_v39 = vrot.slane %v17109_v29, 7  ;;  %v2755_v41 = vadd.f32 %v17211_v15, %v2493_v27  ;;  %v2494_v38 = vmul.f32 %v17235_v21, %v1693_v54  ;;  %14442 = vmatmul.mubr.msk.bf16.gmra.mrb[152].mxu1 %vm960_vm2, %v15523_v0 }
 0x13b   :  { %15123 = vrot.lane.b32.xlu1 %v15122_v16, %s16447_s15  ;;  %v17410_v43 = vmax.f32 %v3991_v9, %v3993_v28  ;;  %v15132_v42 = vpack.i.bf16 %v17380_v1, %v17374_v11  ;;  %v3013_v44 = vmax.f32 %v2757_v36, 0.0  ;;  %v2758_v20 = vadd.f32 %v17211_v15, %v2496_v31  ;;  %14445 = vmatprep.mubr.msk.bf16.mxu1 %vm960_vm2, %v15525_v10  ;;  %v15527_v16 = vld [vmem:[%s21645_s0 + $0x300] sm:$0xff]  }
 0x13c   :  { %v4436_v47 = vrot.slane %v17404_v37, 1  ;;  %v4434_v40 = vsel %vm4410_vm4, %v4432_v26, %v4433_v30  ;;  %v3011_v48 = vmax.f32 %v2755_v41, 0.0  ;;  %v2756_v50 = vadd.f32 %v17211_v15, %v2494_v38 }
 0x13d   :  { %v15147_v33 = vpack.i.bf16 %v17404_v37, %v17410_v43  ;;  %v4435_v49 = vrot.slane %v17410_v43, 1  ;;  %3270 = vst.msk [vmem:[#allocation2 + $0x270] sm:$0xff] %vm3191_vm3, %v3013_v44  ;;  %v3014_v57 = vmax.f32 %v2758_v20, 0.0  ;;  %v4546_v6 = vsel %vm4410_vm4, %v4433_v30, 0.0  ;;  %v14339_v14 = vpop.f32.mrb[48].mxu1 }
 0x13e   :  { %v4547_v3 = vsel %vm4410_vm4, %v4436_v47, 0.0  ;;  %v17429_v35 = vsel %vm4217_vm5, %v4221_v39, %v4222_v32  ;;  %3268 = vst.msk [vmem:[#allocation2 + $0x260] sm:$0xff] %vm3191_vm3, %v3011_v48  ;;  %v3012_v59 = vmax.f32 %v2756_v50, 0.0  ;;  %v4225_v60 = vrot.slane %v17238_v25, 7  ;;  %v1706_v0 = vpop.f32.mrb[49].mxu1 }
 0x13f   :  { %15148 = vrot.lane.b32.xlu0 %v15147_v33, %s16446_s19  ;;  %15133 = vrot.lane.b32.xlu1 %v15132_v42, %s16446_s19  ;;  %v4437_v22 = vsel %vm4410_vm4, %v4435_v49, %v4436_v47  ;;  %3271 = vst.msk [vmem:[#allocation2 + $0x278] sm:$0xff] %vm3191_vm3, %v3014_v57  ;;  %v2499_v63 = vmul.f32 %v17235_v21, %v14339_v14  ;;  %v14340_v8 = vpop.f32.mrb[50].mxu1  ;;  %v4224_v9 = vrot.slane %v17218_v45, 7  ;;  %v4230_v17 = vrot.slane %v17091_v24, 7  ;;  %v3522_v26 = vld [vmem:[#allocation2 + $0x250] ss:$2 sm:$0xff] }
 0x140   :  { %v15152_v4 = vpack.i.bf16 %v4547_v3, %v4437_v22  ;;  %3269 = vst.msk [vmem:[#allocation2 + $0x268] sm:$0xff] %vm3191_vm3, %v3012_v59  ;;  %v2497_v7 = vmul.f32 %v17235_v21, %v1706_v0  ;;  %v15142_v25 = vpack.i.bf16 %v4546_v6, %v4434_v40  ;;  %v2500_v62 = vmul.f32 %v17235_v21, %v14340_v8  ;;  %v1709_v12 = vpop.f32.mrb[51].mxu1  ;;  %v3778_v27 = vld [vmem:[#allocation2 + $0x251] ss:$2 sm:$0xff]  ;;  %v3776_v32 = vld [vmem:[#allocation2 + $0x241] ss:$2 sm:$0xff] }
 0x141   :  { %v2761_v10 = vadd.f32 %v17211_v15, %v2499_v63  ;;  %v4231_v46 = vrot.slane %v17098_v34, 7  ;;  %v2498_v23 = vmul.f32 %v17235_v21, %v1709_v12  ;;  %v17458_v18 = vsel %vm4217_vm5, %v4224_v9, %v4225_v60  ;;  %v3520_v34 = vld [vmem:[#allocation2 + $0x240] ss:$2 sm:$0xff]  ;;  %v15561_v12 = vld [vmem:[%s21649_s4 + $0x50] sm:$0xff]  }
 0x142   :  { %v2759_v19 = vadd.f32 %v17211_v15, %v2497_v7  ;;  %v2762_v30 = vadd.f32 %v17211_v15, %v2500_v62  ;;  %14446 = vmatmul.mubr.msk.bf16.gmra.mrb[156].mxu1 %vm960_vm2, %v15526_v5  ;;  %v4236_v41 = vrot.slane %v17269_v13, 7  ;;  %v4237_v38 = vrot.slane %v17285_v55, 7  ;;  %v15528_v57 = vld [vmem:[%s21645_s0 + $0x308] sm:$0xff]   ;;  %v15529_v5 = vld [vmem:[%s21645_s0 + $0x310] sm:$0xff]  }
 0x143   :  { %15153 = vrot.lane.b32.xlu0 %v15152_v4, %s16447_s15  ;;  %15143 = vrot.lane.b32.xlu1 %v15142_v25, %s16447_s15  ;;  %v3017_v28 = vmax.f32 %v2761_v10, 0.0  ;;  %v17465_v36 = vsel %vm4217_vm5, %v4230_v17, %v4231_v46  ;;  %v2760_v54 = vadd.f32 %v17211_v15, %v2498_v23  ;;  %v4228_v44 = vrot.slane %v17298_v51, 7  ;;  %v15558_v7 = vld [vmem:[%s21649_s4 + $0x48] sm:$0xff]  }
 0x144   :  { %v3015_v31 = vmax.f32 %v2759_v19, 0.0  ;;  %14449 = vmatprep.mubr.msk.bf16.mxu1 %vm960_vm2, %v15527_v16  ;;  %v3018_v42 = vmax.f32 %v2762_v30, 0.0  ;;  %v4227_v20 = vrot.slane %v17307_v53, 7  ;;  %v4233_v47 = vrot.slane %v17303_v52, 7  ;;  %14519 = vmatprep.subr.bf16.mxu1 %v15558_v7 }
 0x145   :  { %3274 = vst.msk [vmem:[#allocation2 + $0x290] sm:$0xff] %vm3191_vm3, %v3017_v28  ;;  %v3016_v40 = vmax.f32 %v2760_v54, 0.0  ;;  %v14343_v48 = vpop.f32.mrb[52].mxu1  ;;  %v17479_v49 = vsel %vm4217_vm5, %v4236_v41, %v4237_v38  ;;  %v3996_v59 = vmax.f32 %v3522_v26, %v3778_v27  ;;  %v3995_v0 = vmax.f32 %v3520_v34, %v3776_v32  ;;  %14520 = vmatpush3.bf16.msra.mxu1 %v15558_v7 }
 0x146   :  { %3272 = vst.msk [vmem:[#allocation2 + $0x280] sm:$0xff] %vm3191_vm3, %v3015_v31  ;;  %v3526_v50 = vld [vmem:[#allocation2 + $0x270] ss:$2 sm:$0xff]  ;;  %v3782_v33 = vld [vmem:[#allocation2 + $0x271] ss:$2 sm:$0xff]  ;;  %3275 = vst.msk [vmem:[#allocation2 + $0x298] sm:$0xff] %vm3191_vm3, %v3018_v42  ;;  %v2503_v55 = vmul.f32 %v17235_v21, %v14343_v48  ;;  %v17489_v22 = vsel %vm4217_vm5, %v4227_v20, %v4228_v44  ;;  %14521 = vmatprep.subr.bf16.mxu1 %v15561_v12 }
 0x147   :  { %v1722_v51 = vpop.f32.mrb[53].mxu1  ;;  %v3524_v3 = vld [vmem:[#allocation2 + $0x260] ss:$2 sm:$0xff]  ;;  %v3780_v6 = vld [vmem:[#allocation2 + $0x261] ss:$2 sm:$0xff]  ;;  %v3998_v14 = vmax.f32 %v3526_v50, %v3782_v33  ;;  %3273 = vst.msk [vmem:[#allocation2 + $0x288] sm:$0xff] %vm3191_vm3, %v3016_v40 }
 0x148   :  { %v2501_v60 = vmul.f32 %v17235_v21, %v1722_v51  ;;  %v14344_v63 = vpop.f32.mrb[54].mxu1  ;;  %v3997_v4 = vmax.f32 %v3524_v3, %v3780_v6  ;;  %v4234_v16 = vrot.slane %v17312_v56, 7  ;;  %v2765_v8 = vadd.f32 %v17211_v15, %v2503_v55  ;;  %v15562_v6 = vld [vmem:[%s21649_s4 + $0x58] sm:$0xff]  }
 0x149   :  { %v2504_v25 = vmul.f32 %v17235_v21, %v14344_v63  ;;  %v1725_v10 = vpop.f32.mrb[55].mxu1  ;;  %v4106_v62 = vmax.f32 %v3996_v59, %v3998_v14  ;;  %v4242_v30 = vrot.slane %v17410_v43, 7  ;;  %v4243_v44 = vrot.slane %v17404_v37, 7  ;;  %v15531_v37 = vld [vmem:[%s21645_s0 + $0x320] sm:$0xff]   ;;  %14522 = vmatpush3.bf16.msra.mxu1 %v15561_v12 }
 0x14a   :  { %v2763_v46 = vadd.f32 %v17211_v15, %v2501_v60  ;;  %v2502_v19 = vmul.f32 %v17235_v21, %v1725_v10  ;;  %v17507_v23 = vmax.f32 %v3995_v0, %v3997_v4  ;;  %v17512_v56 = vsel %vm4217_vm5, %v4233_v47, %v4234_v16  ;;  %14450 = vmatmul.mubr.msk.bf16.gmra.mrb[160].mxu1 %vm960_vm2, %v15528_v57  ;;  %v15530_v57 = vld [vmem:[%s21645_s0 + $0x318] sm:$0xff]  }
 0x14b   :  { %v3021_v26 = vmax.f32 %v2765_v8, 0.0  ;;  %v2766_v27 = vadd.f32 %v17211_v15, %v2504_v25  ;;  %v4439_v28 = vrot.slane %v4106_v62, 1  ;;  %14453 = vmatprep.mubr.msk.bf16.mxu1 %vm960_vm2, %v15529_v5  ;;  %v17538_v3 = vsel %vm4217_vm5, %v4242_v30, %v4243_v44  ;;  %14523 = vmatprep.subr.bf16.mxu1 %v15562_v6 }
 0x14c   :  { %v3019_v34 = vmax.f32 %v2763_v46, 0.0  ;;  %v2764_v32 = vadd.f32 %v17211_v15, %v2502_v19  ;;  %v15157_v31 = vpack.i.bf16 %v4106_v62, %v17507_v23  ;;  %v4438_v54 = vrot.slane %v17507_v23, 1 }
 0x14d   :  { %3278 = vst.msk [vmem:[#allocation2 + $0x2b0] sm:$0xff] %vm3191_vm3, %v3021_v26  ;;  %v3022_v38 = vmax.f32 %v2766_v27, 0.0  ;;  %v4548_v42 = vsel %vm4410_vm4, %v4439_v28, 0.0  ;;  %v14347_v48 = vpop.f32.mrb[56].mxu1  ;;  %v4239_v60 = vrot.slane %v17374_v11, 7  ;;  %v4240_v63 = vrot.slane %v17380_v1, 7  ;;  %14524 = vmatpush3.bf16.msra.mxu1 %v15562_v6 }
 0x14e   :  { %3276 = vst.msk [vmem:[#allocation2 + $0x2a0] sm:$0xff] %vm3191_vm3, %v3019_v34  ;;  %v3020_v40 = vmax.f32 %v2764_v32, 0.0  ;;  %15158 = vrot.lane.b32.xlu1 %v15157_v31, %s16446_s19  ;;  %v4440_v50 = vsel %vm4410_vm4, %v4438_v54, %v4439_v28  ;;  %v2507_v33 = vmul.f32 %v17235_v21, %v14347_v48  ;;  %v1738_v55 = vpop.f32.mrb[57].mxu1  ;;  %v4245_v16 = vrot.slane %v17507_v23, 7  ;;  %v3530_v10 = vld [vmem:[#allocation2 + $0x290] ss:$2 sm:$0xff] }
 0x14f   :  { %3279 = vst.msk [vmem:[#allocation2 + $0x2b8] sm:$0xff] %vm3191_vm3, %v3022_v38  ;;  %v15162_v51 = vpack.i.bf16 %v4548_v42, %v4440_v50  ;;  %v2505_v59 = vmul.f32 %v17235_v21, %v1738_v55  ;;  %v14348_v14 = vpop.f32.mrb[58].mxu1  ;;  %v4246_v7 = vrot.slane %v4106_v62, 7  ;;  %v3786_v46 = vld [vmem:[#allocation2 + $0x291] ss:$2 sm:$0xff]  ;;  %v17556_v1 = vsel %vm4217_vm5, %v4239_v60, %v4240_v63  ;;  %v15532_v31 = vld [vmem:[%s21645_s0 + $0x328] sm:$0xff]  }
 0x150   :  { %3277 = vst.msk [vmem:[#allocation2 + $0x2a8] sm:$0xff] %vm3191_vm3, %v3020_v40  ;;  %v2769_v0 = vadd.f32 %v17211_v15, %v2507_v33  ;;  %v2508_v4 = vmul.f32 %v17235_v21, %v14348_v14  ;;  %v1741_v5 = vpop.f32.mrb[59].mxu1  ;;  %v3528_v62 = vld [vmem:[#allocation2 + $0x280] ss:$2 sm:$0xff]  ;;  %v3784_v26 = vld [vmem:[#allocation2 + $0x281] ss:$2 sm:$0xff] }
 0x151   :  { %v2767_v8 = vadd.f32 %v17211_v15, %v2505_v59  ;;  %v2506_v25 = vmul.f32 %v17235_v21, %v1741_v5  ;;  %v17563_v27 = vsel %vm4217_vm5, %v4245_v16, %v4246_v7  ;;  %v15533_v40 = vld [vmem:[%s21645_s0 + $0x330] sm:$0xff]   ;;  %v3999_v59 = vmax.f32 %v3528_v62, %v3784_v26  ;;  %v17590_v26 = vld [vmem:[%s21648_s3] ss:$0 sm:$0xff] }
 0x152   :  { %15163 = vrot.lane.b32.xlu1 %v15162_v51, %s16447_s15  ;;  %v3025_v12 = vmax.f32 %v2769_v0, 0.0  ;;  %v2770_v19 = vadd.f32 %v17211_v15, %v2508_v4  ;;  %14454 = vmatmul.mubr.msk.bf16.gmra.mrb[164].mxu1 %vm960_vm2, %v15530_v57  ;;  %v4000_v51 = vmax.f32 %v3530_v10, %v3786_v46  ;;  %v17754_v61 = vsel %vm4217_vm5, 0.0, %v4224_v9 }
 0x153   :  { %v3023_v28 = vmax.f32 %v2767_v8, 0.0  ;;  %v2768_v34 = vadd.f32 %v17211_v15, %v2506_v25  ;;  %14457 = vmatprep.mubr.msk.bf16.mxu1 %vm960_vm2, %v15531_v37 }
 0x154   :  { %3282 = vst.msk [vmem:[#allocation2 + $0x2d0] sm:$0xff] %vm3191_vm3, %v3025_v12  ;;  %v3026_v32 = vmax.f32 %v2770_v19, 0.0 }
 0x155   :  { %3280 = vst.msk [vmem:[#allocation2 + $0x2c0] sm:$0xff] %vm3191_vm3, %v3023_v28  ;;  %v3024_v54 = vmax.f32 %v2768_v34, 0.0  ;;  %v14351_v38 = vpop.f32.mrb[60].mxu1 }
 0x156   :  { %v3534_v42 = vld [vmem:[#allocation2 + $0x2b0] ss:$2 sm:$0xff]  ;;  %v3790_v44 = vld [vmem:[#allocation2 + $0x2b1] ss:$2 sm:$0xff]  ;;  %3283 = vst.msk [vmem:[#allocation2 + $0x2d8] sm:$0xff] %vm3191_vm3, %v3026_v32  ;;  %v2511_v48 = vmul.f32 %v17235_v21, %v14351_v38  ;;  %v1754_v50 = vpop.f32.mrb[61].mxu1 }
 0x157   :  { %v3532_v33 = vld [vmem:[#allocation2 + $0x2a0] ss:$2 sm:$0xff]  ;;  %v3788_v55 = vld [vmem:[#allocation2 + $0x2a1] ss:$2 sm:$0xff]  ;;  %v4002_v57 = vmax.f32 %v3534_v42, %v3790_v44  ;;  %3281 = vst.msk [vmem:[#allocation2 + $0x2c8] sm:$0xff] %vm3191_vm3, %v3024_v54  ;;  %v2509_v37 = vmul.f32 %v17235_v21, %v1754_v50  ;;  %v14352_v6 = vpop.f32.mrb[62].mxu1 }
 0x158   :  { %v4001_v14 = vmax.f32 %v3532_v33, %v3788_v55  ;;  %v2773_v63 = vadd.f32 %v17211_v15, %v2511_v48  ;;  %v2512_v0 = vmul.f32 %v17235_v21, %v14352_v6  ;;  %v1757_v4 = vpop.f32.mrb[63].mxu1  ;;  %v15534_v33 = vld [vmem:[%s21645_s0 + $0x338] sm:$0xff]   ;;  %v15535_v55 = vld [vmem:[%s21645_s0 + $0x340] sm:$0xff]  }
 0x159   :  { %v4108_v5 = vmax.f32 %v4000_v51, %v4002_v57  ;;  %v2771_v7 = vadd.f32 %v17211_v15, %v2509_v37  ;;  %v2510_v8 = vmul.f32 %v17235_v21, %v1757_v4 }
 0x15a   :  { %v17583_v25 = vmax.f32 %v3999_v59, %v4001_v14  ;;  %v3029_v10 = vmax.f32 %v2773_v63, 0.0  ;;  %v2774_v46 = vadd.f32 %v17211_v15, %v2512_v0  ;;  %14458 = vmatmul.mubr.msk.bf16.gmra.mrb[168].mxu1 %vm960_vm2, %v15532_v31 }
 0x15b   :  { %v4442_v12 = vrot.slane %v4108_v5, 1  ;;  %v4249_v19 = vrot.slane %v4108_v5, 7  ;;  %v3027_v62 = vmax.f32 %v2771_v7, 0.0  ;;  %v2772_v28 = vadd.f32 %v17590_v26, %v2510_v8  ;;  %14461 = vmatprep.mubr.msk.bf16.mxu1 %vm960_vm2, %v15533_v40 }
 0x15c   :  { %v15167_v34 = vpack.i.bf16 %v4108_v5, %v17583_v25  ;;  %v4441_v32 = vrot.slane %v17583_v25, 1  ;;  %3286 = vst.msk [vmem:[#allocation2 + $0x2f0] sm:$0xff] %vm3191_vm3, %v3029_v10  ;;  %v3030_v15 = vmax.f32 %v2774_v46, 0.0  ;;  %v4248_v54 = vrot.slane %v17583_v25, 7 }
 0x15d   :  { %v4549_v31 = vsel %vm4410_vm4, %v4442_v12, 0.0  ;;  %3284 = vst.msk [vmem:[#allocation2 + $0x2e0] sm:$0xff] %vm3191_vm3, %v3027_v62  ;;  %v3028_v38 = vmax.f32 %v2772_v28, 0.0  ;;  %v14355_v42 = vpop.f32.mrb[64].mxu1  ;;  %v3538_v4 = vld [vmem:[#allocation2 + $0x2d0] ss:$2 sm:$0xff] }
 0x15e   :  { %15168 = vrot.lane.b32.xlu0 %v15167_v34, %s16446_s19  ;;  %v4443_v44 = vsel %vm4410_vm4, %v4441_v32, %v4442_v12  ;;  %3287 = vst.msk [vmem:[#allocation2 + $0x2f8] sm:$0xff] %vm3191_vm3, %v3030_v15  ;;  %v2515_v40 = vmul.f32 %v17235_v21, %v14355_v42  ;;  %v1770_v48 = vpop.f32.mrb[65].mxu1  ;;  %v17613_v51 = vsel %vm4217_vm5, %v4248_v54, %v4249_v19  ;;  %v17619_v21 = vld [vmem:[%s21647_s2] ss:$0 sm:$0xff]  ;;  %v3794_v5 = vld [vmem:[#allocation2 + $0x2d1] ss:$2 sm:$0xff] }
 0x15f   :  { %v15172_v50 = vpack.i.bf16 %v4549_v31, %v4443_v44  ;;  %3285 = vst.msk [vmem:[#allocation2 + $0x2e8] sm:$0xff] %vm3191_vm3, %v3028_v38  ;;  %v2513_v57 = vmul.f32 %v17619_v21, %v1770_v48  ;;  %v14356_v37 = vpop.f32.mrb[66].mxu1  ;;  %v3536_v10 = vld [vmem:[#allocation2 + $0x2c0] ss:$2 sm:$0xff]  ;;  %v3792_v46 = vld [vmem:[#allocation2 + $0x2c1] ss:$2 sm:$0xff] }
 0x160   :  { %v2777_v6 = vadd.f32 %v17590_v26, %v2515_v40  ;;  %v2516_v59 = vmul.f32 %v17619_v21, %v14356_v37  ;;  %v1773_v14 = vpop.f32.mrb[67].mxu1  ;;  %v15536_v28 = vld [vmem:[%s21645_s0 + $0x348] sm:$0xff]   ;;  %v15537_v38 = vld [vmem:[%s21645_s0 + $0x350] sm:$0xff]   ;;  %v4003_v37 = vmax.f32 %v3536_v10, %v3792_v46 }
 0x161   :  { %v2775_v63 = vadd.f32 %v17590_v26, %v2513_v57  ;;  %v2514_v0 = vmul.f32 %v17619_v21, %v1773_v14 }
 0x162   :  { %15173 = vrot.lane.b32.xlu0 %v15172_v50, %s16447_s15  ;;  %v3033_v7 = vmax.f32 %v2777_v6, 0.0  ;;  %v2778_v8 = vadd.f32 %v17590_v26, %v2516_v59  ;;  %14462 = vmatmul.mubr.msk.bf16.gmra.mrb[172].mxu1 %vm960_vm2, %v15534_v33  ;;  %v4004_v50 = vmax.f32 %v3538_v4, %v3794_v5 }
 0x163   :  { %v3031_v12 = vmax.f32 %v2775_v63, 0.0  ;;  %v2776_v19 = vadd.f32 %v17590_v26, %v2514_v0  ;;  %14465 = vmatprep.mubr.msk.bf16.mxu1 %vm960_vm2, %v15535_v55 }
 0x164   :  { %3290 = vst.msk [vmem:[#allocation2 + $0x310] sm:$0xff] %vm3191_vm3, %v3033_v7  ;;  %v3034_v62 = vmax.f32 %v2778_v8, 0.0 }
 0x165   :  { %3288 = vst.msk [vmem:[#allocation2 + $0x300] sm:$0xff] %vm3191_vm3, %v3031_v12  ;;  %v3032_v34 = vmax.f32 %v2776_v19, 0.0  ;;  %v14359_v32 = vpop.f32.mrb[68].mxu1  ;;  %v3542_v15 = vld [vmem:[#allocation2 + $0x2f0] ss:$2 sm:$0xff] }
 0x166   :  { %v3798_v31 = vld [vmem:[#allocation2 + $0x2f1] ss:$2 sm:$0xff]  ;;  %3291 = vst.msk [vmem:[#allocation2 + $0x318] sm:$0xff] %vm3191_vm3, %v3034_v62  ;;  %v2519_v42 = vmul.f32 %v17619_v21, %v14359_v32  ;;  %v1786_v44 = vpop.f32.mrb[69].mxu1  ;;  %v3540_v40 = vld [vmem:[#allocation2 + $0x2e0] ss:$2 sm:$0xff] }
 0x167   :  { %v3796_v48 = vld [vmem:[#allocation2 + $0x2e1] ss:$2 sm:$0xff]  ;;  %v4006_v33 = vmax.f32 %v3542_v15, %v3798_v31  ;;  %3289 = vst.msk [vmem:[#allocation2 + $0x308] sm:$0xff] %vm3191_vm3, %v3032_v34  ;;  %v2517_v55 = vmul.f32 %v17619_v21, %v1786_v44  ;;  %v14360_v57 = vpop.f32.mrb[70].mxu1 }
 0x168   :  { %v4005_v6 = vmax.f32 %v3540_v40, %v3796_v48  ;;  %v2781_v59 = vadd.f32 %v17590_v26, %v2519_v42  ;;  %v2520_v14 = vmul.f32 %v17619_v21, %v14360_v57  ;;  %v1789_v63 = vpop.f32.mrb[71].mxu1 }
 0x169   :  { %v4110_v0 = vmax.f32 %v4004_v50, %v4006_v33  ;;  %v2779_v7 = vadd.f32 %v17590_v26, %v2517_v55  ;;  %v2518_v8 = vmul.f32 %v17619_v21, %v1789_v63  ;;  %v15538_v33 = vld [vmem:[%s21645_s0 + $0x358] sm:$0xff]   ;;  %v15539_v55 = vld [vmem:[%s21645_s0 + $0x360] sm:$0xff]  }
 0x16a   :  { %v17647_v12 = vmax.f32 %v4003_v37, %v4005_v6  ;;  %v3037_v4 = vmax.f32 %v2781_v59, 0.0  ;;  %v2782_v5 = vadd.f32 %v17590_v26, %v2520_v14  ;;  %14466 = vmatmul.mubr.msk.bf16.gmra.mrb[176].mxu1 %vm960_vm2, %v15536_v28 }
 0x16b   :  { %v4445_v19 = vrot.slane %v4110_v0, 1  ;;  %v4252_v10 = vrot.slane %v4110_v0, 7  ;;  %v3035_v46 = vmax.f32 %v2779_v7, 0.0  ;;  %v2780_v62 = vadd.f32 %v17590_v26, %v2518_v8  ;;  %14469 = vmatprep.mubr.msk.bf16.mxu1 %vm960_vm2, %v15537_v38 }
 0x16c   :  { %v15177_v34 = vpack.i.bf16 %v4110_v0, %v17647_v12  ;;  %v4444_v32 = vrot.slane %v17647_v12, 1  ;;  %3294 = vst.msk [vmem:[#allocation2 + $0x330] sm:$0xff] %vm3191_vm3, %v3037_v4  ;;  %v3038_v15 = vmax.f32 %v2782_v5, 0.0  ;;  %v4251_v42 = vrot.slane %v17647_v12, 7 }
 0x16d   :  { %v4550_v31 = vsel %vm4410_vm4, %v4445_v19, 0.0  ;;  %3292 = vst.msk [vmem:[#allocation2 + $0x320] sm:$0xff] %vm3191_vm3, %v3035_v46  ;;  %v3036_v28 = vmax.f32 %v2780_v62, 0.0  ;;  %v14363_v44 = vpop.f32.mrb[72].mxu1  ;;  %v3546_v8 = vld [vmem:[#allocation2 + $0x310] ss:$2 sm:$0xff] }
 0x16e   :  { %15178 = vrot.lane.b32.xlu1 %v15177_v34, %s16446_s19  ;;  %v4446_v40 = vsel %vm4410_vm4, %v4444_v32, %v4445_v19  ;;  %3295 = vst.msk [vmem:[#allocation2 + $0x338] sm:$0xff] %vm3191_vm3, %v3038_v15  ;;  %v2523_v38 = vmul.f32 %v17619_v21, %v14363_v44  ;;  %v1802_v48 = vpop.f32.mrb[73].mxu1  ;;  %v17672_v57 = vsel %vm4217_vm5, %v4251_v42, %v4252_v10  ;;  %v3802_v4 = vld [vmem:[#allocation2 + $0x311] ss:$2 sm:$0xff]  ;;  %v3544_v10 = vld [vmem:[#allocation2 + $0x300] ss:$2 sm:$0xff] }
 0x16f   :  { %v15182_v50 = vpack.i.bf16 %v4550_v31, %v4446_v40  ;;  %3293 = vst.msk [vmem:[#allocation2 + $0x328] sm:$0xff] %vm3191_vm3, %v3036_v28  ;;  %v2521_v37 = vmul.f32 %v17619_v21, %v1802_v48  ;;  %v14364_v6 = vpop.f32.mrb[74].mxu1  ;;  %v3800_v46 = vld [vmem:[#allocation2 + $0x301] ss:$2 sm:$0xff] }
 0x170   :  { %v2785_v59 = vadd.f32 %v17590_v26, %v2523_v38  ;;  %v2524_v14 = vmul.f32 %v17619_v21, %v14364_v6  ;;  %v1805_v63 = vpop.f32.mrb[75].mxu1  ;;  %v15540_v15 = vld [vmem:[%s21645_s0 + $0x368] sm:$0xff]   ;;  %v15541_v38 = vld [vmem:[%s21645_s0 + $0x370] sm:$0xff]  }
 0x171   :  { %v2783_v0 = vadd.f32 %v17590_v26, %v2521_v37  ;;  %v2522_v7 = vmul.f32 %v17619_v21, %v1805_v63  ;;  %v4008_v37 = vmax.f32 %v3546_v8, %v3802_v4  ;;  %v4007_v63 = vmax.f32 %v3544_v10, %v3800_v46 }
 0x172   :  { %15183 = vrot.lane.b32.xlu1 %v15182_v50, %s16447_s15  ;;  %v3041_v5 = vmax.f32 %v2785_v59, 0.0  ;;  %v2786_v19 = vadd.f32 %v17590_v26, %v2524_v14  ;;  %14470 = vmatmul.mubr.msk.bf16.gmra.mrb[180].mxu1 %vm960_vm2, %v15538_v33 }
 0x173   :  { %v3039_v62 = vmax.f32 %v2783_v0, 0.0  ;;  %v2784_v34 = vadd.f32 %v17590_v26, %v2522_v7  ;;  %14473 = vmatprep.mubr.msk.bf16.mxu1 %vm960_vm2, %v15539_v55 }
 0x174   :  { %3298 = vst.msk [vmem:[#allocation2 + $0x350] sm:$0xff] %vm3191_vm3, %v3041_v5  ;;  %v3042_v32 = vmax.f32 %v2786_v19, 0.0 }
 0x175   :  { %3296 = vst.msk [vmem:[#allocation2 + $0x340] sm:$0xff] %vm3191_vm3, %v3039_v62  ;;  %v3040_v31 = vmax.f32 %v2784_v34, 0.0  ;;  %v14367_v28 = vpop.f32.mrb[76].mxu1  ;;  %v3550_v44 = vld [vmem:[#allocation2 + $0x330] ss:$2 sm:$0xff] }
 0x176   :  { %v3806_v40 = vld [vmem:[#allocation2 + $0x331] ss:$2 sm:$0xff]  ;;  %3299 = vst.msk [vmem:[#allocation2 + $0x358] sm:$0xff] %vm3191_vm3, %v3042_v32  ;;  %v2527_v48 = vmul.f32 %v17619_v21, %v14367_v28  ;;  %v1818_v50 = vpop.f32.mrb[77].mxu1  ;;  %v3548_v33 = vld [vmem:[#allocation2 + $0x320] ss:$2 sm:$0xff] }
 0x177   :  { %v3804_v55 = vld [vmem:[#allocation2 + $0x321] ss:$2 sm:$0xff]  ;;  %v4010_v6 = vmax.f32 %v3550_v44, %v3806_v40  ;;  %3297 = vst.msk [vmem:[#allocation2 + $0x348] sm:$0xff] %vm3191_vm3, %v3040_v31  ;;  %v2525_v59 = vmul.f32 %v17619_v21, %v1818_v50  ;;  %v14368_v14 = vpop.f32.mrb[78].mxu1 }
 0x178   :  { %v4009_v0 = vmax.f32 %v3548_v33, %v3804_v55  ;;  %v2789_v7 = vadd.f32 %v17590_v26, %v2527_v48  ;;  %v2528_v5 = vmul.f32 %v17619_v21, %v14368_v14  ;;  %v1821_v19 = vpop.f32.mrb[79].mxu1  ;;  %v15544_v14 = vld [vmem:[%s21645_s0 + $0x380] sm:$0xff]  }
 0x179   :  { %v4112_v62 = vmax.f32 %v4008_v37, %v4010_v6  ;;  %v2787_v34 = vadd.f32 %v17590_v26, %v2525_v59  ;;  %v2526_v32 = vmul.f32 %v17619_v21, %v1821_v19  ;;  %v15542_v59 = vld [vmem:[%s21645_s0 + $0x378] sm:$0xff]  }
 0x17a   :  { %v17701_v28 = vmax.f32 %v4007_v63, %v4009_v0  ;;  %v3045_v8 = vmax.f32 %v2789_v7, 0.0  ;;  %v2790_v4 = vadd.f32 %v17590_v26, %v2528_v5  ;;  %14474 = vmatmul.mubr.msk.bf16.gmra.mrb[184].mxu1 %vm960_vm2, %v15540_v15 }
 0x17b   :  { %v4448_v31 = vrot.slane %v4112_v62, 1  ;;  %v3043_v10 = vmax.f32 %v2787_v34, 0.0  ;;  %v2788_v46 = vadd.f32 %v17590_v26, %v2526_v32  ;;  %14477 = vmatprep.mubr.msk.bf16.mxu1 %vm960_vm2, %v15541_v38  ;;  %v4255_v5 = vrot.slane %v4112_v62, 7 }
 0x17c   :  { %v15187_v44 = vpack.i.bf16 %v4112_v62, %v17701_v28  ;;  %v4447_v40 = vrot.slane %v17701_v28, 1  ;;  %3302 = vst.msk [vmem:[#allocation2 + $0x370] sm:$0xff] %vm3191_vm3, %v3045_v8  ;;  %v3046_v48 = vmax.f32 %v2790_v4, 0.0  ;;  %v4254_v63 = vrot.slane %v17701_v28, 7 }
 0x17d   :  { %v4551_v50 = vsel %vm4410_vm4, %v4448_v31, 0.0  ;;  %3300 = vst.msk [vmem:[#allocation2 + $0x360] sm:$0xff] %vm3191_vm3, %v3043_v10  ;;  %v3044_v33 = vmax.f32 %v2788_v46, 0.0  ;;  %v14371_v55 = vpop.f32.mrb[80].mxu1  ;;  %v3810_v10 = vld [vmem:[#allocation2 + $0x351] ss:$2 sm:$0xff] }
 0x17e   :  { %15188 = vrot.lane.b32.xlu0 %v15187_v44, %s16446_s19  ;;  %v4449_v15 = vsel %vm4410_vm4, %v4447_v40, %v4448_v31  ;;  %3303 = vst.msk [vmem:[#allocation2 + $0x378] sm:$0xff] %vm3191_vm3, %v3046_v48  ;;  %v2531_v37 = vmul.f32 %v17619_v21, %v14371_v55  ;;  %v1834_v38 = vpop.f32.mrb[81].mxu1  ;;  %v3554_v31 = vld [vmem:[#allocation2 + $0x350] ss:$2 sm:$0xff]  ;;  %v17733_v46 = vsel %vm4217_vm5, %v4254_v63, %v4255_v5  ;;  %v3808_v55 = vld [vmem:[#allocation2 + $0x341] ss:$2 sm:$0xff] }
 0x17f   :  { %v15192_v6 = vpack.i.bf16 %v4551_v50, %v4449_v15  ;;  %3301 = vst.msk [vmem:[#allocation2 + $0x368] sm:$0xff] %vm3191_vm3, %v3044_v33  ;;  %v2529_v0 = vmul.f32 %v17619_v21, %v1834_v38  ;;  %v14372_v7 = vpop.f32.mrb[82].mxu1  ;;  %v4378_v50 = vsel %vm4217_vm5, 0.0, %v4218_v58  ;;  %v3552_v33 = vld [vmem:[#allocation2 + $0x340] ss:$2 sm:$0xff]  ;;  %v17749_v38 = vsel %vm4217_vm5, 0.0, %v4221_v39 }
 0x180   :  { %v2793_v19 = vadd.f32 %v17590_v26, %v2531_v37  ;;  %v2532_v34 = vmul.f32 %v17619_v21, %v14372_v7  ;;  %v1837_v32 = vpop.f32.mrb[83].mxu1  ;;  %v15545_v37 = vld [vmem:[%s21645_s0 + $0x388] sm:$0xff]   ;;  %v15069_v7 = vpop.permute.xlu0 %15068  ;;  %v4012_v9 = vmax.f32 %v3554_v31, %v3810_v10 }
 0x181   :  { %v2791_v8 = vadd.f32 %v17590_v26, %v2529_v0  ;;  %v2530_v4 = vmul.f32 %v17619_v21, %v1837_v32  ;;  %v15546_v0 = vld [vmem:[%s21645_s0 + $0x390] sm:$0xff]  }
 0x182   :  { %15193 = vrot.lane.b32.xlu0 %v15192_v6, %s16447_s15  ;;  %v3049_v44 = vmax.f32 %v2793_v19, 0.0  ;;  %v2794_v62 = vadd.f32 %v17590_v26, %v2532_v34  ;;  %14478 = vmatmul.mubr.msk.bf16.gmra.mrb[188].mxu1 %vm960_vm2, %v15542_v59 }
 0x183   :  { %v3047_v40 = vmax.f32 %v2791_v8, 0.0  ;;  %v2792_v48 = vadd.f32 %v17590_v26, %v2530_v4  ;;  %14481 = vmatprep.mubr.msk.bf16.mxu1 %vm960_vm2, %v15544_v14  ;;  %v15071_v8 = vunpack.i.h.bf16 %v15069_v7  ;;  %v15070_v4 = vunpack.i.l.bf16 %v15069_v7 }
 0x184   :  { %3306 = vst.msk [vmem:[#allocation2 + $0x390] sm:$0xff] %vm3191_vm3, %v3049_v44  ;;  %v3050_v15 = vmax.f32 %v2794_v62, 0.0 }
 0x185   :  { %3304 = vst.msk [vmem:[#allocation2 + $0x380] sm:$0xff] %vm3191_vm3, %v3047_v40  ;;  %v3048_v58 = vmax.f32 %v2792_v48, 0.0  ;;  %v14375_v6 = vpop.f32.mrb[84].mxu1  ;;  %v3558_v59 = vld [vmem:[#allocation2 + $0x370] ss:$2 sm:$0xff]  ;;  %v4987_v24 = vsel %vm3191_vm3, %v4378_v50, %v15070_v4 }
 0x186   :  { %v3814_v14 = vld [vmem:[#allocation2 + $0x371] ss:$2 sm:$0xff]  ;;  %3307 = vst.msk [vmem:[#allocation2 + $0x398] sm:$0xff] %vm3191_vm3, %v3050_v15  ;;  %v2535_v29 = vmul.f32 %v17619_v21, %v14375_v6  ;;  %v1850_v39 = vpop.f32.mrb[85].mxu1  ;;  %v3556_v45 = vld [vmem:[#allocation2 + $0x360] ss:$2 sm:$0xff]  ;;  %v4011_v15 = vmax.f32 %v3552_v33, %v3808_v55 }
 0x187   :  { %v3812_v5 = vld [vmem:[#allocation2 + $0x361] ss:$2 sm:$0xff]  ;;  %v4014_v19 = vmax.f32 %v3558_v59, %v3814_v14  ;;  %3305 = vst.msk [vmem:[#allocation2 + $0x388] sm:$0xff] %vm3191_vm3, %v3048_v58  ;;  %v2533_v34 = vmul.f32 %v17619_v21, %v1850_v39  ;;  %v14376_v32 = vpop.f32.mrb[86].mxu1  ;;  %v17773_v58 = vsel %vm4217_vm5, 0.0, %v4230_v17  ;;  %v17778_v59 = vsel %vm4217_vm5, 0.0, %v4236_v41 }
 0x188   :  { %v4013_v44 = vmax.f32 %v3556_v45, %v3812_v5  ;;  %v2797_v62 = vadd.f32 %v17590_v26, %v2535_v29  ;;  %v2536_v40 = vmul.f32 %v17619_v21, %v14376_v32  ;;  %v1853_v48 = vpop.f32.mrb[87].mxu1  ;;  %v4988_v17 = vsel %vm3191_vm3, %v17387_v2, %v15071_v8 }
 0x189   :  { %v17766_v6 = vmax.f32 %v4012_v9, %v4014_v19  ;;  %v2795_v31 = vadd.f32 %v17590_v26, %v2533_v34  ;;  %v2534_v10 = vmul.f32 %v17619_v21, %v1853_v48  ;;  %v15079_v9 = vpop.permute.xlu0 %15078 }
 0x18a   :  { %v3053_v14 = vmax.f32 %v2797_v62, 0.0  ;;  %v2798_v29 = vadd.f32 %v17590_v26, %v2536_v40  ;;  %14482 = vmatmul.mubr.msk.bf16.gmra.mrb[192].mxu1 %vm960_vm2, %v15545_v37  ;;  %v17782_v33 = vmax.f32 %v4011_v15, %v4013_v44  ;;  %v15074_v5 = vpop.permute.xlu1 %15073  ;;  %v15081_v32 = vunpack.i.h.bf16 %v15079_v9  ;;  %v15547_v62 = vld [vmem:[%s21645_s0 + $0x398] sm:$0xff]  }
 0x18b   :  { %v4451_v55 = vrot.slane %v17766_v6, 1  ;;  %v3051_v39 = vmax.f32 %v2795_v31, 0.0  ;;  %v2796_v13 = vadd.f32 %v17590_v26, %v2534_v10  ;;  %14485 = vmatprep.mubr.msk.bf16.mxu1 %vm960_vm2, %v15546_v0  ;;  %v15076_v19 = vunpack.i.h.bf16 %v15074_v5  ;;  %v15548_v10 = vld [vmem:[%s21645_s0 + $0x3a0] sm:$0xff]  }
 0x18c   :  { %3310 = vst.msk [vmem:[#allocation2 + $0x3b0] sm:$0xff] %vm3191_vm3, %v3053_v14  ;;  %v3054_v41 = vmax.f32 %v2798_v29, 0.0  ;;  %v15197_v37 = vpack.i.bf16 %v17766_v6, %v17782_v33  ;;  %v4450_v7 = vrot.slane %v17782_v33, 1  ;;  %v15075_v34 = vunpack.i.l.bf16 %v15074_v5 }
 0x18d   :  { %v4552_v45 = vsel %vm4410_vm4, %v4451_v55, 0.0  ;;  %3308 = vst.msk [vmem:[#allocation2 + $0x3a0] sm:$0xff] %vm3191_vm3, %v3051_v39  ;;  %v3052_v50 = vmax.f32 %v2796_v13, 0.0  ;;  %v14379_v2 = vpop.f32.mrb[88].mxu1  ;;  %v17799_v0 = vsel %vm4217_vm5, 0.0, %v4227_v20  ;;  %v4257_v40 = vrot.slane %v17782_v33, 7 }
 0x18e   :  { %3311 = vst.msk [vmem:[#allocation2 + $0x3b8] sm:$0xff] %vm3191_vm3, %v3054_v41  ;;  %v2539_v8 = vmul.f32 %v17619_v21, %v14379_v2  ;;  %15198 = vrot.lane.b32.xlu1 %v15197_v37, %s16446_s19  ;;  %v1866_v4 = vpop.f32.mrb[89].mxu1  ;;  %v4452_v44 = vsel %vm4410_vm4, %v4450_v7, %v4451_v55  ;;  %v5052_v15 = vsel %vm5051_vm6, %v4987_v24, %v15075_v34  ;;  %v17816_v14 = vld [vmem:[#allocation2 + $0x390] ss:$2 sm:$0xff]  ;;  %v17818_v29 = vld [vmem:[#allocation2 + $0x391] ss:$2 sm:$0xff]  ;;  %v15080_v55 = vunpack.i.l.bf16 %v15079_v9 }
 0x18f   :  { %3309 = vst.msk [vmem:[#allocation2 + $0x3a8] sm:$0xff] %vm3191_vm3, %v3052_v50  ;;  %v2537_v53 = vmul.f32 %v17619_v21, %v1866_v4  ;;  %v14380_v20 = vpop.f32.mrb[90].mxu1  ;;  %v15202_v48 = vpack.i.bf16 %v4552_v45, %v4452_v44  ;;  %v5053_v31 = vsel %vm5051_vm6, %v4988_v17, %v15076_v19  ;;  %v3560_v7 = vld [vmem:[#allocation2 + $0x380] ss:$2 sm:$0xff]  ;;  %v3816_v24 = vld [vmem:[#allocation2 + $0x381] ss:$2 sm:$0xff]  ;;  %v4016_v11 = vmax.f32 %v17816_v14, %v17818_v29 }
 0x190   :  { %v2801_v39 = vadd.f32 %v17590_v26, %v2539_v8  ;;  %v2540_v13 = vmul.f32 %v17619_v21, %v14380_v20  ;;  %v1869_v41 = vpop.f32.mrb[91].mxu1  ;;  %v17822_v37 = vpack.c.bf16 %v5053_v31, %v5052_v15  ;;  %v17829_v5 = vsel %vm4217_vm5, 0.0, %v4233_v47  ;;  %v15549_v31 = vld [vmem:[%s21645_s0 + $0x3a8] sm:$0xff]  }
 0x191   :  { %v2799_v17 = vadd.f32 %v17590_v26, %v2537_v53  ;;  %v2538_v45 = vmul.f32 %v17619_v21, %v1869_v41  ;;  %v4258_v50 = vrot.slane %v17766_v6, 7  ;;  %v17838_v19 = vsel %vm4217_vm5, 0.0, %v4242_v30 }
 0x192   :  { %v3057_v9 = vmax.f32 %v2801_v39, 0.0  ;;  %v2802_v2 = vadd.f32 %v17590_v26, %v2540_v13  ;;  %15203 = vrot.lane.b32.xlu1 %v15202_v48, %s16447_s15  ;;  %14486 = vmatmul.mubr.msk.bf16.gmra.mrb[196].mxu1 %vm960_vm2, %v15547_v62  ;;  %v17845_v47 = vsel %vm4217_vm5, 0.0, %v4239_v60  ;;  %v4989_v43 = vsel %vm3191_vm3, %v17749_v38, %v15080_v55 }
 0x193   :  { %v3055_v34 = vmax.f32 %v2799_v17, 0.0  ;;  %v2800_v52 = vadd.f32 %v17590_v26, %v2538_v45  ;;  %14489 = vmatprep.mubr.msk.bf16.mxu1 %vm960_vm2, %v15548_v10  ;;  %v17850_v6 = vsel %vm4217_vm5, %v4257_v40, %v4258_v50  ;;  %v4990_v30 = vsel %vm3191_vm3, %v17429_v35, %v15081_v32  ;;  %v15550_v45 = vld [vmem:[%s21645_s0 + $0x3b0] sm:$0xff]  }
 0x194   :  { %3314 = vst.msk [vmem:[#allocation2 + $0x3d0] sm:$0xff] %vm3191_vm3, %v3057_v9  ;;  %v3058_v8 = vmax.f32 %v2802_v2, 0.0  ;;  %v15089_v4 = vpop.permute.xlu0 %15088  ;;  %v4015_v38 = vmax.f32 %v3560_v7, %v3816_v24 }
 0x195   :  { %3312 = vst.msk [vmem:[#allocation2 + $0x3c0] sm:$0xff] %vm3191_vm3, %v3055_v34  ;;  %v15091_v60 = vunpack.i.h.bf16 %v15089_v4  ;;  %v15090_v44 = vunpack.i.l.bf16 %v15089_v4  ;;  %v3056_v62 = vmax.f32 %v2800_v52, 0.0  ;;  %v14383_v53 = vpop.f32.mrb[92].mxu1  ;;  %v15084_v20 = vpop.permute.xlu1 %15083  ;;  %v3566_v48 = vld [vmem:[#allocation2 + $0x3b0] ss:$2 sm:$0xff] }
 0x196   :  { %v3822_v15 = vld [vmem:[#allocation2 + $0x3b1] ss:$2 sm:$0xff]  ;;  %3315 = vst.msk [vmem:[#allocation2 + $0x3d8] sm:$0xff] %vm3191_vm3, %v3058_v8  ;;  %v2543_v35 = vmul.f32 %v17619_v21, %v14383_v53  ;;  %v1882_v32 = vpop.f32.mrb[93].mxu1  ;;  %v15086_v10 = vunpack.i.h.bf16 %v15084_v20  ;;  %v15085_v14 = vunpack.i.l.bf16 %v15084_v20  ;;  %v3564_v29 = vld [vmem:[#allocation2 + $0x3a0] ss:$2 sm:$0xff] }
 0x197   :  { %v3820_v55 = vld [vmem:[#allocation2 + $0x3a1] ss:$2 sm:$0xff]  ;;  %v4018_v39 = vmax.f32 %v3566_v48, %v3822_v15  ;;  %v4991_v13 = vsel %vm3191_vm3, %v17754_v61, %v15090_v44  ;;  %v4992_v41 = vsel %vm3191_vm3, %v17458_v18, %v15091_v60  ;;  %3313 = vst.msk [vmem:[#allocation2 + $0x3c8] sm:$0xff] %vm3191_vm3, %v3056_v62  ;;  %v2541_v7 = vmul.f32 %v17619_v21, %v1882_v32  ;;  %v14384_v24 = vpop.f32.mrb[94].mxu1 }
 0x198   :  { %v4017_v17 = vmax.f32 %v3564_v29, %v3820_v55  ;;  %v2805_v9 = vadd.f32 %v17590_v26, %v2543_v35  ;;  %v2544_v2 = vmul.f32 %v17619_v21, %v14384_v24  ;;  %v1885_v34 = vpop.f32.mrb[95].mxu1  ;;  %v5054_v61 = vsel %vm5051_vm6, %v4989_v43, %v15085_v14  ;;  %v15551_v14 = vld [vmem:[%s21645_s0 + $0x3b8] sm:$0xff]  }
 0x199   :  { %v15094_v50 = vpop.permute.xlu0 %15093  ;;  %v5055_v18 = vsel %vm5051_vm6, %v4990_v30, %v15086_v10  ;;  %v2803_v4 = vadd.f32 %v17590_v26, %v2541_v7  ;;  %v2542_v60 = vmul.f32 %v17619_v21, %v1885_v34 }
 0x19a   :  { %v15096_v52 = vunpack.i.h.bf16 %v15094_v50  ;;  %v15095_v8 = vunpack.i.l.bf16 %v15094_v50  ;;  %v3061_v44 = vmax.f32 %v2805_v9, 0.0  ;;  %v2806_v62 = vadd.f32 %v17590_v26, %v2544_v2  ;;  %14490 = vmatmul.mubr.msk.bf16.gmra.mrb[200].mxu1 %vm960_vm2, %v15549_v31 }
 0x19b   :  { %v17882_v53 = vpack.c.bf16 %v5055_v18, %v5054_v61  ;;  %v17884_v20 = vmax.f32 %v4015_v38, %v4017_v17  ;;  %v3059_v30 = vmax.f32 %v2803_v4, 0.0  ;;  %v2804_v15 = vadd.f32 %v17590_v26, %v2542_v60  ;;  %14493 = vmatprep.mubr.msk.bf16.mxu1 %vm960_vm2, %v15550_v45  ;;  %v15552_v4 = vld [vmem:[%s21645_s0 + $0x3c0] sm:$0xff]  }
 0x19c   :  { %v5056_v48 = vsel %vm5051_vm6, %v4991_v13, %v15095_v8  ;;  %v5057_v43 = vsel %vm5051_vm6, %v4992_v41, %v15096_v52  ;;  %3318 = vst.msk [vmem:[#allocation2 + $0x3f0] sm:$0xff] %vm3191_vm3, %v3061_v44  ;;  %v3062_v32 = vmax.f32 %v2806_v62, 0.0  ;;  %v17893_v31 = vmax.f32 %v4016_v11, %v4018_v39 }
 0x19d   :  { %v17890_v35 = vpack.c.bf16 %v5057_v43, %v5056_v48  ;;  %v15099_v10 = vpop.permute.xlu0 %15098  ;;  %v4453_v38 = vrot.slane %v17884_v20, 1  ;;  %3316 = vst.msk [vmem:[#allocation2 + $0x3e0] sm:$0xff] %vm3191_vm3, %v3059_v30  ;;  %v3060_v13 = vmax.f32 %v2804_v15, 0.0  ;;  %v14387_v41 = vpop.f32.mrb[96].mxu1  ;;  %v17900_v7 = vld [vmem:[#allocation2 + $0x3d0] ss:$2 sm:$0xff] }
 0x19e   :  { %v15101_v29 = vunpack.i.h.bf16 %v15099_v10  ;;  %v15100_v55 = vunpack.i.l.bf16 %v15099_v10  ;;  %v17902_v24 = vld [vmem:[#allocation2 + $0x3d1] ss:$2 sm:$0xff]  ;;  %3319 = vst.msk [vmem:[#allocation2 + $0x3f8] sm:$0xff] %vm3191_vm3, %v3062_v32  ;;  %v2547_v11 = vmul.f32 %v17619_v21, %v14387_v41  ;;  %v15207_v39 = vpack.i.bf16 %v17893_v31, %v17884_v20  ;;  %v1898_v17 = vpop.f32.mrb[97].mxu1  ;;  %v17909_v50 = vld [vmem:[#allocation2 + $0x3c0] ss:$2 sm:$0xff] }
 0x19f   :  { %v4454_v45 = vrot.slane %v17893_v31, 1  ;;  %v17911_v9 = vld [vmem:[#allocation2 + $0x3c1] ss:$2 sm:$0xff]  ;;  %v4020_v2 = vmax.f32 %v17900_v7, %v17902_v24  ;;  %3317 = vst.msk [vmem:[#allocation2 + $0x3e8] sm:$0xff] %vm3191_vm3, %v3060_v13  ;;  %v2545_v18 = vmul.f32 %v17619_v21, %v1898_v17  ;;  %v14388_v52 = vpop.f32.mrb[98].mxu1 }
 0x1a0   :  { %v4996_v34 = vsel %vm3191_vm3, %v17465_v36, %v15101_v29  ;;  %v4995_v61 = vsel %vm3191_vm3, %v17773_v58, %v15100_v55  ;;  %v4019_v60 = vmax.f32 %v17909_v50, %v17911_v9  ;;  %v2809_v62 = vadd.f32 %v17590_v26, %v2547_v11  ;;  %15208 = vrot.lane.b32.xlu0 %v15207_v39, %s16446_s19  ;;  %v1901_v43 = vpop.f32.mrb[99].mxu1  ;;  %v17932_v32 = vld [vmem:[%s21648_s3] ss:$0 sm:$0xff]  ;;  %v15555_v50 = vld [vmem:[%s21645_s0 + $0x3d8] sm:$0xff]  }
 0x1a1   :  { %v15104_v8 = vpop.permute.xlu1 %15103  ;;  %v15119_v44 = vpop.permute.xlu0 %15118  ;;  %v2548_v36 = vmul.f32 %v17619_v21, %v14388_v52  ;;  %v2807_v10 = vadd.f32 %v17932_v32, %v2545_v18  ;;  %v2546_v29 = vmul.f32 %v17619_v21, %v1901_v43  ;;  %v15556_v9 = vld [vmem:[%s21645_s0 + $0x3e0] sm:$0xff]  }
 0x1a2   :  { %v15106_v58 = vunpack.i.h.bf16 %v15104_v8  ;;  %v15105_v48 = vunpack.i.l.bf16 %v15104_v8  ;;  %v15121_v30 = vunpack.i.h.bf16 %v15119_v44  ;;  %v15120_v15 = vunpack.i.l.bf16 %v15119_v44  ;;  %14494 = vmatmul.mubr.msk.bf16.gmra.mrb[204].mxu1 %vm960_vm2, %v15551_v14 }
 0x1a3   :  { %v3065_v55 = vmax.f32 %v2809_v62, 0.0  ;;  %v2810_v26 = vadd.f32 %v17932_v32, %v2548_v36  ;;  %v3063_v17 = vmax.f32 %v2807_v10, 0.0  ;;  %v2808_v18 = vadd.f32 %v17932_v32, %v2546_v29  ;;  %14497 = vmatprep.mubr.msk.bf16.mxu1 %vm960_vm2, %v15552_v4 }
 0x1a4   :  { %v4993_v13 = vsel %vm3191_vm3, %v17799_v0, %v15105_v48  ;;  %v4994_v41 = vsel %vm3191_vm3, %v17489_v22, %v15106_v58  ;;  %v5060_v11 = vsel %vm5051_vm6, %v4995_v61, %v15120_v15  ;;  %v5061_v39 = vsel %vm5051_vm6, %v4996_v34, %v15121_v30  ;;  %v17956_v30 = vld [vmem:[%s21647_s2] ss:$0 sm:$0xff]  ;;  %v15553_v15 = vld [vmem:[%s21645_s0 + $0x3c8] sm:$0xff]  }
 0x1a5   :  { %v15109_v52 = vpop.permute.xlu1 %15108  ;;  %v17946_v21 = vpack.c.bf16 %v5061_v39, %v5060_v11  ;;  %3322 = vst.msk [vmem:[#allocation2 + $0x410] sm:$0xff] %vm3191_vm3, %v3065_v55  ;;  %v3066_v0 = vmax.f32 %v2810_v26, 0.0  ;;  %v15129_v8 = vpop.permute.xlu0 %15128  ;;  %v4455_v22 = vsel %vm4410_vm4, %v4453_v38, %v4454_v45  ;;  %v4553_v14 = vsel %vm4410_vm4, %v4454_v45, 0.0  ;;  %3320 = vst.msk [vmem:[#allocation2 + $0x400] sm:$0xff] %vm3191_vm3, %v3063_v17  ;;  %v3574_v58 = vld [vmem:[#allocation2 + $0x3f0] ss:$2 sm:$0xff] }
 0x1a6   :  { %v15131_v61 = vunpack.i.h.bf16 %v15129_v8  ;;  %v15130_v34 = vunpack.i.l.bf16 %v15129_v8  ;;  %v3064_v44 = vmax.f32 %v2808_v18, 0.0  ;;  %v15212_v62 = vpack.i.bf16 %v4553_v14, %v4455_v22  ;;  %v14391_v36 = vpop.f32.mrb[100].mxu1  ;;  %v3830_v48 = vld [vmem:[#allocation2 + $0x3f1] ss:$2 sm:$0xff]  ;;  %v3572_v10 = vld [vmem:[#allocation2 + $0x3e0] ss:$2 sm:$0xff] }
 0x1a7   :  { %3323 = vst.msk [vmem:[#allocation2 + $0x418] sm:$0xff] %vm3191_vm3, %v3066_v0  ;;  %v15111_v4 = vunpack.i.h.bf16 %v15109_v52  ;;  %v15110_v43 = vunpack.i.l.bf16 %v15109_v52  ;;  %v2551_v38 = vmul.f32 %v17956_v30, %v14391_v36  ;;  %v1914_v45 = vpop.f32.mrb[101].mxu1  ;;  %v3828_v29 = vld [vmem:[#allocation2 + $0x3e1] ss:$2 sm:$0xff]  ;;  %v4022_v55 = vmax.f32 %v3574_v58, %v3830_v48  ;;  %v15554_v0 = vld [vmem:[%s21645_s0 + $0x3d0] sm:$0xff]  }
 0x1a8   :  { %v5000_v26 = vsel %vm3191_vm3, %v17479_v49, %v15131_v61  ;;  %v4999_v11 = vsel %vm3191_vm3, %v17778_v59, %v15130_v34  ;;  %3321 = vst.msk [vmem:[#allocation2 + $0x408] sm:$0xff] %vm3191_vm3, %v3064_v44  ;;  %15213 = vrot.lane.b32.xlu0 %v15212_v62, %s16447_s15  ;;  %v2549_v39 = vmul.f32 %v17956_v30, %v1914_v45  ;;  %v14392_v17 = vpop.f32.mrb[102].mxu1 }
 0x1a9   :  { %v15114_v18 = vpop.permute.xlu1 %15113  ;;  %v4021_v52 = vmax.f32 %v3572_v10, %v3828_v29  ;;  %v15139_v8 = vpop.permute.xlu0 %15138  ;;  %v5058_v22 = vsel %vm5051_vm6, %v4993_v13, %v15110_v43  ;;  %v5059_v49 = vsel %vm5051_vm6, %v4994_v41, %v15111_v4  ;;  %v2813_v59 = vadd.f32 %v17932_v32, %v2551_v38 }
 0x1aa   :  { %v2552_v14 = vmul.f32 %v17956_v30, %v14392_v17  ;;  %v1917_v61 = vpop.f32.mrb[103].mxu1  ;;  %v15141_v34 = vunpack.i.h.bf16 %v15139_v8  ;;  %v15140_v44 = vunpack.i.l.bf16 %v15139_v8  ;;  %v17976_v62 = vpack.c.bf16 %v5059_v49, %v5058_v22  ;;  %14498 = vmatmul.mubr.msk.bf16.gmra.mrb[208].mxu1 %vm960_vm2, %v15553_v15 }
 0x1ab   :  { %v2811_v36 = vadd.f32 %v17932_v32, %v2549_v39  ;;  %v3069_v58 = vmax.f32 %v2813_v59, 0.0  ;;  %v15116_v45 = vunpack.i.h.bf16 %v15114_v18  ;;  %v15115_v10 = vunpack.i.l.bf16 %v15114_v18  ;;  %14501 = vmatprep.mubr.msk.bf16.mxu1 %vm960_vm2, %v15554_v0 }
 0x1ac   :  { %v2814_v48 = vadd.f32 %v17932_v32, %v2552_v14  ;;  %v5064_v13 = vsel %vm5051_vm6, %v4999_v11, %v15140_v44  ;;  %v5065_v41 = vsel %vm5051_vm6, %v5000_v26, %v15141_v34  ;;  %v2550_v43 = vmul.f32 %v17956_v30, %v1917_v61 }
 0x1ad   :  { %v3067_v4 = vmax.f32 %v2811_v36, 0.0  ;;  %v15124_v38 = vpop.permute.xlu1 %15123  ;;  %v17985_v29 = vpack.c.bf16 %v5065_v41, %v5064_v13  ;;  %3326 = vst.msk [vmem:[#allocation2 + $0x430] sm:$0xff] %vm3191_vm3, %v3069_v58  ;;  %v4998_v17 = vsel %vm3191_vm3, %v17512_v56, %v15116_v45  ;;  %v4997_v15 = vsel %vm3191_vm3, %v17829_v5, %v15115_v10  ;;  %v14395_v8 = vpop.f32.mrb[104].mxu1 }
 0x1ae   :  { %v3070_v39 = vmax.f32 %v2814_v48, 0.0  ;;  %v2812_v26 = vadd.f32 %v17932_v32, %v2550_v43  ;;  %v15126_v11 = vunpack.i.h.bf16 %v15124_v38  ;;  %v15125_v18 = vunpack.i.l.bf16 %v15124_v38  ;;  %v17999_v22 = vld [vmem:[#allocation2 + $0x410] ss:$2 sm:$0xff]  ;;  %v18001_v49 = vld [vmem:[#allocation2 + $0x411] ss:$2 sm:$0xff]  ;;  %v1930_v59 = vpop.f32.mrb[105].mxu1 }
 0x1af   :  { %3324 = vst.msk [vmem:[#allocation2 + $0x420] sm:$0xff] %vm3191_vm3, %v3067_v4  ;;  %v17997_v0 = vmax.f32 %v4019_v60, %v4021_v52  ;;  %v2555_v56 = vmul.f32 %v17956_v30, %v14395_v8  ;;  %v18008_v5 = vmax.f32 %v4020_v2, %v4022_v55  ;;  %v4024_v60 = vmax.f32 %v17999_v22, %v18001_v49  ;;  %v14396_v2 = vpop.f32.mrb[106].mxu1  ;;  %v18030_v43 = vld [vmem:[#allocation2 + $0x400] ss:$2 sm:$0xff]  ;;  %v18032_v38 = vld [vmem:[#allocation2 + $0x401] ss:$2 sm:$0xff] }
 0x1b0   :  { %3327 = vst.msk [vmem:[#allocation2 + $0x438] sm:$0xff] %vm3191_vm3, %v3070_v39  ;;  %v4260_v52 = vrot.slane %v17884_v20, 7  ;;  %v3068_v14 = vmax.f32 %v2812_v26, 0.0  ;;  %v5062_v61 = vsel %vm5051_vm6, %v4997_v15, %v15125_v18  ;;  %v5063_v7 = vsel %vm5051_vm6, %v4998_v17, %v15126_v11  ;;  %v1933_v45 = vpop.f32.mrb[107].mxu1 }
 0x1b1   :  { %v2553_v24 = vmul.f32 %v17956_v30, %v1930_v59  ;;  %v15149_v55 = vpop.permute.xlu0 %15148  ;;  %v18022_v34 = vpack.c.bf16 %v5063_v7, %v5062_v61  ;;  %v2817_v44 = vadd.f32 %v17932_v32, %v2555_v56  ;;  %v15217_v36 = vpack.i.bf16 %v18008_v5, %v17997_v0  ;;  %v15134_v48 = vpop.permute.xlu1 %15133 }
 0x1b2   :  { %v2556_v58 = vmul.f32 %v17956_v30, %v14396_v2  ;;  %3325 = vst.msk [vmem:[#allocation2 + $0x428] sm:$0xff] %vm3191_vm3, %v3068_v14  ;;  %v15151_v13 = vunpack.i.h.bf16 %v15149_v55  ;;  %v15150_v41 = vunpack.i.l.bf16 %v15149_v55  ;;  %v15136_v4 = vunpack.i.h.bf16 %v15134_v48  ;;  %14502 = vmatmul.mubr.msk.bf16.gmra.mrb[212].mxu1 %vm960_vm2, %v15555_v50 }
 0x1b3   :  { %v2815_v10 = vadd.f32 %v17932_v32, %v2553_v24  ;;  %v3073_v39 = vmax.f32 %v2817_v44, 0.0  ;;  %15218 = vrot.lane.b32.xlu1 %v15217_v36, %s16446_s19  ;;  %v15135_v15 = vunpack.i.l.bf16 %v15134_v48  ;;  %v2554_v26 = vmul.f32 %v17956_v30, %v1933_v45  ;;  %14505 = vmatprep.mubr.msk.bf16.mxu1 %vm960_vm2, %v15556_v9 }
 0x1b4   :  { %v2818_v17 = vadd.f32 %v17932_v32, %v2556_v58  ;;  %v5004_v18 = vsel %vm3191_vm3, %v17538_v3, %v15151_v13  ;;  %v5003_v8 = vsel %vm3191_vm3, %v17838_v19, %v15150_v41  ;;  %v5002_v56 = vsel %vm3191_vm3, %v17556_v1, %v15136_v4 }
 0x1b5   :  { %v3071_v11 = vmax.f32 %v2815_v10, 0.0  ;;  %v15154_v59 = vpop.permute.xlu0 %15153  ;;  %3330 = vst.msk [vmem:[#allocation2 + $0x450] sm:$0xff] %vm3191_vm3, %v3073_v39  ;;  %v5001_v61 = vsel %vm3191_vm3, %v17845_v47, %v15135_v15  ;;  %v2816_v50 = vadd.f32 %v17932_v32, %v2554_v26  ;;  %v4456_v7 = vrot.slane %v17997_v0, 1  ;;  %v15144_v3 = vpop.permute.xlu1 %15143 }
 0x1b6   :  { %v3074_v14 = vmax.f32 %v2818_v17, 0.0 }
 0x1b7   :  { %19 = vsyncpa [#allocation6], 0  ;;  %3328 = vst.msk [vmem:[#allocation2 + $0x440] sm:$0xff] %vm3191_vm3, %v3071_v11  ;;  %v4457_v19 = vrot.slane %v18008_v5, 1  ;;  %v15156_v1 = vunpack.i.h.bf16 %v15154_v59  ;;  %v15155_v24 = vunpack.i.l.bf16 %v15154_v59  ;;  %v15146_v2 = vunpack.i.h.bf16 %v15144_v3  ;;  %v14399_v9 = vpop.f32.mrb[108].mxu1  ;;  %v15557_v58 = vld [vmem:[%s21645_s0 + $0x3e8] sm:$0xff]  }
 0x1b8   :  { %3331 = vst.msk [vmem:[#allocation2 + $0x458] sm:$0xff] %vm3191_vm3, %v3074_v14  ;;  %v3072_v55 = vmax.f32 %v2816_v50, 0.0  ;;  %v15145_v44 = vunpack.i.l.bf16 %v15144_v3  ;;  %v2559_v47 = vmul.f32 %v17956_v30, %v14399_v9  ;;  %v1946_v36 = vpop.f32.mrb[109].mxu1  ;;  %v4023_v48 = vmax.f32 %v18030_v43, %v18032_v38  ;;  %v15559_v45 = vld [vmem:[%s21645_s0 + $0x3f0] sm:$0xff]  }
 0x1b9   :  { %v4458_v10 = vsel %vm4410_vm4, %v4456_v7, %v4457_v19  ;;  %v4554_v13 = vsel %vm4410_vm4, %v4457_v19, 0.0  ;;  %v5068_v41 = vsel %vm5051_vm6, %v5003_v8, %v15155_v24  ;;  %v5069_v4 = vsel %vm5051_vm6, %v5004_v18, %v15156_v1  ;;  %v14400_v39 = vpop.f32.mrb[110].mxu1  ;;  %v3582_v17 = vld [vmem:[#allocation2 + $0x430] ss:$2 sm:$0xff]  ;;  %v3838_v15 = vld [vmem:[#allocation2 + $0x431] ss:$2 sm:$0xff] }
 0x1ba   :  { %3329 = vst.msk [vmem:[#allocation2 + $0x448] sm:$0xff] %vm3191_vm3, %v3072_v55  ;;  %v15222_v26 = vpack.i.bf16 %v4554_v13, %v4458_v10  ;;  %v18067_v11 = vpack.c.bf16 %v5069_v4, %v5068_v41  ;;  %v5066_v43 = vsel %vm5051_vm6, %v5001_v61, %v15145_v44  ;;  %v5067_v38 = vsel %vm5051_vm6, %v5002_v56, %v15146_v2  ;;  %v1949_v59 = vpop.f32.mrb[111].mxu1  ;;  %v3580_v14 = vld [vmem:[#allocation2 + $0x420] ss:$2 sm:$0xff]  ;;  %v3836_v50 = vld [vmem:[#allocation2 + $0x421] ss:$2 sm:$0xff] }
 0x1bb   :  { %v18071_v7 = vpack.c.bf16 %v5067_v38, %v5066_v43  ;;  %v2821_v8 = vadd.f32 %v17932_v32, %v2559_v47  ;;  %v2557_v18 = vmul.f32 %v17956_v30, %v1946_v36  ;;  %v2560_v3 = vmul.f32 %v17956_v30, %v14400_v39  ;;  %14506 = vmatmul.mubr.msk.bf16.gmra.mrb[216].mxu1 %vm960_vm2, %v15557_v58  ;;  %v15560_v41 = vld [vmem:[%s21645_s0 + $0x3f8] sm:$0xff]  }
 0x1bc   :  { %15223 = vrot.lane.b32.xlu1 %v15222_v26, %s16447_s15  ;;  %v2558_v19 = vmul.f32 %v17956_v30, %v1949_v59  ;;  %v4025_v61 = vmax.f32 %v3580_v14, %v3836_v50  ;;  %v4026_v1 = vmax.f32 %v3582_v17, %v3838_v15  ;;  %v4261_v56 = vrot.slane %v17893_v31, 7  ;;  %14509 = vmatprep.mubr.msk.bf16.mxu1 %vm960_vm2, %v15559_v45 }
 0x1bd   :  { %v3077_v24 = vmax.f32 %v2821_v8, 0.0  ;;  %v2819_v2 = vadd.f32 %v17932_v32, %v2557_v18  ;;  %v2822_v9 = vadd.f32 %v17932_v32, %v2560_v3  ;;  %v14403_v10 = vpop.f32.mrb[112].mxu1  ;;  %vm5210_vm7 = vcmask 785408  }
 0x1be   :  { %v2820_v55 = vadd.f32 %v17932_v32, %v2558_v19  ;;  %v18084_v44 = vmax.f32 %v4023_v48, %v4025_v61  ;;  %v18089_v47 = vmax.f32 %v4024_v60, %v4026_v1  ;;  %v18094_v31 = vsel %vm4217_vm5, %v4260_v52, %v4261_v56  ;;  %v1962_v60 = vpop.f32.mrb[113].mxu1 }
 0x1bf   :  { %3334 = vst.msk [vmem:[#allocation2 + $0x470] sm:$0xff] %vm3191_vm3, %v3077_v24  ;;  %v3075_v36 = vmax.f32 %v2819_v2, 0.0  ;;  %v3078_v58 = vmax.f32 %v2822_v9, 0.0  ;;  %v4387_v48 = vsel %vm4217_vm5, 0.0, %v4245_v16  ;;  %v2563_v22 = vmul.f32 %v17956_v30, %v14403_v10  ;;  %v14404_v16 = vpop.f32.mrb[114].mxu1 }
 0x1c0   :  { %v3076_v45 = vmax.f32 %v2820_v55, 0.0  ;;  %v15227_v49 = vpack.i.bf16 %v18089_v47, %v18084_v44  ;;  %v4459_v13 = vrot.slane %v18084_v44, 1  ;;  %v2561_v23 = vmul.f32 %v17956_v30, %v1962_v60  ;;  %v15159_v4 = vpop.permute.xlu1 %15158  ;;  %v3586_v17 = vld [vmem:[#allocation2 + $0x450] ss:$2 sm:$0xff]  ;;  %v3842_v15 = vld [vmem:[#allocation2 + $0x451] ss:$2 sm:$0xff] }
 0x1c1   :  { %3332 = vst.msk [vmem:[#allocation2 + $0x460] sm:$0xff] %vm3191_vm3, %v3075_v36  ;;  %3335 = vst.msk [vmem:[#allocation2 + $0x478] sm:$0xff] %vm3191_vm3, %v3078_v58  ;;  %v4460_v39 = vrot.slane %v18089_v47, 1  ;;  %v2825_v26 = vadd.f32 %v17932_v32, %v2563_v22  ;;  %v2564_v43 = vmul.f32 %v17956_v30, %v14404_v16  ;;  %v15161_v38 = vunpack.i.h.bf16 %v15159_v4  ;;  %v1965_v14 = vpop.f32.mrb[115].mxu1  ;;  %v3584_v22 = vld [vmem:[#allocation2 + $0x440] ss:$2 sm:$0xff] }
 0x1c2   :  { %3333 = vst.msk [vmem:[#allocation2 + $0x468] sm:$0xff] %vm3191_vm3, %v3076_v45  ;;  %15228 = vrot.lane.b32.xlu0 %v15227_v49, %s16446_s19  ;;  %v15160_v59 = vunpack.i.l.bf16 %v15159_v4  ;;  %v2823_v50 = vadd.f32 %v17932_v32, %v2561_v23  ;;  %v2562_v8 = vmul.f32 %v17956_v30, %v1965_v14  ;;  %v4028_v1 = vmax.f32 %v3586_v17, %v3842_v15 }
 0x1c3   :  { %v4461_v18 = vsel %vm4410_vm4, %v4459_v13, %v4460_v39  ;;  %v4555_v3 = vsel %vm4410_vm4, %v4460_v39, 0.0  ;;  %v3081_v19 = vmax.f32 %v2825_v26, 0.0  ;;  %v2826_v61 = vadd.f32 %v17932_v32, %v2564_v43  ;;  %14510 = vmatmul.mubr.msk.bf16.gmra.mrb[220].mxu1 %vm960_vm2, %v15560_v41  ;;  %v3840_v41 = vld [vmem:[#allocation2 + $0x441] ss:$2 sm:$0xff] }
 0x1c4   :  { %v4263_v56 = vrot.slane %v17997_v0, 7  ;;  %v3079_v24 = vmax.f32 %v2823_v50, 0.0  ;;  %v5006_v2 = vsel %vm3191_vm3, %v17563_v27, %v15161_v38  ;;  %v2824_v9 = vadd.f32 %v17932_v32, %v2562_v8  ;;  %v15164_v36 = vpop.permute.xlu1 %15163  ;;  %14525 = vmatprep.mubr.msk.bf16.mxu1 %vm5210_vm7, %v17822_v37 }
 0x1c5   :  { %v15232_v55 = vpack.i.bf16 %v4555_v3, %v4461_v18  ;;  %3338 = vst.msk [vmem:[#allocation2 + $0x490] sm:$0xff] %vm3191_vm3, %v3081_v19  ;;  %v3082_v58 = vmax.f32 %v2826_v61, 0.0  ;;  %v15166_v10 = vunpack.i.h.bf16 %v15164_v36  ;;  %v15165_v45 = vunpack.i.l.bf16 %v15164_v36  ;;  %v14407_v13 = vpop.f32.mrb[116].mxu1 }
 0x1c6   :  { %v4264_v49 = vrot.slane %v18008_v5, 7  ;;  %3336 = vst.msk [vmem:[#allocation2 + $0x480] sm:$0xff] %vm3191_vm3, %v3079_v24  ;;  %v5005_v60 = vsel %vm3191_vm3, %v4387_v48, %v15160_v59  ;;  %v3080_v27 = vmax.f32 %v2824_v9, 0.0  ;;  %v4266_v23 = vrot.slane %v18084_v44, 7  ;;  %v1978_v17 = vpop.f32.mrb[117].mxu1 }
 0x1c7   :  { %15233 = vrot.lane.b32.xlu0 %v15232_v55, %s16447_s15  ;;  %v4267_v16 = vrot.slane %v18089_v47, 7  ;;  %3339 = vst.msk [vmem:[#allocation2 + $0x498] sm:$0xff] %vm3191_vm3, %v3082_v58  ;;  %v5070_v4 = vsel %vm5051_vm6, %v5005_v60, %v15165_v45  ;;  %v5071_v39 = vsel %vm5051_vm6, %v5006_v2, %v15166_v10  ;;  %v2567_v5 = vmul.f32 %v17956_v30, %v14407_v13  ;;  %v14408_v38 = vpop.f32.mrb[118].mxu1 }
 0x1c8   :  { %v3590_v15 = vld [vmem:[#allocation2 + $0x470] ss:$2 sm:$0xff]  ;;  %v3846_v48 = vld [vmem:[#allocation2 + $0x471] ss:$2 sm:$0xff]  ;;  %v18141_v26 = vsel %vm4217_vm5, %v4263_v56, %v4264_v49  ;;  %3337 = vst.msk [vmem:[#allocation2 + $0x488] sm:$0xff] %vm3191_vm3, %v3080_v27  ;;  %v18144_v43 = vpack.c.bf16 %v5071_v39, %v5070_v4  ;;  %v2565_v47 = vmul.f32 %v17956_v30, %v1978_v17  ;;  %v2568_v3 = vmul.f32 %v17956_v30, %v14408_v38  ;;  %v1981_v19 = vpop.f32.mrb[119].mxu1 }
 0x1c9   :  { %v3588_v59 = vld [vmem:[#allocation2 + $0x460] ss:$2 sm:$0xff]  ;;  %v3844_v14 = vld [vmem:[#allocation2 + $0x461] ss:$2 sm:$0xff]  ;;  %v4030_v50 = vmax.f32 %v3590_v15, %v3846_v48  ;;  %v18150_v8 = vsel %vm4217_vm5, %v4266_v23, %v4267_v16  ;;  %v2829_v18 = vadd.f32 %v17932_v32, %v2567_v5  ;;  %v4027_v61 = vmax.f32 %v3584_v22, %v3840_v41 }
 0x1ca   :  { %v4029_v24 = vmax.f32 %v3588_v59, %v3844_v14  ;;  %v2827_v2 = vadd.f32 %v17932_v32, %v2565_v47  ;;  %v2566_v9 = vmul.f32 %v17956_v30, %v1981_v19  ;;  %v2830_v58 = vadd.f32 %v17932_v32, %v2568_v3 }
 0x1cb   :  { %v4122_v55 = vmax.f32 %v4028_v1, %v4030_v50  ;;  %v3085_v36 = vmax.f32 %v2829_v18, 0.0  ;;  %14526 = vmatmul.mubr.msk.bf16.vlgmr.msra.gmra.mrb[224].mxu1 %vm5210_vm7, %v17882_v53  ;;  %vm7984_vm8 = vcmask 1041409  }
 0x1cc   :  { %v18159_v10 = vmax.f32 %v4027_v61, %v4029_v24  ;;  %v3083_v45 = vmax.f32 %v2827_v2, 0.0  ;;  %v2828_v49 = vadd.f32 %v17932_v32, %v2566_v9  ;;  %14529 = vmatprep.mubr.msk.bf16.mxu1 %vm5210_vm7, %v17890_v35  ;;  %v3086_v27 = vmax.f32 %v2830_v58, 0.0 }
 0x1cd   :  { %v4463_v22 = vrot.slane %v4122_v55, 1  ;;  %v4270_v60 = vrot.slane %v4122_v55, 7  ;;  %3342 = vst.msk [vmem:[#allocation2 + $0x4b0] sm:$0xff] %vm3191_vm3, %v3085_v36  ;;  %v14411_v4 = vpop.f32.mrb[120].mxu1 }
 0x1ce   :  { %v15237_v1 = vpack.i.bf16 %v4122_v55, %v18159_v10  ;;  %v4462_v13 = vrot.slane %v18159_v10, 1  ;;  %v4269_v41 = vrot.slane %v18159_v10, 7  ;;  %3340 = vst.msk [vmem:[#allocation2 + $0x4a0] sm:$0xff] %vm3191_vm3, %v3083_v45  ;;  %v3084_v16 = vmax.f32 %v2828_v49, 0.0  ;;  %3343 = vst.msk [vmem:[#allocation2 + $0x4b8] sm:$0xff] %vm3191_vm3, %v3086_v27  ;;  %v1994_v17 = vpop.f32.mrb[121].mxu1 }
 0x1cf   :  { %v4556_v39 = vsel %vm4410_vm4, %v4463_v22, 0.0  ;;  %v2571_v5 = vmul.f32 %v17956_v30, %v14411_v4  ;;  %v2569_v47 = vmul.f32 %v17956_v30, %v1994_v17  ;;  %v14412_v38 = vpop.f32.mrb[122].mxu1  ;;  %v3594_v36 = vld [vmem:[#allocation2 + $0x490] ss:$2 sm:$0xff]  ;;  %v3850_v58 = vld [vmem:[#allocation2 + $0x491] ss:$2 sm:$0xff] }
 0x1d0   :  { %15238 = vrot.lane.b32.xlu1 %v15237_v1, %s16446_s19  ;;  %v4464_v15 = vsel %vm4410_vm4, %v4462_v13, %v4463_v22  ;;  %v18177_v48 = vsel %vm4217_vm5, %v4269_v41, %v4270_v60  ;;  %3341 = vst.msk [vmem:[#allocation2 + $0x4a8] sm:$0xff] %vm3191_vm3, %v3084_v16  ;;  %v15169_v59 = vpop.permute.xlu0 %15168  ;;  %v2572_v18 = vmul.f32 %v17956_v30, %v14412_v38  ;;  %v1997_v3 = vpop.f32.mrb[123].mxu1  ;;  %v4388_v27 = vsel %vm4217_vm5, 0.0, %v4248_v54  ;;  %v3592_v16 = vld [vmem:[#allocation2 + $0x480] ss:$2 sm:$0xff] }
 0x1d1   :  { %v15242_v14 = vpack.i.bf16 %v4556_v39, %v4464_v15  ;;  %v2833_v50 = vadd.f32 %v17932_v32, %v2571_v5  ;;  %v2831_v19 = vadd.f32 %v17932_v32, %v2569_v47  ;;  %v15171_v61 = vunpack.i.h.bf16 %v15169_v59  ;;  %v3848_v4 = vld [vmem:[#allocation2 + $0x481] ss:$2 sm:$0xff] }
 0x1d2   :  { %v15170_v24 = vunpack.i.l.bf16 %v15169_v59  ;;  %v2570_v2 = vmul.f32 %v17956_v30, %v1997_v3  ;;  %v2834_v55 = vadd.f32 %v17932_v32, %v2572_v18  ;;  %v4032_v59 = vmax.f32 %v3594_v36, %v3850_v58 }
 0x1d3   :  { %v3089_v9 = vmax.f32 %v2833_v50, 0.0  ;;  %14530 = vmatmul.mubr.msk.bf16.gmra.mrb[228].mxu1 %vm5210_vm7, %v17976_v62  ;;  %v3087_v45 = vmax.f32 %v2831_v19, 0.0  ;;  %v5008_v39 = vsel %vm3191_vm3, %v17613_v51, %v15171_v61 }
 0x1d4   :  { %15243 = vrot.lane.b32.xlu1 %v15242_v14, %s16447_s15  ;;  %v2832_v49 = vadd.f32 %v17932_v32, %v2570_v2  ;;  %v15174_v22 = vpop.permute.xlu0 %15173  ;;  %14533 = vmatprep.mubr.msk.bf16.mxu1 %vm5210_vm7, %v17946_v21  ;;  %v3090_v60 = vmax.f32 %v2834_v55, 0.0  ;;  %v5007_v5 = vsel %vm3191_vm3, %v4388_v27, %v15170_v24  ;;  %v4031_v2 = vmax.f32 %v3592_v16, %v3848_v4 }
 0x1d5   :  { %3346 = vst.msk [vmem:[#allocation2 + $0x4d0] sm:$0xff] %vm3191_vm3, %v3089_v9  ;;  %v15176_v1 = vunpack.i.h.bf16 %v15174_v22  ;;  %v15175_v13 = vunpack.i.l.bf16 %v15174_v22  ;;  %3344 = vst.msk [vmem:[#allocation2 + $0x4c0] sm:$0xff] %vm3191_vm3, %v3087_v45  ;;  %v14415_v15 = vpop.f32.mrb[124].mxu1  ;;  %v3598_v47 = vld [vmem:[#allocation2 + $0x4b0] ss:$2 sm:$0xff] }
 0x1d6   :  { %v3088_v17 = vmax.f32 %v2832_v49, 0.0  ;;  %v3854_v38 = vld [vmem:[#allocation2 + $0x4b1] ss:$2 sm:$0xff]  ;;  %3347 = vst.msk [vmem:[#allocation2 + $0x4d8] sm:$0xff] %vm3191_vm3, %v3090_v60  ;;  %v2575_v14 = vmul.f32 %v17956_v30, %v14415_v15  ;;  %v2010_v50 = vpop.f32.mrb[125].mxu1 }
 0x1d7   :  { %v5072_v25 = vsel %vm5051_vm6, %v5007_v5, %v15175_v13  ;;  %v5073_v54 = vsel %vm5051_vm6, %v5008_v39, %v15176_v1  ;;  %v3596_v18 = vld [vmem:[#allocation2 + $0x4a0] ss:$2 sm:$0xff]  ;;  %v3852_v3 = vld [vmem:[#allocation2 + $0x4a1] ss:$2 sm:$0xff]  ;;  %v4034_v19 = vmax.f32 %v3598_v47, %v3854_v38  ;;  %v2573_v61 = vmul.f32 %v17956_v30, %v2010_v50  ;;  %v14416_v24 = vpop.f32.mrb[126].mxu1 }
 0x1d8   :  { %3345 = vst.msk [vmem:[#allocation2 + $0x4c8] sm:$0xff] %vm3191_vm3, %v3088_v17  ;;  %v18205_v51 = vpack.c.bf16 %v5073_v54, %v5072_v25  ;;  %v4033_v9 = vmax.f32 %v3596_v18, %v3852_v3  ;;  %v2837_v55 = vadd.f32 %v17932_v32, %v2575_v14  ;;  %v2576_v36 = vmul.f32 %v17956_v30, %v14416_v24  ;;  %v2013_v58 = vpop.f32.mrb[127].mxu1 }
 0x1d9   :  { %v4124_v45 = vmax.f32 %v4032_v59, %v4034_v19  ;;  %v2835_v49 = vadd.f32 %v17932_v32, %v2573_v61  ;;  %v2574_v22 = vmul.f32 %v17956_v30, %v2013_v58 }
 0x1da   :  { %v18212_v60 = vmax.f32 %v4031_v2, %v4033_v9  ;;  %v3093_v27 = vmax.f32 %v2837_v55, 0.0  ;;  %v2838_v1 = vadd.f32 %v17932_v32, %v2576_v36 }
 0x1db   :  { %14534 = vmatmul.mubr.msk.bf16.gmra.mrb[232].mxu1 %vm5210_vm7, %v18022_v34  ;;  %v4466_v13 = vrot.slane %v4124_v45, 1  ;;  %v4273_v16 = vrot.slane %v4124_v45, 7  ;;  %v3091_v4 = vmax.f32 %v2835_v49, 0.0  ;;  %v2836_v39 = vadd.f32 %v17932_v32, %v2574_v22 }
 0x1dc   :  { %14537 = vmatprep.mubr.msk.bf16.mxu1 %vm5210_vm7, %v17985_v29  ;;  %v15247_v5 = vpack.i.bf16 %v4124_v45, %v18212_v60  ;;  %v4465_v17 = vrot.slane %v18212_v60, 1  ;;  %3350 = vst.msk [vmem:[#allocation2 + $0x4f0] sm:$0xff] %vm3191_vm3, %v3093_v27  ;;  %v3094_v15 = vmax.f32 %v2838_v1, 0.0  ;;  %v4272_v38 = vrot.slane %v18212_v60, 7 }
 0x1dd   :  { %v4557_v47 = vsel %vm4410_vm4, %v4466_v13, 0.0  ;;  %3348 = vst.msk [vmem:[#allocation2 + $0x4e0] sm:$0xff] %vm3191_vm3, %v3091_v4  ;;  %v3092_v59 = vmax.f32 %v2836_v39, 0.0  ;;  %v14419_v25 = vpop.f32.mrb[128].mxu1  ;;  %v3602_v1 = vld [vmem:[#allocation2 + $0x4d0] ss:$2 sm:$0xff] }
 0x1de   :  { %15248 = vrot.lane.b32.xlu0 %v15247_v5, %s16446_s19  ;;  %v4467_v54 = vsel %vm4410_vm4, %v4465_v17, %v4466_v13  ;;  %3351 = vst.msk [vmem:[#allocation2 + $0x4f8] sm:$0xff] %vm3191_vm3, %v3094_v15  ;;  %v2579_v14 = vmul.f32 %v17956_v30, %v14419_v25  ;;  %v2026_v50 = vpop.f32.mrb[129].mxu1  ;;  %v18233_v3 = vsel %vm4217_vm5, %v4272_v38, %v4273_v16  ;;  %v3858_v13 = vld [vmem:[#allocation2 + $0x4d1] ss:$2 sm:$0xff]  ;;  %v4389_v17 = vsel %vm4217_vm5, 0.0, %v4251_v42 }
 0x1df   :  { %v15252_v18 = vpack.i.bf16 %v4557_v47, %v4467_v54  ;;  %3349 = vst.msk [vmem:[#allocation2 + $0x4e8] sm:$0xff] %vm3191_vm3, %v3092_v59  ;;  %v2577_v19 = vmul.f32 %v17956_v30, %v2026_v50  ;;  %v14420_v61 = vpop.f32.mrb[130].mxu1  ;;  %v3600_v59 = vld [vmem:[#allocation2 + $0x4c0] ss:$2 sm:$0xff]  ;;  %v3856_v25 = vld [vmem:[#allocation2 + $0x4c1] ss:$2 sm:$0xff] }
 0x1e0   :  { %v15179_v24 = vpop.permute.xlu1 %15178  ;;  %v2841_v2 = vadd.f32 %v17932_v32, %v2579_v14  ;;  %v2580_v9 = vmul.f32 %v17956_v30, %v14420_v61  ;;  %v2029_v55 = vpop.f32.mrb[131].mxu1 }
 0x1e1   :  { %v2839_v36 = vadd.f32 %v17932_v32, %v2577_v19  ;;  %v15181_v58 = vunpack.i.h.bf16 %v15179_v24  ;;  %v15180_v45 = vunpack.i.l.bf16 %v15179_v24  ;;  %v2578_v49 = vmul.f32 %v17956_v30, %v2029_v55 }
 0x1e2   :  { %15253 = vrot.lane.b32.xlu0 %v15252_v18, %s16447_s15  ;;  %v3097_v22 = vmax.f32 %v2841_v2, 0.0  ;;  %v2842_v27 = vadd.f32 %v17932_v32, %v2580_v9  ;;  %v4036_v24 = vmax.f32 %v3602_v1, %v3858_v13 }
 0x1e3   :  { %14538 = vmatmul.mubr.msk.bf16.gmra.mrb[236].mxu1 %vm5210_vm7, %v18071_v7  ;;  %v3095_v16 = vmax.f32 %v2839_v36, 0.0  ;;  %v2840_v4 = vadd.f32 %v17932_v32, %v2578_v49  ;;  %v5010_v54 = vsel %vm3191_vm3, %v17672_v57, %v15181_v58  ;;  %v5009_v14 = vsel %vm3191_vm3, %v4389_v17, %v15180_v45 }
 0x1e4   :  { %v15184_v39 = vpop.permute.xlu1 %15183  ;;  %14541 = vmatprep.mubr.msk.bf16.mxu1 %vm5210_vm7, %v18067_v11  ;;  %3354 = vst.msk [vmem:[#allocation2 + $0x510] sm:$0xff] %vm3191_vm3, %v3097_v22  ;;  %v3098_v5 = vmax.f32 %v2842_v27, 0.0  ;;  %v4035_v22 = vmax.f32 %v3600_v59, %v3856_v25 }
 0x1e5   :  { %v15186_v15 = vunpack.i.h.bf16 %v15184_v39  ;;  %v15185_v47 = vunpack.i.l.bf16 %v15184_v39  ;;  %3352 = vst.msk [vmem:[#allocation2 + $0x500] sm:$0xff] %vm3191_vm3, %v3095_v16  ;;  %v3096_v50 = vmax.f32 %v2840_v4, 0.0  ;;  %v14423_v18 = vpop.f32.mrb[132].mxu1  ;;  %v3606_v19 = vld [vmem:[#allocation2 + $0x4f0] ss:$2 sm:$0xff] }
 0x1e6   :  { %v3862_v61 = vld [vmem:[#allocation2 + $0x4f1] ss:$2 sm:$0xff]  ;;  %3355 = vst.msk [vmem:[#allocation2 + $0x518] sm:$0xff] %vm3191_vm3, %v3098_v5  ;;  %v2583_v2 = vmul.f32 %v17956_v30, %v14423_v18  ;;  %v2042_v9 = vpop.f32.mrb[133].mxu1  ;;  %v3604_v55 = vld [vmem:[#allocation2 + $0x4e0] ss:$2 sm:$0xff] }
 0x1e7   :  { %v5074_v12 = vsel %vm5051_vm6, %v5009_v14, %v15185_v47  ;;  %v5075_v42 = vsel %vm5051_vm6, %v5010_v54, %v15186_v15  ;;  %v3860_v36 = vld [vmem:[#allocation2 + $0x4e1] ss:$2 sm:$0xff]  ;;  %v4038_v49 = vmax.f32 %v3606_v19, %v3862_v61  ;;  %3353 = vst.msk [vmem:[#allocation2 + $0x508] sm:$0xff] %vm3191_vm3, %v3096_v50  ;;  %v2581_v58 = vmul.f32 %v17956_v30, %v2042_v9  ;;  %v14424_v45 = vpop.f32.mrb[134].mxu1 }
 0x1e8   :  { %v18261_v57 = vpack.c.bf16 %v5075_v42, %v5074_v12  ;;  %v4037_v27 = vmax.f32 %v3604_v55, %v3860_v36  ;;  %v2845_v1 = vadd.f32 %v17932_v32, %v2583_v2  ;;  %v2584_v13 = vmul.f32 %v17956_v30, %v14424_v45  ;;  %v2045_v16 = vpop.f32.mrb[135].mxu1 }
 0x1e9   :  { %v4126_v4 = vmax.f32 %v4036_v24, %v4038_v49  ;;  %v2843_v39 = vadd.f32 %v17932_v32, %v2581_v58  ;;  %v2582_v5 = vmul.f32 %v17956_v30, %v2045_v16 }
 0x1ea   :  { %v18268_v17 = vmax.f32 %v4035_v22, %v4037_v27  ;;  %v3101_v15 = vmax.f32 %v2845_v1, 0.0  ;;  %v2846_v47 = vadd.f32 %v17932_v32, %v2584_v13 }
 0x1eb   :  { %14542 = vmatmul.mubr.msk.bf16.gmra.mrb[240].mxu1 %vm5210_vm7, %v18144_v43  ;;  %v4469_v59 = vrot.slane %v4126_v4, 1  ;;  %v4276_v25 = vrot.slane %v4126_v4, 7  ;;  %v3099_v54 = vmax.f32 %v2843_v39, 0.0  ;;  %v2844_v14 = vadd.f32 %v17932_v32, %v2582_v5 }
 0x1ec   :  { %14545 = vmatprep.mubr.msk.bf16.mxu1 %vm5210_vm7, %v18205_v51  ;;  %v15257_v50 = vpack.i.bf16 %v4126_v4, %v18268_v17  ;;  %v4468_v18 = vrot.slane %v18268_v17, 1  ;;  %3358 = vst.msk [vmem:[#allocation2 + $0x530] sm:$0xff] %vm3191_vm3, %v3101_v15  ;;  %v3102_v19 = vmax.f32 %v2846_v47, 0.0  ;;  %v4275_v24 = vrot.slane %v18268_v17, 7 }
 0x1ed   :  { %v4558_v61 = vsel %vm4410_vm4, %v4469_v59, 0.0  ;;  %3356 = vst.msk [vmem:[#allocation2 + $0x520] sm:$0xff] %vm3191_vm3, %v3099_v54  ;;  %v3100_v12 = vmax.f32 %v2844_v14, 0.0  ;;  %v14427_v42 = vpop.f32.mrb[136].mxu1 }
 0x1ee   :  { %15258 = vrot.lane.b32.xlu1 %v15257_v50, %s16446_s19  ;;  %v4470_v2 = vsel %vm4410_vm4, %v4468_v18, %v4469_v59  ;;  %3359 = vst.msk [vmem:[#allocation2 + $0x538] sm:$0xff] %vm3191_vm3, %v3102_v19  ;;  %v2587_v9 = vmul.f32 %v17956_v30, %v14427_v42  ;;  %v2058_v55 = vpop.f32.mrb[137].mxu1  ;;  %v18289_v49 = vsel %vm4217_vm5, %v4275_v24, %v4276_v25  ;;  %v3610_v59 = vld [vmem:[#allocation2 + $0x510] ss:$2 sm:$0xff]  ;;  %v3866_v25 = vld [vmem:[#allocation2 + $0x511] ss:$2 sm:$0xff] }
 0x1ef   :  { %v15262_v36 = vpack.i.bf16 %v4558_v61, %v4470_v2  ;;  %3357 = vst.msk [vmem:[#allocation2 + $0x528] sm:$0xff] %vm3191_vm3, %v3100_v12  ;;  %v2585_v58 = vmul.f32 %v17956_v30, %v2058_v55  ;;  %v14428_v45 = vpop.f32.mrb[138].mxu1  ;;  %v4390_v19 = vsel %vm4217_vm5, 0.0, %v4254_v63  ;;  %v3608_v42 = vld [vmem:[#allocation2 + $0x500] ss:$2 sm:$0xff] }
 0x1f0   :  { %v15189_v22 = vpop.permute.xlu0 %15188  ;;  %v2849_v27 = vadd.f32 %v17932_v32, %v2587_v9  ;;  %v2588_v1 = vmul.f32 %v17956_v30, %v14428_v45  ;;  %v2061_v13 = vpop.f32.mrb[139].mxu1  ;;  %v3864_v2 = vld [vmem:[#allocation2 + $0x501] ss:$2 sm:$0xff] }
 0x1f1   :  { %v2847_v16 = vadd.f32 %v17932_v32, %v2585_v58  ;;  %v15191_v4 = vunpack.i.h.bf16 %v15189_v22  ;;  %v15190_v39 = vunpack.i.l.bf16 %v15189_v22  ;;  %v2586_v5 = vmul.f32 %v17956_v30, %v2061_v13 }
 0x1f2   :  { %15263 = vrot.lane.b32.xlu1 %v15262_v36, %s16447_s15  ;;  %v3105_v15 = vmax.f32 %v2849_v27, 0.0  ;;  %v2850_v47 = vadd.f32 %v17932_v32, %v2588_v1  ;;  %v4040_v22 = vmax.f32 %v3610_v59, %v3866_v25  ;;  %v18321_v59 = vld [vmem:[%s21648_s3] ss:$0 sm:$0xff] }
 0x1f3   :  { %14546 = vmatmul.mubr.msk.bf16.gmra.mrb[244].mxu1 %vm5210_vm7, %v18261_v57  ;;  %v3103_v54 = vmax.f32 %v2847_v16, 0.0  ;;  %v2848_v14 = vadd.f32 %v17932_v32, %v2586_v5  ;;  %v5012_v9 = vsel %vm3191_vm3, %v17733_v46, %v15191_v4  ;;  %v5011_v55 = vsel %vm3191_vm3, %v4390_v19, %v15190_v39 }
 0x1f4   :  { %v15194_v50 = vpop.permute.xlu0 %15193  ;;  %3362 = vst.msk [vmem:[#allocation2 + $0x550] sm:$0xff] %vm3191_vm3, %v3105_v15  ;;  %v3106_v18 = vmax.f32 %v2850_v47, 0.0  ;;  %v4039_v15 = vmax.f32 %v3608_v42, %v3864_v2 }
 0x1f5   :  { %v15196_v61 = vunpack.i.h.bf16 %v15194_v50  ;;  %v15195_v12 = vunpack.i.l.bf16 %v15194_v50  ;;  %3360 = vst.msk [vmem:[#allocation2 + $0x540] sm:$0xff] %vm3191_vm3, %v3103_v54  ;;  %v3104_v32 = vmax.f32 %v2848_v14, 0.0  ;;  %v14431_v36 = vpop.f32.mrb[140].mxu1  ;;  %v3614_v58 = vld [vmem:[#allocation2 + $0x530] ss:$2 sm:$0xff] }
 0x1f6   :  { %v3870_v45 = vld [vmem:[#allocation2 + $0x531] ss:$2 sm:$0xff]  ;;  %3363 = vst.msk [vmem:[#allocation2 + $0x558] sm:$0xff] %vm3191_vm3, %v3106_v18  ;;  %v2591_v27 = vmul.f32 %v17956_v30, %v14431_v36  ;;  %v2074_v1 = vpop.f32.mrb[141].mxu1  ;;  %v3612_v13 = vld [vmem:[#allocation2 + $0x520] ss:$2 sm:$0xff] }
 0x1f7   :  { %v5076_v28 = vsel %vm5051_vm6, %v5011_v55, %v15195_v12  ;;  %v5077_v63 = vsel %vm5051_vm6, %v5012_v9, %v15196_v61  ;;  %v3868_v16 = vld [vmem:[#allocation2 + $0x521] ss:$2 sm:$0xff]  ;;  %v4042_v5 = vmax.f32 %v3614_v58, %v3870_v45  ;;  %3361 = vst.msk [vmem:[#allocation2 + $0x548] sm:$0xff] %vm3191_vm3, %v3104_v32  ;;  %v2589_v4 = vmul.f32 %v17956_v30, %v2074_v1  ;;  %v14432_v39 = vpop.f32.mrb[142].mxu1 }
 0x1f8   :  { %v18315_v46 = vpack.c.bf16 %v5077_v63, %v5076_v28  ;;  %v4041_v47 = vmax.f32 %v3612_v13, %v3868_v16  ;;  %v2853_v25 = vadd.f32 %v18321_v59, %v2591_v27  ;;  %v2592_v54 = vmul.f32 %v17956_v30, %v14432_v39  ;;  %v2077_v14 = vpop.f32.mrb[143].mxu1  ;;  %v18352_v39 = vld [vmem:[%s21647_s2] ss:$0 sm:$0xff] }
 0x1f9   :  { %v4128_v50 = vmax.f32 %v4040_v22, %v4042_v5  ;;  %v2851_v18 = vadd.f32 %v18321_v59, %v2589_v4  ;;  %v2590_v19 = vmul.f32 %v17956_v30, %v2077_v14 }
 0x1fa   :  { %14549 = vmatprep.mubr.msk.bf16.mxu1 %vm5210_vm7, %v18315_v46  ;;  %v18329_v61 = vmax.f32 %v4039_v15, %v4041_v47  ;;  %v3109_v12 = vmax.f32 %v2853_v25, 0.0  ;;  %v2854_v42 = vadd.f32 %v18321_v59, %v2592_v54 }
 0x1fb   :  { %v4472_v2 = vrot.slane %v4128_v50, 1  ;;  %v4279_v9 = vrot.slane %v4128_v50, 7  ;;  %v3107_v55 = vmax.f32 %v2851_v18, 0.0  ;;  %v2852_v32 = vadd.f32 %v18321_v59, %v2590_v19 }
 0x1fc   :  { %v15267_v36 = vpack.i.bf16 %v4128_v50, %v18329_v61  ;;  %v4471_v58 = vrot.slane %v18329_v61, 1  ;;  %3366 = vst.msk [vmem:[#allocation2 + $0x570] sm:$0xff] %vm3191_vm3, %v3109_v12  ;;  %v3110_v45 = vmax.f32 %v2854_v42, 0.0  ;;  %v4278_v28 = vrot.slane %v18329_v61, 7 }
 0x1fd   :  { %v4559_v22 = vsel %vm4410_vm4, %v4472_v2, 0.0  ;;  %3364 = vst.msk [vmem:[#allocation2 + $0x560] sm:$0xff] %vm3191_vm3, %v3107_v55  ;;  %v3108_v63 = vmax.f32 %v2852_v32, 0.0  ;;  %v14435_v27 = vpop.f32.mrb[144].mxu1  ;;  %v3618_v19 = vld [vmem:[#allocation2 + $0x550] ss:$2 sm:$0xff] }
 0x1fe   :  { %15268 = vrot.lane.b32.xlu0 %v15267_v36, %s16446_s19  ;;  %v4473_v1 = vsel %vm4410_vm4, %v4471_v58, %v4472_v2  ;;  %3367 = vst.msk [vmem:[#allocation2 + $0x578] sm:$0xff] %vm3191_vm3, %v3110_v45  ;;  %v2595_v13 = vmul.f32 %v17956_v30, %v14435_v27  ;;  %v2090_v16 = vpop.f32.mrb[145].mxu1  ;;  %v18346_v4 = vsel %vm4217_vm5, %v4278_v28, %v4279_v9  ;;  %v3874_v12 = vld [vmem:[#allocation2 + $0x551] ss:$2 sm:$0xff]  ;;  %v3616_v32 = vld [vmem:[#allocation2 + $0x540] ss:$2 sm:$0xff] }
 0x1ff   :  { %v15272_v5 = vpack.i.bf16 %v4559_v22, %v4473_v1  ;;  %3365 = vst.msk [vmem:[#allocation2 + $0x568] sm:$0xff] %vm3191_vm3, %v3108_v63  ;;  %v2593_v15 = vmul.f32 %v18352_v39, %v2090_v16  ;;  %v14436_v47 = vpop.f32.mrb[146].mxu1  ;;  %v3872_v36 = vld [vmem:[#allocation2 + $0x541] ss:$2 sm:$0xff]  ;;  %v4391_v63 = vsel %vm4217_vm5, 0.0, %v4257_v40  ;;  %v4044_v1 = vmax.f32 %v3618_v19, %v3874_v12 }
 0x200   :  { %v2857_v25 = vadd.f32 %v18321_v59, %v2595_v13  ;;  %v2596_v30 = vmul.f32 %v18352_v39, %v14436_v47  ;;  %v15199_v54 = vpop.permute.xlu1 %15198  ;;  %v2093_v14 = vpop.f32.mrb[147].mxu1 }
 0x201   :  { %v2855_v50 = vadd.f32 %v18321_v59, %v2593_v15  ;;  %v2594_v18 = vmul.f32 %v18352_v39, %v2093_v14  ;;  %v15201_v9 = vunpack.i.h.bf16 %v15199_v54  ;;  %v15200_v55 = vunpack.i.l.bf16 %v15199_v54 }
 0x202   :  { %15273 = vrot.lane.b32.xlu0 %v15272_v5, %s16447_s15  ;;  %v3113_v42 = vmax.f32 %v2857_v25, 0.0  ;;  %v2858_v2 = vadd.f32 %v18321_v59, %v2596_v30  ;;  %v4043_v30 = vmax.f32 %v3616_v32, %v3872_v36 }
 0x203   :  { %v3111_v58 = vmax.f32 %v2855_v50, 0.0  ;;  %v2856_v45 = vadd.f32 %v18321_v59, %v2594_v18  ;;  %v5014_v54 = vsel %vm3191_vm3, %v17850_v6, %v15201_v9  ;;  %v5013_v33 = vsel %vm3191_vm3, %v4391_v63, %v15200_v55 }
 0x204   :  { %3370 = vst.msk [vmem:[#allocation2 + $0x590] sm:$0xff] %vm3191_vm3, %v3113_v42  ;;  %v3114_v22 = vmax.f32 %v2858_v2, 0.0  ;;  %v15204_v27 = vpop.permute.xlu1 %15203 }
 0x205   :  { %3368 = vst.msk [vmem:[#allocation2 + $0x580] sm:$0xff] %vm3191_vm3, %v3111_v58  ;;  %v3112_v13 = vmax.f32 %v2856_v45, 0.0  ;;  %v15206_v16 = vunpack.i.h.bf16 %v15204_v27  ;;  %v15205_v5 = vunpack.i.l.bf16 %v15204_v27  ;;  %v14439_v15 = vpop.f32.mrb[148].mxu1  ;;  %v3622_v47 = vld [vmem:[#allocation2 + $0x570] ss:$2 sm:$0xff] }
 0x206   :  { %v3878_v25 = vld [vmem:[#allocation2 + $0x571] ss:$2 sm:$0xff]  ;;  %3371 = vst.msk [vmem:[#allocation2 + $0x598] sm:$0xff] %vm3191_vm3, %v3114_v22  ;;  %v2599_v40 = vmul.f32 %v18352_v39, %v14439_v15  ;;  %v2106_v14 = vpop.f32.mrb[149].mxu1  ;;  %v3620_v50 = vld [vmem:[#allocation2 + $0x560] ss:$2 sm:$0xff] }
 0x207   :  { %v3876_v18 = vld [vmem:[#allocation2 + $0x561] ss:$2 sm:$0xff]  ;;  %v4046_v19 = vmax.f32 %v3622_v47, %v3878_v25  ;;  %3369 = vst.msk [vmem:[#allocation2 + $0x588] sm:$0xff] %vm3191_vm3, %v3112_v13  ;;  %v5078_v12 = vsel %vm5051_vm6, %v5013_v33, %v15205_v5  ;;  %v5079_v42 = vsel %vm5051_vm6, %v5014_v54, %v15206_v16  ;;  %v2597_v2 = vmul.f32 %v18352_v39, %v2106_v14  ;;  %v14440_v32 = vpop.f32.mrb[150].mxu1 }
 0x208   :  { %v4045_v36 = vmax.f32 %v3620_v50, %v3876_v18  ;;  %v18376_v58 = vpack.c.bf16 %v5079_v42, %v5078_v12  ;;  %v2861_v6 = vadd.f32 %v18321_v59, %v2599_v40  ;;  %v2600_v9 = vmul.f32 %v18352_v39, %v14440_v32  ;;  %v2109_v55 = vpop.f32.mrb[151].mxu1 }
 0x209   :  { %v4130_v45 = vmax.f32 %v4044_v1, %v4046_v19  ;;  %v2859_v22 = vadd.f32 %v18321_v59, %v2597_v2  ;;  %v2598_v63 = vmul.f32 %v18352_v39, %v2109_v55 }
 0x20a   :  { %v18382_v27 = vmax.f32 %v4043_v30, %v4045_v36  ;;  %v3117_v13 = vmax.f32 %v2861_v6, 0.0  ;;  %v2862_v16 = vadd.f32 %v18321_v59, %v2600_v9  ;;  %14550 = vmatmul.mubr.msk.bf16.gmra.mrb[248].mxu1 %vm5210_vm7, %v18376_v58 }
 0x20b   :  { %v4475_v5 = vrot.slane %v4130_v45, 1  ;;  %v4282_v15 = vrot.slane %v4130_v45, 7  ;;  %v3115_v47 = vmax.f32 %v2859_v22, 0.0  ;;  %v2860_v25 = vadd.f32 %v18321_v59, %v2598_v63 }
 0x20c   :  { %v15277_v54 = vpack.i.bf16 %v4130_v45, %v18382_v27  ;;  %v4474_v1 = vrot.slane %v18382_v27, 1  ;;  %3374 = vst.msk [vmem:[#allocation2 + $0x5b0] sm:$0xff] %vm3191_vm3, %v3117_v13  ;;  %v3118_v33 = vmax.f32 %v2862_v16, 0.0  ;;  %v4281_v40 = vrot.slane %v18382_v27, 7 }
 0x20d   :  { %v4560_v30 = vsel %vm4410_vm4, %v4475_v5, 0.0  ;;  %3372 = vst.msk [vmem:[#allocation2 + $0x5a0] sm:$0xff] %vm3191_vm3, %v3115_v47  ;;  %v3116_v14 = vmax.f32 %v2860_v25, 0.0  ;;  %v14443_v50 = vpop.f32.mrb[152].mxu1  ;;  %v3626_v47 = vld [vmem:[#allocation2 + $0x590] ss:$2 sm:$0xff] }
 0x20e   :  { %15278 = vrot.lane.b32.xlu1 %v15277_v54, %s16446_s19  ;;  %v4476_v18 = vsel %vm4410_vm4, %v4474_v1, %v4475_v5  ;;  %3375 = vst.msk [vmem:[#allocation2 + $0x5b8] sm:$0xff] %vm3191_vm3, %v3118_v33  ;;  %v2603_v19 = vmul.f32 %v18352_v39, %v14443_v50  ;;  %v2122_v12 = vpop.f32.mrb[153].mxu1  ;;  %v18401_v2 = vsel %vm4217_vm5, %v4281_v40, %v4282_v15  ;;  %v3882_v25 = vld [vmem:[#allocation2 + $0x591] ss:$2 sm:$0xff]  ;;  %v3624_v33 = vld [vmem:[#allocation2 + $0x580] ss:$2 sm:$0xff] }
 0x20f   :  { %v15282_v42 = vpack.i.bf16 %v4560_v30, %v4476_v18  ;;  %3373 = vst.msk [vmem:[#allocation2 + $0x5a8] sm:$0xff] %vm3191_vm3, %v3116_v14  ;;  %v2601_v32 = vmul.f32 %v18352_v39, %v2122_v12  ;;  %v14444_v36 = vpop.f32.mrb[154].mxu1  ;;  %v3880_v30 = vld [vmem:[#allocation2 + $0x581] ss:$2 sm:$0xff] }
 0x210   :  { %v2865_v6 = vadd.f32 %v18321_v59, %v2603_v19  ;;  %v2604_v9 = vmul.f32 %v18352_v39, %v14444_v36  ;;  %v2125_v55 = vpop.f32.mrb[155].mxu1 }
 0x211   :  { %v2863_v45 = vadd.f32 %v18321_v59, %v2601_v32  ;;  %v2602_v22 = vmul.f32 %v18352_v39, %v2125_v55 }
 0x212   :  { %15283 = vrot.lane.b32.xlu1 %v15282_v42, %s16447_s15  ;;  %v3121_v63 = vmax.f32 %v2865_v6, 0.0  ;;  %v2866_v13 = vadd.f32 %v18321_v59, %v2604_v9  ;;  %v15209_v16 = vpop.permute.xlu0 %15208  ;;  %v4048_v9 = vmax.f32 %v3626_v47, %v3882_v25 }
 0x213   :  { %v3119_v5 = vmax.f32 %v2863_v45, 0.0  ;;  %v2864_v15 = vadd.f32 %v18321_v59, %v2602_v22  ;;  %v15211_v1 = vunpack.i.h.bf16 %v15209_v16  ;;  %v15210_v14 = vunpack.i.l.bf16 %v15209_v16 }
 0x214   :  { %3378 = vst.msk [vmem:[#allocation2 + $0x5d0] sm:$0xff] %vm3191_vm3, %v3121_v63  ;;  %v3122_v54 = vmax.f32 %v2866_v13, 0.0  ;;  %v4392_v45 = vsel %vm4217_vm5, 0.0, %v4260_v52  ;;  %v4047_v13 = vmax.f32 %v3624_v33, %v3880_v30 }
 0x215   :  { %3376 = vst.msk [vmem:[#allocation2 + $0x5c0] sm:$0xff] %vm3191_vm3, %v3119_v5  ;;  %v3120_v50 = vmax.f32 %v2864_v15, 0.0  ;;  %v14447_v18 = vpop.f32.mrb[156].mxu1  ;;  %v3630_v19 = vld [vmem:[#allocation2 + $0x5b0] ss:$2 sm:$0xff]  ;;  %v5016_v5 = vsel %vm3191_vm3, %v18094_v31, %v15211_v1  ;;  %v5015_v20 = vsel %vm3191_vm3, %v4392_v45, %v15210_v14 }
 0x216   :  { %v3886_v12 = vld [vmem:[#allocation2 + $0x5b1] ss:$2 sm:$0xff]  ;;  %3379 = vst.msk [vmem:[#allocation2 + $0x5d8] sm:$0xff] %vm3191_vm3, %v3122_v54  ;;  %v2607_v42 = vmul.f32 %v18352_v39, %v14447_v18  ;;  %v2138_v32 = vpop.f32.mrb[157].mxu1  ;;  %v3628_v36 = vld [vmem:[#allocation2 + $0x5a0] ss:$2 sm:$0xff] }
 0x217   :  { %v3884_v6 = vld [vmem:[#allocation2 + $0x5a1] ss:$2 sm:$0xff]  ;;  %v4050_v55 = vmax.f32 %v3630_v19, %v3886_v12  ;;  %3377 = vst.msk [vmem:[#allocation2 + $0x5c8] sm:$0xff] %vm3191_vm3, %v3120_v50  ;;  %v2605_v22 = vmul.f32 %v18352_v39, %v2138_v32  ;;  %v14448_v63 = vpop.f32.mrb[158].mxu1 }
 0x218   :  { %v4049_v16 = vmax.f32 %v3628_v36, %v3884_v6  ;;  %v2869_v15 = vadd.f32 %v18321_v59, %v2607_v42  ;;  %v2608_v54 = vmul.f32 %v18352_v39, %v14448_v63  ;;  %v2141_v47 = vpop.f32.mrb[159].mxu1 }
 0x219   :  { %v4132_v25 = vmax.f32 %v4048_v9, %v4050_v55  ;;  %v2867_v52 = vadd.f32 %v18321_v59, %v2605_v22  ;;  %v2606_v50 = vmul.f32 %v18352_v39, %v2141_v47 }
 0x21a   :  { %v15214_v18 = vpop.permute.xlu0 %15213  ;;  %v18428_v19 = vmax.f32 %v4047_v13, %v4049_v16  ;;  %v3125_v12 = vmax.f32 %v2869_v15, 0.0  ;;  %v2870_v31 = vadd.f32 %v18321_v59, %v2608_v54 }
 0x21b   :  { %v15216_v33 = vunpack.i.h.bf16 %v15214_v18  ;;  %v15215_v30 = vunpack.i.l.bf16 %v15214_v18  ;;  %v3123_v1 = vmax.f32 %v2867_v52, 0.0  ;;  %v2868_v42 = vadd.f32 %v18321_v59, %v2606_v50 }
 0x21c   :  { %v15287_v32 = vpack.i.bf16 %v4132_v25, %v18428_v19  ;;  %v4477_v36 = vrot.slane %v18428_v19, 1  ;;  %3382 = vst.msk [vmem:[#allocation2 + $0x5f0] sm:$0xff] %vm3191_vm3, %v3125_v12  ;;  %v3126_v9 = vmax.f32 %v2870_v31, 0.0  ;;  %v4478_v55 = vrot.slane %v4132_v25, 1 }
 0x21d   :  { %v5080_v14 = vsel %vm5051_vm6, %v5015_v20, %v15215_v30  ;;  %v5081_v6 = vsel %vm5051_vm6, %v5016_v5, %v15216_v33  ;;  %3380 = vst.msk [vmem:[#allocation2 + $0x5e0] sm:$0xff] %vm3191_vm3, %v3123_v1  ;;  %v3124_v22 = vmax.f32 %v2868_v42, 0.0  ;;  %v14451_v63 = vpop.f32.mrb[160].mxu1  ;;  %v21660_v18 = vrot.slane %v18428_v19, 7 }
 0x21e   :  { %v18437_v45 = vpack.c.bf16 %v5081_v6, %v5080_v14  ;;  %15288 = vrot.lane.b32.xlu0 %v15287_v32, %s16446_s19  ;;  %3383 = vst.msk [vmem:[#allocation2 + $0x5f8] sm:$0xff] %vm3191_vm3, %v3126_v9  ;;  %v2611_v13 = vmul.f32 %v18352_v39, %v14451_v63  ;;  %v2154_v16 = vpop.f32.mrb[161].mxu1  ;;  %v4479_v15 = vsel %vm4410_vm4, %v4477_v36, %v4478_v55  ;;  %v4561_v5 = vsel %vm4410_vm4, %v4478_v55, 0.0  ;;  %v3634_v6 = vld [vmem:[#allocation2 + $0x5d0] ss:$2 sm:$0xff] }
 0x21f   :  { %3381 = vst.msk [vmem:[#allocation2 + $0x5e8] sm:$0xff] %vm3191_vm3, %v3124_v22  ;;  %v2609_v54 = vmul.f32 %v18352_v39, %v2154_v16  ;;  %v14452_v47 = vpop.f32.mrb[162].mxu1  ;;  %v15292_v20 = vpack.i.bf16 %v4561_v5, %v4479_v15  ;;  %v4285_v30 = vrot.slane %v4132_v25, 7  ;;  %v3890_v9 = vld [vmem:[#allocation2 + $0x5d1] ss:$2 sm:$0xff] }
 0x220   :  { %14553 = vmatprep.mubr.msk.bf16.mxu1 %vm5210_vm7, %v18437_v45  ;;  %v2873_v52 = vadd.f32 %v18321_v59, %v2611_v13  ;;  %v2612_v50 = vmul.f32 %v18352_v39, %v14452_v47  ;;  %v2157_v33 = vpop.f32.mrb[163].mxu1  ;;  %v3632_v55 = vld [vmem:[#allocation2 + $0x5c0] ss:$2 sm:$0xff]  ;;  %v3888_v22 = vld [vmem:[#allocation2 + $0x5c1] ss:$2 sm:$0xff] }
 0x221   :  { %v2871_v12 = vadd.f32 %v18321_v59, %v2609_v54  ;;  %v2610_v31 = vmul.f32 %v18352_v39, %v2157_v33  ;;  %v18459_v32 = vsel %vm4217_vm5, %v21660_v18, %v4285_v30  ;;  %v4393_v30 = vsel %vm4217_vm5, 0.0, %v4263_v56 }
 0x222   :  { %15293 = vrot.lane.b32.xlu0 %v15292_v20, %s16447_s15  ;;  %v3129_v1 = vmax.f32 %v2873_v52, 0.0  ;;  %v2874_v42 = vadd.f32 %v18321_v59, %v2612_v50  ;;  %v4052_v50 = vmax.f32 %v3634_v6, %v3890_v9 }
 0x223   :  { %v3127_v36 = vmax.f32 %v2871_v12, 0.0  ;;  %v2872_v14 = vadd.f32 %v18321_v59, %v2610_v31 }
 0x224   :  { %3386 = vst.msk [vmem:[#allocation2 + $0x610] sm:$0xff] %vm3191_vm3, %v3129_v1  ;;  %v3130_v25 = vmax.f32 %v2874_v42, 0.0  ;;  %v4051_v1 = vmax.f32 %v3632_v55, %v3888_v22 }
 0x225   :  { %3384 = vst.msk [vmem:[#allocation2 + $0x600] sm:$0xff] %vm3191_vm3, %v3127_v36  ;;  %v15219_v63 = vpop.permute.xlu1 %15218  ;;  %v3128_v13 = vmax.f32 %v2872_v14, 0.0  ;;  %v14455_v16 = vpop.f32.mrb[164].mxu1  ;;  %v3638_v15 = vld [vmem:[#allocation2 + $0x5f0] ss:$2 sm:$0xff] }
 0x226   :  { %v3894_v5 = vld [vmem:[#allocation2 + $0x5f1] ss:$2 sm:$0xff]  ;;  %3387 = vst.msk [vmem:[#allocation2 + $0x618] sm:$0xff] %vm3191_vm3, %v3130_v25  ;;  %v2615_v54 = vmul.f32 %v18352_v39, %v14455_v16  ;;  %v2170_v47 = vpop.f32.mrb[165].mxu1  ;;  %v3636_v20 = vld [vmem:[#allocation2 + $0x5e0] ss:$2 sm:$0xff]  ;;  %v15221_v36 = vunpack.i.h.bf16 %v15219_v63  ;;  %v15220_v6 = vunpack.i.l.bf16 %v15219_v63 }
 0x227   :  { %v3892_v52 = vld [vmem:[#allocation2 + $0x5e1] ss:$2 sm:$0xff]  ;;  %v4054_v33 = vmax.f32 %v3638_v15, %v3894_v5  ;;  %3385 = vst.msk [vmem:[#allocation2 + $0x608] sm:$0xff] %vm3191_vm3, %v3128_v13  ;;  %v2613_v12 = vmul.f32 %v18352_v39, %v2170_v47  ;;  %v14456_v31 = vpop.f32.mrb[166].mxu1 }
 0x228   :  { %v4053_v42 = vmax.f32 %v3636_v20, %v3892_v52  ;;  %v2877_v14 = vadd.f32 %v18321_v59, %v2615_v54  ;;  %v2616_v25 = vmul.f32 %v18352_v39, %v14456_v31  ;;  %v2173_v16 = vpop.f32.mrb[167].mxu1  ;;  %v5018_v63 = vsel %vm3191_vm3, %v18141_v26, %v15221_v36 }
 0x229   :  { %v4134_v18 = vmax.f32 %v4052_v50, %v4054_v33  ;;  %v2875_v9 = vadd.f32 %v18321_v59, %v2613_v12  ;;  %v2614_v0 = vmul.f32 %v18352_v39, %v2173_v16  ;;  %v5017_v26 = vsel %vm3191_vm3, %v4393_v30, %v15220_v6 }
 0x22a   :  { %v18475_v56 = vmax.f32 %v4051_v1, %v4053_v42  ;;  %v3133_v13 = vmax.f32 %v2877_v14, 0.0  ;;  %v2878_v15 = vadd.f32 %v18321_v59, %v2616_v25 }
 0x22b   :  { %v4481_v5 = vrot.slane %v4134_v18, 1  ;;  %v4288_v55 = vrot.slane %v4134_v18, 7  ;;  %v3131_v22 = vmax.f32 %v2875_v9, 0.0  ;;  %v2876_v47 = vadd.f32 %v18321_v59, %v2614_v0 }
 0x22c   :  { %v15297_v54 = vpack.i.bf16 %v4134_v18, %v18475_v56  ;;  %v4480_v20 = vrot.slane %v18475_v56, 1  ;;  %3390 = vst.msk [vmem:[#allocation2 + $0x630] sm:$0xff] %vm3191_vm3, %v3133_v13  ;;  %v3134_v50 = vmax.f32 %v2878_v15, 0.0  ;;  %v21661_v12 = vrot.slane %v18475_v56, 7 }
 0x22d   :  { %v4562_v33 = vsel %vm4410_vm4, %v4481_v5, 0.0  ;;  %3388 = vst.msk [vmem:[#allocation2 + $0x620] sm:$0xff] %vm3191_vm3, %v3131_v22  ;;  %v3132_v42 = vmax.f32 %v2876_v47, 0.0  ;;  %v14459_v14 = vpop.f32.mrb[168].mxu1 }
 0x22e   :  { %v15224_v52 = vpop.permute.xlu1 %15223  ;;  %15298 = vrot.lane.b32.xlu1 %v15297_v54, %s16446_s19  ;;  %v4482_v18 = vsel %vm4410_vm4, %v4480_v20, %v4481_v5  ;;  %3391 = vst.msk [vmem:[#allocation2 + $0x638] sm:$0xff] %vm3191_vm3, %v3134_v50  ;;  %v2619_v36 = vmul.f32 %v18352_v39, %v14459_v14  ;;  %v2186_v25 = vpop.f32.mrb[169].mxu1  ;;  %v18495_v9 = vsel %vm4217_vm5, %v21661_v12, %v4288_v55  ;;  %v3642_v50 = vld [vmem:[#allocation2 + $0x610] ss:$2 sm:$0xff] }
 0x22f   :  { %v15226_v31 = vunpack.i.h.bf16 %v15224_v52  ;;  %v15225_v1 = vunpack.i.l.bf16 %v15224_v52  ;;  %v15302_v16 = vpack.i.bf16 %v4562_v33, %v4482_v18  ;;  %3389 = vst.msk [vmem:[#allocation2 + $0x628] sm:$0xff] %vm3191_vm3, %v3132_v42  ;;  %v2617_v15 = vmul.f32 %v18352_v39, %v2186_v25  ;;  %v14460_v30 = vpop.f32.mrb[170].mxu1  ;;  %v3898_v33 = vld [vmem:[#allocation2 + $0x611] ss:$2 sm:$0xff] }
 0x230   :  { %v2881_v5 = vadd.f32 %v18321_v59, %v2619_v36  ;;  %v2620_v22 = vmul.f32 %v18352_v39, %v14460_v30  ;;  %v2189_v47 = vpop.f32.mrb[171].mxu1  ;;  %v3896_v36 = vld [vmem:[#allocation2 + $0x601] ss:$2 sm:$0xff] }
 0x231   :  { %v5082_v0 = vsel %vm5051_vm6, %v5017_v26, %v15225_v1  ;;  %v5083_v13 = vsel %vm5051_vm6, %v5018_v63, %v15226_v31  ;;  %v2879_v54 = vadd.f32 %v18321_v59, %v2617_v15  ;;  %v2618_v55 = vmul.f32 %v18352_v39, %v2189_v47  ;;  %v15563_v31 = vld [vmem:[%s21649_s4] sm:$0xff]  }
 0x232   :  { %v18501_v6 = vpack.c.bf16 %v5083_v13, %v5082_v0  ;;  %15303 = vrot.lane.b32.xlu1 %v15302_v16, %s16447_s15  ;;  %v3137_v20 = vmax.f32 %v2881_v5, 0.0  ;;  %v2882_v63 = vadd.f32 %v18321_v59, %v2620_v22  ;;  %v3640_v26 = vld [vmem:[#allocation2 + $0x600] ss:$2 sm:$0xff]  ;;  %v4394_v16 = vsel %vm4217_vm5, 0.0, %v4266_v23  ;;  %14589 = vmatprep.subr.bf16.mxu1 %v15563_v31 }
 0x233   :  { %v3135_v1 = vmax.f32 %v2879_v54, 0.0  ;;  %v2880_v18 = vadd.f32 %v18321_v59, %v2618_v55  ;;  %14590 = vmatpush3.bf16.msra.mxu1 %v15563_v31  ;;  %v4055_v55 = vmax.f32 %v3640_v26, %v3896_v36 }
 0x234   :  { %14554 = vmatmul.mubr.msk.bf16.gmra.mrb[252].mxu1 %vm5210_vm7, %v18501_v6  ;;  %v15229_v52 = vpop.permute.xlu0 %15228  ;;  %3394 = vst.msk [vmem:[#allocation2 + $0x650] sm:$0xff] %vm3191_vm3, %v3137_v20  ;;  %v3138_v25 = vmax.f32 %v2882_v63, 0.0  ;;  %v4056_v20 = vmax.f32 %v3642_v50, %v3898_v33 }
 0x235   :  { %v15231_v42 = vunpack.i.h.bf16 %v15229_v52  ;;  %v15230_v14 = vunpack.i.l.bf16 %v15229_v52  ;;  %3392 = vst.msk [vmem:[#allocation2 + $0x640] sm:$0xff] %vm3191_vm3, %v3135_v1  ;;  %v3136_v0 = vmax.f32 %v2880_v18, 0.0  ;;  %v14463_v13 = vpop.f32.mrb[172].mxu1  ;;  %v3646_v15 = vld [vmem:[#allocation2 + $0x630] ss:$2 sm:$0xff] }
 0x236   :  { %v3902_v30 = vld [vmem:[#allocation2 + $0x631] ss:$2 sm:$0xff]  ;;  %3395 = vst.msk [vmem:[#allocation2 + $0x658] sm:$0xff] %vm3191_vm3, %v3138_v25  ;;  %v2623_v5 = vmul.f32 %v18352_v39, %v14463_v13  ;;  %v2202_v22 = vpop.f32.mrb[173].mxu1  ;;  %v3644_v47 = vld [vmem:[#allocation2 + $0x620] ss:$2 sm:$0xff] }
 0x237   :  { %v3900_v54 = vld [vmem:[#allocation2 + $0x621] ss:$2 sm:$0xff]  ;;  %v4058_v44 = vmax.f32 %v3646_v15, %v3902_v30  ;;  %v5020_v23 = vsel %vm3191_vm3, %v18150_v8, %v15231_v42  ;;  %v5019_v63 = vsel %vm3191_vm3, %v4394_v16, %v15230_v14  ;;  %3393 = vst.msk [vmem:[#allocation2 + $0x648] sm:$0xff] %vm3191_vm3, %v3136_v0  ;;  %v2621_v31 = vmul.f32 %v18352_v39, %v2202_v22  ;;  %v14464_v1 = vpop.f32.mrb[174].mxu1 }
 0x238   :  { %v4057_v18 = vmax.f32 %v3644_v47, %v3900_v54  ;;  %v2885_v12 = vadd.f32 %v18321_v59, %v2623_v5  ;;  %v2624_v26 = vmul.f32 %v18352_v39, %v14464_v1  ;;  %v2205_v50 = vpop.f32.mrb[175].mxu1 }
 0x239   :  { %v15234_v52 = vpop.permute.xlu0 %15233  ;;  %v2883_v33 = vadd.f32 %v18321_v59, %v2621_v31  ;;  %v2622_v8 = vmul.f32 %v18352_v39, %v2205_v50  ;;  %v4136_v14 = vmax.f32 %v4056_v20, %v4058_v44 }
 0x23a   :  { %v15236_v25 = vunpack.i.h.bf16 %v15234_v52  ;;  %v15235_v13 = vunpack.i.l.bf16 %v15234_v52  ;;  %v18531_v42 = vmax.f32 %v4055_v55, %v4057_v18  ;;  %v3141_v0 = vmax.f32 %v2885_v12, 0.0 }
 0x23b   :  { %v2886_v15 = vadd.f32 %v18321_v59, %v2624_v26  ;;  %v3139_v5 = vmax.f32 %v2883_v33, 0.0  ;;  %v2884_v22 = vadd.f32 %v18321_v59, %v2622_v8  ;;  %v4484_v20 = vrot.slane %v4136_v14, 1 }
 0x23c   :  { %v5084_v36 = vsel %vm5051_vm6, %v5019_v63, %v15235_v13  ;;  %v5085_v16 = vsel %vm5051_vm6, %v5020_v23, %v15236_v25  ;;  %v15307_v47 = vpack.i.bf16 %v4136_v14, %v18531_v42  ;;  %3398 = vst.msk [vmem:[#allocation2 + $0x670] sm:$0xff] %vm3191_vm3, %v3141_v0  ;;  %v4483_v55 = vrot.slane %v18531_v42, 1 }
 0x23d   :  { %v18536_v30 = vpack.c.bf16 %v5085_v16, %v5084_v36  ;;  %v3142_v54 = vmax.f32 %v2886_v15, 0.0  ;;  %3396 = vst.msk [vmem:[#allocation2 + $0x660] sm:$0xff] %vm3191_vm3, %v3139_v5  ;;  %v3140_v44 = vmax.f32 %v2884_v22, 0.0  ;;  %v14467_v12 = vpop.f32.mrb[176].mxu1  ;;  %v4563_v31 = vsel %vm4410_vm4, %v4484_v20, 0.0 }
 0x23e   :  { %15308 = vrot.lane.b32.xlu0 %v15307_v47, %s16446_s19  ;;  %v2627_v23 = vmul.f32 %v18352_v39, %v14467_v12  ;;  %v2218_v63 = vpop.f32.mrb[177].mxu1  ;;  %v4485_v52 = vsel %vm4410_vm4, %v4483_v55, %v4484_v20  ;;  %v21667_v1 = vrot.slane %v18531_v42, 7  ;;  %v4291_v26 = vrot.slane %v4136_v14, 7  ;;  %v3650_v5 = vld [vmem:[#allocation2 + $0x650] ss:$2 sm:$0xff] }
 0x23f   :  { %14557 = vmatprep.mubr.msk.bf16.mxu1 %vm5210_vm7, %v18536_v30  ;;  %3399 = vst.msk [vmem:[#allocation2 + $0x678] sm:$0xff] %vm3191_vm3, %v3142_v54  ;;  %3397 = vst.msk [vmem:[#allocation2 + $0x668] sm:$0xff] %vm3191_vm3, %v3140_v44  ;;  %v2625_v18 = vmul.f32 %v18352_v39, %v2218_v63  ;;  %v14468_v25 = vpop.f32.mrb[178].mxu1  ;;  %v15312_v13 = vpack.i.bf16 %v4563_v31, %v4485_v52  ;;  %v3906_v22 = vld [vmem:[#allocation2 + $0x651] ss:$2 sm:$0xff]  ;;  %v4395_v52 = vsel %vm4217_vm5, 0.0, %v4269_v41 }
 0x240   :  { %v2889_v50 = vadd.f32 %v18321_v59, %v2627_v23  ;;  %v2628_v33 = vmul.f32 %v18352_v39, %v14468_v25  ;;  %v2221_v36 = vpop.f32.mrb[179].mxu1  ;;  %v3648_v14 = vld [vmem:[#allocation2 + $0x640] ss:$2 sm:$0xff]  ;;  %v3904_v20 = vld [vmem:[#allocation2 + $0x641] ss:$2 sm:$0xff]  ;;  %v18562_v44 = vsel %vm4217_vm5, %v21667_v1, %v4291_v26 }
 0x241   :  { %v2887_v16 = vadd.f32 %v18321_v59, %v2625_v18  ;;  %v2626_v15 = vmul.f32 %v18352_v39, %v2221_v36  ;;  %v4060_v18 = vmax.f32 %v3650_v5, %v3906_v22  ;;  %v4059_v36 = vmax.f32 %v3648_v14, %v3904_v20 }
 0x242   :  { %v15239_v8 = vpop.permute.xlu1 %15238  ;;  %15313 = vrot.lane.b32.xlu0 %v15312_v13, %s16447_s15  ;;  %v3145_v47 = vmax.f32 %v2889_v50, 0.0  ;;  %v2890_v54 = vadd.f32 %v18321_v59, %v2628_v33 }
 0x243   :  { %v15241_v0 = vunpack.i.h.bf16 %v15239_v8  ;;  %v15240_v55 = vunpack.i.l.bf16 %v15239_v8  ;;  %v3143_v12 = vmax.f32 %v2887_v16, 0.0  ;;  %v2888_v23 = vadd.f32 %v18321_v59, %v2626_v15 }
 0x244   :  { %3402 = vst.msk [vmem:[#allocation2 + $0x690] sm:$0xff] %vm3191_vm3, %v3145_v47  ;;  %v3146_v63 = vmax.f32 %v2890_v54, 0.0 }
 0x245   :  { %3400 = vst.msk [vmem:[#allocation2 + $0x680] sm:$0xff] %vm3191_vm3, %v3143_v12  ;;  %v3144_v25 = vmax.f32 %v2888_v23, 0.0  ;;  %v14471_v33 = vpop.f32.mrb[180].mxu1  ;;  %v5022_v16 = vsel %vm3191_vm3, %v18177_v48, %v15241_v0  ;;  %v5021_v10 = vsel %vm3191_vm3, %v4395_v52, %v15240_v55  ;;  %v15564_v48 = vld [vmem:[%s21649_s4 + $0x8] sm:$0xff]  }
 0x246   :  { %v15244_v31 = vpop.permute.xlu1 %15243  ;;  %v3654_v26 = vld [vmem:[#allocation2 + $0x670] ss:$2 sm:$0xff]  ;;  %v3910_v8 = vld [vmem:[#allocation2 + $0x671] ss:$2 sm:$0xff]  ;;  %3403 = vst.msk [vmem:[#allocation2 + $0x698] sm:$0xff] %vm3191_vm3, %v3146_v63  ;;  %v2631_v41 = vmul.f32 %v18352_v39, %v14471_v33  ;;  %v2234_v15 = vpop.f32.mrb[181].mxu1  ;;  %14591 = vmatprep.subr.bf16.mxu1 %v15564_v48 }
 0x247   :  { %v15246_v13 = vunpack.i.h.bf16 %v15244_v31  ;;  %v15245_v50 = vunpack.i.l.bf16 %v15244_v31  ;;  %v3652_v5 = vld [vmem:[#allocation2 + $0x660] ss:$2 sm:$0xff]  ;;  %v3908_v22 = vld [vmem:[#allocation2 + $0x661] ss:$2 sm:$0xff]  ;;  %v4062_v47 = vmax.f32 %v3654_v26, %v3910_v8  ;;  %3401 = vst.msk [vmem:[#allocation2 + $0x688] sm:$0xff] %vm3191_vm3, %v3144_v25  ;;  %v2629_v14 = vmul.f32 %v18352_v39, %v2234_v15  ;;  %v14472_v20 = vpop.f32.mrb[182].mxu1  ;;  %14592 = vmatpush3.bf16.msra.mxu1 %v15564_v48 }
 0x248   :  { %v4061_v23 = vmax.f32 %v3652_v5, %v3908_v22  ;;  %v2893_v55 = vadd.f32 %v18321_v59, %v2631_v41  ;;  %v2632_v63 = vmul.f32 %v18352_v39, %v14472_v20  ;;  %v2237_v52 = vpop.f32.mrb[183].mxu1 }
 0x249   :  { %v5086_v54 = vsel %vm5051_vm6, %v5021_v10, %v15245_v50  ;;  %v5087_v12 = vsel %vm5051_vm6, %v5022_v16, %v15246_v13  ;;  %v4138_v31 = vmax.f32 %v4060_v18, %v4062_v47  ;;  %v2891_v25 = vadd.f32 %v18321_v59, %v2629_v14 }
 0x24a   :  { %v18582_v0 = vpack.c.bf16 %v5087_v12, %v5086_v54  ;;  %v2630_v13 = vmul.f32 %v18352_v39, %v2237_v52  ;;  %v18588_v50 = vmax.f32 %v4059_v36, %v4061_v23  ;;  %v3149_v33 = vmax.f32 %v2893_v55, 0.0 }
 0x24b   :  { %v2894_v26 = vadd.f32 %v18321_v59, %v2632_v63  ;;  %v4487_v8 = vrot.slane %v4138_v31, 1  ;;  %v4294_v16 = vrot.slane %v4138_v31, 7  ;;  %v3147_v10 = vmax.f32 %v2891_v25, 0.0 }
 0x24c   :  { %14558 = vmatmul.mubr.msk.bf16.gmra.mrb[0].mxu1 %vm5210_vm7, %v18582_v0  ;;  %v2892_v41 = vadd.f32 %v18321_v59, %v2630_v13  ;;  %v15317_v18 = vpack.i.bf16 %v4138_v31, %v18588_v50  ;;  %v4486_v15 = vrot.slane %v18588_v50, 1  ;;  %3406 = vst.msk [vmem:[#allocation2 + $0x6b0] sm:$0xff] %vm3191_vm3, %v3149_v33  ;;  %v21662_v22 = vrot.slane %v18588_v50, 7 }
 0x24d   :  { %v3150_v36 = vmax.f32 %v2894_v26, 0.0  ;;  %v4564_v5 = vsel %vm4410_vm4, %v4487_v8, 0.0  ;;  %3404 = vst.msk [vmem:[#allocation2 + $0x6a0] sm:$0xff] %vm3191_vm3, %v3147_v10  ;;  %v14475_v54 = vpop.f32.mrb[184].mxu1 }
 0x24e   :  { %v3148_v47 = vmax.f32 %v2892_v41, 0.0  ;;  %15318 = vrot.lane.b32.xlu1 %v15317_v18, %s16446_s19  ;;  %v4488_v12 = vsel %vm4410_vm4, %v4486_v15, %v4487_v8  ;;  %v2635_v14 = vmul.f32 %v18352_v39, %v14475_v54  ;;  %v2250_v20 = vpop.f32.mrb[185].mxu1  ;;  %v18607_v48 = vsel %vm4217_vm5, %v21662_v22, %v4294_v16  ;;  %v3658_v18 = vld [vmem:[#allocation2 + $0x690] ss:$2 sm:$0xff]  ;;  %v3914_v15 = vld [vmem:[#allocation2 + $0x691] ss:$2 sm:$0xff] }
 0x24f   :  { %3407 = vst.msk [vmem:[#allocation2 + $0x6b8] sm:$0xff] %vm3191_vm3, %v3150_v36  ;;  %v15322_v23 = vpack.i.bf16 %v4564_v5, %v4488_v12  ;;  %v2633_v55 = vmul.f32 %v18352_v39, %v2250_v20  ;;  %v14476_v63 = vpop.f32.mrb[186].mxu1  ;;  %v4396_v12 = vsel %vm4217_vm5, 0.0, %v4272_v38 }
 0x250   :  { %3405 = vst.msk [vmem:[#allocation2 + $0x6a8] sm:$0xff] %vm3191_vm3, %v3148_v47  ;;  %v15249_v52 = vpop.permute.xlu0 %15248  ;;  %v2897_v31 = vadd.f32 %v18321_v59, %v2635_v14  ;;  %v2636_v25 = vmul.f32 %v18352_v39, %v14476_v63  ;;  %v2253_v13 = vpop.f32.mrb[187].mxu1 }
 0x251   :  { %v2895_v33 = vadd.f32 %v18321_v59, %v2633_v55  ;;  %v15251_v26 = vunpack.i.h.bf16 %v15249_v52  ;;  %v15250_v8 = vunpack.i.l.bf16 %v15249_v52  ;;  %v2634_v10 = vmul.f32 %v18352_v39, %v2253_v13  ;;  %v3656_v55 = vld [vmem:[#allocation2 + $0x680] ss:$2 sm:$0xff] }
 0x252   :  { %15323 = vrot.lane.b32.xlu1 %v15322_v23, %s16447_s15  ;;  %v3153_v16 = vmax.f32 %v2897_v31, 0.0  ;;  %v2898_v41 = vadd.f32 %v18321_v59, %v2636_v25  ;;  %v3912_v23 = vld [vmem:[#allocation2 + $0x681] ss:$2 sm:$0xff] }
 0x253   :  { %v3151_v36 = vmax.f32 %v2895_v33, 0.0  ;;  %v2896_v5 = vadd.f32 %v18321_v59, %v2634_v10  ;;  %v5024_v63 = vsel %vm3191_vm3, %v18233_v3, %v15251_v26  ;;  %v5023_v52 = vsel %vm3191_vm3, %v4396_v12, %v15250_v8 }
 0x254   :  { %v15254_v47 = vpop.permute.xlu0 %15253  ;;  %3410 = vst.msk [vmem:[#allocation2 + $0x6d0] sm:$0xff] %vm3191_vm3, %v3153_v16  ;;  %v3154_v54 = vmax.f32 %v2898_v41, 0.0  ;;  %v4064_v10 = vmax.f32 %v3658_v18, %v3914_v15  ;;  %v4063_v18 = vmax.f32 %v3656_v55, %v3912_v23  ;;  %v15565_v55 = vld [vmem:[%s21649_s4 + $0x10] sm:$0xff]  }
 0x255   :  { %v15256_v14 = vunpack.i.h.bf16 %v15254_v47  ;;  %v15255_v20 = vunpack.i.l.bf16 %v15254_v47  ;;  %3408 = vst.msk [vmem:[#allocation2 + $0x6c0] sm:$0xff] %vm3191_vm3, %v3151_v36  ;;  %v3152_v31 = vmax.f32 %v2896_v5, 0.0  ;;  %v14479_v25 = vpop.f32.mrb[188].mxu1  ;;  %14593 = vmatprep.subr.bf16.mxu1 %v15565_v55 }
 0x256   :  { %v3662_v13 = vld [vmem:[#allocation2 + $0x6b0] ss:$2 sm:$0xff]  ;;  %v3918_v33 = vld [vmem:[#allocation2 + $0x6b1] ss:$2 sm:$0xff]  ;;  %3411 = vst.msk [vmem:[#allocation2 + $0x6d8] sm:$0xff] %vm3191_vm3, %v3154_v54  ;;  %v2639_v16 = vmul.f32 %v18352_v39, %v14479_v25  ;;  %v2266_v41 = vpop.f32.mrb[189].mxu1  ;;  %14594 = vmatpush3.bf16.msra.mxu1 %v15565_v55 }
 0x257   :  { %v5088_v60 = vsel %vm5051_vm6, %v5023_v52, %v15255_v20  ;;  %v5089_v38 = vsel %vm5051_vm6, %v5024_v63, %v15256_v14  ;;  %v3660_v36 = vld [vmem:[#allocation2 + $0x6a0] ss:$2 sm:$0xff]  ;;  %v3916_v47 = vld [vmem:[#allocation2 + $0x6a1] ss:$2 sm:$0xff]  ;;  %v4066_v22 = vmax.f32 %v3662_v13, %v3918_v33  ;;  %3409 = vst.msk [vmem:[#allocation2 + $0x6c8] sm:$0xff] %vm3191_vm3, %v3152_v31  ;;  %v2637_v26 = vmul.f32 %v18352_v39, %v2266_v41  ;;  %v14480_v8 = vpop.f32.mrb[190].mxu1 }
 0x258   :  { %v18631_v3 = vpack.c.bf16 %v5089_v38, %v5088_v60  ;;  %v4065_v15 = vmax.f32 %v3660_v36, %v3916_v47  ;;  %v2901_v5 = vadd.f32 %v18321_v59, %v2639_v16  ;;  %v2640_v54 = vmul.f32 %v18352_v39, %v14480_v8  ;;  %v2269_v12 = vpop.f32.mrb[191].mxu1 }
 0x259   :  { %v4140_v14 = vmax.f32 %v4064_v10, %v4066_v22  ;;  %v2899_v20 = vadd.f32 %v18321_v59, %v2637_v26  ;;  %v2638_v63 = vmul.f32 %v18352_v39, %v2269_v12 }
 0x25a   :  { %14561 = vmatprep.mubr.msk.bf16.mxu1 %vm5210_vm7, %v18631_v3  ;;  %v18640_v52 = vmax.f32 %v4063_v18, %v4065_v15  ;;  %v3157_v23 = vmax.f32 %v2901_v5, 0.0  ;;  %v2902_v31 = vadd.f32 %v18321_v59, %v2640_v54 }
 0x25b   :  { %v4490_v25 = vrot.slane %v4140_v14, 1  ;;  %v4297_v13 = vrot.slane %v4140_v14, 7  ;;  %v3155_v33 = vmax.f32 %v2899_v20, 0.0  ;;  %v2900_v22 = vadd.f32 %v18321_v59, %v2638_v63 }
 0x25c   :  { %v15327_v10 = vpack.i.bf16 %v4140_v14, %v18640_v52  ;;  %v4489_v60 = vrot.slane %v18640_v52, 1  ;;  %3414 = vst.msk [vmem:[#allocation2 + $0x6f0] sm:$0xff] %vm3191_vm3, %v3157_v23  ;;  %v3158_v38 = vmax.f32 %v2902_v31, 0.0  ;;  %v21664_v41 = vrot.slane %v18640_v52, 7  ;;  %v18669_v23 = vld [vmem:[%s21648_s3] ss:$0 sm:$0xff] }
 0x25d   :  { %v4565_v16 = vsel %vm4410_vm4, %v4490_v25, 0.0  ;;  %3412 = vst.msk [vmem:[#allocation2 + $0x6e0] sm:$0xff] %vm3191_vm3, %v3155_v33  ;;  %v3156_v36 = vmax.f32 %v2900_v22, 0.0  ;;  %v14483_v47 = vpop.f32.mrb[192].mxu1 }
 0x25e   :  { %15328 = vrot.lane.b32.xlu0 %v15327_v10, %s16446_s19  ;;  %v4491_v26 = vsel %vm4410_vm4, %v4489_v60, %v4490_v25  ;;  %3415 = vst.msk [vmem:[#allocation2 + $0x6f8] sm:$0xff] %vm3191_vm3, %v3158_v38  ;;  %v2643_v8 = vmul.f32 %v18352_v39, %v14483_v47  ;;  %v2282_v18 = vpop.f32.mrb[193].mxu1  ;;  %v18660_v5 = vsel %vm4217_vm5, %v21664_v41, %v4297_v13  ;;  %v3922_v60 = vld [vmem:[#allocation2 + $0x6d1] ss:$2 sm:$0xff] }
 0x25f   :  { %v15332_v15 = vpack.i.bf16 %v4565_v16, %v4491_v26  ;;  %3413 = vst.msk [vmem:[#allocation2 + $0x6e8] sm:$0xff] %vm3191_vm3, %v3156_v36  ;;  %v2641_v54 = vmul.f32 %v18352_v39, %v2282_v18  ;;  %v14484_v12 = vpop.f32.mrb[194].mxu1  ;;  %v4397_v26 = vsel %vm4217_vm5, 0.0, %v4275_v24  ;;  %v3664_v18 = vld [vmem:[#allocation2 + $0x6c0] ss:$2 sm:$0xff] }
 0x260   :  { %v15259_v14 = vpop.permute.xlu1 %15258  ;;  %v2905_v20 = vadd.f32 %v18321_v59, %v2643_v8  ;;  %v2644_v63 = vmul.f32 %v18352_v39, %v14484_v12  ;;  %v2285_v55 = vpop.f32.mrb[195].mxu1  ;;  %v3666_v59 = vld [vmem:[#allocation2 + $0x6d0] ss:$2 sm:$0xff] }
 0x261   :  { %v2903_v31 = vadd.f32 %v18669_v23, %v2641_v54  ;;  %v15261_v25 = vunpack.i.h.bf16 %v15259_v14  ;;  %v15260_v13 = vunpack.i.l.bf16 %v15259_v14  ;;  %v2642_v33 = vmul.f32 %v18352_v39, %v2285_v55 }
 0x262   :  { %15333 = vrot.lane.b32.xlu0 %v15332_v15, %s16447_s15  ;;  %v3161_v22 = vmax.f32 %v2905_v20, 0.0  ;;  %v2906_v10 = vadd.f32 %v18669_v23, %v2644_v63  ;;  %v3920_v15 = vld [vmem:[#allocation2 + $0x6c1] ss:$2 sm:$0xff] }
 0x263   :  { %v3159_v38 = vmax.f32 %v2903_v31, 0.0  ;;  %v2904_v16 = vadd.f32 %v18669_v23, %v2642_v33  ;;  %v5026_v54 = vsel %vm3191_vm3, %v18289_v49, %v15261_v25  ;;  %v5025_v12 = vsel %vm3191_vm3, %v4397_v26, %v15260_v13  ;;  %v18690_v33 = vld [vmem:[%s21647_s2] ss:$0 sm:$0xff] }
 0x264   :  { %v15264_v36 = vpop.permute.xlu1 %15263  ;;  %3418 = vst.msk [vmem:[#allocation2 + $0x710] sm:$0xff] %vm3191_vm3, %v3161_v22  ;;  %v3162_v47 = vmax.f32 %v2906_v10, 0.0  ;;  %v4068_v31 = vmax.f32 %v3666_v59, %v3922_v60 }
 0x265   :  { %v15266_v8 = vunpack.i.h.bf16 %v15264_v36  ;;  %v15265_v39 = vunpack.i.l.bf16 %v15264_v36  ;;  %3416 = vst.msk [vmem:[#allocation2 + $0x700] sm:$0xff] %vm3191_vm3, %v3159_v38  ;;  %v3160_v14 = vmax.f32 %v2904_v16, 0.0  ;;  %v14487_v20 = vpop.f32.mrb[196].mxu1  ;;  %v3670_v63 = vld [vmem:[#allocation2 + $0x6f0] ss:$2 sm:$0xff]  ;;  %v4067_v16 = vmax.f32 %v3664_v18, %v3920_v15 }
 0x266   :  { %v3926_v55 = vld [vmem:[#allocation2 + $0x6f1] ss:$2 sm:$0xff]  ;;  %3419 = vst.msk [vmem:[#allocation2 + $0x718] sm:$0xff] %vm3191_vm3, %v3162_v47  ;;  %v2647_v49 = vmul.f32 %v18690_v33, %v14487_v20  ;;  %v2298_v25 = vpop.f32.mrb[197].mxu1  ;;  %v3668_v13 = vld [vmem:[#allocation2 + $0x6e0] ss:$2 sm:$0xff] }
 0x267   :  { %v5090_v17 = vsel %vm5051_vm6, %v5025_v12, %v15265_v39  ;;  %v5091_v24 = vsel %vm5051_vm6, %v5026_v54, %v15266_v8  ;;  %v3924_v22 = vld [vmem:[#allocation2 + $0x6e1] ss:$2 sm:$0xff]  ;;  %v4070_v10 = vmax.f32 %v3670_v63, %v3926_v55  ;;  %3417 = vst.msk [vmem:[#allocation2 + $0x708] sm:$0xff] %vm3191_vm3, %v3160_v14  ;;  %v2645_v60 = vmul.f32 %v18690_v33, %v2298_v25  ;;  %v14488_v38 = vpop.f32.mrb[198].mxu1 }
 0x268   :  { %v18694_v59 = vpack.c.bf16 %v5091_v24, %v5090_v17  ;;  %v4069_v36 = vmax.f32 %v3668_v13, %v3924_v22  ;;  %v2909_v47 = vadd.f32 %v18669_v23, %v2647_v49  ;;  %v2648_v26 = vmul.f32 %v18690_v33, %v14488_v38  ;;  %v2301_v8 = vpop.f32.mrb[199].mxu1 }
 0x269   :  { %v4142_v39 = vmax.f32 %v4068_v31, %v4070_v10  ;;  %v2907_v54 = vadd.f32 %v18669_v23, %v2645_v60  ;;  %v2646_v12 = vmul.f32 %v18690_v33, %v2301_v8 }
 0x26a   :  { %14562 = vmatmul.mubr.msk.bf16.gmra.mrb[4].mxu1 %vm5210_vm7, %v18694_v59  ;;  %v18703_v14 = vmax.f32 %v4067_v16, %v4069_v36  ;;  %v3165_v20 = vmax.f32 %v2909_v47, 0.0  ;;  %v2910_v63 = vadd.f32 %v18669_v23, %v2648_v26 }
 0x26b   :  { %v4493_v18 = vrot.slane %v4142_v39, 1  ;;  %v4300_v15 = vrot.slane %v4142_v39, 7  ;;  %v3163_v55 = vmax.f32 %v2907_v54, 0.0  ;;  %v2908_v17 = vadd.f32 %v18669_v23, %v2646_v12 }
 0x26c   :  { %v15337_v24 = vpack.i.bf16 %v4142_v39, %v18703_v14  ;;  %v4492_v31 = vrot.slane %v18703_v14, 1  ;;  %3422 = vst.msk [vmem:[#allocation2 + $0x730] sm:$0xff] %vm3191_vm3, %v3165_v20  ;;  %v3166_v49 = vmax.f32 %v2910_v63, 0.0  ;;  %v21663_v13 = vrot.slane %v18703_v14, 7 }
 0x26d   :  { %v4566_v25 = vsel %vm4410_vm4, %v4493_v18, 0.0  ;;  %3420 = vst.msk [vmem:[#allocation2 + $0x720] sm:$0xff] %vm3191_vm3, %v3163_v55  ;;  %v3164_v22 = vmax.f32 %v2908_v17, 0.0  ;;  %v14491_v10 = vpop.f32.mrb[200].mxu1 }
 0x26e   :  { %15338 = vrot.lane.b32.xlu1 %v15337_v24, %s16446_s19  ;;  %v4494_v60 = vsel %vm4410_vm4, %v4492_v31, %v4493_v18  ;;  %3423 = vst.msk [vmem:[#allocation2 + $0x738] sm:$0xff] %vm3191_vm3, %v3166_v49  ;;  %v2651_v38 = vmul.f32 %v18690_v33, %v14491_v10  ;;  %v2314_v16 = vpop.f32.mrb[201].mxu1  ;;  %v18720_v47 = vsel %vm4217_vm5, %v21663_v13, %v4300_v15  ;;  %v3674_v31 = vld [vmem:[#allocation2 + $0x710] ss:$2 sm:$0xff]  ;;  %v3930_v49 = vld [vmem:[#allocation2 + $0x711] ss:$2 sm:$0xff] }
 0x26f   :  { %v15342_v36 = vpack.i.bf16 %v4566_v25, %v4494_v60  ;;  %3421 = vst.msk [vmem:[#allocation2 + $0x728] sm:$0xff] %vm3191_vm3, %v3164_v22  ;;  %v2649_v26 = vmul.f32 %v18690_v33, %v2314_v16  ;;  %v14492_v8 = vpop.f32.mrb[202].mxu1  ;;  %v15566_v25 = vld [vmem:[%s21649_s4 + $0x18] sm:$0xff]   ;;  %v4398_v16 = vsel %vm4217_vm5, 0.0, %v4278_v28 }
 0x270   :  { %v15269_v39 = vpop.permute.xlu0 %15268  ;;  %v2913_v54 = vadd.f32 %v18669_v23, %v2651_v38  ;;  %v2652_v12 = vmul.f32 %v18690_v33, %v14492_v8  ;;  %v2317_v20 = vpop.f32.mrb[203].mxu1  ;;  %v3672_v8 = vld [vmem:[#allocation2 + $0x700] ss:$2 sm:$0xff]  ;;  %14595 = vmatprep.subr.bf16.mxu1 %v15566_v25 }
 0x271   :  { %v2911_v63 = vadd.f32 %v18669_v23, %v2649_v26  ;;  %v15271_v18 = vunpack.i.h.bf16 %v15269_v39  ;;  %v15270_v55 = vunpack.i.l.bf16 %v15269_v39  ;;  %v2650_v17 = vmul.f32 %v18690_v33, %v2317_v20  ;;  %v3928_v39 = vld [vmem:[#allocation2 + $0x701] ss:$2 sm:$0xff]  ;;  %14596 = vmatpush3.bf16.msra.mxu1 %v15566_v25 }
 0x272   :  { %15343 = vrot.lane.b32.xlu1 %v15342_v36, %s16447_s15  ;;  %v3169_v15 = vmax.f32 %v2913_v54, 0.0  ;;  %v2914_v24 = vadd.f32 %v18669_v23, %v2652_v12 }
 0x273   :  { %v3167_v22 = vmax.f32 %v2911_v63, 0.0  ;;  %v2912_v10 = vadd.f32 %v18669_v23, %v2650_v17  ;;  %v5028_v54 = vsel %vm3191_vm3, %v18346_v4, %v15271_v18  ;;  %v5027_v12 = vsel %vm3191_vm3, %v4398_v16, %v15270_v55 }
 0x274   :  { %v15274_v60 = vpop.permute.xlu0 %15273  ;;  %3426 = vst.msk [vmem:[#allocation2 + $0x750] sm:$0xff] %vm3191_vm3, %v3169_v15  ;;  %v3170_v38 = vmax.f32 %v2914_v24, 0.0  ;;  %v4072_v24 = vmax.f32 %v3674_v31, %v3930_v49  ;;  %v4071_v49 = vmax.f32 %v3672_v8, %v3928_v39 }
 0x275   :  { %v15276_v36 = vunpack.i.h.bf16 %v15274_v60  ;;  %v15275_v26 = vunpack.i.l.bf16 %v15274_v60  ;;  %3424 = vst.msk [vmem:[#allocation2 + $0x740] sm:$0xff] %vm3191_vm3, %v3167_v22  ;;  %v3168_v20 = vmax.f32 %v2912_v10, 0.0  ;;  %v14495_v63 = vpop.f32.mrb[204].mxu1  ;;  %v3678_v17 = vld [vmem:[#allocation2 + $0x730] ss:$2 sm:$0xff] }
 0x276   :  { %v3934_v15 = vld [vmem:[#allocation2 + $0x731] ss:$2 sm:$0xff]  ;;  %3427 = vst.msk [vmem:[#allocation2 + $0x758] sm:$0xff] %vm3191_vm3, %v3170_v38  ;;  %v2655_v60 = vmul.f32 %v18690_v33, %v14495_v63  ;;  %v2330_v22 = vpop.f32.mrb[205].mxu1  ;;  %v3676_v13 = vld [vmem:[#allocation2 + $0x720] ss:$2 sm:$0xff] }
 0x277   :  { %v5092_v61 = vsel %vm5051_vm6, %v5027_v12, %v15275_v26  ;;  %v5093_v28 = vsel %vm5051_vm6, %v5028_v54, %v15276_v36  ;;  %v3932_v41 = vld [vmem:[#allocation2 + $0x721] ss:$2 sm:$0xff]  ;;  %v4074_v4 = vmax.f32 %v3678_v17, %v3934_v15  ;;  %3425 = vst.msk [vmem:[#allocation2 + $0x748] sm:$0xff] %vm3191_vm3, %v3168_v20  ;;  %v2653_v55 = vmul.f32 %v18690_v33, %v2330_v22  ;;  %v14496_v31 = vpop.f32.mrb[206].mxu1 }
 0x278   :  { %v18747_v18 = vpack.c.bf16 %v5093_v28, %v5092_v61  ;;  %v4073_v25 = vmax.f32 %v3676_v13, %v3932_v41  ;;  %v2917_v10 = vadd.f32 %v18669_v23, %v2655_v60  ;;  %v2656_v38 = vmul.f32 %v18690_v33, %v14496_v31  ;;  %v2333_v16 = vpop.f32.mrb[207].mxu1 }
 0x279   :  { %v4144_v36 = vmax.f32 %v4072_v24, %v4074_v4  ;;  %v2915_v26 = vadd.f32 %v18669_v23, %v2653_v55  ;;  %v2654_v54 = vmul.f32 %v18690_v33, %v2333_v16 }
 0x27a   :  { %14565 = vmatprep.mubr.msk.bf16.mxu1 %vm5210_vm7, %v18747_v18  ;;  %v18756_v12 = vmax.f32 %v4071_v49, %v4073_v25  ;;  %v3173_v20 = vmax.f32 %v2917_v10, 0.0  ;;  %v2918_v63 = vadd.f32 %v18669_v23, %v2656_v38 }
 0x27b   :  { %v4496_v8 = vrot.slane %v4144_v36, 1  ;;  %v4303_v41 = vrot.slane %v4144_v36, 7  ;;  %v3171_v13 = vmax.f32 %v2915_v26, 0.0  ;;  %v2916_v39 = vadd.f32 %v18669_v23, %v2654_v54 }
 0x27c   :  { %v15347_v17 = vpack.i.bf16 %v4144_v36, %v18756_v12  ;;  %v4495_v15 = vrot.slane %v18756_v12, 1  ;;  %3430 = vst.msk [vmem:[#allocation2 + $0x770] sm:$0xff] %vm3191_vm3, %v3173_v20  ;;  %v3174_v24 = vmax.f32 %v2918_v63, 0.0  ;;  %v21665_v28 = vrot.slane %v18756_v12, 7 }
 0x27d   :  { %v4567_v61 = vsel %vm4410_vm4, %v4496_v8, 0.0  ;;  %3428 = vst.msk [vmem:[#allocation2 + $0x760] sm:$0xff] %vm3191_vm3, %v3171_v13  ;;  %v3172_v60 = vmax.f32 %v2916_v39, 0.0  ;;  %v14499_v22 = vpop.f32.mrb[208].mxu1 }
 0x27e   :  { %15348 = vrot.lane.b32.xlu0 %v15347_v17, %s16446_s19  ;;  %v4497_v4 = vsel %vm4410_vm4, %v4495_v15, %v4496_v8  ;;  %3431 = vst.msk [vmem:[#allocation2 + $0x778] sm:$0xff] %vm3191_vm3, %v3174_v24  ;;  %v2659_v55 = vmul.f32 %v18690_v33, %v14499_v22  ;;  %v2346_v31 = vpop.f32.mrb[209].mxu1  ;;  %v18773_v25 = vsel %vm4217_vm5, %v21665_v28, %v4303_v41  ;;  %v3682_v17 = vld [vmem:[#allocation2 + $0x750] ss:$2 sm:$0xff]  ;;  %v3938_v15 = vld [vmem:[#allocation2 + $0x751] ss:$2 sm:$0xff] }
 0x27f   :  { %v15352_v49 = vpack.i.bf16 %v4567_v61, %v4497_v4  ;;  %3429 = vst.msk [vmem:[#allocation2 + $0x768] sm:$0xff] %vm3191_vm3, %v3172_v60  ;;  %v2657_v10 = vmul.f32 %v18690_v33, %v2346_v31  ;;  %v14500_v38 = vpop.f32.mrb[210].mxu1  ;;  %v4399_v4 = vsel %vm4217_vm5, 0.0, %v4281_v40 }
 0x280   :  { %v15279_v16 = vpop.permute.xlu1 %15278  ;;  %v2921_v36 = vadd.f32 %v18669_v23, %v2659_v55  ;;  %v2660_v26 = vmul.f32 %v18690_v33, %v14500_v38  ;;  %v2349_v54 = vpop.f32.mrb[211].mxu1 }
 0x281   :  { %v2919_v20 = vadd.f32 %v18669_v23, %v2657_v10  ;;  %v15281_v63 = vunpack.i.h.bf16 %v15279_v16  ;;  %v15280_v8 = vunpack.i.l.bf16 %v15279_v16  ;;  %v2658_v13 = vmul.f32 %v18690_v33, %v2349_v54  ;;  %v3680_v10 = vld [vmem:[#allocation2 + $0x740] ss:$2 sm:$0xff] }
 0x282   :  { %15353 = vrot.lane.b32.xlu0 %v15352_v49, %s16447_s15  ;;  %v3177_v41 = vmax.f32 %v2921_v36, 0.0  ;;  %v2922_v39 = vadd.f32 %v18669_v23, %v2660_v26  ;;  %v3936_v49 = vld [vmem:[#allocation2 + $0x741] ss:$2 sm:$0xff] }
 0x283   :  { %v3175_v24 = vmax.f32 %v2919_v20, 0.0  ;;  %v2920_v61 = vadd.f32 %v18669_v23, %v2658_v13  ;;  %v5030_v38 = vsel %vm3191_vm3, %v18401_v2, %v15281_v63  ;;  %v5029_v16 = vsel %vm3191_vm3, %v4399_v4, %v15280_v8 }
 0x284   :  { %v15284_v60 = vpop.permute.xlu1 %15283  ;;  %3434 = vst.msk [vmem:[#allocation2 + $0x790] sm:$0xff] %vm3191_vm3, %v3177_v41  ;;  %v3178_v22 = vmax.f32 %v2922_v39, 0.0  ;;  %v4076_v13 = vmax.f32 %v3682_v17, %v3938_v15  ;;  %v4075_v17 = vmax.f32 %v3680_v10, %v3936_v49 }
 0x285   :  { %v15286_v55 = vunpack.i.h.bf16 %v15284_v60  ;;  %v15285_v31 = vunpack.i.l.bf16 %v15284_v60  ;;  %3432 = vst.msk [vmem:[#allocation2 + $0x780] sm:$0xff] %vm3191_vm3, %v3175_v24  ;;  %v3176_v36 = vmax.f32 %v2920_v61, 0.0  ;;  %v14503_v26 = vpop.f32.mrb[212].mxu1  ;;  %v3686_v54 = vld [vmem:[#allocation2 + $0x770] ss:$2 sm:$0xff]  ;;  %v15567_v61 = vld [vmem:[%s21649_s4 + $0x20] sm:$0xff]  }
 0x286   :  { %v3942_v20 = vld [vmem:[#allocation2 + $0x771] ss:$2 sm:$0xff]  ;;  %3435 = vst.msk [vmem:[#allocation2 + $0x798] sm:$0xff] %vm3191_vm3, %v3178_v22  ;;  %v2663_v41 = vmul.f32 %v18690_v33, %v14503_v26  ;;  %v2362_v39 = vpop.f32.mrb[213].mxu1  ;;  %v3684_v24 = vld [vmem:[#allocation2 + $0x760] ss:$2 sm:$0xff]  ;;  %14597 = vmatprep.subr.bf16.mxu1 %v15567_v61 }
 0x287   :  { %v5094_v27 = vsel %vm5051_vm6, %v5029_v16, %v15285_v31  ;;  %v5095_v40 = vsel %vm5051_vm6, %v5030_v38, %v15286_v55  ;;  %v3940_v60 = vld [vmem:[#allocation2 + $0x761] ss:$2 sm:$0xff]  ;;  %v4078_v28 = vmax.f32 %v3686_v54, %v3942_v20  ;;  %3433 = vst.msk [vmem:[#allocation2 + $0x788] sm:$0xff] %vm3191_vm3, %v3176_v36  ;;  %v2661_v63 = vmul.f32 %v18690_v33, %v2362_v39  ;;  %v14504_v8 = vpop.f32.mrb[214].mxu1 }
 0x288   :  { %v18797_v2 = vpack.c.bf16 %v5095_v40, %v5094_v27  ;;  %v4077_v15 = vmax.f32 %v3684_v24, %v3940_v60  ;;  %v2925_v22 = vadd.f32 %v18669_v23, %v2663_v41  ;;  %v2664_v4 = vmul.f32 %v18690_v33, %v14504_v8  ;;  %v2365_v55 = vpop.f32.mrb[215].mxu1  ;;  %14598 = vmatpush3.bf16.msra.mxu1 %v15567_v61 }
 0x289   :  { %v4146_v31 = vmax.f32 %v4076_v13, %v4078_v28  ;;  %v2923_v38 = vadd.f32 %v18669_v23, %v2661_v63  ;;  %v2662_v16 = vmul.f32 %v18690_v33, %v2365_v55 }
 0x28a   :  { %14566 = vmatmul.mubr.msk.bf16.gmra.mrb[8].mxu1 %vm5210_vm7, %v18797_v2  ;;  %v18809_v36 = vmax.f32 %v4075_v17, %v4077_v15  ;;  %v3181_v10 = vmax.f32 %v2925_v22, 0.0  ;;  %v2926_v49 = vadd.f32 %v18669_v23, %v2664_v4 }
 0x28b   :  { %v4499_v26 = vrot.slane %v4146_v31, 1  ;;  %v4306_v54 = vrot.slane %v4146_v31, 7  ;;  %v3179_v20 = vmax.f32 %v2923_v38, 0.0  ;;  %v2924_v27 = vadd.f32 %v18669_v23, %v2662_v16 }
 0x28c   :  { %v15357_v28 = vpack.i.bf16 %v4146_v31, %v18809_v36  ;;  %v4498_v13 = vrot.slane %v18809_v36, 1  ;;  %3438 = vst.msk [vmem:[#allocation2 + $0x7b0] sm:$0xff] %vm3191_vm3, %v3181_v10  ;;  %v3182_v40 = vmax.f32 %v2926_v49, 0.0  ;;  %v21666_v39 = vrot.slane %v18809_v36, 7 }
 0x28d   :  { %v4568_v41 = vsel %vm4410_vm4, %v4499_v26, 0.0  ;;  %3436 = vst.msk [vmem:[#allocation2 + $0x7a0] sm:$0xff] %vm3191_vm3, %v3179_v20  ;;  %v3180_v24 = vmax.f32 %v2924_v27, 0.0 }
 0x28e   :  { %v14507_v60 = vpop.f32.mrb[216].mxu1  ;;  %15358 = vrot.lane.b32.xlu1 %v15357_v28, %s16446_s19  ;;  %v4500_v63 = vsel %vm4410_vm4, %v4498_v13, %v4499_v26  ;;  %3439 = vst.msk [vmem:[#allocation2 + $0x7b8] sm:$0xff] %vm3191_vm3, %v3182_v40  ;;  %v18826_v61 = vsel %vm4217_vm5, %v21666_v39, %v4306_v54  ;;  %v3690_v28 = vld [vmem:[#allocation2 + $0x790] ss:$2 sm:$0xff]  ;;  %v3946_v13 = vld [vmem:[#allocation2 + $0x791] ss:$2 sm:$0xff] }
 0x28f   :  { %v2667_v8 = vmul.f32 %v18690_v33, %v14507_v60  ;;  %v2378_v17 = vpop.f32.mrb[217].mxu1  ;;  %v15362_v15 = vpack.i.bf16 %v4568_v41, %v4500_v63  ;;  %3437 = vst.msk [vmem:[#allocation2 + $0x7a8] sm:$0xff] %vm3191_vm3, %v3180_v24  ;;  %v21668_v63 = vrot.slane %v18428_v19, 7 }
 0x290   :  { %v2665_v22 = vmul.f32 %v18690_v33, %v2378_v17  ;;  %v14508_v4 = vpop.f32.mrb[218].mxu1  ;;  %v15289_v55 = vpop.permute.xlu0 %15288 }
 0x291   :  { %v2929_v31 = vadd.f32 %v18669_v23, %v2667_v8  ;;  %v2668_v38 = vmul.f32 %v18690_v33, %v14508_v4  ;;  %v2381_v16 = vpop.f32.mrb[219].mxu1  ;;  %v15291_v49 = vunpack.i.h.bf16 %v15289_v55  ;;  %v15290_v26 = vunpack.i.l.bf16 %v15289_v55  ;;  %v3688_v4 = vld [vmem:[#allocation2 + $0x780] ss:$2 sm:$0xff] }
 0x292   :  { %v2927_v10 = vadd.f32 %v18669_v23, %v2665_v22  ;;  %v2666_v20 = vmul.f32 %v18690_v33, %v2381_v16  ;;  %15363 = vrot.lane.b32.xlu1 %v15362_v15, %s16447_s15  ;;  %v4400_v8 = vsel %vm4217_vm5, 0.0, %v21668_v63  ;;  %v3944_v15 = vld [vmem:[#allocation2 + $0x781] ss:$2 sm:$0xff] }
 0x293   :  { %v3185_v54 = vmax.f32 %v2929_v31, 0.0  ;;  %v2930_v27 = vadd.f32 %v18669_v23, %v2668_v38  ;;  %v5032_v55 = vsel %vm3191_vm3, %v18459_v32, %v15291_v49  ;;  %v5031_v31 = vsel %vm3191_vm3, %v4400_v8, %v15290_v26 }
 0x294   :  { %v3183_v40 = vmax.f32 %v2927_v10, 0.0  ;;  %v2928_v41 = vadd.f32 %v18669_v23, %v2666_v20  ;;  %v15294_v24 = vpop.permute.xlu0 %15293 }
 0x295   :  { %3442 = vst.msk [vmem:[#allocation2 + $0x7d0] sm:$0xff] %vm3191_vm3, %v3185_v54  ;;  %v3186_v60 = vmax.f32 %v2930_v27, 0.0  ;;  %v15296_v17 = vunpack.i.h.bf16 %v15294_v24  ;;  %v15295_v22 = vunpack.i.l.bf16 %v15294_v24  ;;  %v3694_v10 = vld [vmem:[#allocation2 + $0x7b0] ss:$2 sm:$0xff]  ;;  %v3950_v20 = vld [vmem:[#allocation2 + $0x7b1] ss:$2 sm:$0xff]  ;;  %v4080_v54 = vmax.f32 %v3690_v28, %v3946_v13 }
 0x296   :  { %3440 = vst.msk [vmem:[#allocation2 + $0x7c0] sm:$0xff] %vm3191_vm3, %v3183_v40  ;;  %v3184_v38 = vmax.f32 %v2928_v41, 0.0  ;;  %v14511_v16 = vpop.f32.mrb[220].mxu1  ;;  %v3692_v40 = vld [vmem:[#allocation2 + $0x7a0] ss:$2 sm:$0xff]  ;;  %v4082_v1 = vmax.f32 %v3694_v10, %v3950_v20  ;;  %v4079_v28 = vmax.f32 %v3688_v4, %v3944_v15 }
 0x297   :  { %3443 = vst.msk [vmem:[#allocation2 + $0x7d8] sm:$0xff] %vm3191_vm3, %v3186_v60  ;;  %v5096_v19 = vsel %vm5051_vm6, %v5031_v31, %v15295_v22  ;;  %v5097_v27 = vsel %vm5051_vm6, %v5032_v55, %v15296_v17  ;;  %v2671_v24 = vmul.f32 %v18690_v33, %v14511_v16  ;;  %v2394_v63 = vpop.f32.mrb[221].mxu1  ;;  %v3948_v39 = vld [vmem:[#allocation2 + $0x7a1] ss:$2 sm:$0xff] }
 0x298   :  { %3441 = vst.msk [vmem:[#allocation2 + $0x7c8] sm:$0xff] %vm3191_vm3, %v3184_v38  ;;  %v18850_v32 = vpack.c.bf16 %v5097_v27, %v5096_v19  ;;  %v2669_v49 = vmul.f32 %v18690_v33, %v2394_v63  ;;  %v14512_v26 = vpop.f32.mrb[222].mxu1  ;;  %v4081_v13 = vmax.f32 %v3692_v40, %v3948_v39  ;;  %v4148_v17 = vmax.f32 %v4080_v54, %v4082_v1  ;;  %v15568_v4 = vld [vmem:[%s21649_s4 + $0x28] sm:$0xff]  }
 0x299   :  { %v2933_v41 = vadd.f32 %v18669_v23, %v2671_v24  ;;  %v2672_v60 = vmul.f32 %v18690_v33, %v14512_v26  ;;  %v2397_v8 = vpop.f32.mrb[223].mxu1  ;;  %14599 = vmatprep.subr.bf16.mxu1 %v15568_v4 }
 0x29a   :  { %v2931_v22 = vadd.f32 %v18669_v23, %v2669_v49  ;;  %v2670_v55 = vmul.f32 %v18690_v33, %v2397_v8  ;;  %14569 = vmatprep.mubr.msk.bf16.mxu1 %vm5210_vm7, %v18850_v32  ;;  %v18859_v31 = vmax.f32 %v4079_v28, %v4081_v13  ;;  %v4502_v38 = vrot.slane %v4148_v17, 1  ;;  %14600 = vmatpush3.bf16.msra.mxu1 %v15568_v4 }
 0x29b   :  { %v3189_v39 = vmax.f32 %v2933_v41, 0.0  ;;  %v2934_v15 = vadd.f32 %v18669_v23, %v2672_v60  ;;  %v4309_v16 = vrot.slane %v4148_v17, 7  ;;  %v21669_v8 = vrot.slane %v18475_v56, 7 }
 0x29c   :  { %v3187_v10 = vmax.f32 %v2931_v22, 0.0  ;;  %v2932_v1 = vadd.f32 %v18669_v23, %v2670_v55  ;;  %v15367_v20 = vpack.i.bf16 %v4148_v17, %v18859_v31  ;;  %v4501_v33 = vrot.slane %v18859_v31, 1 }
 0x29d   :  { %3446 = vst.msk [vmem:[#allocation2 + $0x7f0] sm:$0xff] %vm3191_vm3, %v3189_v39  ;;  %v3190_v54 = vmax.f32 %v2934_v15, 0.0  ;;  %v4569_v19 = vsel %vm4410_vm4, %v4502_v38, 0.0  ;;  %v4308_v27 = vrot.slane %v18859_v31, 7  ;;  %v4401_v17 = vsel %vm4217_vm5, 0.0, %v21669_v8 }
 0x29e   :  { %3444 = vst.msk [vmem:[#allocation2 + $0x7e0] sm:$0xff] %vm3191_vm3, %v3187_v10  ;;  %v3188_v24 = vmax.f32 %v2932_v1, 0.0  ;;  %15368 = vrot.lane.b32.xlu0 %v15367_v20, %s16446_s19  ;;  %v4503_v23 = vsel %vm4410_vm4, %v4501_v33, %v4502_v38  ;;  %v3698_v41 = vld [vmem:[#allocation2 + $0x7d0] ss:$2 sm:$0xff]  ;;  %v3954_v60 = vld [vmem:[#allocation2 + $0x7d1] ss:$2 sm:$0xff] }
 0x29f   :  { %3447 = vst.msk [vmem:[#allocation2 + $0x7f8] sm:$0xff] %vm3191_vm3, %v3190_v54  ;;  %v15372_v63 = vpack.i.bf16 %v4569_v19, %v4503_v23  ;;  %v18878_v40 = vsel %vm4217_vm5, %v4308_v27, %v4309_v16  ;;  %v3696_v4 = vld [vmem:[#allocation2 + $0x7c0] ss:$2 sm:$0xff]  ;;  %v3952_v39 = vld [vmem:[#allocation2 + $0x7c1] ss:$2 sm:$0xff]  ;;  %v4084_v56 = vmax.f32 %v3698_v41, %v3954_v60 }
 0x2a0   :  { %3445 = vst.msk [vmem:[#allocation2 + $0x7e8] sm:$0xff] %vm3191_vm3, %v3188_v24  ;;  %v15299_v49 = vpop.permute.xlu1 %15298  ;;  %v4083_v23 = vmax.f32 %v3696_v4, %v3952_v39 }
 0x2a1   :  { %v15301_v26 = vunpack.i.h.bf16 %v15299_v49  ;;  %v15300_v28 = vunpack.i.l.bf16 %v15299_v49 }
 0x2a2   :  { %15373 = vrot.lane.b32.xlu0 %v15372_v63, %s16447_s15 }
 0x2a3   :  { %v5034_v15 = vsel %vm3191_vm3, %v18495_v9, %v15301_v26  ;;  %v5033_v38 = vsel %vm3191_vm3, %v4401_v17, %v15300_v28 }
 0x2a4   :  { %v15304_v13 = vpop.permute.xlu1 %15303 }
 0x2a5   :  { %v15306_v22 = vunpack.i.h.bf16 %v15304_v13  ;;  %v15305_v55 = vunpack.i.l.bf16 %v15304_v13  ;;  %v18899_v13 = vld [vmem:[%s21649_s4 + $0x60] sm:$0xff]  }
 0x2a6   :  { %v3702_v16 = vld [vmem:[#allocation2 + $0x7f0] ss:$2 sm:$0xff]  ;;  %v3958_v10 = vld [vmem:[#allocation2 + $0x7f1] ss:$2 sm:$0xff]  ;;  %14665 = vmatprep.subr.bf16.mxu1 %v18899_v13 }
 0x2a7   :  { %v5098_v1 = vsel %vm5051_vm6, %v5033_v38, %v15305_v55  ;;  %v5099_v20 = vsel %vm5051_vm6, %v5034_v15, %v15306_v22  ;;  %v3700_v33 = vld [vmem:[#allocation2 + $0x7e0] ss:$2 sm:$0xff]  ;;  %v3956_v54 = vld [vmem:[#allocation2 + $0x7e1] ss:$2 sm:$0xff]  ;;  %v4086_v19 = vmax.f32 %v3702_v16, %v3958_v10  ;;  %v21670_v10 = vrot.slane %v18531_v42, 7 }
 0x2a8   :  { %v18890_v24 = vpack.c.bf16 %v5099_v20, %v5098_v1  ;;  %v4085_v63 = vmax.f32 %v3700_v33, %v3956_v54 }
 0x2a9   :  { %v4150_v49 = vmax.f32 %v4084_v56, %v4086_v19  ;;  %v4402_v1 = vsel %vm4217_vm5, 0.0, %v21670_v10 }
 0x2aa   :  { %14570 = vmatmul.mubr.msk.bf16.gmra.mrb[12].mxu1 %vm5210_vm7, %v18890_v24  ;;  %v18894_v9 = vmax.f32 %v4083_v23, %v4085_v63 }
 0x2ab   :  { %v4505_v26 = vrot.slane %v4150_v49, 1  ;;  %v4312_v28 = vrot.slane %v4150_v49, 7 }
 0x2ac   :  { %v15377_v41 = vpack.i.bf16 %v4150_v49, %v18894_v9  ;;  %v4504_v60 = vrot.slane %v18894_v9, 1  ;;  %v4311_v8 = vrot.slane %v18894_v9, 7  ;;  %v15570_v9 = vld [vmem:[%s21649_s4 + $0x68] sm:$0xff]  }
 0x2ad   :  { %v4570_v17 = vsel %vm4410_vm4, %v4505_v26, 0.0 }
 0x2ae   :  { %15378 = vrot.lane.b32.xlu1 %v15377_v41, %s16446_s19  ;;  %v4506_v22 = vsel %vm4410_vm4, %v4504_v60, %v4505_v26  ;;  %v18911_v55 = vsel %vm4217_vm5, %v4311_v8, %v4312_v28  ;;  %v21671_v41 = vrot.slane %v18588_v50, 7 }
 0x2af   :  { %v15382_v4 = vpack.i.bf16 %v4570_v17, %v4506_v22 }
 0x2b0   :  { %v15309_v39 = vpop.permute.xlu0 %15308  ;;  %v4403_v60 = vsel %vm4217_vm5, 0.0, %v21671_v41 }
 0x2b1   :  { %v15311_v15 = vunpack.i.h.bf16 %v15309_v39  ;;  %v15310_v38 = vunpack.i.l.bf16 %v15309_v39 }
 0x2b2   :  { %15383 = vrot.lane.b32.xlu1 %v15382_v4, %s16447_s15 }
 0x2b3   :  { %v5036_v54 = vsel %vm3191_vm3, %v18562_v44, %v15311_v15  ;;  %v5035_v56 = vsel %vm3191_vm3, %v4402_v1, %v15310_v38 }
 0x2b4   :  { %v15314_v16 = vpop.permute.xlu0 %15313 }
 0x2b5   :  { %v15316_v20 = vunpack.i.h.bf16 %v15314_v16  ;;  %v15315_v33 = vunpack.i.l.bf16 %v15314_v16 }
 0x2b7   :  { %v5100_v19 = vsel %vm5051_vm6, %v5035_v56, %v15315_v33  ;;  %v5101_v23 = vsel %vm5051_vm6, %v5036_v54, %v15316_v20  ;;  %v21672_v20 = vrot.slane %v18640_v52, 7 }
 0x2b8   :  { %v18922_v63 = vpack.c.bf16 %v5101_v23, %v5100_v19 }
 0x2b9   :  { %v4404_v33 = vsel %vm4217_vm5, 0.0, %v21672_v20  ;;  %v21674_v20 = vrot.slane %v18756_v12, 7 }
 0x2ba   :  { %14573 = vmatprep.mubr.msk.bf16.mxu1 %vm5210_vm7, %v18922_v63 }
 0x2c0   :  { %v15319_v49 = vpop.permute.xlu1 %15318 }
 0x2c1   :  { %v15321_v42 = vunpack.i.h.bf16 %v15319_v49  ;;  %v15320_v26 = vunpack.i.l.bf16 %v15319_v49 }
 0x2c3   :  { %v5038_v22 = vsel %vm3191_vm3, %v18607_v48, %v15321_v42  ;;  %v5037_v4 = vsel %vm3191_vm3, %v4403_v60, %v15320_v26  ;;  %v21673_v60 = vrot.slane %v18703_v14, 7 }
 0x2c4   :  { %v15324_v28 = vpop.permute.xlu1 %15323 }
 0x2c5   :  { %v15326_v44 = vunpack.i.h.bf16 %v15324_v28  ;;  %v15325_v17 = vunpack.i.l.bf16 %v15324_v28 }
 0x2c7   :  { %v5102_v39 = vsel %vm5051_vm6, %v5037_v4, %v15325_v17  ;;  %v5103_v15 = vsel %vm5051_vm6, %v5038_v22, %v15326_v44  ;;  %v4405_v44 = vsel %vm4217_vm5, 0.0, %v21673_v60 }
 0x2c8   :  { %v18934_v38 = vpack.c.bf16 %v5103_v15, %v5102_v39 }
 0x2ca   :  { %14574 = vmatmul.mubr.msk.bf16.gmra.mrb[16].mxu1 %vm5210_vm7, %v18934_v38 }
 0x2d0   :  { %v15329_v16 = vpop.permute.xlu0 %15328 }
 0x2d1   :  { %v15331_v50 = vunpack.i.h.bf16 %v15329_v16  ;;  %v15330_v10 = vunpack.i.l.bf16 %v15329_v16 }
 0x2d3   :  { %v5040_v56 = vsel %vm3191_vm3, %v18660_v5, %v15331_v50  ;;  %v5039_v19 = vsel %vm3191_vm3, %v4404_v33, %v15330_v10  ;;  %v4406_v33 = vsel %vm4217_vm5, 0.0, %v21674_v20 }
 0x2d4   :  { %v15334_v1 = vpop.permute.xlu0 %15333 }
 0x2d5   :  { %v15336_v48 = vunpack.i.h.bf16 %v15334_v1  ;;  %v15335_v54 = vunpack.i.l.bf16 %v15334_v1 }
 0x2d7   :  { %v5104_v23 = vsel %vm5051_vm6, %v5039_v19, %v15335_v54  ;;  %v5105_v49 = vsel %vm5051_vm6, %v5040_v56, %v15336_v48 }
 0x2d8   :  { %v18946_v42 = vpack.c.bf16 %v5105_v49, %v5104_v23 }
 0x2da   :  { %14577 = vmatprep.mubr.msk.bf16.mxu1 %vm5210_vm7, %v18946_v42 }
 0x2e0   :  { %v15339_v26 = vpop.permute.xlu1 %15338 }
 0x2e1   :  { %v15341_v52 = vunpack.i.h.bf16 %v15339_v26  ;;  %v15340_v28 = vunpack.i.l.bf16 %v15339_v26 }
 0x2e3   :  { %v5042_v22 = vsel %vm3191_vm3, %v18720_v47, %v15341_v52  ;;  %v5041_v4 = vsel %vm3191_vm3, %v4405_v44, %v15340_v28 }
 0x2e4   :  { %v15344_v41 = vpop.permute.xlu1 %15343 }
 0x2e5   :  { %v15346_v5 = vunpack.i.h.bf16 %v15344_v41  ;;  %v15345_v17 = vunpack.i.l.bf16 %v15344_v41  ;;  %v21675_v41 = vrot.slane %v18809_v36, 7 }
 0x2e7   :  { %v5106_v39 = vsel %vm5051_vm6, %v5041_v4, %v15345_v17  ;;  %v5107_v15 = vsel %vm5051_vm6, %v5042_v22, %v15346_v5  ;;  %v4407_v60 = vsel %vm4217_vm5, 0.0, %v21675_v41 }
 0x2e8   :  { %v18958_v16 = vpack.c.bf16 %v5107_v15, %v5106_v39 }
 0x2ea   :  { %14578 = vmatmul.mubr.msk.bf16.gmra.mrb[20].mxu1 %vm5210_vm7, %v18958_v16 }
 0x2f0   :  { %v15349_v50 = vpop.permute.xlu0 %15348 }
 0x2f1   :  { %v15351_v14 = vunpack.i.h.bf16 %v15349_v50  ;;  %v15350_v10 = vunpack.i.l.bf16 %v15349_v50 }
 0x2f3   :  { %v5044_v54 = vsel %vm3191_vm3, %v18773_v25, %v15351_v14  ;;  %v5043_v56 = vsel %vm3191_vm3, %v4406_v33, %v15350_v10  ;;  %v4408_v10 = vsel %vm4217_vm5, 0.0, %v4308_v27 }
 0x2f4   :  { %v15354_v1 = vpop.permute.xlu0 %15353 }
 0x2f5   :  { %v15356_v47 = vunpack.i.h.bf16 %v15354_v1  ;;  %v15355_v48 = vunpack.i.l.bf16 %v15354_v1 }
 0x2f7   :  { %v5108_v19 = vsel %vm5051_vm6, %v5043_v56, %v15355_v48  ;;  %v5109_v23 = vsel %vm5051_vm6, %v5044_v54, %v15356_v47 }
 0x2f8   :  { %v18970_v49 = vpack.c.bf16 %v5109_v23, %v5108_v19  ;;  %v4409_v23 = vsel %vm4217_vm5, 0.0, %v4311_v8  ;;  %v15571_v8 = vld [vmem:[%s21649_s4 + $0x70] sm:$0xff]  }
 0x2fa   :  { %14581 = vmatprep.mubr.msk.bf16.mxu1 %vm5210_vm7, %v18970_v49 }
 0x300   :  { %v15359_v26 = vpop.permute.xlu1 %15358 }
 0x301   :  { %v15361_v12 = vunpack.i.h.bf16 %v15359_v26  ;;  %v15360_v52 = vunpack.i.l.bf16 %v15359_v26 }
 0x303   :  { %v5046_v5 = vsel %vm3191_vm3, %v18826_v61, %v15361_v12  ;;  %v5045_v17 = vsel %vm3191_vm3, %v4407_v60, %v15360_v52 }
 0x304   :  { %v15364_v28 = vpop.permute.xlu1 %15363 }
 0x305   :  { %v15366_v25 = vunpack.i.h.bf16 %v15364_v28  ;;  %v15365_v44 = vunpack.i.l.bf16 %v15364_v28 }
 0x307   :  { %v5110_v22 = vsel %vm5051_vm6, %v5045_v17, %v15365_v44  ;;  %v5111_v4 = vsel %vm5051_vm6, %v5046_v5, %v15366_v25  ;;  %v16448_v25 = vmov 0.0|0.0  }
 0x308   :  { %v18982_v39 = vpack.c.bf16 %v5111_v4, %v5110_v22  ;;  %v15582_v22 = vld [vmem:[%s21652_s7 + $0x98] sm:$0xff]  }
 0x30a   :  { %14582 = vmatmul.mubr.msk.bf16.gmra.mrb[24].mxu1 %vm5210_vm7, %v18982_v39 }
 0x310   :  { %v15369_v15 = vpop.permute.xlu0 %15368 }
 0x311   :  { %v15371_v36 = vunpack.i.h.bf16 %v15369_v15  ;;  %v15370_v50 = vunpack.i.l.bf16 %v15369_v15 }
 0x313   :  { %v5048_v20 = vsel %vm3191_vm3, %v18878_v40, %v15371_v36  ;;  %v5047_v33 = vsel %vm3191_vm3, %v4408_v10, %v15370_v50 }
 0x314   :  { %v15374_v14 = vpop.permute.xlu0 %15373 }
 0x315   :  { %v15376_v61 = vunpack.i.h.bf16 %v15374_v14  ;;  %v15375_v1 = vunpack.i.l.bf16 %v15374_v14 }
 0x317   :  { %v5112_v47 = vsel %vm5051_vm6, %v5047_v33, %v15375_v1  ;;  %v5113_v48 = vsel %vm5051_vm6, %v5048_v20, %v15376_v61  ;;  %v15583_v20 = vld [vmem:[%s21652_s7 + $0xa0] sm:$0xff]  }
 0x318   :  { %v18994_v54 = vpack.c.bf16 %v5113_v48, %v5112_v47 }
 0x31a   :  { %14585 = vmatprep.mubr.msk.bf16.mxu1 %vm5210_vm7, %v18994_v54 }
 0x320   :  { %v15379_v56 = vpop.permute.xlu1 %15378 }
 0x321   :  { %v15381_v31 = vunpack.i.h.bf16 %v15379_v56  ;;  %v15380_v19 = vunpack.i.l.bf16 %v15379_v56 }
 0x323   :  { %v5050_v12 = vsel %vm3191_vm3, %v18911_v55, %v15381_v31  ;;  %v5049_v52 = vsel %vm3191_vm3, %v4409_v23, %v15380_v19  ;;  %v15572_v55 = vld [vmem:[%s21649_s4 + $0x78] sm:$0xff]  }
 0x324   :  { %v15384_v27 = vpop.permute.xlu1 %15383 }
 0x325   :  { %v15386_v40 = vunpack.i.h.bf16 %v15384_v27  ;;  %v15385_v26 = vunpack.i.l.bf16 %v15384_v27 }
 0x327   :  { %v5114_v28 = vsel %vm5051_vm6, %v5049_v52, %v15385_v26  ;;  %v5115_v41 = vsel %vm5051_vm6, %v5050_v12, %v15386_v40  ;;  %v15584_v12 = vld [vmem:[%s21652_s7 + $0xa8] sm:$0xff]  }
 0x328   :  { %v19006_v60 = vpack.c.bf16 %v5115_v41, %v5114_v28 }
 0x32a   :  { %14586 = vmatmul.mubr.msk.bf16.gmra.mrb[28].mxu1 %vm5210_vm7, %v19006_v60 }
 0x32b   :  { %14601 = vmatprep.mubr.bf16.mxu1 %v16448_v25 }
 0x332   :  { %14602 = vmatmul.mubr.msk.bf16.vlgmr.msra.gmra.mrb[224].mxu1 %vm5210_vm7, %v17822_v37  ;;  %v15573_v37 = vld [vmem:[%s21649_s4 + $0x80] sm:$0xff]  }
 0x333   :  { %14666 = vmatpush3.bf16.msra.mxu1 %v18899_v13  ;;  %14605 = vmatprep.mubr.msk.bf16.mxu1 %vm5210_vm7, %v17882_v53  ;;  %v15574_v13 = vld [vmem:[%s21649_s4 + $0x88] sm:$0xff]  }
 0x334   :  { %14667 = vmatprep.subr.bf16.mxu1 %v15570_v9 }
 0x337   :  { %14668 = vmatpush3.bf16.msra.mxu1 %v15570_v9 }
 0x338   :  { %14669 = vmatprep.subr.bf16.mxu1 %v15571_v8 }
 0x33a   :  { %14606 = vmatmul.mubr.msk.bf16.gmra.mrb[228].mxu1 %vm5210_vm7, %v17890_v35 }
 0x33b   :  { %14609 = vmatprep.mubr.msk.bf16.mxu1 %vm5210_vm7, %v17976_v62  ;;  %14670 = vmatpush3.bf16.msra.mxu1 %v15571_v8 }
 0x33c   :  { %14671 = vmatprep.subr.bf16.mxu1 %v15572_v55 }
 0x33f   :  { %14672 = vmatpush3.bf16.msra.mxu1 %v15572_v55 }
 0x340   :  { %14673 = vmatprep.subr.bf16.mxu1 %v15573_v37 }
 0x342   :  { %14610 = vmatmul.mubr.msk.bf16.gmra.mrb[232].mxu1 %vm5210_vm7, %v17946_v21 }
 0x343   :  { %14613 = vmatprep.mubr.msk.bf16.mxu1 %vm5210_vm7, %v18022_v34  ;;  %14674 = vmatpush3.bf16.msra.mxu1 %v15573_v37 }
 0x344   :  { %14675 = vmatprep.subr.bf16.mxu1 %v15574_v13 }
 0x347   :  { %14676 = vmatpush3.bf16.msra.mxu1 %v15574_v13 }
 0x34a   :  { %14614 = vmatmul.mubr.msk.bf16.gmra.mrb[236].mxu1 %vm5210_vm7, %v17985_v29 }
 0x34b   :  { %14617 = vmatprep.mubr.msk.bf16.mxu1 %vm5210_vm7, %v18071_v7 }
 0x352   :  { %14618 = vmatmul.mubr.msk.bf16.gmra.mrb[240].mxu1 %vm5210_vm7, %v18067_v11 }
 0x353   :  { %14621 = vmatprep.mubr.msk.bf16.mxu1 %vm5210_vm7, %v18144_v43 }
 0x35a   :  { %14622 = vmatmul.mubr.msk.bf16.gmra.mrb[244].mxu1 %vm5210_vm7, %v18205_v51 }
 0x35b   :  { %14625 = vmatprep.mubr.msk.bf16.mxu1 %vm5210_vm7, %v18261_v57 }
 0x362   :  { %14626 = vmatmul.mubr.msk.bf16.gmra.mrb[248].mxu1 %vm5210_vm7, %v18315_v46 }
 0x363   :  { %14629 = vmatprep.mubr.msk.bf16.mxu1 %vm5210_vm7, %v18376_v58 }
 0x36a   :  { %14630 = vmatmul.mubr.msk.bf16.gmra.mrb[252].mxu1 %vm5210_vm7, %v18437_v45 }
 0x36b   :  { %14633 = vmatprep.mubr.bf16.mxu1 %v16448_v25 }
 0x372   :  { %14634 = vmatmul.mubr.msk.bf16.gmra.mrb[0].mxu1 %vm5210_vm7, %v18536_v30 }
 0x373   :  { %14637 = vmatprep.mubr.msk.bf16.mxu1 %vm5210_vm7, %v18582_v0 }
 0x37a   :  { %14638 = vmatmul.mubr.msk.bf16.gmra.mrb[4].mxu1 %vm5210_vm7, %v18631_v3 }
 0x37b   :  { %14641 = vmatprep.mubr.msk.bf16.mxu1 %vm5210_vm7, %v18694_v59 }
 0x382   :  { %14642 = vmatmul.mubr.msk.bf16.gmra.mrb[8].mxu1 %vm5210_vm7, %v18747_v18 }
 0x383   :  { %14645 = vmatprep.mubr.msk.bf16.mxu1 %vm5210_vm7, %v18797_v2 }
 0x38a   :  { %14646 = vmatmul.mubr.msk.bf16.gmra.mrb[12].mxu1 %vm5210_vm7, %v18850_v32 }
 0x38b   :  { %14649 = vmatprep.mubr.msk.bf16.mxu1 %vm5210_vm7, %v18890_v24 }
 0x392   :  { %14650 = vmatmul.mubr.msk.bf16.gmra.mrb[16].mxu1 %vm5210_vm7, %v18922_v63 }
 0x393   :  { %14653 = vmatprep.mubr.msk.bf16.mxu1 %vm5210_vm7, %v18934_v38 }
 0x39a   :  { %14654 = vmatmul.mubr.msk.bf16.gmra.mrb[20].mxu1 %vm5210_vm7, %v18946_v42 }
 0x39b   :  { %14657 = vmatprep.mubr.msk.bf16.mxu1 %vm5210_vm7, %v18958_v16 }
 0x3a2   :  { %14658 = vmatmul.mubr.msk.bf16.gmra.mrb[24].mxu1 %vm5210_vm7, %v18970_v49 }
 0x3a3   :  { %14661 = vmatprep.mubr.msk.bf16.mxu1 %vm5210_vm7, %v18982_v39 }
 0x3aa   :  { %14662 = vmatmul.mubr.msk.bf16.gmra.mrb[28].mxu1 %vm5210_vm7, %v18994_v54 }
 0x3ab   :  { %14677 = vmatprep.mubr.msk.bf16.mxu1 %vm5210_vm7, %v17882_v53  ;;  %v15575_v53 = vld [vmem:[%s21652_s7 + $0x60] sm:$0xff]  }
 0x3b2   :  { %14678 = vmatmul.mubr.msk.bf16.vlgmr.msra.gmra.mrb[224].mxu1 %vm5210_vm7, %v17890_v35  ;;  %v16449_v35 = vmov 0  }
 0x3b3   :  { %14681 = vmatprep.mubr.msk.bf16.mxu1 %vm5210_vm7, %v17976_v62  ;;  %7214 = vmatprep.subr.bf16.mxu1 %v16449_v35  ;;  %v15577_v62 = vld [vmem:[%s21652_s7 + $0x70] sm:$0xff]  }
 0x3b4   :  { %8180 = vmatprep.mubr.bf16.mxu0 %v16449_v35  ;;  %7215 = vmatpush1.bf16.msra.mxu1 %v15575_v53 }
 0x3b5   :  { %7216 = vmatprep.subr.bf16.mxu1 %v16449_v35 }
 0x3ba   :  { %14682 = vmatmul.mubr.msk.bf16.gmra.mrb[228].mxu1 %vm5210_vm7, %v17946_v21  ;;  %v15576_v21 = vld [vmem:[%s21652_s7 + $0x68] sm:$0xff]  }
 0x3bb   :  { %14685 = vmatprep.mubr.msk.bf16.mxu1 %vm5210_vm7, %v18022_v34  ;;  %7217 = vmatpush1.bf16.msra.mxu1 %v15576_v21  ;;  %v19171_v34 = vld [vmem:[%s21650_s5] ss:$0 sm:$0xff] }
 0x3bc   :  { %7218 = vmatprep.subr.bf16.mxu1 %v16449_v35 }
 0x3bf   :  { %7219 = vmatpush1.bf16.msra.mxu1 %v15577_v62  ;;  %v15585_v62 = vld [vmem:[%s21652_s7 + $0xb0] sm:$0xff]  }
 0x3c0   :  { %7220 = vmatprep.subr.bf16.mxu1 %v16449_v35 }
 0x3c2   :  { %14686 = vmatmul.mubr.msk.bf16.gmra.mrb[232].mxu1 %vm5210_vm7, %v17985_v29  ;;  %v15578_v29 = vld [vmem:[%s21652_s7 + $0x78] sm:$0xff]  }
 0x3c3   :  { %14689 = vmatprep.mubr.msk.bf16.mxu1 %vm5210_vm7, %v18071_v7  ;;  %7221 = vmatpush1.bf16.msra.mxu1 %v15578_v29 }
 0x3c4   :  { %7222 = vmatprep.subr.bf16.mxu1 %v16449_v35 }
 0x3ca   :  { %14690 = vmatmul.mubr.msk.bf16.gmra.mrb[236].mxu1 %vm5210_vm7, %v18067_v11  ;;  %v19176_v11 = vld [vmem:[%s21651_s6] ss:$0 sm:$0xff] }
 0x3cb   :  { %14693 = vmatprep.mubr.msk.bf16.mxu1 %vm5210_vm7, %v18144_v43  ;;  %v15579_v43 = vld [vmem:[%s21652_s7 + $0x80] sm:$0xff]  }
 0x3cc   :  { %7223 = vmatpush1.bf16.msra.mxu1 %v15579_v43 }
 0x3cd   :  { %7224 = vmatprep.subr.bf16.mxu1 %v16449_v35 }
 0x3d2   :  { %14694 = vmatmul.mubr.msk.bf16.gmra.mrb[240].mxu1 %vm5210_vm7, %v18205_v51 }
 0x3d3   :  { %14697 = vmatprep.mubr.msk.bf16.mxu1 %vm5210_vm7, %v18261_v57 }
 0x3da   :  { %14698 = vmatmul.mubr.msk.bf16.gmra.mrb[244].mxu1 %vm5210_vm7, %v18315_v46 }
 0x3db   :  { %14701 = vmatprep.mubr.msk.bf16.mxu1 %vm5210_vm7, %v18376_v58 }
 0x3e2   :  { %14702 = vmatmul.mubr.msk.bf16.gmra.mrb[248].mxu1 %vm5210_vm7, %v18437_v45  ;;  %v15580_v45 = vld [vmem:[%s21652_s7 + $0x88] sm:$0xff]  }
 0x3e3   :  { %14705 = vmatprep.mubr.msk.bf16.mxu1 %vm5210_vm7, %v18501_v6  ;;  %7225 = vmatpush1.bf16.msra.mxu1 %v15580_v45 }
 0x3e4   :  { %7226 = vmatprep.subr.bf16.mxu1 %v16449_v35 }
 0x3ea   :  { %14706 = vmatmul.mubr.bf16.gmra.mrb[252].mxu1 %v16448_v25 }
 0x3eb   :  { %14709 = vmatprep.mubr.msk.bf16.mxu1 %vm5210_vm7, %v18582_v0 }
 0x3f2   :  { %14710 = vmatmul.mubr.msk.bf16.gmra.mrb[0].mxu1 %vm5210_vm7, %v18631_v3 }
 0x3f3   :  { %14713 = vmatprep.mubr.msk.bf16.mxu1 %vm5210_vm7, %v18694_v59 }
 0x3fa   :  { %14714 = vmatmul.mubr.msk.bf16.gmra.mrb[4].mxu1 %vm5210_vm7, %v18747_v18 }
 0x3fb   :  { %14717 = vmatprep.mubr.msk.bf16.mxu1 %vm5210_vm7, %v18797_v2 }
 0x402   :  { %14718 = vmatmul.mubr.msk.bf16.gmra.mrb[8].mxu1 %vm5210_vm7, %v18850_v32 }
 0x403   :  { %14721 = vmatprep.mubr.msk.bf16.mxu1 %vm5210_vm7, %v18890_v24 }
 0x40a   :  { %14722 = vmatmul.mubr.msk.bf16.gmra.mrb[12].mxu1 %vm5210_vm7, %v18922_v63  ;;  %v15581_v63 = vld [vmem:[%s21652_s7 + $0x90] sm:$0xff]  }
 0x40b   :  { %14725 = vmatprep.mubr.msk.bf16.mxu1 %vm5210_vm7, %v18934_v38  ;;  %7227 = vmatpush1.bf16.msra.mxu1 %v15581_v63 }
 0x40c   :  { %7228 = vmatprep.subr.bf16.mxu1 %v16449_v35 }
 0x40f   :  { %7229 = vmatpush1.bf16.msra.mxu1 %v15582_v22 }
 0x410   :  { %7230 = vmatprep.subr.bf16.mxu1 %v16449_v35 }
 0x412   :  { %14726 = vmatmul.mubr.msk.bf16.gmra.mrb[16].mxu1 %vm5210_vm7, %v18946_v42 }
 0x413   :  { %14729 = vmatprep.mubr.msk.bf16.mxu1 %vm5210_vm7, %v18958_v16  ;;  %7231 = vmatpush1.bf16.msra.mxu1 %v15583_v20 }
 0x414   :  { %7232 = vmatprep.subr.bf16.mxu1 %v16449_v35 }
 0x417   :  { %7233 = vmatpush1.bf16.msra.mxu1 %v15584_v12 }
 0x418   :  { %7234 = vmatprep.subr.bf16.mxu1 %v16449_v35 }
 0x41a   :  { %14730 = vmatmul.mubr.msk.bf16.gmra.mrb[20].mxu1 %vm5210_vm7, %v18970_v49 }
 0x41b   :  { %14733 = vmatprep.mubr.msk.bf16.mxu1 %vm5210_vm7, %v18982_v39  ;;  %7235 = vmatpush1.bf16.msra.mxu1 %v15585_v62 }
 0x41c   :  { %7236 = vmatprep.subr.bf16.mxu1 %v16449_v35 }
 0x422   :  { %14734 = vmatmul.mubr.msk.bf16.gmra.mrb[24].mxu1 %vm5210_vm7, %v18994_v54 }
 0x423   :  { %14737 = vmatprep.mubr.msk.bf16.mxu1 %vm5210_vm7, %v19006_v60 }
 0x42a   :  { %14738 = vmatmul.mubr.bf16.gmra.mrb[28].mxu1 %v16448_v25 }
 0x485   :  { %v14679_v7 = vpop.f32.mrb[224].mxu1 }
 0x486   :  { %v6334_v51 = vmul.f32 %v14679_v7, %v19171_v34  ;;  %v6007_v57 = vpop.f32.mrb[225].mxu1 }
 0x487   :  { %v6332_v46 = vmul.f32 %v19171_v34, %v6007_v57  ;;  %v14680_v58 = vpop.f32.mrb[226].mxu1 }
 0x488   :  { %v6404_v6 = vadd.f32 %v19176_v11, %v6334_v51  ;;  %v6335_v30 = vmul.f32 %v14680_v58, %v19171_v34  ;;  %v6010_v0 = vpop.f32.mrb[227].mxu1 }
 0x489   :  { %v6402_v3 = vadd.f32 %v19176_v11, %v6332_v46  ;;  %v6333_v59 = vmul.f32 %v19171_v34, %v6010_v0 }
 0x48a   :  { %v6468_v18 = vmax.f32 %v6404_v6, 0.0  ;;  %v6405_v2 = vadd.f32 %v19176_v11, %v6335_v30 }
 0x48b   :  { %v6466_v32 = vmax.f32 %v6402_v3, 0.0  ;;  %v6403_v24 = vadd.f32 %v19176_v11, %v6333_v59 }
 0x48c   :  { %6532 = vst.msk [vmem:[#allocation3 + $0x10] sm:$0xff] %vm5051_vm6, %v6468_v18  ;;  %v6469_v38 = vmax.f32 %v6405_v2, 0.0  ;;  %v15586_v2 = vld [vmem:[%s21652_s7 + $0xb8] sm:$0xff]  }
 0x48d   :  { %6530 = vst.msk [vmem:[#allocation3] sm:$0xff] %vm5051_vm6, %v6466_v32  ;;  %v6467_v42 = vmax.f32 %v6403_v24, 0.0  ;;  %v14683_v16 = vpop.f32.mrb[228].mxu1  ;;  %7237 = vmatpush1.bf16.msra.mxu1 %v15586_v2 }
 0x48e   :  { %6533 = vst.msk [vmem:[#allocation3 + $0x18] sm:$0xff] %vm5051_vm6, %v6469_v38  ;;  %v6338_v49 = vmul.f32 %v14683_v16, %v19171_v34  ;;  %v6023_v44 = vpop.f32.mrb[229].mxu1  ;;  %7431 = vmatprep.subr.bf16.mxu1 %v16449_v35 }
 0x48f   :  { %6531 = vst.msk [vmem:[#allocation3 + $0x8] sm:$0xff] %vm5051_vm6, %v6467_v42  ;;  %v6336_v5 = vmul.f32 %v19171_v34, %v6023_v44  ;;  %v14684_v17 = vpop.f32.mrb[230].mxu1 }
 0x490   :  { %v6408_v4 = vadd.f32 %v19176_v11, %v6338_v49  ;;  %v6339_v39 = vmul.f32 %v14684_v17, %v19171_v34  ;;  %v6026_v15 = vpop.f32.mrb[231].mxu1 }
 0x491   :  { %v6406_v36 = vadd.f32 %v19176_v11, %v6336_v5  ;;  %v6337_v50 = vmul.f32 %v19171_v34, %v6026_v15 }
 0x492   :  { %v6472_v14 = vmax.f32 %v6408_v4, 0.0  ;;  %v6409_v10 = vadd.f32 %v19176_v11, %v6339_v39 }
 0x493   :  { %v6470_v61 = vmax.f32 %v6406_v36, 0.0  ;;  %v6407_v1 = vadd.f32 %v19176_v11, %v6337_v50 }
 0x494   :  { %6536 = vst.msk [vmem:[#allocation3 + $0x30] sm:$0xff] %vm5051_vm6, %v6472_v14  ;;  %v6473_v33 = vmax.f32 %v6409_v10, 0.0 }
 0x495   :  { %6534 = vst.msk [vmem:[#allocation3 + $0x20] sm:$0xff] %vm5051_vm6, %v6470_v61  ;;  %v6471_v47 = vmax.f32 %v6407_v1, 0.0  ;;  %v14687_v48 = vpop.f32.mrb[232].mxu1  ;;  %v6596_v54 = vld [vmem:[#allocation3 + $0x10] ss:$2 sm:$0xff] }
 0x496   :  { %v6660_v56 = vld [vmem:[#allocation3 + $0x11] ss:$2 sm:$0xff]  ;;  %6537 = vst.msk [vmem:[#allocation3 + $0x38] sm:$0xff] %vm5051_vm6, %v6473_v33  ;;  %v6342_v31 = vmul.f32 %v14687_v48, %v19171_v34  ;;  %v6039_v19 = vpop.f32.mrb[233].mxu1  ;;  %v6594_v27 = vld [vmem:[#allocation3] ss:$2 sm:$0xff] }
 0x497   :  { %v6658_v23 = vld [vmem:[#allocation3 + $0x1] ss:$2 sm:$0xff]  ;;  %6535 = vst.msk [vmem:[#allocation3 + $0x28] sm:$0xff] %vm5051_vm6, %v6471_v47  ;;  %v6340_v40 = vmul.f32 %v19171_v34, %v6039_v19  ;;  %v14688_v26 = vpop.f32.mrb[234].mxu1  ;;  %v6722_v55 = vmax.f32 %v6596_v54, %v6660_v56 }
 0x498   :  { %v6412_v52 = vadd.f32 %v19176_v11, %v6342_v31  ;;  %v6343_v28 = vmul.f32 %v14688_v26, %v19171_v34  ;;  %v6042_v41 = vpop.f32.mrb[235].mxu1  ;;  %v6721_v8 = vmax.f32 %v6594_v27, %v6658_v23 }
 0x499   :  { %v6410_v60 = vadd.f32 %v19176_v11, %v6340_v40  ;;  %v6341_v9 = vmul.f32 %v19171_v34, %v6042_v41 }
 0x49a   :  { %v6476_v37 = vmax.f32 %v6412_v52, 0.0  ;;  %v6413_v13 = vadd.f32 %v19176_v11, %v6343_v28  ;;  %v19239_v46 = vmax.f32 %v6721_v8, %v6722_v55 }
 0x49b   :  { %v6474_v53 = vmax.f32 %v6410_v60, 0.0  ;;  %v6411_v21 = vadd.f32 %v19176_v11, %v6341_v9 }
 0x49c   :  { %6540 = vst.msk [vmem:[#allocation3 + $0x50] sm:$0xff] %vm5051_vm6, %v6476_v37  ;;  %v6477_v29 = vmax.f32 %v6413_v13, 0.0  ;;  %v6835_v49 = vrot.slane %v19239_v46, 1 }
 0x49d   :  { %6538 = vst.msk [vmem:[#allocation3 + $0x40] sm:$0xff] %vm5051_vm6, %v6474_v53  ;;  %v6475_v7 = vmax.f32 %v6411_v21, 0.0  ;;  %v14691_v43 = vpop.f32.mrb[236].mxu1  ;;  %v6600_v51 = vld [vmem:[#allocation3 + $0x30] ss:$2 sm:$0xff] }
 0x49e   :  { %v6664_v57 = vld [vmem:[#allocation3 + $0x31] ss:$2 sm:$0xff]  ;;  %6541 = vst.msk [vmem:[#allocation3 + $0x58] sm:$0xff] %vm5051_vm6, %v6477_v29  ;;  %v6346_v58 = vmul.f32 %v14691_v43, %v19171_v34  ;;  %v6055_v45 = vpop.f32.mrb[237].mxu1  ;;  %v6598_v6 = vld [vmem:[#allocation3 + $0x20] ss:$2 sm:$0xff] }
 0x49f   :  { %v6662_v30 = vld [vmem:[#allocation3 + $0x21] ss:$2 sm:$0xff]  ;;  %v6724_v0 = vmax.f32 %v6600_v51, %v6664_v57  ;;  %6539 = vst.msk [vmem:[#allocation3 + $0x48] sm:$0xff] %vm5051_vm6, %v6475_v7  ;;  %v6344_v3 = vmul.f32 %v19171_v34, %v6055_v45  ;;  %v14692_v59 = vpop.f32.mrb[238].mxu1  ;;  %v19266_v14 = vsel %vm4410_vm4, %v6835_v49, 0.0 }
 0x4a0   :  { %v6723_v18 = vmax.f32 %v6598_v6, %v6662_v30  ;;  %v6416_v32 = vadd.f32 %v19176_v11, %v6346_v58  ;;  %v6347_v24 = vmul.f32 %v14692_v59, %v19171_v34  ;;  %v6058_v63 = vpop.f32.mrb[239].mxu1 }
 0x4a1   :  { %v6414_v38 = vadd.f32 %v19176_v11, %v6344_v3  ;;  %v6345_v42 = vmul.f32 %v19171_v34, %v6058_v63 }
 0x4a2   :  { %v19253_v16 = vmax.f32 %v6723_v18, %v6724_v0  ;;  %v6480_v44 = vmax.f32 %v6416_v32, 0.0  ;;  %v6417_v5 = vadd.f32 %v19176_v11, %v6347_v24 }
 0x4a3   :  { %v6478_v17 = vmax.f32 %v6414_v38, 0.0  ;;  %v6415_v22 = vadd.f32 %v19176_v11, %v6345_v42 }
 0x4a4   :  { %v15387_v4 = vpack.i.bf16 %v19253_v16, %v19239_v46  ;;  %v6836_v39 = vrot.slane %v19253_v16, 1  ;;  %6544 = vst.msk [vmem:[#allocation3 + $0x70] sm:$0xff] %vm5051_vm6, %v6480_v44  ;;  %v6481_v15 = vmax.f32 %v6417_v5, 0.0 }
 0x4a5   :  { %6542 = vst.msk [vmem:[#allocation3 + $0x60] sm:$0xff] %vm5051_vm6, %v6478_v17  ;;  %v6479_v36 = vmax.f32 %v6415_v22, 0.0  ;;  %v14695_v50 = vpop.f32.mrb[240].mxu1  ;;  %v6604_v61 = vld [vmem:[#allocation3 + $0x50] ss:$2 sm:$0xff] }
 0x4a6   :  { %15388 = vrot.lane.b32.xlu0 %v15387_v4, %s16447_s15  ;;  %v6868_v10 = vsel %vm4410_vm4, %v6836_v39, 0.0  ;;  %6545 = vst.msk [vmem:[#allocation3 + $0x78] sm:$0xff] %vm5051_vm6, %v6481_v15  ;;  %v6350_v1 = vmul.f32 %v14695_v50, %v19171_v34  ;;  %v6071_v20 = vpop.f32.mrb[241].mxu1  ;;  %v6602_v47 = vld [vmem:[#allocation3 + $0x40] ss:$2 sm:$0xff] }
 0x4a7   :  { %v13938_v33 = vpack.c.bf16 %v6868_v10, %v19266_v14  ;;  %v6666_v48 = vld [vmem:[#allocation3 + $0x41] ss:$2 sm:$0xff]  ;;  %6543 = vst.msk [vmem:[#allocation3 + $0x68] sm:$0xff] %vm5051_vm6, %v6479_v36  ;;  %v6348_v54 = vmul.f32 %v19171_v34, %v6071_v20  ;;  %v14696_v56 = vpop.f32.mrb[242].mxu1  ;;  %v6668_v31 = vld [vmem:[#allocation3 + $0x51] ss:$2 sm:$0xff] }
 0x4a8   :  { %v6725_v19 = vmax.f32 %v6602_v47, %v6666_v48  ;;  %v6420_v27 = vadd.f32 %v19176_v11, %v6350_v1  ;;  %v6351_v23 = vmul.f32 %v14696_v56, %v19171_v34  ;;  %v6074_v40 = vpop.f32.mrb[243].mxu1  ;;  %v6726_v26 = vmax.f32 %v6604_v61, %v6668_v31 }
 0x4a9   :  { %13298 = vmatprep.mubr.msk.bf16.mxu1 %vm5051_vm6, %v13938_v33  ;;  %v6418_v12 = vadd.f32 %v19176_v11, %v6348_v54  ;;  %v6349_v52 = vmul.f32 %v19171_v34, %v6074_v40 }
 0x4aa   :  { %v6484_v28 = vmax.f32 %v6420_v27, 0.0  ;;  %v6421_v41 = vadd.f32 %v19176_v11, %v6351_v23  ;;  %v19280_v60 = vmax.f32 %v6725_v19, %v6726_v26 }
 0x4ab   :  { %v6482_v9 = vmax.f32 %v6418_v12, 0.0  ;;  %v6419_v8 = vadd.f32 %v19176_v11, %v6349_v52 }
 0x4ac   :  { %6548 = vst.msk [vmem:[#allocation3 + $0x90] sm:$0xff] %vm5051_vm6, %v6484_v28  ;;  %v6485_v55 = vmax.f32 %v6421_v41, 0.0  ;;  %v6837_v37 = vrot.slane %v19280_v60, 1 }
 0x4ad   :  { %6546 = vst.msk [vmem:[#allocation3 + $0x80] sm:$0xff] %vm5051_vm6, %v6482_v9  ;;  %v6483_v13 = vmax.f32 %v6419_v8, 0.0  ;;  %v14699_v53 = vpop.f32.mrb[244].mxu1  ;;  %v6608_v21 = vld [vmem:[#allocation3 + $0x70] ss:$2 sm:$0xff] }
 0x4ae   :  { %v6672_v62 = vld [vmem:[#allocation3 + $0x71] ss:$2 sm:$0xff]  ;;  %6549 = vst.msk [vmem:[#allocation3 + $0x98] sm:$0xff] %vm5051_vm6, %v6485_v55  ;;  %v6354_v29 = vmul.f32 %v14699_v53, %v19171_v34  ;;  %v6087_v7 = vpop.f32.mrb[245].mxu1  ;;  %v6606_v43 = vld [vmem:[#allocation3 + $0x60] ss:$2 sm:$0xff] }
 0x4af   :  { %v6670_v51 = vld [vmem:[#allocation3 + $0x61] ss:$2 sm:$0xff]  ;;  %v6728_v57 = vmax.f32 %v6608_v21, %v6672_v62  ;;  %v19289_v58 = vsel %vm4410_vm4, %v6837_v37, 0.0  ;;  %6547 = vst.msk [vmem:[#allocation3 + $0x88] sm:$0xff] %vm5051_vm6, %v6483_v13  ;;  %v6352_v45 = vmul.f32 %v19171_v34, %v6087_v7  ;;  %v14700_v6 = vpop.f32.mrb[246].mxu1 }
 0x4b0   :  { %v6727_v30 = vmax.f32 %v6606_v43, %v6670_v51  ;;  %v19294_v0 = vpack.c.bf16 %v19289_v58, %v6868_v10  ;;  %v6424_v3 = vadd.f32 %v19176_v11, %v6354_v29  ;;  %v6355_v59 = vmul.f32 %v14700_v6, %v19171_v34  ;;  %v6090_v18 = vpop.f32.mrb[247].mxu1 }
 0x4b1   :  { %v6422_v2 = vadd.f32 %v19176_v11, %v6352_v45  ;;  %v6353_v32 = vmul.f32 %v19171_v34, %v6090_v18 }
 0x4b2   :  { %v19300_v24 = vmax.f32 %v6727_v30, %v6728_v57  ;;  %v6488_v63 = vmax.f32 %v6424_v3, 0.0  ;;  %v6425_v38 = vadd.f32 %v19176_v11, %v6355_v59 }
 0x4b3   :  { %v6486_v42 = vmax.f32 %v6422_v2, 0.0  ;;  %v6423_v49 = vadd.f32 %v19176_v11, %v6353_v32 }
 0x4b4   :  { %v15392_v44 = vpack.i.bf16 %v19300_v24, %v19280_v60  ;;  %v6838_v5 = vrot.slane %v19300_v24, 1  ;;  %6552 = vst.msk [vmem:[#allocation3 + $0xb0] sm:$0xff] %vm5051_vm6, %v6488_v63  ;;  %v6489_v17 = vmax.f32 %v6425_v38, 0.0 }
 0x4b5   :  { %6550 = vst.msk [vmem:[#allocation3 + $0xa0] sm:$0xff] %vm5051_vm6, %v6486_v42  ;;  %v6487_v22 = vmax.f32 %v6423_v49, 0.0  ;;  %v14703_v4 = vpop.f32.mrb[248].mxu1  ;;  %v6612_v39 = vld [vmem:[#allocation3 + $0x90] ss:$2 sm:$0xff] }
 0x4b6   :  { %15393 = vrot.lane.b32.xlu1 %v15392_v44, %s16447_s15  ;;  %v6676_v15 = vld [vmem:[#allocation3 + $0x91] ss:$2 sm:$0xff]  ;;  %6553 = vst.msk [vmem:[#allocation3 + $0xb8] sm:$0xff] %vm5051_vm6, %v6489_v17  ;;  %v6358_v36 = vmul.f32 %v14703_v4, %v19171_v34  ;;  %v6103_v50 = vpop.f32.mrb[249].mxu1  ;;  %v6610_v10 = vld [vmem:[#allocation3 + $0x80] ss:$2 sm:$0xff] }
 0x4b7   :  { %v6674_v61 = vld [vmem:[#allocation3 + $0x81] ss:$2 sm:$0xff]  ;;  %v6730_v1 = vmax.f32 %v6612_v39, %v6676_v15  ;;  %v19313_v20 = vsel %vm4410_vm4, %v6838_v5, 0.0  ;;  %6551 = vst.msk [vmem:[#allocation3 + $0xa8] sm:$0xff] %vm5051_vm6, %v6487_v22  ;;  %v6356_v33 = vmul.f32 %v19171_v34, %v6103_v50  ;;  %v14704_v47 = vpop.f32.mrb[250].mxu1 }
 0x4b8   :  { %v6729_v48 = vmax.f32 %v6610_v10, %v6674_v61  ;;  %v13940_v54 = vpack.c.bf16 %v19313_v20, %v19289_v58  ;;  %v6428_v56 = vadd.f32 %v19176_v11, %v6358_v36  ;;  %v6359_v31 = vmul.f32 %v14704_v47, %v19171_v34  ;;  %v6106_v19 = vpop.f32.mrb[251].mxu1 }
 0x4b9   :  { %v6426_v27 = vadd.f32 %v19176_v11, %v6356_v33  ;;  %v6357_v23 = vmul.f32 %v19171_v34, %v6106_v19  ;;  %v6790_v58 = vrot.slane %v19300_v24, 7  ;;  %v15591_v24 = vld [vmem:[%s21652_s7 + $0x20] sm:$0xff]  }
 0x4ba   :  { %v19323_v40 = vmax.f32 %v6729_v48, %v6730_v1  ;;  %v6492_v26 = vmax.f32 %v6428_v56, 0.0  ;;  %v6429_v12 = vadd.f32 %v19176_v11, %v6359_v31 }
 0x4bb   :  { %v6490_v52 = vmax.f32 %v6426_v27, 0.0  ;;  %v6427_v28 = vadd.f32 %v19176_v11, %v6357_v23 }
 0x4bc   :  { %v6839_v41 = vrot.slane %v19323_v40, 1  ;;  %6556 = vst.msk [vmem:[#allocation3 + $0xd0] sm:$0xff] %vm5051_vm6, %v6492_v26  ;;  %v6493_v9 = vmax.f32 %v6429_v12, 0.0 }
 0x4bd   :  { %6554 = vst.msk [vmem:[#allocation3 + $0xc0] sm:$0xff] %vm5051_vm6, %v6490_v52  ;;  %v6491_v8 = vmax.f32 %v6427_v28, 0.0  ;;  %v14707_v55 = vpop.f32.mrb[252].mxu1  ;;  %v6616_v37 = vld [vmem:[#allocation3 + $0xb0] ss:$2 sm:$0xff] }
 0x4be   :  { %v6680_v13 = vld [vmem:[#allocation3 + $0xb1] ss:$2 sm:$0xff]  ;;  %6557 = vst.msk [vmem:[#allocation3 + $0xd8] sm:$0xff] %vm5051_vm6, %v6493_v9  ;;  %v6362_v53 = vmul.f32 %v14707_v55, %v19171_v34  ;;  %v6119_v21 = vpop.f32.mrb[253].mxu1  ;;  %v6614_v62 = vld [vmem:[#allocation3 + $0xa0] ss:$2 sm:$0xff] }
 0x4bf   :  { %v6678_v29 = vld [vmem:[#allocation3 + $0xa1] ss:$2 sm:$0xff]  ;;  %v6732_v7 = vmax.f32 %v6616_v37, %v6680_v13  ;;  %v19333_v43 = vsel %vm4410_vm4, %v6839_v41, 0.0  ;;  %6555 = vst.msk [vmem:[#allocation3 + $0xc8] sm:$0xff] %vm5051_vm6, %v6491_v8  ;;  %v6360_v51 = vmul.f32 %v19171_v34, %v6119_v21  ;;  %v14708_v57 = vpop.f32.mrb[254].mxu1 }
 0x4c0   :  { %v6731_v45 = vmax.f32 %v6614_v62, %v6678_v29  ;;  %v19339_v6 = vpack.c.bf16 %v19333_v43, %v19313_v20  ;;  %v6432_v30 = vadd.f32 %v19176_v11, %v6362_v53  ;;  %v6363_v3 = vmul.f32 %v14708_v57, %v19171_v34  ;;  %v6122_v59 = vpop.f32.mrb[255].mxu1  ;;  %v15590_v20 = vld [vmem:[%s21652_s7 + $0x18] sm:$0xff]  }
 0x4c1   :  { %v6430_v18 = vadd.f32 %v19176_v11, %v6360_v51  ;;  %v6361_v2 = vmul.f32 %v19171_v34, %v6122_v59 }
 0x4c2   :  { %v19345_v32 = vmax.f32 %v6731_v45, %v6732_v7  ;;  %v6496_v63 = vmax.f32 %v6432_v30, 0.0  ;;  %v6433_v38 = vadd.f32 %v19176_v11, %v6363_v3 }
 0x4c3   :  { %v6494_v42 = vmax.f32 %v6430_v18, 0.0  ;;  %v6431_v49 = vadd.f32 %v19176_v11, %v6361_v2 }
 0x4c4   :  { %v15397_v44 = vpack.i.bf16 %v19345_v32, %v19323_v40  ;;  %v6840_v5 = vrot.slane %v19345_v32, 1  ;;  %6560 = vst.msk [vmem:[#allocation3 + $0xf0] sm:$0xff] %vm5051_vm6, %v6496_v63  ;;  %v6497_v17 = vmax.f32 %v6433_v38, 0.0 }
 0x4c5   :  { %6558 = vst.msk [vmem:[#allocation3 + $0xe0] sm:$0xff] %vm5051_vm6, %v6494_v42  ;;  %v6495_v22 = vmax.f32 %v6431_v49, 0.0  ;;  %v14711_v4 = vpop.f32.mrb[0].mxu1  ;;  %v6620_v39 = vld [vmem:[#allocation3 + $0xd0] ss:$2 sm:$0xff] }
 0x4c6   :  { %15398 = vrot.lane.b32.xlu0 %v15397_v44, %s16447_s15  ;;  %v6684_v15 = vld [vmem:[#allocation3 + $0xd1] ss:$2 sm:$0xff]  ;;  %6561 = vst.msk [vmem:[#allocation3 + $0xf8] sm:$0xff] %vm5051_vm6, %v6497_v17  ;;  %v6366_v36 = vmul.f32 %v14711_v4, %v19171_v34  ;;  %v6135_v50 = vpop.f32.mrb[1].mxu1  ;;  %v6618_v10 = vld [vmem:[#allocation3 + $0xc0] ss:$2 sm:$0xff] }
 0x4c7   :  { %v6682_v61 = vld [vmem:[#allocation3 + $0xc1] ss:$2 sm:$0xff]  ;;  %v6734_v1 = vmax.f32 %v6620_v39, %v6684_v15  ;;  %v19358_v33 = vsel %vm4410_vm4, %v6840_v5, 0.0  ;;  %6559 = vst.msk [vmem:[#allocation3 + $0xe8] sm:$0xff] %vm5051_vm6, %v6495_v22  ;;  %v6364_v47 = vmul.f32 %v19171_v34, %v6135_v50  ;;  %v14712_v48 = vpop.f32.mrb[2].mxu1 }
 0x4c8   :  { %v6733_v56 = vmax.f32 %v6618_v10, %v6682_v61  ;;  %v13942_v31 = vpack.c.bf16 %v19358_v33, %v19333_v43  ;;  %v6436_v19 = vadd.f32 %v19176_v11, %v6366_v36  ;;  %v6367_v27 = vmul.f32 %v14712_v48, %v19171_v34  ;;  %v6138_v23 = vpop.f32.mrb[3].mxu1 }
 0x4c9   :  { %v6434_v26 = vadd.f32 %v19176_v11, %v6364_v47  ;;  %v6365_v12 = vmul.f32 %v19171_v34, %v6138_v23  ;;  %v6792_v43 = vrot.slane %v19345_v32, 7  ;;  %v15595_v32 = vld [vmem:[%s21652_s7 + $0x40] sm:$0xff]  }
 0x4ca   :  { %v19368_v52 = vmax.f32 %v6733_v56, %v6734_v1  ;;  %v6500_v28 = vmax.f32 %v6436_v19, 0.0  ;;  %v6437_v41 = vadd.f32 %v19176_v11, %v6367_v27 }
 0x4cb   :  { %v6498_v9 = vmax.f32 %v6434_v26, 0.0  ;;  %v6435_v8 = vadd.f32 %v19176_v11, %v6365_v12 }
 0x4cc   :  { %v6841_v55 = vrot.slane %v19368_v52, 1  ;;  %6564 = vst.msk [vmem:[#allocation3 + $0x110] sm:$0xff] %vm5051_vm6, %v6500_v28  ;;  %v6501_v37 = vmax.f32 %v6437_v41, 0.0 }
 0x4cd   :  { %6562 = vst.msk [vmem:[#allocation3 + $0x100] sm:$0xff] %vm5051_vm6, %v6498_v9  ;;  %v6499_v13 = vmax.f32 %v6435_v8, 0.0  ;;  %v14715_v53 = vpop.f32.mrb[4].mxu1  ;;  %v6624_v21 = vld [vmem:[#allocation3 + $0xf0] ss:$2 sm:$0xff] }
 0x4ce   :  { %v6688_v62 = vld [vmem:[#allocation3 + $0xf1] ss:$2 sm:$0xff]  ;;  %6565 = vst.msk [vmem:[#allocation3 + $0x118] sm:$0xff] %vm5051_vm6, %v6501_v37  ;;  %v6370_v29 = vmul.f32 %v14715_v53, %v19171_v34  ;;  %v6151_v7 = vpop.f32.mrb[5].mxu1  ;;  %v6622_v51 = vld [vmem:[#allocation3 + $0xe0] ss:$2 sm:$0xff] }
 0x4cf   :  { %v6686_v57 = vld [vmem:[#allocation3 + $0xe1] ss:$2 sm:$0xff]  ;;  %v6736_v45 = vmax.f32 %v6624_v21, %v6688_v62  ;;  %v19378_v30 = vsel %vm4410_vm4, %v6841_v55, 0.0  ;;  %6563 = vst.msk [vmem:[#allocation3 + $0x108] sm:$0xff] %vm5051_vm6, %v6499_v13  ;;  %v6368_v3 = vmul.f32 %v19171_v34, %v6151_v7  ;;  %v14716_v59 = vpop.f32.mrb[6].mxu1 }
 0x4d0   :  { %v6735_v18 = vmax.f32 %v6622_v51, %v6686_v57  ;;  %v19384_v2 = vpack.c.bf16 %v19378_v30, %v19358_v33  ;;  %v6440_v63 = vadd.f32 %v19176_v11, %v6370_v29  ;;  %v6371_v38 = vmul.f32 %v14716_v59, %v19171_v34  ;;  %v6154_v42 = vpop.f32.mrb[7].mxu1  ;;  %v15594_v33 = vld [vmem:[%s21652_s7 + $0x38] sm:$0xff]  }
 0x4d1   :  { %v6438_v49 = vadd.f32 %v19176_v11, %v6368_v3  ;;  %v6369_v44 = vmul.f32 %v19171_v34, %v6154_v42 }
 0x4d2   :  { %v19390_v5 = vmax.f32 %v6735_v18, %v6736_v45  ;;  %v6504_v17 = vmax.f32 %v6440_v63, 0.0  ;;  %v6441_v22 = vadd.f32 %v19176_v11, %v6371_v38 }
 0x4d3   :  { %v6502_v4 = vmax.f32 %v6438_v49, 0.0  ;;  %v6439_v39 = vadd.f32 %v19176_v11, %v6369_v44 }
 0x4d4   :  { %v15402_v15 = vpack.i.bf16 %v19390_v5, %v19368_v52  ;;  %v6842_v36 = vrot.slane %v19390_v5, 1  ;;  %6568 = vst.msk [vmem:[#allocation3 + $0x130] sm:$0xff] %vm5051_vm6, %v6504_v17  ;;  %v6505_v50 = vmax.f32 %v6441_v22, 0.0 }
 0x4d5   :  { %6566 = vst.msk [vmem:[#allocation3 + $0x120] sm:$0xff] %vm5051_vm6, %v6502_v4  ;;  %v6503_v10 = vmax.f32 %v6439_v39, 0.0  ;;  %v14719_v61 = vpop.f32.mrb[8].mxu1  ;;  %v6628_v1 = vld [vmem:[#allocation3 + $0x110] ss:$2 sm:$0xff] }
 0x4d6   :  { %15403 = vrot.lane.b32.xlu1 %v15402_v15, %s16447_s15  ;;  %v6692_v47 = vld [vmem:[#allocation3 + $0x111] ss:$2 sm:$0xff]  ;;  %6569 = vst.msk [vmem:[#allocation3 + $0x138] sm:$0xff] %vm5051_vm6, %v6505_v50  ;;  %v6374_v48 = vmul.f32 %v14719_v61, %v19171_v34  ;;  %v6167_v56 = vpop.f32.mrb[9].mxu1  ;;  %v6626_v19 = vld [vmem:[#allocation3 + $0x100] ss:$2 sm:$0xff] }
 0x4d7   :  { %v6690_v27 = vld [vmem:[#allocation3 + $0x101] ss:$2 sm:$0xff]  ;;  %v19403_v23 = vsel %vm4410_vm4, %v6842_v36, 0.0  ;;  %6567 = vst.msk [vmem:[#allocation3 + $0x128] sm:$0xff] %vm5051_vm6, %v6503_v10  ;;  %v6372_v26 = vmul.f32 %v19171_v34, %v6167_v56  ;;  %v14720_v12 = vpop.f32.mrb[10].mxu1  ;;  %v6738_v37 = vmax.f32 %v6628_v1, %v6692_v47 }
 0x4d8   :  { %v13944_v28 = vpack.c.bf16 %v19403_v23, %v19378_v30  ;;  %v6444_v41 = vadd.f32 %v19176_v11, %v6374_v48  ;;  %v6375_v9 = vmul.f32 %v14720_v12, %v19171_v34  ;;  %v6170_v8 = vpop.f32.mrb[11].mxu1  ;;  %v6737_v55 = vmax.f32 %v6626_v19, %v6690_v27 }
 0x4d9   :  { %v6442_v13 = vadd.f32 %v19176_v11, %v6372_v26  ;;  %v6373_v53 = vmul.f32 %v19171_v34, %v6170_v8  ;;  %v6794_v30 = vrot.slane %v19390_v5, 7 }
 0x4da   :  { %v6508_v21 = vmax.f32 %v6444_v41, 0.0  ;;  %v6445_v62 = vadd.f32 %v19176_v11, %v6375_v9  ;;  %v19416_v57 = vmax.f32 %v6737_v55, %v6738_v37 }
 0x4db   :  { %v6506_v29 = vmax.f32 %v6442_v13, 0.0  ;;  %v6443_v7 = vadd.f32 %v19176_v11, %v6373_v53 }
 0x4dc   :  { %6572 = vst.msk [vmem:[#allocation3 + $0x150] sm:$0xff] %vm5051_vm6, %v6508_v21  ;;  %v6509_v51 = vmax.f32 %v6445_v62, 0.0  ;;  %v6843_v50 = vrot.slane %v19416_v57, 1 }
 0x4dd   :  { %6570 = vst.msk [vmem:[#allocation3 + $0x140] sm:$0xff] %vm5051_vm6, %v6506_v29  ;;  %v6507_v45 = vmax.f32 %v6443_v7, 0.0  ;;  %v14723_v3 = vpop.f32.mrb[12].mxu1  ;;  %v6632_v59 = vld [vmem:[#allocation3 + $0x130] ss:$2 sm:$0xff] }
 0x4de   :  { %v6696_v18 = vld [vmem:[#allocation3 + $0x131] ss:$2 sm:$0xff]  ;;  %6573 = vst.msk [vmem:[#allocation3 + $0x158] sm:$0xff] %vm5051_vm6, %v6509_v51  ;;  %v6378_v63 = vmul.f32 %v14723_v3, %v19171_v34  ;;  %v6183_v38 = vpop.f32.mrb[13].mxu1  ;;  %v6630_v42 = vld [vmem:[#allocation3 + $0x120] ss:$2 sm:$0xff] }
 0x4df   :  { %v6694_v49 = vld [vmem:[#allocation3 + $0x121] ss:$2 sm:$0xff]  ;;  %v6740_v44 = vmax.f32 %v6632_v59, %v6696_v18  ;;  %6571 = vst.msk [vmem:[#allocation3 + $0x148] sm:$0xff] %vm5051_vm6, %v6507_v45  ;;  %v6376_v17 = vmul.f32 %v19171_v34, %v6183_v38  ;;  %v14724_v22 = vpop.f32.mrb[14].mxu1  ;;  %v19437_v41 = vsel %vm4410_vm4, %v6843_v50, 0.0 }
 0x4e0   :  { %v6739_v4 = vmax.f32 %v6630_v42, %v6694_v49  ;;  %v6448_v39 = vadd.f32 %v19176_v11, %v6378_v63  ;;  %v6379_v15 = vmul.f32 %v14724_v22, %v19171_v34  ;;  %v6186_v36 = vpop.f32.mrb[15].mxu1 }
 0x4e1   :  { %v6446_v10 = vadd.f32 %v19176_v11, %v6376_v17  ;;  %v6377_v61 = vmul.f32 %v19171_v34, %v6186_v36 }
 0x4e2   :  { %v19428_v1 = vmax.f32 %v6739_v4, %v6740_v44  ;;  %v6512_v47 = vmax.f32 %v6448_v39, 0.0  ;;  %v6449_v48 = vadd.f32 %v19176_v11, %v6379_v15 }
 0x4e3   :  { %v6510_v56 = vmax.f32 %v6446_v10, 0.0  ;;  %v6447_v19 = vadd.f32 %v19176_v11, %v6377_v61 }
 0x4e4   :  { %v15407_v27 = vpack.i.bf16 %v19428_v1, %v19416_v57  ;;  %v6844_v26 = vrot.slane %v19428_v1, 1  ;;  %6576 = vst.msk [vmem:[#allocation3 + $0x170] sm:$0xff] %vm5051_vm6, %v6512_v47  ;;  %v6513_v12 = vmax.f32 %v6449_v48, 0.0 }
 0x4e5   :  { %6574 = vst.msk [vmem:[#allocation3 + $0x160] sm:$0xff] %vm5051_vm6, %v6510_v56  ;;  %v6511_v9 = vmax.f32 %v6447_v19, 0.0  ;;  %v14727_v8 = vpop.f32.mrb[16].mxu1  ;;  %v6636_v55 = vld [vmem:[#allocation3 + $0x150] ss:$2 sm:$0xff] }
 0x4e6   :  { %15408 = vrot.lane.b32.xlu0 %v15407_v27, %s16447_s15  ;;  %v6700_v37 = vld [vmem:[#allocation3 + $0x151] ss:$2 sm:$0xff]  ;;  %6577 = vst.msk [vmem:[#allocation3 + $0x178] sm:$0xff] %vm5051_vm6, %v6513_v12  ;;  %v6382_v13 = vmul.f32 %v14727_v8, %v19171_v34  ;;  %v6199_v53 = vpop.f32.mrb[17].mxu1  ;;  %v6634_v21 = vld [vmem:[#allocation3 + $0x140] ss:$2 sm:$0xff] }
 0x4e7   :  { %v6698_v62 = vld [vmem:[#allocation3 + $0x141] ss:$2 sm:$0xff]  ;;  %v6742_v29 = vmax.f32 %v6636_v55, %v6700_v37  ;;  %v19444_v7 = vsel %vm4410_vm4, %v6844_v26, 0.0  ;;  %6575 = vst.msk [vmem:[#allocation3 + $0x168] sm:$0xff] %vm5051_vm6, %v6511_v9  ;;  %v6380_v51 = vmul.f32 %v19171_v34, %v6199_v53  ;;  %v14728_v45 = vpop.f32.mrb[18].mxu1 }
 0x4e8   :  { %v6741_v3 = vmax.f32 %v6634_v21, %v6698_v62  ;;  %v13946_v59 = vpack.c.bf16 %v19444_v7, %v19437_v41  ;;  %v6452_v18 = vadd.f32 %v19176_v11, %v6382_v13  ;;  %v6383_v63 = vmul.f32 %v14728_v45, %v19171_v34  ;;  %v6202_v38 = vpop.f32.mrb[19].mxu1 }
 0x4e9   :  { %v6450_v42 = vadd.f32 %v19176_v11, %v6380_v51  ;;  %v6381_v49 = vmul.f32 %v19171_v34, %v6202_v38 }
 0x4ea   :  { %v19454_v44 = vmax.f32 %v6741_v3, %v6742_v29  ;;  %v6516_v17 = vmax.f32 %v6452_v18, 0.0  ;;  %v6453_v22 = vadd.f32 %v19176_v11, %v6383_v63 }
 0x4eb   :  { %v6514_v4 = vmax.f32 %v6450_v42, 0.0  ;;  %v6451_v39 = vadd.f32 %v19176_v11, %v6381_v49 }
 0x4ec   :  { %v6845_v15 = vrot.slane %v19454_v44, 1  ;;  %6580 = vst.msk [vmem:[#allocation3 + $0x190] sm:$0xff] %vm5051_vm6, %v6516_v17  ;;  %v6517_v36 = vmax.f32 %v6453_v22, 0.0 }
 0x4ed   :  { %6578 = vst.msk [vmem:[#allocation3 + $0x180] sm:$0xff] %vm5051_vm6, %v6514_v4  ;;  %v6515_v50 = vmax.f32 %v6451_v39, 0.0  ;;  %v14731_v10 = vpop.f32.mrb[20].mxu1  ;;  %v6640_v61 = vld [vmem:[#allocation3 + $0x170] ss:$2 sm:$0xff] }
 0x4ee   :  { %v6704_v47 = vld [vmem:[#allocation3 + $0x171] ss:$2 sm:$0xff]  ;;  %6581 = vst.msk [vmem:[#allocation3 + $0x198] sm:$0xff] %vm5051_vm6, %v6517_v36  ;;  %v6386_v48 = vmul.f32 %v14731_v10, %v19171_v34  ;;  %v6215_v56 = vpop.f32.mrb[21].mxu1  ;;  %v6638_v19 = vld [vmem:[#allocation3 + $0x160] ss:$2 sm:$0xff] }
 0x4ef   :  { %v6702_v27 = vld [vmem:[#allocation3 + $0x161] ss:$2 sm:$0xff]  ;;  %v6744_v26 = vmax.f32 %v6640_v61, %v6704_v47  ;;  %v19464_v12 = vsel %vm4410_vm4, %v6845_v15, 0.0  ;;  %6579 = vst.msk [vmem:[#allocation3 + $0x188] sm:$0xff] %vm5051_vm6, %v6515_v50  ;;  %v6384_v9 = vmul.f32 %v19171_v34, %v6215_v56  ;;  %v14732_v8 = vpop.f32.mrb[22].mxu1 }
 0x4f0   :  { %v6743_v55 = vmax.f32 %v6638_v19, %v6702_v27  ;;  %v19470_v37 = vpack.c.bf16 %v19464_v12, %v19444_v7  ;;  %v6456_v13 = vadd.f32 %v19176_v11, %v6386_v48  ;;  %v6387_v53 = vmul.f32 %v14732_v8, %v19171_v34  ;;  %v6218_v21 = vpop.f32.mrb[23].mxu1 }
 0x4f1   :  { %v6454_v62 = vadd.f32 %v19176_v11, %v6384_v9  ;;  %v6385_v29 = vmul.f32 %v19171_v34, %v6218_v21 }
 0x4f2   :  { %v19476_v51 = vmax.f32 %v6743_v55, %v6744_v26  ;;  %v6520_v45 = vmax.f32 %v6456_v13, 0.0  ;;  %v6457_v3 = vadd.f32 %v19176_v11, %v6387_v53 }
 0x4f3   :  { %v6518_v18 = vmax.f32 %v6454_v62, 0.0  ;;  %v6455_v63 = vadd.f32 %v19176_v11, %v6385_v29 }
 0x4f4   :  { %v15412_v38 = vpack.i.bf16 %v19476_v51, %v19454_v44  ;;  %v6846_v42 = vrot.slane %v19476_v51, 1  ;;  %6584 = vst.msk [vmem:[#allocation3 + $0x1b0] sm:$0xff] %vm5051_vm6, %v6520_v45  ;;  %v6521_v49 = vmax.f32 %v6457_v3, 0.0 }
 0x4f5   :  { %6582 = vst.msk [vmem:[#allocation3 + $0x1a0] sm:$0xff] %vm5051_vm6, %v6518_v18  ;;  %v6519_v17 = vmax.f32 %v6455_v63, 0.0  ;;  %v14735_v22 = vpop.f32.mrb[24].mxu1  ;;  %v6644_v4 = vld [vmem:[#allocation3 + $0x190] ss:$2 sm:$0xff] }
 0x4f6   :  { %15413 = vrot.lane.b32.xlu1 %v15412_v38, %s16447_s15  ;;  %v6708_v39 = vld [vmem:[#allocation3 + $0x191] ss:$2 sm:$0xff]  ;;  %6585 = vst.msk [vmem:[#allocation3 + $0x1b8] sm:$0xff] %vm5051_vm6, %v6521_v49  ;;  %v6390_v15 = vmul.f32 %v14735_v22, %v19171_v34  ;;  %v6231_v36 = vpop.f32.mrb[25].mxu1  ;;  %v6642_v50 = vld [vmem:[#allocation3 + $0x180] ss:$2 sm:$0xff] }
 0x4f7   :  { %v6706_v10 = vld [vmem:[#allocation3 + $0x181] ss:$2 sm:$0xff]  ;;  %v6746_v61 = vmax.f32 %v6644_v4, %v6708_v39  ;;  %v19489_v47 = vsel %vm4410_vm4, %v6846_v42, 0.0  ;;  %6583 = vst.msk [vmem:[#allocation3 + $0x1a8] sm:$0xff] %vm5051_vm6, %v6519_v17  ;;  %v6388_v48 = vmul.f32 %v19171_v34, %v6231_v36  ;;  %v14736_v56 = vpop.f32.mrb[26].mxu1 }
 0x4f8   :  { %v6745_v19 = vmax.f32 %v6642_v50, %v6706_v10  ;;  %v13948_v27 = vpack.c.bf16 %v19489_v47, %v19464_v12  ;;  %v6460_v26 = vadd.f32 %v19176_v11, %v6390_v15  ;;  %v6391_v9 = vmul.f32 %v14736_v56, %v19171_v34  ;;  %v6234_v8 = vpop.f32.mrb[27].mxu1 }
 0x4f9   :  { %v6458_v55 = vadd.f32 %v19176_v11, %v6388_v48  ;;  %v6389_v13 = vmul.f32 %v19171_v34, %v6234_v8 }
 0x4fa   :  { %v19499_v53 = vmax.f32 %v6745_v19, %v6746_v61  ;;  %v6524_v21 = vmax.f32 %v6460_v26, 0.0  ;;  %v6461_v62 = vadd.f32 %v19176_v11, %v6391_v9 }
 0x4fb   :  { %v6522_v29 = vmax.f32 %v6458_v55, 0.0  ;;  %v6459_v45 = vadd.f32 %v19176_v11, %v6389_v13 }
 0x4fc   :  { %v6847_v3 = vrot.slane %v19499_v53, 1  ;;  %6588 = vst.msk [vmem:[#allocation3 + $0x1d0] sm:$0xff] %vm5051_vm6, %v6524_v21  ;;  %v6525_v18 = vmax.f32 %v6461_v62, 0.0 }
 0x4fd   :  { %6586 = vst.msk [vmem:[#allocation3 + $0x1c0] sm:$0xff] %vm5051_vm6, %v6522_v29  ;;  %v6523_v63 = vmax.f32 %v6459_v45, 0.0  ;;  %v14739_v38 = vpop.f32.mrb[28].mxu1  ;;  %v6648_v42 = vld [vmem:[#allocation3 + $0x1b0] ss:$2 sm:$0xff] }
 0x4fe   :  { %v6712_v49 = vld [vmem:[#allocation3 + $0x1b1] ss:$2 sm:$0xff]  ;;  %6589 = vst.msk [vmem:[#allocation3 + $0x1d8] sm:$0xff] %vm5051_vm6, %v6525_v18  ;;  %v6394_v17 = vmul.f32 %v14739_v38, %v19171_v34  ;;  %v6247_v22 = vpop.f32.mrb[29].mxu1  ;;  %v6646_v4 = vld [vmem:[#allocation3 + $0x1a0] ss:$2 sm:$0xff] }
 0x4ff   :  { %v6710_v39 = vld [vmem:[#allocation3 + $0x1a1] ss:$2 sm:$0xff]  ;;  %v6748_v15 = vmax.f32 %v6648_v42, %v6712_v49  ;;  %v19509_v36 = vsel %vm4410_vm4, %v6847_v3, 0.0  ;;  %6587 = vst.msk [vmem:[#allocation3 + $0x1c8] sm:$0xff] %vm5051_vm6, %v6523_v63  ;;  %v6392_v50 = vmul.f32 %v19171_v34, %v6247_v22  ;;  %v14740_v10 = vpop.f32.mrb[30].mxu1 }
 0x500   :  { %v6747_v61 = vmax.f32 %v6646_v4, %v6710_v39  ;;  %v19515_v48 = vpack.c.bf16 %v19509_v36, %v19489_v47  ;;  %v6464_v56 = vadd.f32 %v19176_v11, %v6394_v17  ;;  %v6395_v19 = vmul.f32 %v14740_v10, %v19171_v34  ;;  %v6250_v26 = vpop.f32.mrb[31].mxu1 }
 0x501   :  { %v6462_v9 = vadd.f32 %v19176_v11, %v6392_v50  ;;  %v6393_v8 = vmul.f32 %v19171_v34, %v6250_v26 }
 0x502   :  { %v19521_v55 = vmax.f32 %v6747_v61, %v6748_v15  ;;  %v6528_v13 = vmax.f32 %v6464_v56, 0.0  ;;  %v6465_v21 = vadd.f32 %v19176_v11, %v6395_v19 }
 0x503   :  { %v6526_v62 = vmax.f32 %v6462_v9, 0.0  ;;  %v6463_v29 = vadd.f32 %v19176_v11, %v6393_v8 }
 0x504   :  { %v15417_v45 = vpack.i.bf16 %v19521_v55, %v19499_v53  ;;  %v6848_v3 = vrot.slane %v19521_v55, 1  ;;  %6592 = vst.msk [vmem:[#allocation3 + $0x1f0] sm:$0xff] %vm5051_vm6, %v6528_v13  ;;  %v6529_v18 = vmax.f32 %v6465_v21, 0.0  ;;  %v6800_v12 = vrot.slane %v19521_v55, 7 }
 0x505   :  { %6590 = vst.msk [vmem:[#allocation3 + $0x1e0] sm:$0xff] %vm5051_vm6, %v6526_v62  ;;  %v6527_v63 = vmax.f32 %v6463_v29, 0.0  ;;  %v6652_v34 = vld [vmem:[#allocation3 + $0x1d0] ss:$2 sm:$0xff]  ;;  %v6716_v38 = vld [vmem:[#allocation3 + $0x1d1] ss:$2 sm:$0xff] }
 0x506   :  { %15418 = vrot.lane.b32.xlu0 %v15417_v45, %s16447_s15  ;;  %v19532_v42 = vsel %vm4410_vm4, %v6848_v3, 0.0  ;;  %6593 = vst.msk [vmem:[#allocation3 + $0x1f8] sm:$0xff] %vm5051_vm6, %v6529_v18  ;;  %v6650_v11 = vld [vmem:[#allocation3 + $0x1c0] ss:$2 sm:$0xff]  ;;  %v6714_v49 = vld [vmem:[#allocation3 + $0x1c1] ss:$2 sm:$0xff]  ;;  %v6750_v17 = vmax.f32 %v6652_v34, %v6716_v38 }
 0x507   :  { %v13950_v22 = vpack.c.bf16 %v19532_v42, %v19509_v36  ;;  %6591 = vst.msk [vmem:[#allocation3 + $0x1e8] sm:$0xff] %vm5051_vm6, %v6527_v63  ;;  %v6749_v4 = vmax.f32 %v6650_v11, %v6714_v49  ;;  %v6787_v29 = vrot.slane %v19239_v46, 7  ;;  %v6788_v45 = vrot.slane %v19253_v16, 7  ;;  %v15587_v16 = vld [vmem:[%s21652_s7] sm:$0xff]  }
 0x509   :  { %v19538_v39 = vmax.f32 %v6749_v4, %v6750_v17  ;;  %v6819_v11 = vsel %vm4217_vm5, 0.0, %v6787_v29  ;;  %v6820_v49 = vsel %vm4217_vm5, 0.0, %v6788_v45  ;;  %v15592_v45 = vld [vmem:[%s21652_s7 + $0x28] sm:$0xff]  }
 0x50b   :  { %v6849_v15 = vrot.slane %v19538_v39, 1 }
 0x50d   :  { %v6656_v50 = vld [vmem:[#allocation3 + $0x1f0] ss:$2 sm:$0xff]  ;;  %v6720_v10 = vld [vmem:[#allocation3 + $0x1f1] ss:$2 sm:$0xff]  ;;  %v19542_v61 = vsel %vm4410_vm4, %v6849_v15, 0.0  ;;  %v15588_v15 = vld [vmem:[%s21652_s7 + $0x8] sm:$0xff]  }
 0x50e   :  { %v6654_v56 = vld [vmem:[#allocation3 + $0x1e0] ss:$2 sm:$0xff]  ;;  %v6718_v19 = vld [vmem:[#allocation3 + $0x1e1] ss:$2 sm:$0xff]  ;;  %v6752_v26 = vmax.f32 %v6656_v50, %v6720_v10  ;;  %v19546_v9 = vpack.c.bf16 %v19542_v61, %v19532_v42  ;;  %v15589_v50 = vld [vmem:[%s21652_s7 + $0x10] sm:$0xff]   ;;  %v6789_v10 = vrot.slane %v19280_v60, 7 }
 0x50f   :  { %v6751_v8 = vmax.f32 %v6654_v56, %v6718_v19 }
 0x511   :  { %v19548_v13 = vmax.f32 %v6751_v8, %v6752_v26  ;;  %v6821_v26 = vsel %vm4217_vm5, 0.0, %v6789_v10  ;;  %v6822_v8 = vsel %vm4217_vm5, 0.0, %v6790_v58  ;;  %v15597_v10 = vld [vmem:[%s21652_s7 + $0x50] sm:$0xff]   ;;  %v6793_v58 = vrot.slane %v19368_v52, 7 }
 0x513   :  { %v15422_v21 = vpack.i.bf16 %v19548_v13, %v19538_v39  ;;  %v6850_v62 = vrot.slane %v19548_v13, 1  ;;  %v6802_v36 = vrot.slane %v19548_v13, 7 }
 0x515   :  { %15423 = vrot.lane.b32.xlu1 %v15422_v21, %s16447_s15  ;;  %v19557_v3 = vsel %vm4410_vm4, %v6850_v62, 0.0 }
 0x516   :  { %v13952_v18 = vpack.c.bf16 %v19557_v3, %v19542_v61 }
 0x518   :  { %v15389_v63 = vpop.permute.xlu0 %15388 }
 0x519   :  { %v15391_v34 = vunpack.i.h.bf16 %v15389_v63  ;;  %v15390_v38 = vunpack.i.l.bf16 %v15389_v63  ;;  %v15593_v63 = vld [vmem:[%s21652_s7 + $0x30] sm:$0xff]  }
 0x51b   :  { %v19564_v17 = vsel %vm5051_vm6, %v6819_v11, %v15390_v38  ;;  %v6932_v46 = vsel %vm5051_vm6, %v6820_v49, %v15391_v34  ;;  %v6791_v34 = vrot.slane %v19323_v40, 7 }
 0x51c   :  { %v13937_v4 = vpack.c.bf16 %v6932_v46, %v19564_v17 }
 0x51d   :  { %v6823_v49 = vsel %vm4217_vm5, 0.0, %v6791_v34 }
 0x51e   :  { %7247 = vmatmul.mubr.bf16.vlgmr.msra.gmra.mrb[32].mxu1 %v13937_v4 }
 0x51f   :  { %13299 = vmatprep.mubr.msk.bf16.mxu1 %vm5051_vm6, %v13940_v54  ;;  %7432 = vmatpush1.bf16.msra.mxu1 %v15587_v16 }
 0x520   :  { %7433 = vmatprep.subr.bf16.mxu1 %v16449_v35 }
 0x523   :  { %7434 = vmatpush1.bf16.msra.mxu1 %v15588_v15 }
 0x524   :  { %7435 = vmatprep.subr.bf16.mxu1 %v16449_v35 }
 0x527   :  { %7436 = vmatpush1.bf16.msra.mxu1 %v15589_v50  ;;  %v15596_v50 = vld [vmem:[%s21652_s7 + $0x48] sm:$0xff]  }
 0x528   :  { %v15394_v54 = vpop.permute.xlu1 %15393  ;;  %7437 = vmatprep.subr.bf16.mxu1 %v16449_v35 }
 0x529   :  { %v15396_v56 = vunpack.i.h.bf16 %v15394_v54  ;;  %v15395_v19 = vunpack.i.l.bf16 %v15394_v54 }
 0x52b   :  { %v6933_v21 = vsel %vm5051_vm6, %v6821_v26, %v15395_v19  ;;  %v6934_v60 = vsel %vm5051_vm6, %v6822_v8, %v15396_v56  ;;  %7438 = vmatpush1.bf16.msra.mxu1 %v15590_v20  ;;  %v6825_v19 = vsel %vm4217_vm5, 0.0, %v6793_v58  ;;  %v6826_v26 = vsel %vm4217_vm5, 0.0, %v6794_v30 }
 0x52c   :  { %v13939_v62 = vpack.c.bf16 %v6934_v60, %v6933_v21  ;;  %v19596_v29 = vpack.c.bf16 %v6933_v21, %v6932_v46  ;;  %7439 = vmatprep.subr.bf16.mxu1 %v16449_v35  ;;  %v6824_v46 = vsel %vm4217_vm5, 0.0, %v6792_v43 }
 0x52e   :  { %7255 = vmatmul.mubr.bf16.gmra.mrb[36].mxu1 %v13939_v62 }
 0x52f   :  { %13300 = vmatprep.mubr.msk.bf16.mxu1 %vm5051_vm6, %v13942_v31  ;;  %7440 = vmatpush1.bf16.msra.mxu1 %v15591_v24  ;;  %v6796_v24 = vrot.slane %v19428_v1, 7  ;;  %v6798_v1 = vrot.slane %v19476_v51, 7 }
 0x530   :  { %7441 = vmatprep.subr.bf16.mxu1 %v16449_v35 }
 0x531   :  { %v6828_v43 = vsel %vm4217_vm5, 0.0, %v6796_v24 }
 0x533   :  { %7442 = vmatpush1.bf16.msra.mxu1 %v15592_v45 }
 0x534   :  { %7443 = vmatprep.subr.bf16.mxu1 %v16449_v35 }
 0x537   :  { %7444 = vmatpush1.bf16.msra.mxu1 %v15593_v63 }
 0x538   :  { %v15399_v31 = vpop.permute.xlu0 %15398  ;;  %7445 = vmatprep.subr.bf16.mxu1 %v16449_v35 }
 0x539   :  { %v15401_v38 = vunpack.i.h.bf16 %v15399_v31  ;;  %v15400_v11 = vunpack.i.l.bf16 %v15399_v31 }
 0x53b   :  { %v6935_v16 = vsel %vm5051_vm6, %v6823_v49, %v15400_v11  ;;  %v6936_v40 = vsel %vm5051_vm6, %v6824_v46, %v15401_v38  ;;  %7446 = vmatpush1.bf16.msra.mxu1 %v15594_v33  ;;  %v6830_v46 = vsel %vm4217_vm5, 0.0, %v6798_v1  ;;  %v15607_v1 = vld [vmem:[%s21652_s7 + $0x100] sm:$0xff]  }
 0x53c   :  { %v13941_v4 = vpack.c.bf16 %v6936_v40, %v6935_v16  ;;  %v19624_v15 = vpack.c.bf16 %v6935_v16, %v6934_v60  ;;  %7447 = vmatprep.subr.bf16.mxu1 %v16449_v35  ;;  %v6795_v60 = vrot.slane %v19416_v57, 7  ;;  %v6797_v57 = vrot.slane %v19454_v44, 7 }
 0x53d   :  { %v6799_v44 = vrot.slane %v19499_v53, 7  ;;  %v6801_v53 = vrot.slane %v19538_v39, 7 }
 0x53e   :  { %7263 = vmatmul.mubr.bf16.gmra.mrb[40].mxu1 %v13941_v4  ;;  %v6827_v34 = vsel %vm4217_vm5, 0.0, %v6795_v60  ;;  %v6829_v49 = vsel %vm4217_vm5, 0.0, %v6797_v57  ;;  %v15599_v60 = vld [vmem:[%s21652_s7 + $0xc0] sm:$0xff]   ;;  %v15606_v57 = vld [vmem:[%s21652_s7 + $0xf8] sm:$0xff]  }
 0x53f   :  { %13301 = vmatprep.mubr.msk.bf16.mxu1 %vm5051_vm6, %v13944_v28  ;;  %7448 = vmatpush1.bf16.msra.mxu1 %v15595_v32  ;;  %v15598_v28 = vld [vmem:[%s21652_s7 + $0x58] sm:$0xff]  }
 0x540   :  { %7449 = vmatprep.subr.bf16.mxu1 %v16449_v35 }
 0x543   :  { %7450 = vmatpush1.bf16.msra.mxu1 %v15596_v50  ;;  %v6831_v50 = vsel %vm4217_vm5, 0.0, %v6799_v44  ;;  %v15631_v44 = vld [vmem:[%s21655_s10 + $0xc4] ss:$16 sps:$4 sm:$0xff]  }
 0x544   :  { %7451 = vmatprep.subr.bf16.mxu1 %v16449_v35 }
 0x547   :  { %7452 = vmatpush1.bf16.msra.mxu1 %v15597_v10  ;;  %v6832_v10 = vsel %vm4217_vm5, 0.0, %v6800_v12  ;;  %v15632_v12 = vld [vmem:[%s21655_s10 + $0xe0] ss:$16 sps:$4 sm:$0xff]  }
 0x548   :  { %v15404_v20 = vpop.permute.xlu1 %15403  ;;  %7453 = vmatprep.subr.bf16.mxu1 %v16449_v35 }
 0x549   :  { %v15406_v54 = vunpack.i.h.bf16 %v15404_v20  ;;  %v15405_v56 = vunpack.i.l.bf16 %v15404_v20 }
 0x54b   :  { %v6937_v8 = vsel %vm5051_vm6, %v6825_v19, %v15405_v56  ;;  %v19649_v52 = vsel %vm5051_vm6, %v6826_v26, %v15406_v54  ;;  %7454 = vmatpush1.bf16.msra.mxu1 %v15598_v28  ;;  %v6948_v54 = vpack.c.bf16 %v19266_v14, %v19266_v14  ;;  %v6833_v56 = vsel %vm4217_vm5, 0.0, %v6801_v53  ;;  %v15611_v14 = vld [vmem:[%s21655_s10] ss:$16 sps:$4 sm:$0xff]  }
 0x54c   :  { %v13943_v5 = vpack.c.bf16 %v19649_v52, %v6937_v8  ;;  %v19652_v21 = vpack.c.bf16 %v6937_v8, %v6936_v40  ;;  %7637 = vmatprep.subr.bf16.mxu1 %v16449_v35  ;;  %v6834_v19 = vsel %vm4217_vm5, 0.0, %v6802_v36  ;;  %v15613_v8 = vld [vmem:[%s21655_s10 + $0x4] ss:$16 sps:$4 sm:$0xff]  }
 0x54d   :  { %v13307_v13 = vcombine.low %v16448_v25, %v6948_v54  ;;  %8148 = vmatprep.subr.bf16.mxu0 %v15613_v8 }
 0x54e   :  { %7271 = vmatmul.mubr.bf16.gmra.mrb[44].mxu1 %v13943_v5  ;;  %v6947_v5 = vpack.c.bf16 %v19564_v17, %v19564_v17  ;;  %8149 = vmatpush1.bf16.msra.mxu0 %v15611_v14  ;;  %v15601_v17 = vld [vmem:[%s21652_s7 + $0xd0] sm:$0xff]  }
 0x54f   :  { %13302 = vmatprep.mubr.msk.bf16.mxu1 %vm5051_vm6, %v13946_v59 }
 0x550   :  { %v13306_v24 = vcombine.low %v16448_v25, %v6947_v5 }
 0x558   :  { %v15409_v62 = vpop.permute.xlu0 %15408 }
 0x559   :  { %v15411_v45 = vunpack.i.h.bf16 %v15409_v62  ;;  %v15410_v63 = vunpack.i.l.bf16 %v15409_v62  ;;  %v15600_v62 = vld [vmem:[%s21652_s7 + $0xc8] sm:$0xff]  }
 0x55b   :  { %v19664_v33 = vsel %vm5051_vm6, %v6827_v34, %v15410_v63  ;;  %v6940_v31 = vsel %vm5051_vm6, %v6828_v43, %v15411_v45  ;;  %v15602_v45 = vld [vmem:[%s21652_s7 + $0xd8] sm:$0xff]   ;;  %v15603_v63 = vld [vmem:[%s21652_s7 + $0xe0] sm:$0xff]   ;;  %v15604_v34 = vld [vmem:[%s21652_s7 + $0xe8] sm:$0xff]   ;;  %v6964_v43 = vpack.c.bf16 %v19437_v41, %v19437_v41 }
 0x55c   :  { %v13945_v7 = vpack.c.bf16 %v6940_v31, %v19664_v33  ;;  %v6963_v41 = vpack.c.bf16 %v19664_v33, %v19664_v33  ;;  %v15608_v33 = vld [vmem:[%s21652_s7 + $0x108] sm:$0xff]  }
 0x55e   :  { %7279 = vmatmul.mubr.bf16.gmra.mrb[48].mxu1 %v13945_v7  ;;  %v13315_v7 = vcombine.low %v16448_v25, %v6964_v43 }
 0x55f   :  { %13303 = vmatprep.mubr.msk.bf16.mxu1 %vm5051_vm6, %v13948_v27 }
 0x568   :  { %v15414_v59 = vpop.permute.xlu1 %15413 }
 0x569   :  { %v15416_v38 = vunpack.i.h.bf16 %v15414_v59  ;;  %v15415_v11 = vunpack.i.l.bf16 %v15414_v59  ;;  %v13314_v59 = vcombine.low %v16448_v25, %v6963_v41 }
 0x56b   :  { %v6941_v16 = vsel %vm5051_vm6, %v6829_v49, %v15415_v11  ;;  %v6942_v40 = vsel %vm5051_vm6, %v6830_v46, %v15416_v38  ;;  %v15609_v38 = vld [vmem:[%s21652_s7 + $0x110] sm:$0xff]   ;;  %v15610_v11 = vld [vmem:[%s21652_s7 + $0x118] sm:$0xff]   ;;  %v6962_v49 = vpack.c.bf16 %v19403_v23, %v19403_v23 }
 0x56c   :  { %v13947_v32 = vpack.c.bf16 %v6942_v40, %v6941_v16  ;;  %v19678_v4 = vpack.c.bf16 %v6941_v16, %v6940_v31  ;;  %v15605_v31 = vld [vmem:[%s21652_s7 + $0xf0] sm:$0xff]  }
 0x56d   :  { %v13367_v46 = vcombine.low %v6962_v49, %v16448_v25  ;;  %v15625_v16 = vld [vmem:[%s21655_s10 + $0x84] ss:$16 sps:$4 sm:$0xff]  }
 0x56e   :  { %7287 = vmatmul.mubr.bf16.gmra.mrb[52].mxu1 %v13947_v32  ;;  %v15628_v32 = vld [vmem:[%s21655_s10 + $0xa4] ss:$16 sps:$4 sm:$0xff]  }
 0x56f   :  { %13304 = vmatprep.mubr.msk.bf16.mxu1 %vm5051_vm6, %v13950_v22 }
 0x578   :  { %v15419_v51 = vpop.permute.xlu0 %15418 }
 0x579   :  { %v15421_v47 = vunpack.i.h.bf16 %v15419_v51  ;;  %v15420_v27 = vunpack.i.l.bf16 %v15419_v51  ;;  %v15634_v51 = vld [vmem:[%s21655_s10 + $0xe4] ss:$16 sps:$4 sm:$0xff]  }
 0x57b   :  { %v6943_v58 = vsel %vm5051_vm6, %v6831_v50, %v15420_v27  ;;  %v6944_v30 = vsel %vm5051_vm6, %v6832_v10, %v15421_v47  ;;  %v15637_v47 = vld [vmem:[%s21655_s10 + $0xc] ss:$16 sps:$4 sm:$0xff]   ;;  %v19872_v27 = vld [vmem:[%s21653_s8] ss:$0 sm:$0xff] }
 0x57c   :  { %v13949_v28 = vpack.c.bf16 %v6944_v30, %v6943_v58  ;;  %v19690_v20 = vpack.c.bf16 %v6943_v58, %v6942_v40  ;;  %v15626_v40 = vld [vmem:[%s21655_s10 + $0xa0] ss:$16 sps:$4 sm:$0xff]  }
 0x57d   :  { %v19877_v50 = vld [vmem:[%s21654_s9] ss:$0 sm:$0xff] }
 0x57e   :  { %7295 = vmatmul.mubr.bf16.gmra.mrb[56].mxu1 %v13949_v28 }
 0x57f   :  { %13305 = vmatprep.mubr.msk.bf16.mxu1 %vm5051_vm6, %v13952_v18 }
 0x587   :  { %v15424_v55 = vpop.permute.xlu1 %15423 }
 0x588   :  { %v15426_v42 = vunpack.i.h.bf16 %v15424_v55  ;;  %v15425_v22 = vunpack.i.l.bf16 %v15424_v55 }
 0x58a   :  { %v6945_v26 = vsel %vm5051_vm6, %v6833_v56, %v15425_v22  ;;  %v19704_v61 = vsel %vm5051_vm6, %v6834_v19, %v15426_v42 }
 0x58b   :  { %v13951_v18 = vpack.c.bf16 %v19704_v61, %v6945_v26  ;;  %v19707_v39 = vpack.c.bf16 %v6945_v26, %v6944_v30  ;;  %v6977_v23 = vpack.c.bf16 %v19704_v61, %v19704_v61 }
 0x58d   :  { %7303 = vmatmul.mubr.bf16.gmra.mrb[60].mxu1 %v13951_v18 }
 0x58e   :  { %13334 = vmatprep.mubr.msk.bf16.mxu1 %vm5051_vm6, %v13307_v13 }
 0x595   :  { %7464 = vmatmul.mubr.bf16.vlgmr.msra.gmra.mrb[32].mxu1 %v13306_v24 }
 0x596   :  { %7638 = vmatpush1.bf16.msra.mxu1 %v15599_v60  ;;  %13335 = vmatprep.mubr.msk.bf16.mxu1 %vm5051_vm6, %v19294_v0 }
 0x597   :  { %7639 = vmatprep.subr.bf16.mxu1 %v16449_v35 }
 0x59a   :  { %7640 = vmatpush1.bf16.msra.mxu1 %v15600_v62 }
 0x59b   :  { %7641 = vmatprep.subr.bf16.mxu1 %v16449_v35 }
 0x59d   :  { %7472 = vmatmul.mubr.bf16.gmra.mrb[36].mxu1 %v19596_v29 }
 0x59e   :  { %13336 = vmatprep.mubr.msk.bf16.mxu1 %vm5051_vm6, %v19339_v6  ;;  %7642 = vmatpush1.bf16.msra.mxu1 %v15601_v17 }
 0x59f   :  { %7643 = vmatprep.subr.bf16.mxu1 %v16449_v35 }
 0x5a2   :  { %7644 = vmatpush1.bf16.msra.mxu1 %v15602_v45 }
 0x5a3   :  { %7645 = vmatprep.subr.bf16.mxu1 %v16449_v35 }
 0x5a5   :  { %7480 = vmatmul.mubr.bf16.gmra.mrb[40].mxu1 %v19624_v15 }
 0x5a6   :  { %13337 = vmatprep.mubr.msk.bf16.mxu1 %vm5051_vm6, %v19384_v2  ;;  %7646 = vmatpush1.bf16.msra.mxu1 %v15603_v63 }
 0x5a7   :  { %7647 = vmatprep.subr.bf16.mxu1 %v16449_v35 }
 0x5aa   :  { %7648 = vmatpush1.bf16.msra.mxu1 %v15604_v34 }
 0x5ab   :  { %7649 = vmatprep.subr.bf16.mxu1 %v16449_v35 }
 0x5ad   :  { %7488 = vmatmul.mubr.bf16.gmra.mrb[44].mxu1 %v19652_v21 }
 0x5ae   :  { %13338 = vmatprep.mubr.msk.bf16.mxu1 %vm5051_vm6, %v13315_v7  ;;  %7650 = vmatpush1.bf16.msra.mxu1 %v15605_v31 }
 0x5af   :  { %7651 = vmatprep.subr.bf16.mxu1 %v16449_v35 }
 0x5b2   :  { %7652 = vmatpush1.bf16.msra.mxu1 %v15606_v57 }
 0x5b3   :  { %7653 = vmatprep.subr.bf16.mxu1 %v16449_v35 }
 0x5b5   :  { %7496 = vmatmul.mubr.bf16.gmra.mrb[48].mxu1 %v13314_v59 }
 0x5b6   :  { %13339 = vmatprep.mubr.msk.bf16.mxu1 %vm5051_vm6, %v19470_v37  ;;  %7654 = vmatpush1.bf16.msra.mxu1 %v15607_v1 }
 0x5b7   :  { %7655 = vmatprep.subr.bf16.mxu1 %v16449_v35 }
 0x5ba   :  { %7656 = vmatpush1.bf16.msra.mxu1 %v15608_v33 }
 0x5bb   :  { %7657 = vmatprep.subr.bf16.mxu1 %v16449_v35 }
 0x5bd   :  { %7504 = vmatmul.mubr.bf16.gmra.mrb[52].mxu1 %v19678_v4 }
 0x5be   :  { %13340 = vmatprep.mubr.msk.bf16.mxu1 %vm5051_vm6, %v19515_v48  ;;  %7658 = vmatpush1.bf16.msra.mxu1 %v15609_v38 }
 0x5bf   :  { %7659 = vmatprep.subr.bf16.mxu1 %v16449_v35 }
 0x5c2   :  { %7660 = vmatpush1.bf16.msra.mxu1 %v15610_v11 }
 0x5c5   :  { %7512 = vmatmul.mubr.bf16.gmra.mrb[56].mxu1 %v19690_v20 }
 0x5c6   :  { %13341 = vmatprep.mubr.msk.bf16.mxu1 %vm5051_vm6, %v19546_v9 }
 0x5cd   :  { %7520 = vmatmul.mubr.bf16.gmra.mrb[60].mxu1 %v19707_v39 }
 0x5ce   :  { %13382 = vmatprep.mubr.msk.bf16.mxu1 %vm5051_vm6, %v19294_v0  ;;  %v6961_v0 = vpack.c.bf16 %v19649_v52, %v19649_v52  ;;  %v15622_v52 = vld [vmem:[%s21655_s10 + $0x64] ss:$16 sps:$4 sm:$0xff]  }
 0x5d5   :  { %7670 = vmatmul.mubr.bf16.vlgmr.msra.gmra.mrb[32].mxu1 %v19596_v29  ;;  %v13366_v29 = vcombine.low %v6961_v0, %v16448_v25 }
 0x5d6   :  { %13383 = vmatprep.mubr.msk.bf16.mxu1 %vm5051_vm6, %v19339_v6  ;;  %v6978_v6 = vpack.c.bf16 %v19557_v3, %v19557_v3  ;;  %v15617_v3 = vld [vmem:[%s21655_s10 + $0x40] ss:$16 sps:$4 sm:$0xff]  }
 0x5dd   :  { %7678 = vmatmul.mubr.bf16.gmra.mrb[36].mxu1 %v19624_v15  ;;  %v15619_v15 = vld [vmem:[%s21655_s10 + $0x44] ss:$16 sps:$4 sm:$0xff]  }
 0x5de   :  { %13384 = vmatprep.mubr.msk.bf16.mxu1 %vm5051_vm6, %v19384_v2  ;;  %v13369_v2 = vcombine.low %v6978_v6, %v16448_v25 }
 0x5e5   :  { %7686 = vmatmul.mubr.bf16.gmra.mrb[40].mxu1 %v19652_v21  ;;  %v15623_v21 = vld [vmem:[%s21655_s10 + $0x80] ss:$16 sps:$4 sm:$0xff]  }
 0x5e6   :  { %13385 = vmatprep.mubr.msk.bf16.mxu1 %vm5051_vm6, %v13367_v46 }
 0x5ed   :  { %7694 = vmatmul.mubr.bf16.gmra.mrb[44].mxu1 %v13366_v29 }
 0x5ee   :  { %13386 = vmatprep.mubr.msk.bf16.mxu1 %vm5051_vm6, %v19470_v37  ;;  %v13368_v37 = vcombine.low %v6977_v23, %v16448_v25  ;;  %v15620_v25 = vld [vmem:[%s21655_s10 + $0x60] ss:$16 sps:$4 sm:$0xff]  }
 0x5f5   :  { %7702 = vmatmul.mubr.bf16.gmra.mrb[48].mxu1 %v19678_v4  ;;  %v15629_v4 = vld [vmem:[%s21655_s10 + $0xc0] ss:$16 sps:$4 sm:$0xff]  }
 0x5f6   :  { %13387 = vmatprep.mubr.msk.bf16.mxu1 %vm5051_vm6, %v19515_v48  ;;  %v15614_v48 = vld [vmem:[%s21655_s10 + $0x20] ss:$16 sps:$4 sm:$0xff]  }
 0x5fd   :  { %7710 = vmatmul.mubr.bf16.gmra.mrb[52].mxu1 %v19690_v20 }
 0x5fe   :  { %13388 = vmatprep.mubr.msk.bf16.mxu1 %vm5051_vm6, %v19546_v9  ;;  %v15616_v9 = vld [vmem:[%s21655_s10 + $0x24] ss:$16 sps:$4 sm:$0xff]  }
 0x5ff   :  { %8150 = vmatprep.subr.bf16.mxu0 %v15616_v9 }
 0x600   :  { %8151 = vmatpush1.bf16.msra.mxu0 %v15614_v48 }
 0x601   :  { %8152 = vmatprep.subr.bf16.mxu0 %v15619_v15 }
 0x604   :  { %8153 = vmatpush1.bf16.msra.mxu0 %v15617_v3 }
 0x605   :  { %7718 = vmatmul.mubr.bf16.gmra.mrb[56].mxu1 %v19707_v39  ;;  %8154 = vmatprep.subr.bf16.mxu0 %v15622_v52 }
 0x606   :  { %13389 = vmatprep.mubr.msk.bf16.mxu1 %vm5051_vm6, %v13369_v2 }
 0x608   :  { %8155 = vmatpush1.bf16.msra.mxu0 %v15620_v25 }
 0x609   :  { %8156 = vmatprep.subr.bf16.mxu0 %v15625_v16 }
 0x60c   :  { %8157 = vmatpush1.bf16.msra.mxu0 %v15623_v21 }
 0x60d   :  { %7726 = vmatmul.mubr.bf16.gmra.mrb[60].mxu1 %v13368_v37  ;;  %8158 = vmatprep.subr.bf16.mxu0 %v15628_v32 }
 0x610   :  { %8159 = vmatpush1.bf16.msra.mxu0 %v15626_v40 }
 0x611   :  { %8160 = vmatprep.subr.bf16.mxu0 %v15631_v44 }
 0x614   :  { %8161 = vmatpush1.bf16.msra.mxu0 %v15629_v4 }
 0x615   :  { %8162 = vmatprep.subr.bf16.mxu0 %v15634_v51 }
 0x618   :  { %8163 = vmatpush1.bf16.msra.mxu0 %v15632_v12 }
 0x619   :  { %8189 = vmatprep.subr.bf16.mxu0 %v15637_v47 }
 0x6a8   :  { %v7671_v10 = vpop.f32.mrb[32].mxu1 }
 0x6a9   :  { %v7756_v58 = vmul.f32 %v19872_v27, %v7671_v10  ;;  %v7673_v30 = vpop.f32.mrb[33].mxu1 }
 0x6aa   :  { %v7674_v28 = vpop.f32.mrb[34].mxu1 }
 0x6ab   :  { %v7778_v20 = vadd.f32 %v19877_v50, %v7756_v58  ;;  %v7757_v53 = vmul.f32 %v19872_v27, %v7674_v28  ;;  %v7676_v36 = vpop.f32.mrb[35].mxu1 }
 0x6ad   :  { %v7794_v55 = vmax.f32 %v7778_v20, 0.0  ;;  %v7779_v42 = vadd.f32 %v19877_v50, %v7757_v53 }
 0x6af   :  { %7810 = vst [vmem:[#allocation4] sm:$0xff] %v7794_v55  ;;  %v7795_v22 = vmax.f32 %v7779_v42, 0.0 }
 0x6b0   :  { %v7679_v54 = vpop.f32.mrb[36].mxu1 }
 0x6b1   :  { %7811 = vst [vmem:[#allocation4 + $0x8] sm:$0xff] %v7795_v22  ;;  %v7758_v56 = vmul.f32 %v19872_v27, %v7679_v54  ;;  %v7681_v19 = vpop.f32.mrb[37].mxu1 }
 0x6b2   :  { %v7682_v26 = vpop.f32.mrb[38].mxu1 }
 0x6b3   :  { %v7780_v61 = vadd.f32 %v19877_v50, %v7758_v56  ;;  %v7759_v18 = vmul.f32 %v19872_v27, %v7682_v26  ;;  %v7684_v39 = vpop.f32.mrb[39].mxu1 }
 0x6b5   :  { %v7796_v13 = vmax.f32 %v7780_v61, 0.0  ;;  %v7781_v14 = vadd.f32 %v19877_v50, %v7759_v18 }
 0x6b6   :  { %v7826_v52 = vld [vmem:[#allocation4] ss:$2 sm:$0xf]  ;;  %v7858_v16 = vld [vmem:[#allocation4 + $0x1] ss:$2 sm:$0xf] }
 0x6b7   :  { %7812 = vst [vmem:[#allocation4 + $0x10] sm:$0xff] %v7796_v13  ;;  %v7797_v8 = vmax.f32 %v7781_v14, 0.0  ;;  %v7889_v51 = vmax.f32 %v7826_v52, %v7858_v16 }
 0x6b8   :  { %v7687_v5 = vpop.f32.mrb[40].mxu1  ;;  %v7828_v9 = vld [vmem:[#allocation4 + $0x8] ss:$2 sm:$0xf] }
 0x6b9   :  { %7813 = vst [vmem:[#allocation4 + $0x18] sm:$0xff] %v7797_v8  ;;  %v7760_v60 = vmul.f32 %v19872_v27, %v7687_v5  ;;  %v7689_v24 = vpop.f32.mrb[41].mxu1  ;;  %v7860_v25 = vld [vmem:[#allocation4 + $0x9] ss:$2 sm:$0xf] }
 0x6ba   :  { %v7690_v62 = vpop.f32.mrb[42].mxu1  ;;  %v7890_v32 = vmax.f32 %v7828_v9, %v7860_v25 }
 0x6bb   :  { %v7782_v17 = vadd.f32 %v19877_v50, %v7760_v60  ;;  %v7761_v45 = vmul.f32 %v19872_v27, %v7690_v62  ;;  %v7692_v63 = vpop.f32.mrb[43].mxu1 }
 0x6bc   :  { %v7905_v30 = vmax.f32 %v7889_v51, %v7890_v32 }
 0x6bd   :  { %v7798_v34 = vmax.f32 %v7782_v17, 0.0  ;;  %v7783_v43 = vadd.f32 %v19877_v50, %v7761_v45 }
 0x6be   :  { %v7830_v55 = vld [vmem:[#allocation4 + $0x10] ss:$2 sm:$0xf]  ;;  %v7862_v42 = vld [vmem:[#allocation4 + $0x11] ss:$2 sm:$0xf]  ;;  %v7913_v61 = vpack.c.bf16 %v7905_v30, %v7905_v30 }
 0x6bf   :  { %7814 = vst [vmem:[#allocation4 + $0x20] sm:$0xff] %v7798_v34  ;;  %v7799_v31 = vmax.f32 %v7783_v43, 0.0  ;;  %v7891_v45 = vmax.f32 %v7830_v55, %v7862_v42  ;;  %v15640_v55 = vld [vmem:[%s21655_s10 + $0x2c] ss:$16 sps:$4 sm:$0xff]  }
 0x6c0   :  { %v7695_v7 = vpop.f32.mrb[44].mxu1  ;;  %v7832_v53 = vld [vmem:[#allocation4 + $0x18] ss:$2 sm:$0xf]  ;;  %v7981_v34 = vunpack.c.l.b16 %v7913_v61 }
 0x6c1   :  { %7815 = vst [vmem:[#allocation4 + $0x28] sm:$0xff] %v7799_v31  ;;  %v7762_v57 = vmul.f32 %v19872_v27, %v7695_v7  ;;  %v7697_v41 = vpop.f32.mrb[45].mxu1  ;;  %v7864_v22 = vld [vmem:[#allocation4 + $0x19] ss:$2 sm:$0xf] }
 0x6c2   :  { %v7698_v1 = vpop.f32.mrb[46].mxu1  ;;  %v7892_v14 = vmax.f32 %v7832_v53, %v7864_v22  ;;  %v15638_v22 = vld [vmem:[%s21655_s10 + $0x28] ss:$16 sps:$4 sm:$0xff]  }
 0x6c3   :  { %v7784_v59 = vadd.f32 %v19877_v50, %v7762_v57  ;;  %v7763_v33 = vmul.f32 %v19872_v27, %v7698_v1  ;;  %v7700_v38 = vpop.f32.mrb[47].mxu1 }
 0x6c4   :  { %v7906_v41 = vmax.f32 %v7891_v45, %v7892_v14 }
 0x6c5   :  { %v7800_v11 = vmax.f32 %v7784_v59, 0.0  ;;  %v7785_v49 = vadd.f32 %v19877_v50, %v7763_v33 }
 0x6c6   :  { %v7834_v59 = vld [vmem:[#allocation4 + $0x20] ss:$2 sm:$0xf]  ;;  %v7866_v33 = vld [vmem:[#allocation4 + $0x21] ss:$2 sm:$0xf] }
 0x6c7   :  { %7816 = vst [vmem:[#allocation4 + $0x30] sm:$0xff] %v7800_v11  ;;  %v7801_v46 = vmax.f32 %v7785_v49, 0.0 }
 0x6c8   :  { %v7703_v0 = vpop.f32.mrb[48].mxu1  ;;  %v7836_v43 = vld [vmem:[#allocation4 + $0x28] ss:$2 sm:$0xf] }
 0x6c9   :  { %7817 = vst [vmem:[#allocation4 + $0x38] sm:$0xff] %v7801_v46  ;;  %v7764_v29 = vmul.f32 %v19872_v27, %v7703_v0  ;;  %v7705_v6 = vpop.f32.mrb[49].mxu1  ;;  %v7868_v31 = vld [vmem:[#allocation4 + $0x29] ss:$2 sm:$0xf] }
 0x6ca   :  { %v7706_v2 = vpop.f32.mrb[50].mxu1  ;;  %v7894_v49 = vmax.f32 %v7836_v43, %v7868_v31  ;;  %v8548_v6 = vrot.slane %v7981_v34, 2  ;;  %v15641_v31 = vld [vmem:[%s21655_s10 + $0x48] ss:$16 sps:$4 sm:$0xff]  }
 0x6cb   :  { %v7786_v23 = vadd.f32 %v19877_v50, %v7764_v29  ;;  %v7765_v37 = vmul.f32 %v19872_v27, %v7706_v2  ;;  %v7708_v48 = vpop.f32.mrb[51].mxu1  ;;  %v8266_v29 = vrot.slane %v7981_v34, 1 }
 0x6cc   :  { %v8831_v48 = vrot.slane %v7981_v34, 3 }
 0x6cd   :  { %v7802_v3 = vmax.f32 %v7786_v23, 0.0  ;;  %v7787_v15 = vadd.f32 %v19877_v50, %v7765_v37 }
 0x6ce   :  { %v7838_v14 = vld [vmem:[#allocation4 + $0x30] ss:$2 sm:$0xf] }
 0x6cf   :  { %7818 = vst [vmem:[#allocation4 + $0x40] sm:$0xff] %v7802_v3  ;;  %v7803_v21 = vmax.f32 %v7787_v15, 0.0  ;;  %v7914_v3 = vpack.c.bf16 %v7906_v41, %v7906_v41  ;;  %v7893_v15 = vmax.f32 %v7834_v59, %v7866_v33  ;;  %v15646_v59 = vld [vmem:[%s21655_s10 + $0x6c] ss:$16 sps:$4 sm:$0xff]  }
 0x6d0   :  { %v7711_v40 = vpop.f32.mrb[52].mxu1  ;;  %v7840_v42 = vld [vmem:[#allocation4 + $0x38] ss:$2 sm:$0xf] }
 0x6d1   :  { %7819 = vst [vmem:[#allocation4 + $0x48] sm:$0xff] %v7803_v21  ;;  %v7766_v4 = vmul.f32 %v19872_v27, %v7711_v40  ;;  %v7713_v44 = vpop.f32.mrb[53].mxu1 }
 0x6d2   :  { %v7714_v12 = vpop.f32.mrb[54].mxu1 }
 0x6d3   :  { %v7788_v47 = vadd.f32 %v19877_v50, %v7766_v4  ;;  %v7767_v10 = vmul.f32 %v19872_v27, %v7714_v12  ;;  %v7716_v58 = vpop.f32.mrb[55].mxu1 }
 0x6d5   :  { %v7804_v28 = vmax.f32 %v7788_v47, 0.0  ;;  %v7789_v20 = vadd.f32 %v19877_v50, %v7767_v10  ;;  %v7907_v47 = vmax.f32 %v7893_v15, %v7894_v49  ;;  %v15635_v10 = vld [vmem:[%s21655_s10 + $0x8] ss:$16 sps:$4 sm:$0xff]  }
 0x6d6   :  { %v7842_v36 = vld [vmem:[#allocation4 + $0x40] ss:$2 sm:$0xf]  ;;  %v7874_v56 = vld [vmem:[#allocation4 + $0x41] ss:$2 sm:$0xf] }
 0x6d7   :  { %7820 = vst [vmem:[#allocation4 + $0x50] sm:$0xff] %v7804_v28  ;;  %v7805_v54 = vmax.f32 %v7789_v20, 0.0  ;;  %v7897_v5 = vmax.f32 %v7842_v36, %v7874_v56  ;;  %v19932_v56 = vunpack.c.l.b16 %v7914_v3 }
 0x6d8   :  { %v7719_v19 = vpop.f32.mrb[56].mxu1  ;;  %v7844_v26 = vld [vmem:[#allocation4 + $0x48] ss:$2 sm:$0xf] }
 0x6d9   :  { %7821 = vst [vmem:[#allocation4 + $0x58] sm:$0xff] %v7805_v54  ;;  %v7768_v18 = vmul.f32 %v19872_v27, %v7719_v19  ;;  %v7721_v39 = vpop.f32.mrb[57].mxu1  ;;  %v7876_v13 = vld [vmem:[#allocation4 + $0x49] ss:$2 sm:$0xf]  ;;  %v9965_v33 = vrot.slane %v19932_v56, 3 }
 0x6da   :  { %v7722_v8 = vpop.f32.mrb[58].mxu1  ;;  %v7898_v60 = vmax.f32 %v7844_v26, %v7876_v13  ;;  %v7872_v26 = vld [vmem:[#allocation4 + $0x39] ss:$2 sm:$0xf]  ;;  %v7915_v39 = vpack.c.bf16 %v7907_v47, %v7907_v47 }
 0x6db   :  { %v7790_v24 = vadd.f32 %v19877_v50, %v7768_v18  ;;  %v7769_v62 = vmul.f32 %v19872_v27, %v7722_v8  ;;  %v7724_v17 = vpop.f32.mrb[59].mxu1  ;;  %v7870_v8 = vld [vmem:[#allocation4 + $0x31] ss:$2 sm:$0xf] }
 0x6dc   :  { %v7909_v63 = vmax.f32 %v7897_v5, %v7898_v60  ;;  %v9400_v17 = vrot.slane %v19932_v56, 1  ;;  %v7895_v43 = vmax.f32 %v7838_v14, %v7870_v8  ;;  %v15656_v8 = vld [vmem:[%s21655_s10 + $0xe8] ss:$16 sps:$4 sm:$0xff]  }
 0x6dd   :  { %v7806_v7 = vmax.f32 %v7790_v24, 0.0  ;;  %v7791_v57 = vadd.f32 %v19877_v50, %v7769_v62  ;;  %v7896_v24 = vmax.f32 %v7840_v42, %v7872_v26 }
 0x6de   :  { %v7917_v1 = vpack.c.bf16 %v7909_v63, %v7909_v63  ;;  %v7846_v11 = vld [vmem:[#allocation4 + $0x50] ss:$2 sm:$0xf]  ;;  %v7878_v2 = vld [vmem:[#allocation4 + $0x51] ss:$2 sm:$0xf] }
 0x6df   :  { %7822 = vst [vmem:[#allocation4 + $0x60] sm:$0xff] %v7806_v7  ;;  %v7807_v38 = vmax.f32 %v7791_v57, 0.0  ;;  %v7899_v51 = vmax.f32 %v7846_v11, %v7878_v2  ;;  %v9682_v57 = vrot.slane %v19932_v56, 2  ;;  %v7908_v11 = vmax.f32 %v7895_v43, %v7896_v24  ;;  %v15664_v24 = vld [vmem:[%s21655_s10 + $0x124] ss:$16 sps:$4 sm:$0xff]  }
 0x6e0   :  { %v7727_v46 = vpop.f32.mrb[60].mxu1  ;;  %v7982_v0 = vunpack.c.l.b16 %v7917_v1  ;;  %v7848_v9 = vld [vmem:[#allocation4 + $0x58] ss:$2 sm:$0xf]  ;;  %v15668_v43 = vld [vmem:[%s21655_s10 + $0x160] ss:$16 sps:$4 sm:$0xff]  }
 0x6e1   :  { %7823 = vst [vmem:[#allocation4 + $0x68] sm:$0xff] %v7807_v38  ;;  %v7770_v23 = vmul.f32 %v19872_v27, %v7727_v46  ;;  %v7729_v37 = vpop.f32.mrb[61].mxu1  ;;  %v7880_v12 = vld [vmem:[#allocation4 + $0x59] ss:$2 sm:$0xf] }
 0x6e2   :  { %v7730_v25 = vpop.f32.mrb[62].mxu1  ;;  %v7983_v52 = vrot.slane %v7982_v0, 7  ;;  %v19909_v21 = vsel %vm7984_vm8, %v7982_v0, %v8266_v29  ;;  %v8549_v16 = vrot.slane %v7982_v0, 1  ;;  %v8832_v40 = vrot.slane %v7982_v0, 2  ;;  %v15644_v0 = vld [vmem:[%s21655_s10 + $0x68] ss:$16 sps:$4 sm:$0xff]  }
 0x6e3   :  { %v7792_v32 = vadd.f32 %v19877_v50, %v7770_v23  ;;  %v7771_v4 = vmul.f32 %v19872_v27, %v7730_v25  ;;  %v7732_v44 = vpop.f32.mrb[63].mxu1  ;;  %v7900_v20 = vmax.f32 %v7848_v9, %v7880_v12  ;;  %v15649_v29 = vld [vmem:[%s21655_s10 + $0x8c] ss:$16 sps:$4 sm:$0xff]   ;;  %v7916_v25 = vpack.c.bf16 %v7908_v11, %v7908_v11  ;;  %v15647_v12 = vld [vmem:[%s21655_s10 + $0x88] ss:$16 sps:$4 sm:$0xff]  }
 0x6e4   :  { %v7985_v58 = vsel %vm7984_vm8, %v7983_v52, %v7981_v34  ;;  %v19918_v30 = vsel %vm7984_vm8, %v8549_v16, %v8548_v6  ;;  %v19921_v28 = vsel %vm7984_vm8, %v8832_v40, %v8831_v48  ;;  %v19942_v34 = vunpack.c.l.b16 %v7915_v39  ;;  %v15658_v39 = vld [vmem:[%s21655_s10 + $0xec] ss:$16 sps:$4 sm:$0xff]   ;;  %v15680_v11 = vld [vmem:[%s21655_s10 + $0x1e0] ss:$16 sps:$4 sm:$0xff]  }
 0x6e5   :  { %v7808_v53 = vmax.f32 %v7792_v32, 0.0  ;;  %v7793_v27 = vadd.f32 %v19877_v50, %v7771_v4  ;;  %v19924_v36 = vpack.c.b16 %v7985_v58, %v7985_v58  ;;  %v7910_v54 = vmax.f32 %v7899_v51, %v7900_v20  ;;  %v15643_v50 = vld [vmem:[%s21655_s10 + $0x4c] ss:$16 sps:$4 sm:$0xff]  }
 0x6e6   :  { %v7850_v19 = vld [vmem:[#allocation4 + $0x60] ss:$2 sm:$0xf]  ;;  %v7882_v18 = vld [vmem:[#allocation4 + $0x61] ss:$2 sm:$0xf]  ;;  %v19993_v20 = vunpack.c.l.b16 %v7916_v25 }
 0x6e7   :  { %7824 = vst [vmem:[#allocation4 + $0x70] sm:$0xff] %v7808_v53  ;;  %v7809_v61 = vmax.f32 %v7793_v27, 0.0  ;;  %8181 = vmatmul.mubr.bf16.vlgmr.msra.gmra.mrb[32].mxu0 %v19924_v36  ;;  %v7918_v13 = vpack.c.bf16 %v7910_v54, %v7910_v54  ;;  %v7901_v45 = vmax.f32 %v7850_v19, %v7882_v18  ;;  %v10534_v2 = vrot.slane %v19942_v34, 1  ;;  %v15650_v27 = vld [vmem:[%s21655_s10 + $0xa8] ss:$16 sps:$4 sm:$0xff]  }
 0x6e8   :  { %8190 = vmatpush1.bf16.msra.mxu0 %v15635_v10  ;;  %8221 = vmatprep.mubr.bf16.mxu0 %v16449_v35  ;;  %v7852_v5 = vld [vmem:[#allocation4 + $0x68] ss:$2 sm:$0xf]  ;;  %v7884_v60 = vld [vmem:[#allocation4 + $0x69] ss:$2 sm:$0xf] }
 0x6e9   :  { %7825 = vst [vmem:[#allocation4 + $0x78] sm:$0xff] %v7809_v61  ;;  %8191 = vmatprep.subr.bf16.mxu0 %v15640_v55  ;;  %v19939_v62 = vunpack.c.l.b16 %v7918_v13  ;;  %v7902_v63 = vmax.f32 %v7852_v5, %v7884_v60  ;;  %v10816_v23 = vrot.slane %v19942_v34, 2  ;;  %v11099_v40 = vrot.slane %v19942_v34, 3  ;;  %v15652_v10 = vld [vmem:[%s21655_s10 + $0xac] ss:$16 sps:$4 sm:$0xff]  }
 0x6ea   :  { %v15655_v55 = vld [vmem:[%s21655_s10 + $0xcc] ss:$16 sps:$4 sm:$0xff]   ;;  %v11950_v54 = vrot.slane %v19993_v20, 2  ;;  %v12233_v61 = vrot.slane %v19993_v20, 3  ;;  %v15653_v18 = vld [vmem:[%s21655_s10 + $0xc8] ss:$16 sps:$4 sm:$0xff]  }
 0x6eb   :  { %v19949_v7 = vsel %vm7984_vm8, %v19939_v62, %v9400_v17  ;;  %v9683_v41 = vrot.slane %v19939_v62, 1  ;;  %v7911_v1 = vmax.f32 %v7901_v45, %v7902_v63  ;;  %v9966_v38 = vrot.slane %v19939_v62, 2  ;;  %v15661_v5 = vld [vmem:[%s21655_s10 + $0x104] ss:$16 sps:$4 sm:$0xff]   ;;  %v15659_v60 = vld [vmem:[%s21655_s10 + $0x100] ss:$16 sps:$4 sm:$0xff]  }
 0x6ec   :  { %8192 = vmatpush1.bf16.msra.mxu0 %v15638_v22  ;;  %v11668_v22 = vrot.slane %v19993_v20, 1  ;;  %v15662_v17 = vld [vmem:[%s21655_s10 + $0x120] ss:$16 sps:$4 sm:$0xff]   ;;  %v15667_v45 = vld [vmem:[%s21655_s10 + $0x144] ss:$16 sps:$4 sm:$0xff]  }
 0x6ed   :  { %8193 = vmatprep.subr.bf16.mxu0 %v15643_v50  ;;  %v19959_v49 = vsel %vm7984_vm8, %v9683_v41, %v9682_v57  ;;  %v7919_v46 = vpack.c.bf16 %v7911_v1, %v7911_v1  ;;  %v19968_v6 = vsel %vm7984_vm8, %v9966_v38, %v9965_v33  ;;  %v15665_v63 = vld [vmem:[%s21655_s10 + $0x140] ss:$16 sps:$4 sm:$0xff]   ;;  %v15676_v41 = vld [vmem:[%s21655_s10 + $0x1a4] ss:$16 sps:$4 sm:$0xff]   ;;  %v15695_v25 = vld [vmem:[%s21655_s10 + $0x188] ss:$16 sps:$4 sm:$0xff]  }
 0x6ee   :  { %v7854_v48 = vld [vmem:[#allocation4 + $0x70] ss:$2 sm:$0xf]  ;;  %v7886_v9 = vld [vmem:[#allocation4 + $0x71] ss:$2 sm:$0xf] }
 0x6ef   :  { %v19972_v37 = vunpack.c.l.b16 %v7919_v46  ;;  %v7903_v4 = vmax.f32 %v7854_v48, %v7886_v9  ;;  %v15671_v57 = vld [vmem:[%s21655_s10 + $0x180] ss:$16 sps:$4 sm:$0xff]   ;;  %v15682_v38 = vld [vmem:[%s21655_s10 + $0x1e4] ss:$16 sps:$4 sm:$0xff]   ;;  %v15685_v46 = vld [vmem:[%s21655_s10 + $0x10c] ss:$16 sps:$4 sm:$0xff]  }
 0x6f0   :  { %8194 = vmatpush1.bf16.msra.mxu0 %v15641_v31  ;;  %v7856_v3 = vld [vmem:[#allocation4 + $0x78] ss:$2 sm:$0xf]  ;;  %v7888_v15 = vld [vmem:[#allocation4 + $0x79] ss:$2 sm:$0xf] }
 0x6f1   :  { %8195 = vmatprep.subr.bf16.mxu0 %v15646_v59  ;;  %v19976_v52 = vsel %vm7984_vm8, %v19972_v37, %v10534_v2  ;;  %v10817_v16 = vrot.slane %v19972_v37, 1  ;;  %v11100_v32 = vrot.slane %v19972_v37, 2  ;;  %v7904_v44 = vmax.f32 %v7856_v3, %v7888_v15  ;;  %v15673_v31 = vld [vmem:[%s21655_s10 + $0x184] ss:$16 sps:$4 sm:$0xff]   ;;  %v15674_v1 = vld [vmem:[%s21655_s10 + $0x1a0] ss:$16 sps:$4 sm:$0xff]  }
 0x6f2   :  { %v15679_v59 = vld [vmem:[%s21655_s10 + $0x1c4] ss:$16 sps:$4 sm:$0xff]   ;;  %v15677_v33 = vld [vmem:[%s21655_s10 + $0x1c0] ss:$16 sps:$4 sm:$0xff]   ;;  %v15688_v2 = vld [vmem:[%s21655_s10 + $0x12c] ss:$16 sps:$4 sm:$0xff]  }
 0x6f3   :  { %v19985_v51 = vsel %vm7984_vm8, %v10817_v16, %v10816_v23  ;;  %v19988_v47 = vsel %vm7984_vm8, %v11100_v32, %v11099_v40  ;;  %v7912_v58 = vmax.f32 %v7903_v4, %v7904_v44  ;;  %v15686_v23 = vld [vmem:[%s21655_s10 + $0x128] ss:$16 sps:$4 sm:$0xff]   ;;  %v15691_v48 = vld [vmem:[%s21655_s10 + $0x14c] ss:$16 sps:$4 sm:$0xff]  }
 0x6f4   :  { %8196 = vmatpush1.bf16.msra.mxu0 %v15644_v0  ;;  %v15683_v0 = vld [vmem:[%s21655_s10 + $0x108] ss:$16 sps:$4 sm:$0xff]   ;;  %v15694_v9 = vld [vmem:[%s21655_s10 + $0x16c] ss:$16 sps:$4 sm:$0xff]  }
 0x6f5   :  { %8197 = vmatprep.subr.bf16.mxu0 %v15649_v29  ;;  %v7920_v53 = vpack.c.bf16 %v7912_v58, %v7912_v58  ;;  %v8268_v29 = vpack.c.b16 %v19909_v21, %v19909_v21  ;;  %v15689_v21 = vld [vmem:[%s21655_s10 + $0x148] ss:$16 sps:$4 sm:$0xff]   ;;  %v15697_v15 = vld [vmem:[%s21655_s10 + $0x18c] ss:$16 sps:$4 sm:$0xff]   ;;  %v15707_v58 = vld [vmem:[%s21655_s10 + $0x200] ss:$16 sps:$4 sm:$0xff]  }
 0x6f6   :  { %v15692_v3 = vld [vmem:[%s21655_s10 + $0x168] ss:$16 sps:$4 sm:$0xff]   ;;  %v15700_v16 = vld [vmem:[%s21655_s10 + $0x1ac] ss:$16 sps:$4 sm:$0xff]  }
 0x6f7   :  { %v20001_v42 = vunpack.c.l.b16 %v7920_v53  ;;  %v15698_v40 = vld [vmem:[%s21655_s10 + $0x1a8] ss:$16 sps:$4 sm:$0xff]   ;;  %v15703_v32 = vld [vmem:[%s21655_s10 + $0x1cc] ss:$16 sps:$4 sm:$0xff]   ;;  %v15712_v53 = vld [vmem:[%s21655_s10 + $0x224] ss:$16 sps:$4 sm:$0xff]  }
 0x6f8   :  { %8198 = vmatpush1.bf16.msra.mxu0 %v15647_v12  ;;  %v15701_v4 = vld [vmem:[%s21655_s10 + $0x1c8] ss:$16 sps:$4 sm:$0xff]   ;;  %v15706_v44 = vld [vmem:[%s21655_s10 + $0x1ec] ss:$16 sps:$4 sm:$0xff]  }
 0x6f9   :  { %8199 = vmatprep.subr.bf16.mxu0 %v15652_v10  ;;  %v20007_v19 = vsel %vm7984_vm8, %v20001_v42, %v11668_v22  ;;  %v11951_v26 = vrot.slane %v20001_v42, 1  ;;  %v12234_v50 = vrot.slane %v20001_v42, 2  ;;  %v15704_v12 = vld [vmem:[%s21655_s10 + $0x1e8] ss:$16 sps:$4 sm:$0xff]   ;;  %v15709_v10 = vld [vmem:[%s21655_s10 + $0x204] ss:$16 sps:$4 sm:$0xff]  }
 0x6fa   :  { %v15713_v22 = vld [vmem:[%s21655_s10 + $0x240] ss:$16 sps:$4 sm:$0xff]  }
 0x6fb   :  { %v20019_v13 = vsel %vm7984_vm8, %v11951_v26, %v11950_v54  ;;  %v20022_v14 = vsel %vm7984_vm8, %v12234_v50, %v12233_v61  ;;  %v15718_v54 = vld [vmem:[%s21655_s10 + $0x264] ss:$16 sps:$4 sm:$0xff]   ;;  %v15716_v26 = vld [vmem:[%s21655_s10 + $0x260] ss:$16 sps:$4 sm:$0xff]  }
 0x6fc   :  { %8200 = vmatpush1.bf16.msra.mxu0 %v15650_v27  ;;  %v15710_v27 = vld [vmem:[%s21655_s10 + $0x220] ss:$16 sps:$4 sm:$0xff]   ;;  %v15721_v61 = vld [vmem:[%s21655_s10 + $0x284] ss:$16 sps:$4 sm:$0xff]  }
 0x6fd   :  { %8201 = vmatprep.subr.bf16.mxu0 %v15655_v55  ;;  %v15715_v55 = vld [vmem:[%s21655_s10 + $0x244] ss:$16 sps:$4 sm:$0xff]   ;;  %v15719_v50 = vld [vmem:[%s21655_s10 + $0x280] ss:$16 sps:$4 sm:$0xff]  }
 0x700   :  { %8202 = vmatpush1.bf16.msra.mxu0 %v15653_v18  ;;  %v15724_v18 = vld [vmem:[%s21655_s10 + $0x2a4] ss:$16 sps:$4 sm:$0xff]  }
 0x701   :  { %8203 = vmatprep.subr.bf16.mxu0 %v15658_v39  ;;  %v15722_v39 = vld [vmem:[%s21655_s10 + $0x2a0] ss:$16 sps:$4 sm:$0xff]  }
 0x704   :  { %8204 = vmatpush1.bf16.msra.mxu0 %v15656_v8  ;;  %v15727_v8 = vld [vmem:[%s21655_s10 + $0x2c4] ss:$16 sps:$4 sm:$0xff]  }
 0x705   :  { %8430 = vmatprep.subr.bf16.mxu0 %v15661_v5  ;;  %v15725_v5 = vld [vmem:[%s21655_s10 + $0x2c0] ss:$16 sps:$4 sm:$0xff]  }
 0x707   :  { %8222 = vmatmul.mubr.bf16.vlgmr.msra.gmra.mrb[36].mxu0 %v19924_v36  ;;  %v15670_v36 = vld [vmem:[%s21655_s10 + $0x164] ss:$16 sps:$4 sm:$0xff]  }
 0x708   :  { %8431 = vmatpush1.bf16.msra.mxu0 %v15659_v60  ;;  %8462 = vmatprep.mubr.bf16.mxu0 %v16449_v35  ;;  %v15730_v60 = vld [vmem:[%s21655_s10 + $0x2e4] ss:$16 sps:$4 sm:$0xff]  }
 0x709   :  { %8432 = vmatprep.subr.bf16.mxu0 %v15664_v24  ;;  %v15728_v24 = vld [vmem:[%s21655_s10 + $0x2e0] ss:$16 sps:$4 sm:$0xff]  }
 0x70c   :  { %8433 = vmatpush1.bf16.msra.mxu0 %v15662_v17  ;;  %v15733_v17 = vld [vmem:[%s21655_s10 + $0x20c] ss:$16 sps:$4 sm:$0xff]  }
 0x70d   :  { %8434 = vmatprep.subr.bf16.mxu0 %v15667_v45  ;;  %v15731_v45 = vld [vmem:[%s21655_s10 + $0x208] ss:$16 sps:$4 sm:$0xff]  }
 0x710   :  { %8435 = vmatpush1.bf16.msra.mxu0 %v15665_v63  ;;  %v8551_v63 = vpack.c.b16 %v19918_v30, %v19918_v30  ;;  %v15737_v30 = vld [vmem:[%s21655_s10 + $0x248] ss:$16 sps:$4 sm:$0xff]  }
 0x711   :  { %8436 = vmatprep.subr.bf16.mxu0 %v15670_v36  ;;  %v15736_v36 = vld [vmem:[%s21655_s10 + $0x22c] ss:$16 sps:$4 sm:$0xff]  }
 0x714   :  { %8437 = vmatpush1.bf16.msra.mxu0 %v15668_v43  ;;  %v15734_v43 = vld [vmem:[%s21655_s10 + $0x228] ss:$16 sps:$4 sm:$0xff]  }
 0x715   :  { %8438 = vmatprep.subr.bf16.mxu0 %v15673_v31  ;;  %v15739_v31 = vld [vmem:[%s21655_s10 + $0x24c] ss:$16 sps:$4 sm:$0xff]  }
 0x718   :  { %8439 = vmatpush1.bf16.msra.mxu0 %v15671_v57  ;;  %v15742_v57 = vld [vmem:[%s21655_s10 + $0x26c] ss:$16 sps:$4 sm:$0xff]  }
 0x719   :  { %8440 = vmatprep.subr.bf16.mxu0 %v15676_v41  ;;  %v15740_v41 = vld [vmem:[%s21655_s10 + $0x268] ss:$16 sps:$4 sm:$0xff]  }
 0x71c   :  { %8441 = vmatpush1.bf16.msra.mxu0 %v15674_v1  ;;  %v15745_v1 = vld [vmem:[%s21655_s10 + $0x28c] ss:$16 sps:$4 sm:$0xff]  }
 0x71d   :  { %8442 = vmatprep.subr.bf16.mxu0 %v15679_v59  ;;  %v15743_v59 = vld [vmem:[%s21655_s10 + $0x288] ss:$16 sps:$4 sm:$0xff]  }
 0x720   :  { %8443 = vmatpush1.bf16.msra.mxu0 %v15677_v33  ;;  %v15748_v33 = vld [vmem:[%s21655_s10 + $0x2ac] ss:$16 sps:$4 sm:$0xff]  }
 0x721   :  { %8444 = vmatprep.subr.bf16.mxu0 %v15682_v38  ;;  %v15746_v38 = vld [vmem:[%s21655_s10 + $0x2a8] ss:$16 sps:$4 sm:$0xff]  }
 0x724   :  { %8445 = vmatpush1.bf16.msra.mxu0 %v15680_v11  ;;  %v15751_v11 = vld [vmem:[%s21655_s10 + $0x2cc] ss:$16 sps:$4 sm:$0xff]  }
 0x725   :  { %8471 = vmatprep.subr.bf16.mxu0 %v15685_v46  ;;  %v15749_v46 = vld [vmem:[%s21655_s10 + $0x2c8] ss:$16 sps:$4 sm:$0xff]  }
 0x727   :  { %8463 = vmatmul.mubr.bf16.vlgmr.msra.gmra.mrb[32].mxu0 %v8268_v29 }
 0x728   :  { %8472 = vmatpush1.bf16.msra.mxu0 %v15683_v0  ;;  %8503 = vmatprep.mubr.bf16.mxu0 %v16449_v35  ;;  %v15754_v0 = vld [vmem:[%s21655_s10 + $0x2ec] ss:$16 sps:$4 sm:$0xff]  }
 0x729   :  { %8473 = vmatprep.subr.bf16.mxu0 %v15688_v2  ;;  %v15757_v2 = vld [vmem:[%s21655_s10 + $0x304] ss:$16 sps:$4 sm:$0xff]  }
 0x72c   :  { %8474 = vmatpush1.bf16.msra.mxu0 %v15686_v23  ;;  %v15755_v23 = vld [vmem:[%s21655_s10 + $0x300] ss:$16 sps:$4 sm:$0xff]  }
 0x72d   :  { %8475 = vmatprep.subr.bf16.mxu0 %v15691_v48  ;;  %v15760_v48 = vld [vmem:[%s21655_s10 + $0x324] ss:$16 sps:$4 sm:$0xff]  }
 0x730   :  { %8476 = vmatpush1.bf16.msra.mxu0 %v15689_v21  ;;  %v15758_v21 = vld [vmem:[%s21655_s10 + $0x320] ss:$16 sps:$4 sm:$0xff]  }
 0x731   :  { %8477 = vmatprep.subr.bf16.mxu0 %v15694_v9  ;;  %v15763_v9 = vld [vmem:[%s21655_s10 + $0x344] ss:$16 sps:$4 sm:$0xff]  }
 0x734   :  { %8478 = vmatpush1.bf16.msra.mxu0 %v15692_v3  ;;  %v15761_v3 = vld [vmem:[%s21655_s10 + $0x340] ss:$16 sps:$4 sm:$0xff]  }
 0x735   :  { %8479 = vmatprep.subr.bf16.mxu0 %v15697_v15  ;;  %v15766_v15 = vld [vmem:[%s21655_s10 + $0x364] ss:$16 sps:$4 sm:$0xff]  }
 0x738   :  { %8480 = vmatpush1.bf16.msra.mxu0 %v15695_v25  ;;  %v15764_v25 = vld [vmem:[%s21655_s10 + $0x360] ss:$16 sps:$4 sm:$0xff]  }
 0x739   :  { %8481 = vmatprep.subr.bf16.mxu0 %v15700_v16  ;;  %v15769_v16 = vld [vmem:[%s21655_s10 + $0x384] ss:$16 sps:$4 sm:$0xff]  }
 0x73c   :  { %8482 = vmatpush1.bf16.msra.mxu0 %v15698_v40  ;;  %v15767_v40 = vld [vmem:[%s21655_s10 + $0x380] ss:$16 sps:$4 sm:$0xff]  }
 0x73d   :  { %8483 = vmatprep.subr.bf16.mxu0 %v15703_v32  ;;  %v15772_v32 = vld [vmem:[%s21655_s10 + $0x3a4] ss:$16 sps:$4 sm:$0xff]  }
 0x740   :  { %8484 = vmatpush1.bf16.msra.mxu0 %v15701_v4  ;;  %v15770_v4 = vld [vmem:[%s21655_s10 + $0x3a0] ss:$16 sps:$4 sm:$0xff]  }
 0x741   :  { %8485 = vmatprep.subr.bf16.mxu0 %v15706_v44  ;;  %v15775_v44 = vld [vmem:[%s21655_s10 + $0x3c4] ss:$16 sps:$4 sm:$0xff]  }
 0x744   :  { %8486 = vmatpush1.bf16.msra.mxu0 %v15704_v12  ;;  %v15773_v12 = vld [vmem:[%s21655_s10 + $0x3c0] ss:$16 sps:$4 sm:$0xff]  }
 0x745   :  { %8713 = vmatprep.subr.bf16.mxu0 %v15709_v10  ;;  %v15778_v10 = vld [vmem:[%s21655_s10 + $0x3e4] ss:$16 sps:$4 sm:$0xff]  }
 0x747   :  { %8504 = vmatmul.mubr.bf16.vlgmr.msra.gmra.mrb[36].mxu0 %v8268_v29  ;;  %v15752_v29 = vld [vmem:[%s21655_s10 + $0x2e8] ss:$16 sps:$4 sm:$0xff]  }
 0x748   :  { %8714 = vmatpush1.bf16.msra.mxu0 %v15707_v58  ;;  %8745 = vmatprep.mubr.bf16.mxu0 %v16449_v35  ;;  %v15776_v58 = vld [vmem:[%s21655_s10 + $0x3e0] ss:$16 sps:$4 sm:$0xff]  }
 0x749   :  { %8715 = vmatprep.subr.bf16.mxu0 %v15712_v53  ;;  %v15781_v53 = vld [vmem:[%s21655_s10 + $0x30c] ss:$16 sps:$4 sm:$0xff]  }
 0x74c   :  { %8716 = vmatpush1.bf16.msra.mxu0 %v15710_v27  ;;  %v15779_v27 = vld [vmem:[%s21655_s10 + $0x308] ss:$16 sps:$4 sm:$0xff]  }
 0x74d   :  { %8717 = vmatprep.subr.bf16.mxu0 %v15715_v55  ;;  %v8834_v55 = vpack.c.b16 %v19921_v28, %v19921_v28  ;;  %v15785_v28 = vld [vmem:[%s21655_s10 + $0x348] ss:$16 sps:$4 sm:$0xff]  }
 0x750   :  { %8718 = vmatpush1.bf16.msra.mxu0 %v15713_v22  ;;  %v15784_v22 = vld [vmem:[%s21655_s10 + $0x32c] ss:$16 sps:$4 sm:$0xff]  }
 0x751   :  { %8719 = vmatprep.subr.bf16.mxu0 %v15718_v54  ;;  %v15782_v54 = vld [vmem:[%s21655_s10 + $0x328] ss:$16 sps:$4 sm:$0xff]  }
 0x754   :  { %8720 = vmatpush1.bf16.msra.mxu0 %v15716_v26  ;;  %v15787_v26 = vld [vmem:[%s21655_s10 + $0x34c] ss:$16 sps:$4 sm:$0xff]  }
 0x755   :  { %8721 = vmatprep.subr.bf16.mxu0 %v15721_v61  ;;  %v15790_v61 = vld [vmem:[%s21655_s10 + $0x36c] ss:$16 sps:$4 sm:$0xff]  }
 0x758   :  { %8722 = vmatpush1.bf16.msra.mxu0 %v15719_v50  ;;  %v15788_v50 = vld [vmem:[%s21655_s10 + $0x368] ss:$16 sps:$4 sm:$0xff]  }
 0x759   :  { %8723 = vmatprep.subr.bf16.mxu0 %v15724_v18  ;;  %v15793_v18 = vld [vmem:[%s21655_s10 + $0x38c] ss:$16 sps:$4 sm:$0xff]  }
 0x75c   :  { %8724 = vmatpush1.bf16.msra.mxu0 %v15722_v39  ;;  %v15791_v39 = vld [vmem:[%s21655_s10 + $0x388] ss:$16 sps:$4 sm:$0xff]  }
 0x75d   :  { %8725 = vmatprep.subr.bf16.mxu0 %v15727_v8  ;;  %v15796_v8 = vld [vmem:[%s21655_s10 + $0x3ac] ss:$16 sps:$4 sm:$0xff]  }
 0x760   :  { %8726 = vmatpush1.bf16.msra.mxu0 %v15725_v5  ;;  %v15794_v5 = vld [vmem:[%s21655_s10 + $0x3a8] ss:$16 sps:$4 sm:$0xff]  }
 0x761   :  { %8727 = vmatprep.subr.bf16.mxu0 %v15730_v60  ;;  %v15799_v60 = vld [vmem:[%s21655_s10 + $0x3cc] ss:$16 sps:$4 sm:$0xff]  }
 0x764   :  { %8728 = vmatpush1.bf16.msra.mxu0 %v15728_v24  ;;  %v15797_v24 = vld [vmem:[%s21655_s10 + $0x3c8] ss:$16 sps:$4 sm:$0xff]  }
 0x765   :  { %8754 = vmatprep.subr.bf16.mxu0 %v15733_v17  ;;  %v15802_v17 = vld [vmem:[%s21655_s10 + $0x3ec] ss:$16 sps:$4 sm:$0xff]  }
 0x767   :  { %8746 = vmatmul.mubr.bf16.vlgmr.msra.gmra.mrb[32].mxu0 %v8551_v63 }
 0x768   :  { %8755 = vmatpush1.bf16.msra.mxu0 %v15731_v45  ;;  %8786 = vmatprep.mubr.bf16.mxu0 %v16449_v35  ;;  %v15800_v45 = vld [vmem:[%s21655_s10 + $0x3e8] ss:$16 sps:$4 sm:$0xff]  }
 0x769   :  { %8756 = vmatprep.subr.bf16.mxu0 %v15736_v36  ;;  %v15803_v36 = vld [vmem:[%s21655_s10 + $0x400] ss:$16 sps:$4 sm:$0xff]  }
 0x76c   :  { %8757 = vmatpush1.bf16.msra.mxu0 %v15734_v43  ;;  %v15808_v43 = vld [vmem:[%s21655_s10 + $0x424] ss:$16 sps:$4 sm:$0xff]  }
 0x76d   :  { %8758 = vmatprep.subr.bf16.mxu0 %v15739_v31  ;;  %v15806_v31 = vld [vmem:[%s21655_s10 + $0x420] ss:$16 sps:$4 sm:$0xff]  }
 0x770   :  { %8759 = vmatpush1.bf16.msra.mxu0 %v15737_v30  ;;  %v15811_v30 = vld [vmem:[%s21655_s10 + $0x444] ss:$16 sps:$4 sm:$0xff]  }
 0x771   :  { %8760 = vmatprep.subr.bf16.mxu0 %v15742_v57  ;;  %v15809_v57 = vld [vmem:[%s21655_s10 + $0x440] ss:$16 sps:$4 sm:$0xff]  }
 0x774   :  { %8761 = vmatpush1.bf16.msra.mxu0 %v15740_v41  ;;  %v15814_v41 = vld [vmem:[%s21655_s10 + $0x464] ss:$16 sps:$4 sm:$0xff]  }
 0x775   :  { %8762 = vmatprep.subr.bf16.mxu0 %v15745_v1  ;;  %v15812_v1 = vld [vmem:[%s21655_s10 + $0x460] ss:$16 sps:$4 sm:$0xff]  }
 0x778   :  { %8763 = vmatpush1.bf16.msra.mxu0 %v15743_v59  ;;  %v15817_v59 = vld [vmem:[%s21655_s10 + $0x484] ss:$16 sps:$4 sm:$0xff]  }
 0x779   :  { %8764 = vmatprep.subr.bf16.mxu0 %v15748_v33  ;;  %v15815_v33 = vld [vmem:[%s21655_s10 + $0x480] ss:$16 sps:$4 sm:$0xff]  }
 0x77c   :  { %8765 = vmatpush1.bf16.msra.mxu0 %v15746_v38  ;;  %v15820_v38 = vld [vmem:[%s21655_s10 + $0x4a4] ss:$16 sps:$4 sm:$0xff]  }
 0x77d   :  { %8766 = vmatprep.subr.bf16.mxu0 %v15751_v11  ;;  %v15818_v11 = vld [vmem:[%s21655_s10 + $0x4a0] ss:$16 sps:$4 sm:$0xff]  }
 0x780   :  { %8767 = vmatpush1.bf16.msra.mxu0 %v15749_v46  ;;  %v15823_v46 = vld [vmem:[%s21655_s10 + $0x4c4] ss:$16 sps:$4 sm:$0xff]  }
 0x781   :  { %8768 = vmatprep.subr.bf16.mxu0 %v15754_v0  ;;  %v15821_v0 = vld [vmem:[%s21655_s10 + $0x4c0] ss:$16 sps:$4 sm:$0xff]  }
 0x784   :  { %8769 = vmatpush1.bf16.msra.mxu0 %v15752_v29  ;;  %v15826_v29 = vld [vmem:[%s21655_s10 + $0x4e4] ss:$16 sps:$4 sm:$0xff]  }
 0x785   :  { %8996 = vmatprep.subr.bf16.mxu0 %v15757_v2  ;;  %v9118_v2 = vrot.slane %v19939_v62, 7  ;;  %v15832_v62 = vld [vmem:[%s21655_s10 + $0x42c] ss:$16 sps:$4 sm:$0xff]  }
 0x787   :  { %8787 = vmatmul.mubr.bf16.vlgmr.msra.gmra.mrb[36].mxu0 %v8551_v63  ;;  %v15805_v63 = vld [vmem:[%s21655_s10 + $0x404] ss:$16 sps:$4 sm:$0xff]  }
 0x788   :  { %8997 = vmatpush1.bf16.msra.mxu0 %v15755_v23  ;;  %9028 = vmatprep.mubr.bf16.mxu0 %v16449_v35  ;;  %v15824_v23 = vld [vmem:[%s21655_s10 + $0x4e0] ss:$16 sps:$4 sm:$0xff]  }
 0x789   :  { %8998 = vmatprep.subr.bf16.mxu0 %v15760_v48  ;;  %v15829_v48 = vld [vmem:[%s21655_s10 + $0x40c] ss:$16 sps:$4 sm:$0xff]  }
 0x78c   :  { %8999 = vmatpush1.bf16.msra.mxu0 %v15758_v21  ;;  %v9119_v21 = vsel %vm7984_vm8, %v9118_v2, %v19932_v56  ;;  %v15835_v56 = vld [vmem:[%s21655_s10 + $0x44c] ss:$16 sps:$4 sm:$0xff]  }
 0x78d   :  { %9000 = vmatprep.subr.bf16.mxu0 %v15763_v9  ;;  %v15827_v9 = vld [vmem:[%s21655_s10 + $0x408] ss:$16 sps:$4 sm:$0xff]   ;;  %v15898_v2 = vld [vmem:[%s21655_s10 + $0x5ec] ss:$16 sps:$4 sm:$0xff]  }
 0x790   :  { %9001 = vmatpush1.bf16.msra.mxu0 %v15761_v3  ;;  %v9120_v3 = vpack.c.b16 %v9119_v21, %v9119_v21  ;;  %v15899_v21 = vld [vmem:[%s21655_s10 + $0x600] ss:$16 sps:$4 sm:$0xff]  }
 0x791   :  { %9002 = vmatprep.subr.bf16.mxu0 %v15766_v15  ;;  %v15830_v15 = vld [vmem:[%s21655_s10 + $0x428] ss:$16 sps:$4 sm:$0xff]  }
 0x794   :  { %9003 = vmatpush1.bf16.msra.mxu0 %v15764_v25  ;;  %v15833_v25 = vld [vmem:[%s21655_s10 + $0x448] ss:$16 sps:$4 sm:$0xff]  }
 0x795   :  { %9004 = vmatprep.subr.bf16.mxu0 %v15769_v16  ;;  %v15838_v16 = vld [vmem:[%s21655_s10 + $0x46c] ss:$16 sps:$4 sm:$0xff]  }
 0x798   :  { %9005 = vmatpush1.bf16.msra.mxu0 %v15767_v40  ;;  %v15836_v40 = vld [vmem:[%s21655_s10 + $0x468] ss:$16 sps:$4 sm:$0xff]  }
 0x799   :  { %9006 = vmatprep.subr.bf16.mxu0 %v15772_v32  ;;  %v15841_v32 = vld [vmem:[%s21655_s10 + $0x48c] ss:$16 sps:$4 sm:$0xff]  }
 0x79c   :  { %9007 = vmatpush1.bf16.msra.mxu0 %v15770_v4  ;;  %v15839_v4 = vld [vmem:[%s21655_s10 + $0x488] ss:$16 sps:$4 sm:$0xff]  }
 0x79d   :  { %9008 = vmatprep.subr.bf16.mxu0 %v15775_v44  ;;  %v15844_v44 = vld [vmem:[%s21655_s10 + $0x4ac] ss:$16 sps:$4 sm:$0xff]  }
 0x7a0   :  { %9009 = vmatpush1.bf16.msra.mxu0 %v15773_v12  ;;  %v15842_v12 = vld [vmem:[%s21655_s10 + $0x4a8] ss:$16 sps:$4 sm:$0xff]  }
 0x7a1   :  { %9010 = vmatprep.subr.bf16.mxu0 %v15778_v10  ;;  %v15847_v10 = vld [vmem:[%s21655_s10 + $0x4cc] ss:$16 sps:$4 sm:$0xff]  }
 0x7a4   :  { %9011 = vmatpush1.bf16.msra.mxu0 %v15776_v58  ;;  %v15845_v58 = vld [vmem:[%s21655_s10 + $0x4c8] ss:$16 sps:$4 sm:$0xff]  }
 0x7a5   :  { %9037 = vmatprep.subr.bf16.mxu0 %v15781_v53  ;;  %v15850_v53 = vld [vmem:[%s21655_s10 + $0x4ec] ss:$16 sps:$4 sm:$0xff]  }
 0x7a7   :  { %9029 = vmatmul.mubr.bf16.vlgmr.msra.gmra.mrb[32].mxu0 %v8834_v55 }
 0x7a8   :  { %9038 = vmatpush1.bf16.msra.mxu0 %v15779_v27  ;;  %9069 = vmatprep.mubr.bf16.mxu0 %v16449_v35  ;;  %v15848_v27 = vld [vmem:[%s21655_s10 + $0x4e8] ss:$16 sps:$4 sm:$0xff]  }
 0x7a9   :  { %9039 = vmatprep.subr.bf16.mxu0 %v15784_v22  ;;  %v15851_v22 = vld [vmem:[%s21655_s10 + $0x500] ss:$16 sps:$4 sm:$0xff]  }
 0x7ac   :  { %9040 = vmatpush1.bf16.msra.mxu0 %v15782_v54  ;;  %v15856_v54 = vld [vmem:[%s21655_s10 + $0x524] ss:$16 sps:$4 sm:$0xff]  }
 0x7ad   :  { %9041 = vmatprep.subr.bf16.mxu0 %v15787_v26  ;;  %v15854_v26 = vld [vmem:[%s21655_s10 + $0x520] ss:$16 sps:$4 sm:$0xff]  }
 0x7b0   :  { %9042 = vmatpush1.bf16.msra.mxu0 %v15785_v28  ;;  %v15859_v28 = vld [vmem:[%s21655_s10 + $0x544] ss:$16 sps:$4 sm:$0xff]  }
 0x7b1   :  { %9043 = vmatprep.subr.bf16.mxu0 %v15790_v61  ;;  %v15857_v61 = vld [vmem:[%s21655_s10 + $0x540] ss:$16 sps:$4 sm:$0xff]  }
 0x7b4   :  { %9044 = vmatpush1.bf16.msra.mxu0 %v15788_v50  ;;  %v15862_v50 = vld [vmem:[%s21655_s10 + $0x564] ss:$16 sps:$4 sm:$0xff]  }
 0x7b5   :  { %9045 = vmatprep.subr.bf16.mxu0 %v15793_v18  ;;  %v15860_v18 = vld [vmem:[%s21655_s10 + $0x560] ss:$16 sps:$4 sm:$0xff]  }
 0x7b8   :  { %9046 = vmatpush1.bf16.msra.mxu0 %v15791_v39  ;;  %v15865_v39 = vld [vmem:[%s21655_s10 + $0x584] ss:$16 sps:$4 sm:$0xff]  }
 0x7b9   :  { %9047 = vmatprep.subr.bf16.mxu0 %v15796_v8  ;;  %v15863_v8 = vld [vmem:[%s21655_s10 + $0x580] ss:$16 sps:$4 sm:$0xff]  }
 0x7bc   :  { %9048 = vmatpush1.bf16.msra.mxu0 %v15794_v5  ;;  %v15868_v5 = vld [vmem:[%s21655_s10 + $0x5a4] ss:$16 sps:$4 sm:$0xff]  }
 0x7bd   :  { %9049 = vmatprep.subr.bf16.mxu0 %v15799_v60  ;;  %v15866_v60 = vld [vmem:[%s21655_s10 + $0x5a0] ss:$16 sps:$4 sm:$0xff]  }
 0x7c0   :  { %9050 = vmatpush1.bf16.msra.mxu0 %v15797_v24  ;;  %v15871_v24 = vld [vmem:[%s21655_s10 + $0x5c4] ss:$16 sps:$4 sm:$0xff]  }
 0x7c1   :  { %9051 = vmatprep.subr.bf16.mxu0 %v15802_v17  ;;  %v15869_v17 = vld [vmem:[%s21655_s10 + $0x5c0] ss:$16 sps:$4 sm:$0xff]  }
 0x7c4   :  { %9052 = vmatpush1.bf16.msra.mxu0 %v15800_v45  ;;  %v15874_v45 = vld [vmem:[%s21655_s10 + $0x5e4] ss:$16 sps:$4 sm:$0xff]  }
 0x7c5   :  { %9282 = vmatprep.subr.bf16.mxu0 %v15805_v63  ;;  %v15872_v63 = vld [vmem:[%s21655_s10 + $0x5e0] ss:$16 sps:$4 sm:$0xff]  }
 0x7c7   :  { %9070 = vmatmul.mubr.bf16.vlgmr.msra.gmra.mrb[36].mxu0 %v8834_v55  ;;  %v15853_v55 = vld [vmem:[%s21655_s10 + $0x504] ss:$16 sps:$4 sm:$0xff]  }
 0x7c8   :  { %9283 = vmatpush1.bf16.msra.mxu0 %v15803_v36  ;;  %9314 = vmatprep.mubr.bf16.mxu0 %v16449_v35  ;;  %v15877_v36 = vld [vmem:[%s21655_s10 + $0x50c] ss:$16 sps:$4 sm:$0xff]  }
 0x7c9   :  { %9284 = vmatprep.subr.bf16.mxu0 %v15808_v43  ;;  %v15875_v43 = vld [vmem:[%s21655_s10 + $0x508] ss:$16 sps:$4 sm:$0xff]  }
 0x7cc   :  { %9285 = vmatpush1.bf16.msra.mxu0 %v15806_v31  ;;  %v9402_v31 = vpack.c.b16 %v19949_v7, %v19949_v7  ;;  %v15881_v7 = vld [vmem:[%s21655_s10 + $0x548] ss:$16 sps:$4 sm:$0xff]  }
 0x7cd   :  { %9286 = vmatprep.subr.bf16.mxu0 %v15811_v30  ;;  %v15880_v30 = vld [vmem:[%s21655_s10 + $0x52c] ss:$16 sps:$4 sm:$0xff]  }
 0x7d0   :  { %9287 = vmatpush1.bf16.msra.mxu0 %v15809_v57  ;;  %v15878_v57 = vld [vmem:[%s21655_s10 + $0x528] ss:$16 sps:$4 sm:$0xff]  }
 0x7d1   :  { %9288 = vmatprep.subr.bf16.mxu0 %v15814_v41  ;;  %v15883_v41 = vld [vmem:[%s21655_s10 + $0x54c] ss:$16 sps:$4 sm:$0xff]  }
 0x7d4   :  { %9289 = vmatpush1.bf16.msra.mxu0 %v15812_v1  ;;  %v15886_v1 = vld [vmem:[%s21655_s10 + $0x56c] ss:$16 sps:$4 sm:$0xff]  }
 0x7d5   :  { %9290 = vmatprep.subr.bf16.mxu0 %v15817_v59  ;;  %v15884_v59 = vld [vmem:[%s21655_s10 + $0x568] ss:$16 sps:$4 sm:$0xff]  }
 0x7d8   :  { %9291 = vmatpush1.bf16.msra.mxu0 %v15815_v33  ;;  %v15889_v33 = vld [vmem:[%s21655_s10 + $0x58c] ss:$16 sps:$4 sm:$0xff]  }
 0x7d9   :  { %9292 = vmatprep.subr.bf16.mxu0 %v15820_v38  ;;  %v15887_v38 = vld [vmem:[%s21655_s10 + $0x588] ss:$16 sps:$4 sm:$0xff]  }
 0x7dc   :  { %9293 = vmatpush1.bf16.msra.mxu0 %v15818_v11  ;;  %v15892_v11 = vld [vmem:[%s21655_s10 + $0x5ac] ss:$16 sps:$4 sm:$0xff]  }
 0x7dd   :  { %9294 = vmatprep.subr.bf16.mxu0 %v15823_v46  ;;  %v15890_v46 = vld [vmem:[%s21655_s10 + $0x5a8] ss:$16 sps:$4 sm:$0xff]  }
 0x7e0   :  { %9295 = vmatpush1.bf16.msra.mxu0 %v15821_v0  ;;  %v15895_v0 = vld [vmem:[%s21655_s10 + $0x5cc] ss:$16 sps:$4 sm:$0xff]  }
 0x7e1   :  { %9296 = vmatprep.subr.bf16.mxu0 %v15826_v29  ;;  %v15893_v29 = vld [vmem:[%s21655_s10 + $0x5c8] ss:$16 sps:$4 sm:$0xff]  }
 0x7e4   :  { %9297 = vmatpush1.bf16.msra.mxu0 %v15824_v23  ;;  %v15896_v23 = vld [vmem:[%s21655_s10 + $0x5e8] ss:$16 sps:$4 sm:$0xff]  }
 0x7e5   :  { %9323 = vmatprep.subr.bf16.mxu0 %v15829_v48  ;;  %v15901_v48 = vld [vmem:[%s21655_s10 + $0x604] ss:$16 sps:$4 sm:$0xff]  }
 0x7e7   :  { %9315 = vmatmul.mubr.bf16.vlgmr.msra.gmra.mrb[32].mxu0 %v9120_v3 }
 0x7e8   :  { %9324 = vmatpush1.bf16.msra.mxu0 %v15827_v9  ;;  %9355 = vmatprep.mubr.bf16.mxu0 %v16449_v35  ;;  %v15904_v9 = vld [vmem:[%s21655_s10 + $0x624] ss:$16 sps:$4 sm:$0xff]  }
 0x7e9   :  { %9325 = vmatprep.subr.bf16.mxu0 %v15832_v62  ;;  %v15907_v62 = vld [vmem:[%s21655_s10 + $0x644] ss:$16 sps:$4 sm:$0xff]  }
 0x7ec   :  { %9326 = vmatpush1.bf16.msra.mxu0 %v15830_v15  ;;  %v15905_v15 = vld [vmem:[%s21655_s10 + $0x640] ss:$16 sps:$4 sm:$0xff]  }
 0x7ed   :  { %9327 = vmatprep.subr.bf16.mxu0 %v15835_v56  ;;  %v15910_v56 = vld [vmem:[%s21655_s10 + $0x664] ss:$16 sps:$4 sm:$0xff]  }
 0x7f0   :  { %9328 = vmatpush1.bf16.msra.mxu0 %v15833_v25  ;;  %v15908_v25 = vld [vmem:[%s21655_s10 + $0x660] ss:$16 sps:$4 sm:$0xff]  }
 0x7f1   :  { %9329 = vmatprep.subr.bf16.mxu0 %v15838_v16  ;;  %v15913_v16 = vld [vmem:[%s21655_s10 + $0x684] ss:$16 sps:$4 sm:$0xff]  }
 0x7f4   :  { %9330 = vmatpush1.bf16.msra.mxu0 %v15836_v40  ;;  %v15911_v40 = vld [vmem:[%s21655_s10 + $0x680] ss:$16 sps:$4 sm:$0xff]  }
 0x7f5   :  { %9331 = vmatprep.subr.bf16.mxu0 %v15841_v32  ;;  %v15916_v32 = vld [vmem:[%s21655_s10 + $0x6a4] ss:$16 sps:$4 sm:$0xff]  }
 0x7f8   :  { %9332 = vmatpush1.bf16.msra.mxu0 %v15839_v4  ;;  %v15914_v4 = vld [vmem:[%s21655_s10 + $0x6a0] ss:$16 sps:$4 sm:$0xff]  }
 0x7f9   :  { %9333 = vmatprep.subr.bf16.mxu0 %v15844_v44  ;;  %v15919_v44 = vld [vmem:[%s21655_s10 + $0x6c4] ss:$16 sps:$4 sm:$0xff]  }
 0x7fc   :  { %9334 = vmatpush1.bf16.msra.mxu0 %v15842_v12  ;;  %v15917_v12 = vld [vmem:[%s21655_s10 + $0x6c0] ss:$16 sps:$4 sm:$0xff]  }
 0x7fd   :  { %9335 = vmatprep.subr.bf16.mxu0 %v15847_v10  ;;  %v15922_v10 = vld [vmem:[%s21655_s10 + $0x6e4] ss:$16 sps:$4 sm:$0xff]  }
 0x800   :  { %9336 = vmatpush1.bf16.msra.mxu0 %v15845_v58  ;;  %v15920_v58 = vld [vmem:[%s21655_s10 + $0x6e0] ss:$16 sps:$4 sm:$0xff]  }
 0x801   :  { %9337 = vmatprep.subr.bf16.mxu0 %v15850_v53  ;;  %v15925_v53 = vld [vmem:[%s21655_s10 + $0x60c] ss:$16 sps:$4 sm:$0xff]  }
 0x804   :  { %9338 = vmatpush1.bf16.msra.mxu0 %v15848_v27  ;;  %v15923_v27 = vld [vmem:[%s21655_s10 + $0x608] ss:$16 sps:$4 sm:$0xff]  }
 0x805   :  { %9564 = vmatprep.subr.bf16.mxu0 %v15853_v55  ;;  %v9685_v55 = vpack.c.b16 %v19959_v49, %v19959_v49  ;;  %v15929_v49 = vld [vmem:[%s21655_s10 + $0x648] ss:$16 sps:$4 sm:$0xff]  }
 0x807   :  { %9356 = vmatmul.mubr.bf16.vlgmr.msra.gmra.mrb[36].mxu0 %v9120_v3  ;;  %v15902_v3 = vld [vmem:[%s21655_s10 + $0x620] ss:$16 sps:$4 sm:$0xff]  }
 0x808   :  { %9565 = vmatpush1.bf16.msra.mxu0 %v15851_v22  ;;  %9596 = vmatprep.mubr.bf16.mxu0 %v16449_v35  ;;  %v15928_v22 = vld [vmem:[%s21655_s10 + $0x62c] ss:$16 sps:$4 sm:$0xff]  }
 0x809   :  { %9566 = vmatprep.subr.bf16.mxu0 %v15856_v54  ;;  %v15926_v54 = vld [vmem:[%s21655_s10 + $0x628] ss:$16 sps:$4 sm:$0xff]  }
 0x80c   :  { %9567 = vmatpush1.bf16.msra.mxu0 %v15854_v26  ;;  %v15931_v26 = vld [vmem:[%s21655_s10 + $0x64c] ss:$16 sps:$4 sm:$0xff]  }
 0x80d   :  { %9568 = vmatprep.subr.bf16.mxu0 %v15859_v28  ;;  %v15934_v28 = vld [vmem:[%s21655_s10 + $0x66c] ss:$16 sps:$4 sm:$0xff]  }
 0x810   :  { %9569 = vmatpush1.bf16.msra.mxu0 %v15857_v61  ;;  %v15932_v61 = vld [vmem:[%s21655_s10 + $0x668] ss:$16 sps:$4 sm:$0xff]  }
 0x811   :  { %9570 = vmatprep.subr.bf16.mxu0 %v15862_v50  ;;  %v15937_v50 = vld [vmem:[%s21655_s10 + $0x68c] ss:$16 sps:$4 sm:$0xff]  }
 0x814   :  { %9571 = vmatpush1.bf16.msra.mxu0 %v15860_v18  ;;  %v15935_v18 = vld [vmem:[%s21655_s10 + $0x688] ss:$16 sps:$4 sm:$0xff]  }
 0x815   :  { %9572 = vmatprep.subr.bf16.mxu0 %v15865_v39  ;;  %v15940_v39 = vld [vmem:[%s21655_s10 + $0x6ac] ss:$16 sps:$4 sm:$0xff]  }
 0x818   :  { %9573 = vmatpush1.bf16.msra.mxu0 %v15863_v8  ;;  %v15938_v8 = vld [vmem:[%s21655_s10 + $0x6a8] ss:$16 sps:$4 sm:$0xff]  }
 0x819   :  { %9574 = vmatprep.subr.bf16.mxu0 %v15868_v5  ;;  %v15943_v5 = vld [vmem:[%s21655_s10 + $0x6cc] ss:$16 sps:$4 sm:$0xff]  }
 0x81c   :  { %9575 = vmatpush1.bf16.msra.mxu0 %v15866_v60  ;;  %v15941_v60 = vld [vmem:[%s21655_s10 + $0x6c8] ss:$16 sps:$4 sm:$0xff]  }
 0x81d   :  { %9576 = vmatprep.subr.bf16.mxu0 %v15871_v24  ;;  %v15946_v24 = vld [vmem:[%s21655_s10 + $0x6ec] ss:$16 sps:$4 sm:$0xff]  }
 0x820   :  { %9577 = vmatpush1.bf16.msra.mxu0 %v15869_v17  ;;  %v15944_v17 = vld [vmem:[%s21655_s10 + $0x6e8] ss:$16 sps:$4 sm:$0xff]  }
 0x821   :  { %9578 = vmatprep.subr.bf16.mxu0 %v15874_v45  ;;  %v15949_v45 = vld [vmem:[%s21655_s10 + $0x704] ss:$16 sps:$4 sm:$0xff]  }
 0x824   :  { %9579 = vmatpush1.bf16.msra.mxu0 %v15872_v63  ;;  %v15947_v63 = vld [vmem:[%s21655_s10 + $0x700] ss:$16 sps:$4 sm:$0xff]  }
 0x825   :  { %9605 = vmatprep.subr.bf16.mxu0 %v15877_v36  ;;  %v15952_v36 = vld [vmem:[%s21655_s10 + $0x724] ss:$16 sps:$4 sm:$0xff]  }
 0x827   :  { %9597 = vmatmul.mubr.bf16.vlgmr.msra.gmra.mrb[32].mxu0 %v9402_v31 }
 0x828   :  { %9606 = vmatpush1.bf16.msra.mxu0 %v15875_v43  ;;  %9637 = vmatprep.mubr.bf16.mxu0 %v16449_v35  ;;  %v15950_v43 = vld [vmem:[%s21655_s10 + $0x720] ss:$16 sps:$4 sm:$0xff]  }
 0x829   :  { %9607 = vmatprep.subr.bf16.mxu0 %v15880_v30  ;;  %v15953_v30 = vld [vmem:[%s21655_s10 + $0x740] ss:$16 sps:$4 sm:$0xff]  }
 0x82c   :  { %9608 = vmatpush1.bf16.msra.mxu0 %v15878_v57  ;;  %v15958_v57 = vld [vmem:[%s21655_s10 + $0x764] ss:$16 sps:$4 sm:$0xff]  }
 0x82d   :  { %9609 = vmatprep.subr.bf16.mxu0 %v15883_v41  ;;  %v15956_v41 = vld [vmem:[%s21655_s10 + $0x760] ss:$16 sps:$4 sm:$0xff]  }
 0x830   :  { %9610 = vmatpush1.bf16.msra.mxu0 %v15881_v7  ;;  %v15961_v7 = vld [vmem:[%s21655_s10 + $0x784] ss:$16 sps:$4 sm:$0xff]  }
 0x831   :  { %9611 = vmatprep.subr.bf16.mxu0 %v15886_v1  ;;  %v15959_v1 = vld [vmem:[%s21655_s10 + $0x780] ss:$16 sps:$4 sm:$0xff]  }
 0x834   :  { %9612 = vmatpush1.bf16.msra.mxu0 %v15884_v59  ;;  %v15964_v59 = vld [vmem:[%s21655_s10 + $0x7a4] ss:$16 sps:$4 sm:$0xff]  }
 0x835   :  { %9613 = vmatprep.subr.bf16.mxu0 %v15889_v33  ;;  %v15962_v33 = vld [vmem:[%s21655_s10 + $0x7a0] ss:$16 sps:$4 sm:$0xff]  }
 0x838   :  { %9614 = vmatpush1.bf16.msra.mxu0 %v15887_v38  ;;  %v15967_v38 = vld [vmem:[%s21655_s10 + $0x7c4] ss:$16 sps:$4 sm:$0xff]  }
 0x839   :  { %9615 = vmatprep.subr.bf16.mxu0 %v15892_v11  ;;  %v15965_v11 = vld [vmem:[%s21655_s10 + $0x7c0] ss:$16 sps:$4 sm:$0xff]  }
 0x83c   :  { %9616 = vmatpush1.bf16.msra.mxu0 %v15890_v46  ;;  %v15970_v46 = vld [vmem:[%s21655_s10 + $0x7e4] ss:$16 sps:$4 sm:$0xff]  }
 0x83d   :  { %9617 = vmatprep.subr.bf16.mxu0 %v15895_v0  ;;  %v15968_v0 = vld [vmem:[%s21655_s10 + $0x7e0] ss:$16 sps:$4 sm:$0xff]  }
 0x840   :  { %9618 = vmatpush1.bf16.msra.mxu0 %v15893_v29  ;;  %v15973_v29 = vld [vmem:[%s21655_s10 + $0x70c] ss:$16 sps:$4 sm:$0xff]  }
 0x841   :  { %9619 = vmatprep.subr.bf16.mxu0 %v15898_v2  ;;  %v15971_v2 = vld [vmem:[%s21655_s10 + $0x708] ss:$16 sps:$4 sm:$0xff]  }
 0x844   :  { %9620 = vmatpush1.bf16.msra.mxu0 %v15896_v23  ;;  %v9968_v23 = vpack.c.b16 %v19968_v6, %v19968_v6  ;;  %v15977_v6 = vld [vmem:[%s21655_s10 + $0x748] ss:$16 sps:$4 sm:$0xff]  }
 0x845   :  { %9847 = vmatprep.subr.bf16.mxu0 %v15901_v48  ;;  %v15976_v48 = vld [vmem:[%s21655_s10 + $0x72c] ss:$16 sps:$4 sm:$0xff]  }
 0x847   :  { %9638 = vmatmul.mubr.bf16.vlgmr.msra.gmra.mrb[36].mxu0 %v9402_v31  ;;  %v15955_v31 = vld [vmem:[%s21655_s10 + $0x744] ss:$16 sps:$4 sm:$0xff]  }
 0x848   :  { %9848 = vmatpush1.bf16.msra.mxu0 %v15899_v21  ;;  %9879 = vmatprep.mubr.bf16.mxu0 %v16449_v35  ;;  %v15974_v21 = vld [vmem:[%s21655_s10 + $0x728] ss:$16 sps:$4 sm:$0xff]  }
 0x849   :  { %9849 = vmatprep.subr.bf16.mxu0 %v15904_v9  ;;  %v15979_v9 = vld [vmem:[%s21655_s10 + $0x74c] ss:$16 sps:$4 sm:$0xff]  }
 0x84c   :  { %9850 = vmatpush1.bf16.msra.mxu0 %v15902_v3  ;;  %v15982_v3 = vld [vmem:[%s21655_s10 + $0x76c] ss:$16 sps:$4 sm:$0xff]  }
 0x84d   :  { %9851 = vmatprep.subr.bf16.mxu0 %v15907_v62  ;;  %v15980_v62 = vld [vmem:[%s21655_s10 + $0x768] ss:$16 sps:$4 sm:$0xff]  }
 0x850   :  { %9852 = vmatpush1.bf16.msra.mxu0 %v15905_v15  ;;  %v15985_v15 = vld [vmem:[%s21655_s10 + $0x78c] ss:$16 sps:$4 sm:$0xff]  }
 0x851   :  { %9853 = vmatprep.subr.bf16.mxu0 %v15910_v56  ;;  %v15983_v56 = vld [vmem:[%s21655_s10 + $0x788] ss:$16 sps:$4 sm:$0xff]  }
 0x854   :  { %9854 = vmatpush1.bf16.msra.mxu0 %v15908_v25  ;;  %v15988_v25 = vld [vmem:[%s21655_s10 + $0x7ac] ss:$16 sps:$4 sm:$0xff]  }
 0x855   :  { %9855 = vmatprep.subr.bf16.mxu0 %v15913_v16  ;;  %v15986_v16 = vld [vmem:[%s21655_s10 + $0x7a8] ss:$16 sps:$4 sm:$0xff]  }
 0x858   :  { %9856 = vmatpush1.bf16.msra.mxu0 %v15911_v40  ;;  %v15991_v40 = vld [vmem:[%s21655_s10 + $0x7cc] ss:$16 sps:$4 sm:$0xff]  }
 0x859   :  { %9857 = vmatprep.subr.bf16.mxu0 %v15916_v32  ;;  %v15989_v32 = vld [vmem:[%s21655_s10 + $0x7c8] ss:$16 sps:$4 sm:$0xff]  }
 0x85c   :  { %9858 = vmatpush1.bf16.msra.mxu0 %v15914_v4  ;;  %v15994_v4 = vld [vmem:[%s21655_s10 + $0x7ec] ss:$16 sps:$4 sm:$0xff]  }
 0x85d   :  { %9859 = vmatprep.subr.bf16.mxu0 %v15919_v44  ;;  %v15992_v44 = vld [vmem:[%s21655_s10 + $0x7e8] ss:$16 sps:$4 sm:$0xff]  }
 0x860   :  { %9860 = vmatpush1.bf16.msra.mxu0 %v15917_v12  ;;  %v15997_v12 = vld [vmem:[%s21655_s10 + $0x804] ss:$16 sps:$4 sm:$0xff]  }
 0x861   :  { %9861 = vmatprep.subr.bf16.mxu0 %v15922_v10  ;;  %v15995_v10 = vld [vmem:[%s21655_s10 + $0x800] ss:$16 sps:$4 sm:$0xff]  }
 0x864   :  { %9862 = vmatpush1.bf16.msra.mxu0 %v15920_v58  ;;  %v16000_v58 = vld [vmem:[%s21655_s10 + $0x824] ss:$16 sps:$4 sm:$0xff]  }
 0x865   :  { %9888 = vmatprep.subr.bf16.mxu0 %v15925_v53  ;;  %v15998_v53 = vld [vmem:[%s21655_s10 + $0x820] ss:$16 sps:$4 sm:$0xff]  }
 0x867   :  { %9880 = vmatmul.mubr.bf16.vlgmr.msra.gmra.mrb[32].mxu0 %v9685_v55 }
 0x868   :  { %9889 = vmatpush1.bf16.msra.mxu0 %v15923_v27  ;;  %9920 = vmatprep.mubr.bf16.mxu0 %v16449_v35  ;;  %v16003_v27 = vld [vmem:[%s21655_s10 + $0x844] ss:$16 sps:$4 sm:$0xff]  }
 0x869   :  { %9890 = vmatprep.subr.bf16.mxu0 %v15928_v22  ;;  %v16006_v22 = vld [vmem:[%s21655_s10 + $0x864] ss:$16 sps:$4 sm:$0xff]  }
 0x86c   :  { %9891 = vmatpush1.bf16.msra.mxu0 %v15926_v54  ;;  %v16004_v54 = vld [vmem:[%s21655_s10 + $0x860] ss:$16 sps:$4 sm:$0xff]  }
 0x86d   :  { %9892 = vmatprep.subr.bf16.mxu0 %v15931_v26  ;;  %v16009_v26 = vld [vmem:[%s21655_s10 + $0x884] ss:$16 sps:$4 sm:$0xff]  }
 0x870   :  { %9893 = vmatpush1.bf16.msra.mxu0 %v15929_v49  ;;  %v16007_v49 = vld [vmem:[%s21655_s10 + $0x880] ss:$16 sps:$4 sm:$0xff]  }
 0x871   :  { %9894 = vmatprep.subr.bf16.mxu0 %v15934_v28  ;;  %v16012_v28 = vld [vmem:[%s21655_s10 + $0x8a4] ss:$16 sps:$4 sm:$0xff]  }
 0x874   :  { %9895 = vmatpush1.bf16.msra.mxu0 %v15932_v61  ;;  %v16010_v61 = vld [vmem:[%s21655_s10 + $0x8a0] ss:$16 sps:$4 sm:$0xff]  }
 0x875   :  { %9896 = vmatprep.subr.bf16.mxu0 %v15937_v50  ;;  %v16015_v50 = vld [vmem:[%s21655_s10 + $0x8c4] ss:$16 sps:$4 sm:$0xff]  }
 0x878   :  { %9897 = vmatpush1.bf16.msra.mxu0 %v15935_v18  ;;  %v16013_v18 = vld [vmem:[%s21655_s10 + $0x8c0] ss:$16 sps:$4 sm:$0xff]  }
 0x879   :  { %9898 = vmatprep.subr.bf16.mxu0 %v15940_v39  ;;  %v16018_v39 = vld [vmem:[%s21655_s10 + $0x8e4] ss:$16 sps:$4 sm:$0xff]  }
 0x87c   :  { %9899 = vmatpush1.bf16.msra.mxu0 %v15938_v8  ;;  %v10252_v8 = vrot.slane %v19972_v37, 7  ;;  %v16024_v37 = vld [vmem:[%s21655_s10 + $0x82c] ss:$16 sps:$4 sm:$0xff]  }
 0x87d   :  { %9900 = vmatprep.subr.bf16.mxu0 %v15943_v5  ;;  %v16016_v5 = vld [vmem:[%s21655_s10 + $0x8e0] ss:$16 sps:$4 sm:$0xff]  }
 0x880   :  { %9901 = vmatpush1.bf16.msra.mxu0 %v15941_v60  ;;  %v16021_v60 = vld [vmem:[%s21655_s10 + $0x80c] ss:$16 sps:$4 sm:$0xff]  }
 0x881   :  { %9902 = vmatprep.subr.bf16.mxu0 %v15946_v24  ;;  %v10253_v24 = vsel %vm7984_vm8, %v10252_v8, %v19942_v34  ;;  %v16027_v34 = vld [vmem:[%s21655_s10 + $0x84c] ss:$16 sps:$4 sm:$0xff]   ;;  %v16094_v8 = vld [vmem:[%s21655_s10 + $0xa20] ss:$16 sps:$4 sm:$0xff]  }
 0x884   :  { %9903 = vmatpush1.bf16.msra.mxu0 %v15944_v17  ;;  %v16019_v17 = vld [vmem:[%s21655_s10 + $0x808] ss:$16 sps:$4 sm:$0xff]  }
 0x885   :  { %10130 = vmatprep.subr.bf16.mxu0 %v15949_v45  ;;  %v10254_v45 = vpack.c.b16 %v10253_v24, %v10253_v24  ;;  %v16102_v24 = vld [vmem:[%s21655_s10 + $0xa64] ss:$16 sps:$4 sm:$0xff]  }
 0x887   :  { %9921 = vmatmul.mubr.bf16.vlgmr.msra.gmra.mrb[36].mxu0 %v9685_v55  ;;  %v16001_v55 = vld [vmem:[%s21655_s10 + $0x840] ss:$16 sps:$4 sm:$0xff]  }
 0x888   :  { %10131 = vmatpush1.bf16.msra.mxu0 %v15947_v63  ;;  %10162 = vmatprep.mubr.bf16.mxu0 %v16449_v35  ;;  %v16022_v63 = vld [vmem:[%s21655_s10 + $0x828] ss:$16 sps:$4 sm:$0xff]  }
 0x889   :  { %10132 = vmatprep.subr.bf16.mxu0 %v15952_v36  ;;  %v16025_v36 = vld [vmem:[%s21655_s10 + $0x848] ss:$16 sps:$4 sm:$0xff]  }
 0x88c   :  { %10133 = vmatpush1.bf16.msra.mxu0 %v15950_v43  ;;  %v16030_v43 = vld [vmem:[%s21655_s10 + $0x86c] ss:$16 sps:$4 sm:$0xff]  }
 0x88d   :  { %10134 = vmatprep.subr.bf16.mxu0 %v15955_v31  ;;  %v16028_v31 = vld [vmem:[%s21655_s10 + $0x868] ss:$16 sps:$4 sm:$0xff]  }
 0x890   :  { %10135 = vmatpush1.bf16.msra.mxu0 %v15953_v30  ;;  %v16033_v30 = vld [vmem:[%s21655_s10 + $0x88c] ss:$16 sps:$4 sm:$0xff]  }
 0x891   :  { %10136 = vmatprep.subr.bf16.mxu0 %v15958_v57  ;;  %v16031_v57 = vld [vmem:[%s21655_s10 + $0x888] ss:$16 sps:$4 sm:$0xff]  }
 0x894   :  { %10137 = vmatpush1.bf16.msra.mxu0 %v15956_v41  ;;  %v16036_v41 = vld [vmem:[%s21655_s10 + $0x8ac] ss:$16 sps:$4 sm:$0xff]  }
 0x895   :  { %10138 = vmatprep.subr.bf16.mxu0 %v15961_v7  ;;  %v16034_v7 = vld [vmem:[%s21655_s10 + $0x8a8] ss:$16 sps:$4 sm:$0xff]  }
 0x898   :  { %10139 = vmatpush1.bf16.msra.mxu0 %v15959_v1  ;;  %v16039_v1 = vld [vmem:[%s21655_s10 + $0x8cc] ss:$16 sps:$4 sm:$0xff]  }
 0x899   :  { %10140 = vmatprep.subr.bf16.mxu0 %v15964_v59  ;;  %v16037_v59 = vld [vmem:[%s21655_s10 + $0x8c8] ss:$16 sps:$4 sm:$0xff]  }
 0x89c   :  { %10141 = vmatpush1.bf16.msra.mxu0 %v15962_v33  ;;  %v16042_v33 = vld [vmem:[%s21655_s10 + $0x8ec] ss:$16 sps:$4 sm:$0xff]  }
 0x89d   :  { %10142 = vmatprep.subr.bf16.mxu0 %v15967_v38  ;;  %v16040_v38 = vld [vmem:[%s21655_s10 + $0x8e8] ss:$16 sps:$4 sm:$0xff]  }
 0x8a0   :  { %10143 = vmatpush1.bf16.msra.mxu0 %v15965_v11  ;;  %v16045_v11 = vld [vmem:[%s21655_s10 + $0x904] ss:$16 sps:$4 sm:$0xff]  }
 0x8a1   :  { %10144 = vmatprep.subr.bf16.mxu0 %v15970_v46  ;;  %v16043_v46 = vld [vmem:[%s21655_s10 + $0x900] ss:$16 sps:$4 sm:$0xff]  }
 0x8a4   :  { %10145 = vmatpush1.bf16.msra.mxu0 %v15968_v0  ;;  %v16048_v0 = vld [vmem:[%s21655_s10 + $0x924] ss:$16 sps:$4 sm:$0xff]  }
 0x8a5   :  { %10171 = vmatprep.subr.bf16.mxu0 %v15973_v29  ;;  %v16046_v29 = vld [vmem:[%s21655_s10 + $0x920] ss:$16 sps:$4 sm:$0xff]  }
 0x8a7   :  { %10163 = vmatmul.mubr.bf16.vlgmr.msra.gmra.mrb[32].mxu0 %v9968_v23 }
 0x8a8   :  { %10172 = vmatpush1.bf16.msra.mxu0 %v15971_v2  ;;  %10203 = vmatprep.mubr.bf16.mxu0 %v16449_v35  ;;  %v16051_v2 = vld [vmem:[%s21655_s10 + $0x944] ss:$16 sps:$4 sm:$0xff]  }
 0x8a9   :  { %10173 = vmatprep.subr.bf16.mxu0 %v15976_v48  ;;  %v16054_v48 = vld [vmem:[%s21655_s10 + $0x964] ss:$16 sps:$4 sm:$0xff]  }
 0x8ac   :  { %10174 = vmatpush1.bf16.msra.mxu0 %v15974_v21  ;;  %v16052_v21 = vld [vmem:[%s21655_s10 + $0x960] ss:$16 sps:$4 sm:$0xff]  }
 0x8ad   :  { %10175 = vmatprep.subr.bf16.mxu0 %v15979_v9  ;;  %v16057_v9 = vld [vmem:[%s21655_s10 + $0x984] ss:$16 sps:$4 sm:$0xff]  }
 0x8b0   :  { %10176 = vmatpush1.bf16.msra.mxu0 %v15977_v6  ;;  %v16055_v6 = vld [vmem:[%s21655_s10 + $0x980] ss:$16 sps:$4 sm:$0xff]  }
 0x8b1   :  { %10177 = vmatprep.subr.bf16.mxu0 %v15982_v3  ;;  %v16060_v3 = vld [vmem:[%s21655_s10 + $0x9a4] ss:$16 sps:$4 sm:$0xff]  }
 0x8b4   :  { %10178 = vmatpush1.bf16.msra.mxu0 %v15980_v62  ;;  %v16058_v62 = vld [vmem:[%s21655_s10 + $0x9a0] ss:$16 sps:$4 sm:$0xff]  }
 0x8b5   :  { %10179 = vmatprep.subr.bf16.mxu0 %v15985_v15  ;;  %v16063_v15 = vld [vmem:[%s21655_s10 + $0x9c4] ss:$16 sps:$4 sm:$0xff]  }
 0x8b8   :  { %10180 = vmatpush1.bf16.msra.mxu0 %v15983_v56  ;;  %v16061_v56 = vld [vmem:[%s21655_s10 + $0x9c0] ss:$16 sps:$4 sm:$0xff]  }
 0x8b9   :  { %10181 = vmatprep.subr.bf16.mxu0 %v15988_v25  ;;  %v16066_v25 = vld [vmem:[%s21655_s10 + $0x9e4] ss:$16 sps:$4 sm:$0xff]  }
 0x8bc   :  { %10182 = vmatpush1.bf16.msra.mxu0 %v15986_v16  ;;  %v16064_v16 = vld [vmem:[%s21655_s10 + $0x9e0] ss:$16 sps:$4 sm:$0xff]  }
 0x8bd   :  { %10183 = vmatprep.subr.bf16.mxu0 %v15991_v40  ;;  %v16069_v40 = vld [vmem:[%s21655_s10 + $0x90c] ss:$16 sps:$4 sm:$0xff]  }
 0x8c0   :  { %10184 = vmatpush1.bf16.msra.mxu0 %v15989_v32  ;;  %v16067_v32 = vld [vmem:[%s21655_s10 + $0x908] ss:$16 sps:$4 sm:$0xff]  }
 0x8c1   :  { %10185 = vmatprep.subr.bf16.mxu0 %v15994_v4  ;;  %v10536_v4 = vpack.c.b16 %v19976_v52, %v19976_v52  ;;  %v16073_v52 = vld [vmem:[%s21655_s10 + $0x948] ss:$16 sps:$4 sm:$0xff]  }
 0x8c4   :  { %10186 = vmatpush1.bf16.msra.mxu0 %v15992_v44  ;;  %v16072_v44 = vld [vmem:[%s21655_s10 + $0x92c] ss:$16 sps:$4 sm:$0xff]  }
 0x8c5   :  { %10416 = vmatprep.subr.bf16.mxu0 %v15997_v12  ;;  %v16070_v12 = vld [vmem:[%s21655_s10 + $0x928] ss:$16 sps:$4 sm:$0xff]  }
 0x8c7   :  { %10204 = vmatmul.mubr.bf16.vlgmr.msra.gmra.mrb[36].mxu0 %v9968_v23  ;;  %v16049_v23 = vld [vmem:[%s21655_s10 + $0x940] ss:$16 sps:$4 sm:$0xff]  }
 0x8c8   :  { %10417 = vmatpush1.bf16.msra.mxu0 %v15995_v10  ;;  %10448 = vmatprep.mubr.bf16.mxu0 %v16449_v35  ;;  %v16075_v10 = vld [vmem:[%s21655_s10 + $0x94c] ss:$16 sps:$4 sm:$0xff]  }
 0x8c9   :  { %10418 = vmatprep.subr.bf16.mxu0 %v16000_v58  ;;  %v16078_v58 = vld [vmem:[%s21655_s10 + $0x96c] ss:$16 sps:$4 sm:$0xff]  }
 0x8cc   :  { %10419 = vmatpush1.bf16.msra.mxu0 %v15998_v53  ;;  %v16076_v53 = vld [vmem:[%s21655_s10 + $0x968] ss:$16 sps:$4 sm:$0xff]  }
 0x8cd   :  { %10420 = vmatprep.subr.bf16.mxu0 %v16003_v27  ;;  %v16081_v27 = vld [vmem:[%s21655_s10 + $0x98c] ss:$16 sps:$4 sm:$0xff]  }
 0x8d0   :  { %10421 = vmatpush1.bf16.msra.mxu0 %v16001_v55  ;;  %v16079_v55 = vld [vmem:[%s21655_s10 + $0x988] ss:$16 sps:$4 sm:$0xff]  }
 0x8d1   :  { %10422 = vmatprep.subr.bf16.mxu0 %v16006_v22  ;;  %v16084_v22 = vld [vmem:[%s21655_s10 + $0x9ac] ss:$16 sps:$4 sm:$0xff]  }
 0x8d4   :  { %10423 = vmatpush1.bf16.msra.mxu0 %v16004_v54  ;;  %v16082_v54 = vld [vmem:[%s21655_s10 + $0x9a8] ss:$16 sps:$4 sm:$0xff]  }
 0x8d5   :  { %10424 = vmatprep.subr.bf16.mxu0 %v16009_v26  ;;  %v16087_v26 = vld [vmem:[%s21655_s10 + $0x9cc] ss:$16 sps:$4 sm:$0xff]  }
 0x8d8   :  { %10425 = vmatpush1.bf16.msra.mxu0 %v16007_v49  ;;  %v16085_v49 = vld [vmem:[%s21655_s10 + $0x9c8] ss:$16 sps:$4 sm:$0xff]  }
 0x8d9   :  { %10426 = vmatprep.subr.bf16.mxu0 %v16012_v28  ;;  %v16090_v28 = vld [vmem:[%s21655_s10 + $0x9ec] ss:$16 sps:$4 sm:$0xff]  }
 0x8dc   :  { %10427 = vmatpush1.bf16.msra.mxu0 %v16010_v61  ;;  %v16088_v61 = vld [vmem:[%s21655_s10 + $0x9e8] ss:$16 sps:$4 sm:$0xff]  }
 0x8dd   :  { %10428 = vmatprep.subr.bf16.mxu0 %v16015_v50  ;;  %v16093_v50 = vld [vmem:[%s21655_s10 + $0xa04] ss:$16 sps:$4 sm:$0xff]  }
 0x8e0   :  { %10429 = vmatpush1.bf16.msra.mxu0 %v16013_v18  ;;  %v16091_v18 = vld [vmem:[%s21655_s10 + $0xa00] ss:$16 sps:$4 sm:$0xff]  }
 0x8e1   :  { %10430 = vmatprep.subr.bf16.mxu0 %v16018_v39  ;;  %v16096_v39 = vld [vmem:[%s21655_s10 + $0xa24] ss:$16 sps:$4 sm:$0xff]  }
 0x8e4   :  { %10431 = vmatpush1.bf16.msra.mxu0 %v16016_v5  ;;  %v16099_v5 = vld [vmem:[%s21655_s10 + $0xa44] ss:$16 sps:$4 sm:$0xff]  }
 0x8e5   :  { %10457 = vmatprep.subr.bf16.mxu0 %v16021_v60  ;;  %v16097_v60 = vld [vmem:[%s21655_s10 + $0xa40] ss:$16 sps:$4 sm:$0xff]  }
 0x8e7   :  { %10449 = vmatmul.mubr.bf16.vlgmr.msra.gmra.mrb[32].mxu0 %v10254_v45 }
 0x8e8   :  { %10458 = vmatpush1.bf16.msra.mxu0 %v16019_v17  ;;  %10489 = vmatprep.mubr.bf16.mxu0 %v16449_v35  ;;  %v16100_v17 = vld [vmem:[%s21655_s10 + $0xa60] ss:$16 sps:$4 sm:$0xff]  }
 0x8e9   :  { %10459 = vmatprep.subr.bf16.mxu0 %v16024_v37  ;;  %v16103_v37 = vld [vmem:[%s21655_s10 + $0xa80] ss:$16 sps:$4 sm:$0xff]  }
 0x8ec   :  { %10460 = vmatpush1.bf16.msra.mxu0 %v16022_v63  ;;  %v16108_v63 = vld [vmem:[%s21655_s10 + $0xaa4] ss:$16 sps:$4 sm:$0xff]  }
 0x8ed   :  { %10461 = vmatprep.subr.bf16.mxu0 %v16027_v34  ;;  %v16106_v34 = vld [vmem:[%s21655_s10 + $0xaa0] ss:$16 sps:$4 sm:$0xff]  }
 0x8f0   :  { %10462 = vmatpush1.bf16.msra.mxu0 %v16025_v36  ;;  %v16111_v36 = vld [vmem:[%s21655_s10 + $0xac4] ss:$16 sps:$4 sm:$0xff]  }
 0x8f1   :  { %10463 = vmatprep.subr.bf16.mxu0 %v16030_v43  ;;  %v16109_v43 = vld [vmem:[%s21655_s10 + $0xac0] ss:$16 sps:$4 sm:$0xff]  }
 0x8f4   :  { %10464 = vmatpush1.bf16.msra.mxu0 %v16028_v31  ;;  %v16114_v31 = vld [vmem:[%s21655_s10 + $0xae4] ss:$16 sps:$4 sm:$0xff]  }
 0x8f5   :  { %10465 = vmatprep.subr.bf16.mxu0 %v16033_v30  ;;  %v16112_v30 = vld [vmem:[%s21655_s10 + $0xae0] ss:$16 sps:$4 sm:$0xff]  }
 0x8f8   :  { %10466 = vmatpush1.bf16.msra.mxu0 %v16031_v57  ;;  %v16117_v57 = vld [vmem:[%s21655_s10 + $0xa0c] ss:$16 sps:$4 sm:$0xff]  }
 0x8f9   :  { %10467 = vmatprep.subr.bf16.mxu0 %v16036_v41  ;;  %v16115_v41 = vld [vmem:[%s21655_s10 + $0xa08] ss:$16 sps:$4 sm:$0xff]  }
 0x8fc   :  { %10468 = vmatpush1.bf16.msra.mxu0 %v16034_v7  ;;  %v10819_v7 = vpack.c.b16 %v19985_v51, %v19985_v51  ;;  %v16121_v51 = vld [vmem:[%s21655_s10 + $0xa48] ss:$16 sps:$4 sm:$0xff]  }
 0x8fd   :  { %10469 = vmatprep.subr.bf16.mxu0 %v16039_v1  ;;  %v16120_v1 = vld [vmem:[%s21655_s10 + $0xa2c] ss:$16 sps:$4 sm:$0xff]  }
 0x900   :  { %10470 = vmatpush1.bf16.msra.mxu0 %v16037_v59  ;;  %v16118_v59 = vld [vmem:[%s21655_s10 + $0xa28] ss:$16 sps:$4 sm:$0xff]  }
 0x901   :  { %10471 = vmatprep.subr.bf16.mxu0 %v16042_v33  ;;  %v16123_v33 = vld [vmem:[%s21655_s10 + $0xa4c] ss:$16 sps:$4 sm:$0xff]  }
 0x904   :  { %10472 = vmatpush1.bf16.msra.mxu0 %v16040_v38  ;;  %v16126_v38 = vld [vmem:[%s21655_s10 + $0xa6c] ss:$16 sps:$4 sm:$0xff]  }
 0x905   :  { %10698 = vmatprep.subr.bf16.mxu0 %v16045_v11  ;;  %v16124_v11 = vld [vmem:[%s21655_s10 + $0xa68] ss:$16 sps:$4 sm:$0xff]  }
 0x907   :  { %10490 = vmatmul.mubr.bf16.vlgmr.msra.gmra.mrb[36].mxu0 %v10254_v45  ;;  %v16105_v45 = vld [vmem:[%s21655_s10 + $0xa84] ss:$16 sps:$4 sm:$0xff]  }
 0x908   :  { %10699 = vmatpush1.bf16.msra.mxu0 %v16043_v46  ;;  %10730 = vmatprep.mubr.bf16.mxu0 %v16449_v35  ;;  %v16129_v46 = vld [vmem:[%s21655_s10 + $0xa8c] ss:$16 sps:$4 sm:$0xff]  }
 0x909   :  { %10700 = vmatprep.subr.bf16.mxu0 %v16048_v0  ;;  %v16127_v0 = vld [vmem:[%s21655_s10 + $0xa88] ss:$16 sps:$4 sm:$0xff]  }
 0x90c   :  { %10701 = vmatpush1.bf16.msra.mxu0 %v16046_v29  ;;  %v16132_v29 = vld [vmem:[%s21655_s10 + $0xaac] ss:$16 sps:$4 sm:$0xff]  }
 0x90d   :  { %10702 = vmatprep.subr.bf16.mxu0 %v16051_v2  ;;  %v16130_v2 = vld [vmem:[%s21655_s10 + $0xaa8] ss:$16 sps:$4 sm:$0xff]  }
 0x910   :  { %10703 = vmatpush1.bf16.msra.mxu0 %v16049_v23  ;;  %v16135_v23 = vld [vmem:[%s21655_s10 + $0xacc] ss:$16 sps:$4 sm:$0xff]  }
 0x911   :  { %10704 = vmatprep.subr.bf16.mxu0 %v16054_v48  ;;  %v16133_v48 = vld [vmem:[%s21655_s10 + $0xac8] ss:$16 sps:$4 sm:$0xff]  }
 0x914   :  { %10705 = vmatpush1.bf16.msra.mxu0 %v16052_v21  ;;  %v16138_v21 = vld [vmem:[%s21655_s10 + $0xaec] ss:$16 sps:$4 sm:$0xff]  }
 0x915   :  { %10706 = vmatprep.subr.bf16.mxu0 %v16057_v9  ;;  %v16136_v9 = vld [vmem:[%s21655_s10 + $0xae8] ss:$16 sps:$4 sm:$0xff]  }
 0x918   :  { %10707 = vmatpush1.bf16.msra.mxu0 %v16055_v6  ;;  %v16141_v6 = vld [vmem:[%s21655_s10 + $0xb04] ss:$16 sps:$4 sm:$0xff]  }
 0x919   :  { %10708 = vmatprep.subr.bf16.mxu0 %v16060_v3  ;;  %v16139_v3 = vld [vmem:[%s21655_s10 + $0xb00] ss:$16 sps:$4 sm:$0xff]  }
 0x91c   :  { %10709 = vmatpush1.bf16.msra.mxu0 %v16058_v62  ;;  %v16144_v62 = vld [vmem:[%s21655_s10 + $0xb24] ss:$16 sps:$4 sm:$0xff]  }
 0x91d   :  { %10710 = vmatprep.subr.bf16.mxu0 %v16063_v15  ;;  %v16142_v15 = vld [vmem:[%s21655_s10 + $0xb20] ss:$16 sps:$4 sm:$0xff]  }
 0x920   :  { %10711 = vmatpush1.bf16.msra.mxu0 %v16061_v56  ;;  %v16147_v56 = vld [vmem:[%s21655_s10 + $0xb44] ss:$16 sps:$4 sm:$0xff]  }
 0x921   :  { %10712 = vmatprep.subr.bf16.mxu0 %v16066_v25  ;;  %v16145_v25 = vld [vmem:[%s21655_s10 + $0xb40] ss:$16 sps:$4 sm:$0xff]  }
 0x924   :  { %10713 = vmatpush1.bf16.msra.mxu0 %v16064_v16  ;;  %v16150_v16 = vld [vmem:[%s21655_s10 + $0xb64] ss:$16 sps:$4 sm:$0xff]  }
 0x925   :  { %10739 = vmatprep.subr.bf16.mxu0 %v16069_v40  ;;  %v16148_v40 = vld [vmem:[%s21655_s10 + $0xb60] ss:$16 sps:$4 sm:$0xff]  }
 0x927   :  { %10731 = vmatmul.mubr.bf16.vlgmr.msra.gmra.mrb[32].mxu0 %v10536_v4 }
 0x928   :  { %10740 = vmatpush1.bf16.msra.mxu0 %v16067_v32  ;;  %10771 = vmatprep.mubr.bf16.mxu0 %v16449_v35  ;;  %v16153_v32 = vld [vmem:[%s21655_s10 + $0xb84] ss:$16 sps:$4 sm:$0xff]  }
 0x929   :  { %10741 = vmatprep.subr.bf16.mxu0 %v16072_v44  ;;  %v16156_v44 = vld [vmem:[%s21655_s10 + $0xba4] ss:$16 sps:$4 sm:$0xff]  }
 0x92c   :  { %10742 = vmatpush1.bf16.msra.mxu0 %v16070_v12  ;;  %v16154_v12 = vld [vmem:[%s21655_s10 + $0xba0] ss:$16 sps:$4 sm:$0xff]  }
 0x92d   :  { %10743 = vmatprep.subr.bf16.mxu0 %v16075_v10  ;;  %v16159_v10 = vld [vmem:[%s21655_s10 + $0xbc4] ss:$16 sps:$4 sm:$0xff]  }
 0x930   :  { %10744 = vmatpush1.bf16.msra.mxu0 %v16073_v52  ;;  %v16157_v52 = vld [vmem:[%s21655_s10 + $0xbc0] ss:$16 sps:$4 sm:$0xff]  }
 0x931   :  { %10745 = vmatprep.subr.bf16.mxu0 %v16078_v58  ;;  %v16162_v58 = vld [vmem:[%s21655_s10 + $0xbe4] ss:$16 sps:$4 sm:$0xff]  }
 0x934   :  { %10746 = vmatpush1.bf16.msra.mxu0 %v16076_v53  ;;  %v16160_v53 = vld [vmem:[%s21655_s10 + $0xbe0] ss:$16 sps:$4 sm:$0xff]  }
 0x935   :  { %10747 = vmatprep.subr.bf16.mxu0 %v16081_v27  ;;  %v16165_v27 = vld [vmem:[%s21655_s10 + $0xb0c] ss:$16 sps:$4 sm:$0xff]  }
 0x938   :  { %10748 = vmatpush1.bf16.msra.mxu0 %v16079_v55  ;;  %v16163_v55 = vld [vmem:[%s21655_s10 + $0xb08] ss:$16 sps:$4 sm:$0xff]  }
 0x939   :  { %10749 = vmatprep.subr.bf16.mxu0 %v16084_v22  ;;  %v11102_v22 = vpack.c.b16 %v19988_v47, %v19988_v47  ;;  %v16169_v47 = vld [vmem:[%s21655_s10 + $0xb48] ss:$16 sps:$4 sm:$0xff]  }
 0x93c   :  { %10750 = vmatpush1.bf16.msra.mxu0 %v16082_v54  ;;  %v16168_v54 = vld [vmem:[%s21655_s10 + $0xb2c] ss:$16 sps:$4 sm:$0xff]  }
 0x93d   :  { %10751 = vmatprep.subr.bf16.mxu0 %v16087_v26  ;;  %v16166_v26 = vld [vmem:[%s21655_s10 + $0xb28] ss:$16 sps:$4 sm:$0xff]  }
 0x940   :  { %10752 = vmatpush1.bf16.msra.mxu0 %v16085_v49  ;;  %v16171_v49 = vld [vmem:[%s21655_s10 + $0xb4c] ss:$16 sps:$4 sm:$0xff]  }
 0x941   :  { %10753 = vmatprep.subr.bf16.mxu0 %v16090_v28  ;;  %v16174_v28 = vld [vmem:[%s21655_s10 + $0xb6c] ss:$16 sps:$4 sm:$0xff]  }
 0x944   :  { %10754 = vmatpush1.bf16.msra.mxu0 %v16088_v61  ;;  %v16172_v61 = vld [vmem:[%s21655_s10 + $0xb68] ss:$16 sps:$4 sm:$0xff]  }
 0x945   :  { %10981 = vmatprep.subr.bf16.mxu0 %v16093_v50  ;;  %v16177_v50 = vld [vmem:[%s21655_s10 + $0xb8c] ss:$16 sps:$4 sm:$0xff]  }
 0x947   :  { %10772 = vmatmul.mubr.bf16.vlgmr.msra.gmra.mrb[36].mxu0 %v10536_v4  ;;  %v16151_v4 = vld [vmem:[%s21655_s10 + $0xb80] ss:$16 sps:$4 sm:$0xff]  }
 0x948   :  { %10982 = vmatpush1.bf16.msra.mxu0 %v16091_v18  ;;  %11013 = vmatprep.mubr.bf16.mxu0 %v16449_v35  ;;  %v16175_v18 = vld [vmem:[%s21655_s10 + $0xb88] ss:$16 sps:$4 sm:$0xff]  }
 0x949   :  { %10983 = vmatprep.subr.bf16.mxu0 %v16096_v39  ;;  %v16180_v39 = vld [vmem:[%s21655_s10 + $0xbac] ss:$16 sps:$4 sm:$0xff]  }
 0x94c   :  { %10984 = vmatpush1.bf16.msra.mxu0 %v16094_v8  ;;  %v16178_v8 = vld [vmem:[%s21655_s10 + $0xba8] ss:$16 sps:$4 sm:$0xff]  }
 0x94d   :  { %10985 = vmatprep.subr.bf16.mxu0 %v16099_v5  ;;  %v16183_v5 = vld [vmem:[%s21655_s10 + $0xbcc] ss:$16 sps:$4 sm:$0xff]  }
 0x950   :  { %10986 = vmatpush1.bf16.msra.mxu0 %v16097_v60  ;;  %v16181_v60 = vld [vmem:[%s21655_s10 + $0xbc8] ss:$16 sps:$4 sm:$0xff]  }
 0x951   :  { %10987 = vmatprep.subr.bf16.mxu0 %v16102_v24  ;;  %v16186_v24 = vld [vmem:[%s21655_s10 + $0xbec] ss:$16 sps:$4 sm:$0xff]  }
 0x954   :  { %10988 = vmatpush1.bf16.msra.mxu0 %v16100_v17  ;;  %v16184_v17 = vld [vmem:[%s21655_s10 + $0xbe8] ss:$16 sps:$4 sm:$0xff]  }
 0x955   :  { %10989 = vmatprep.subr.bf16.mxu0 %v16105_v45  ;;  %v16189_v45 = vld [vmem:[%s21655_s10 + $0xc04] ss:$16 sps:$4 sm:$0xff]  }
 0x958   :  { %10990 = vmatpush1.bf16.msra.mxu0 %v16103_v37  ;;  %v16187_v37 = vld [vmem:[%s21655_s10 + $0xc00] ss:$16 sps:$4 sm:$0xff]  }
 0x959   :  { %10991 = vmatprep.subr.bf16.mxu0 %v16108_v63  ;;  %v16192_v63 = vld [vmem:[%s21655_s10 + $0xc24] ss:$16 sps:$4 sm:$0xff]  }
 0x95c   :  { %10992 = vmatpush1.bf16.msra.mxu0 %v16106_v34  ;;  %v16190_v34 = vld [vmem:[%s21655_s10 + $0xc20] ss:$16 sps:$4 sm:$0xff]  }
 0x95d   :  { %10993 = vmatprep.subr.bf16.mxu0 %v16111_v36  ;;  %v16195_v36 = vld [vmem:[%s21655_s10 + $0xc44] ss:$16 sps:$4 sm:$0xff]  }
 0x960   :  { %10994 = vmatpush1.bf16.msra.mxu0 %v16109_v43  ;;  %v16193_v43 = vld [vmem:[%s21655_s10 + $0xc40] ss:$16 sps:$4 sm:$0xff]  }
 0x961   :  { %10995 = vmatprep.subr.bf16.mxu0 %v16114_v31  ;;  %v16198_v31 = vld [vmem:[%s21655_s10 + $0xc64] ss:$16 sps:$4 sm:$0xff]  }
 0x964   :  { %10996 = vmatpush1.bf16.msra.mxu0 %v16112_v30  ;;  %v16196_v30 = vld [vmem:[%s21655_s10 + $0xc60] ss:$16 sps:$4 sm:$0xff]  }
 0x965   :  { %11022 = vmatprep.subr.bf16.mxu0 %v16117_v57  ;;  %v16201_v57 = vld [vmem:[%s21655_s10 + $0xc84] ss:$16 sps:$4 sm:$0xff]  }
 0x967   :  { %11014 = vmatmul.mubr.bf16.vlgmr.msra.gmra.mrb[32].mxu0 %v10819_v7 }
 0x968   :  { %11023 = vmatpush1.bf16.msra.mxu0 %v16115_v41  ;;  %11054 = vmatprep.mubr.bf16.mxu0 %v16449_v35  ;;  %v16199_v41 = vld [vmem:[%s21655_s10 + $0xc80] ss:$16 sps:$4 sm:$0xff]  }
 0x969   :  { %11024 = vmatprep.subr.bf16.mxu0 %v16120_v1  ;;  %v16202_v1 = vld [vmem:[%s21655_s10 + $0xca0] ss:$16 sps:$4 sm:$0xff]  }
 0x96c   :  { %11025 = vmatpush1.bf16.msra.mxu0 %v16118_v59  ;;  %v16207_v59 = vld [vmem:[%s21655_s10 + $0xcc4] ss:$16 sps:$4 sm:$0xff]  }
 0x96d   :  { %11026 = vmatprep.subr.bf16.mxu0 %v16123_v33  ;;  %v16205_v33 = vld [vmem:[%s21655_s10 + $0xcc0] ss:$16 sps:$4 sm:$0xff]  }
 0x970   :  { %11027 = vmatpush1.bf16.msra.mxu0 %v16121_v51  ;;  %v16210_v51 = vld [vmem:[%s21655_s10 + $0xce4] ss:$16 sps:$4 sm:$0xff]  }
 0x971   :  { %11028 = vmatprep.subr.bf16.mxu0 %v16126_v38  ;;  %v11386_v38 = vrot.slane %v20001_v42, 7  ;;  %v16216_v42 = vld [vmem:[%s21655_s10 + $0xc2c] ss:$16 sps:$4 sm:$0xff]  }
 0x974   :  { %11029 = vmatpush1.bf16.msra.mxu0 %v16124_v11  ;;  %v16208_v11 = vld [vmem:[%s21655_s10 + $0xce0] ss:$16 sps:$4 sm:$0xff]  }
 0x975   :  { %11030 = vmatprep.subr.bf16.mxu0 %v16129_v46  ;;  %v16213_v46 = vld [vmem:[%s21655_s10 + $0xc0c] ss:$16 sps:$4 sm:$0xff]  }
 0x978   :  { %11031 = vmatpush1.bf16.msra.mxu0 %v16127_v0  ;;  %v11387_v0 = vsel %vm7984_vm8, %v11386_v38, %v19993_v20  ;;  %v16219_v20 = vld [vmem:[%s21655_s10 + $0xc4c] ss:$16 sps:$4 sm:$0xff]  }
 0x979   :  { %11032 = vmatprep.subr.bf16.mxu0 %v16132_v29  ;;  %v16211_v29 = vld [vmem:[%s21655_s10 + $0xc08] ss:$16 sps:$4 sm:$0xff]  }
 0x97a   :  { %v16382_v38 = vld [vmem:[%s21657_s12 + $0x8] sm:$0xff]  }
 0x97c   :  { %11033 = vmatpush1.bf16.msra.mxu0 %v16130_v2  ;;  %v11388_v2 = vpack.c.b16 %v11387_v0, %v11387_v0  ;;  %v16294_v0 = vld [vmem:[%s21655_s10 + $0xe64] ss:$16 sps:$4 sm:$0xff]  }
 0x97d   :  { %11034 = vmatprep.subr.bf16.mxu0 %v16135_v23  ;;  %v16214_v23 = vld [vmem:[%s21655_s10 + $0xc28] ss:$16 sps:$4 sm:$0xff]  }
 0x980   :  { %11035 = vmatpush1.bf16.msra.mxu0 %v16133_v48  ;;  %v16217_v48 = vld [vmem:[%s21655_s10 + $0xc48] ss:$16 sps:$4 sm:$0xff]  }
 0x981   :  { %11036 = vmatprep.subr.bf16.mxu0 %v16138_v21  ;;  %v16222_v21 = vld [vmem:[%s21655_s10 + $0xc6c] ss:$16 sps:$4 sm:$0xff]  }
 0x984   :  { %11037 = vmatpush1.bf16.msra.mxu0 %v16136_v9  ;;  %v16220_v9 = vld [vmem:[%s21655_s10 + $0xc68] ss:$16 sps:$4 sm:$0xff]  }
 0x985   :  { %11264 = vmatprep.subr.bf16.mxu0 %v16141_v6  ;;  %v16225_v6 = vld [vmem:[%s21655_s10 + $0xc8c] ss:$16 sps:$4 sm:$0xff]  }
 0x987   :  { %11055 = vmatmul.mubr.bf16.vlgmr.msra.gmra.mrb[36].mxu0 %v10819_v7  ;;  %v16204_v7 = vld [vmem:[%s21655_s10 + $0xca4] ss:$16 sps:$4 sm:$0xff]  }
 0x988   :  { %11265 = vmatpush1.bf16.msra.mxu0 %v16139_v3  ;;  %11296 = vmatprep.mubr.bf16.mxu0 %v16449_v35  ;;  %v16223_v3 = vld [vmem:[%s21655_s10 + $0xc88] ss:$16 sps:$4 sm:$0xff]  }
 0x989   :  { %11266 = vmatprep.subr.bf16.mxu0 %v16144_v62  ;;  %v16228_v62 = vld [vmem:[%s21655_s10 + $0xcac] ss:$16 sps:$4 sm:$0xff]  }
 0x98c   :  { %11267 = vmatpush1.bf16.msra.mxu0 %v16142_v15  ;;  %v16226_v15 = vld [vmem:[%s21655_s10 + $0xca8] ss:$16 sps:$4 sm:$0xff]  }
 0x98d   :  { %11268 = vmatprep.subr.bf16.mxu0 %v16147_v56  ;;  %v16231_v56 = vld [vmem:[%s21655_s10 + $0xccc] ss:$16 sps:$4 sm:$0xff]  }
 0x990   :  { %11269 = vmatpush1.bf16.msra.mxu0 %v16145_v25  ;;  %v16229_v25 = vld [vmem:[%s21655_s10 + $0xcc8] ss:$16 sps:$4 sm:$0xff]  }
 0x991   :  { %11270 = vmatprep.subr.bf16.mxu0 %v16150_v16  ;;  %v16234_v16 = vld [vmem:[%s21655_s10 + $0xcec] ss:$16 sps:$4 sm:$0xff]  }
 0x994   :  { %11271 = vmatpush1.bf16.msra.mxu0 %v16148_v40  ;;  %v16232_v40 = vld [vmem:[%s21655_s10 + $0xce8] ss:$16 sps:$4 sm:$0xff]  }
 0x995   :  { %11272 = vmatprep.subr.bf16.mxu0 %v16153_v32  ;;  %v16237_v32 = vld [vmem:[%s21655_s10 + $0xd04] ss:$16 sps:$4 sm:$0xff]  }
 0x998   :  { %11273 = vmatpush1.bf16.msra.mxu0 %v16151_v4  ;;  %v16235_v4 = vld [vmem:[%s21655_s10 + $0xd00] ss:$16 sps:$4 sm:$0xff]  }
 0x999   :  { %11274 = vmatprep.subr.bf16.mxu0 %v16156_v44  ;;  %v16240_v44 = vld [vmem:[%s21655_s10 + $0xd24] ss:$16 sps:$4 sm:$0xff]  }
 0x99c   :  { %11275 = vmatpush1.bf16.msra.mxu0 %v16154_v12  ;;  %v16238_v12 = vld [vmem:[%s21655_s10 + $0xd20] ss:$16 sps:$4 sm:$0xff]  }
 0x99d   :  { %11276 = vmatprep.subr.bf16.mxu0 %v16159_v10  ;;  %v16243_v10 = vld [vmem:[%s21655_s10 + $0xd44] ss:$16 sps:$4 sm:$0xff]  }
 0x9a0   :  { %11277 = vmatpush1.bf16.msra.mxu0 %v16157_v52  ;;  %v16241_v52 = vld [vmem:[%s21655_s10 + $0xd40] ss:$16 sps:$4 sm:$0xff]  }
 0x9a1   :  { %11278 = vmatprep.subr.bf16.mxu0 %v16162_v58  ;;  %v16246_v58 = vld [vmem:[%s21655_s10 + $0xd64] ss:$16 sps:$4 sm:$0xff]  }
 0x9a4   :  { %11279 = vmatpush1.bf16.msra.mxu0 %v16160_v53  ;;  %v16244_v53 = vld [vmem:[%s21655_s10 + $0xd60] ss:$16 sps:$4 sm:$0xff]  }
 0x9a5   :  { %11305 = vmatprep.subr.bf16.mxu0 %v16165_v27  ;;  %v16249_v27 = vld [vmem:[%s21655_s10 + $0xd84] ss:$16 sps:$4 sm:$0xff]  }
 0x9a7   :  { %11297 = vmatmul.mubr.bf16.vlgmr.msra.gmra.mrb[32].mxu0 %v11102_v22 }
 0x9a8   :  { %11306 = vmatpush1.bf16.msra.mxu0 %v16163_v55  ;;  %11337 = vmatprep.mubr.bf16.mxu0 %v16449_v35  ;;  %v16247_v55 = vld [vmem:[%s21655_s10 + $0xd80] ss:$16 sps:$4 sm:$0xff]  }
 0x9a9   :  { %11307 = vmatprep.subr.bf16.mxu0 %v16168_v54  ;;  %v16250_v54 = vld [vmem:[%s21655_s10 + $0xda0] ss:$16 sps:$4 sm:$0xff]  }
 0x9ac   :  { %11308 = vmatpush1.bf16.msra.mxu0 %v16166_v26  ;;  %v16255_v26 = vld [vmem:[%s21655_s10 + $0xdc4] ss:$16 sps:$4 sm:$0xff]  }
 0x9ad   :  { %11309 = vmatprep.subr.bf16.mxu0 %v16171_v49  ;;  %v16253_v49 = vld [vmem:[%s21655_s10 + $0xdc0] ss:$16 sps:$4 sm:$0xff]  }
 0x9b0   :  { %11310 = vmatpush1.bf16.msra.mxu0 %v16169_v47  ;;  %v16258_v47 = vld [vmem:[%s21655_s10 + $0xde4] ss:$16 sps:$4 sm:$0xff]  }
 0x9b1   :  { %11311 = vmatprep.subr.bf16.mxu0 %v16174_v28  ;;  %v16256_v28 = vld [vmem:[%s21655_s10 + $0xde0] ss:$16 sps:$4 sm:$0xff]  }
 0x9b4   :  { %11312 = vmatpush1.bf16.msra.mxu0 %v16172_v61  ;;  %v16261_v61 = vld [vmem:[%s21655_s10 + $0xd0c] ss:$16 sps:$4 sm:$0xff]  }
 0x9b5   :  { %11313 = vmatprep.subr.bf16.mxu0 %v16177_v50  ;;  %v16259_v50 = vld [vmem:[%s21655_s10 + $0xd08] ss:$16 sps:$4 sm:$0xff]  }
 0x9b8   :  { %11314 = vmatpush1.bf16.msra.mxu0 %v16175_v18  ;;  %v11670_v18 = vpack.c.b16 %v20007_v19, %v20007_v19  ;;  %v16265_v19 = vld [vmem:[%s21655_s10 + $0xd48] ss:$16 sps:$4 sm:$0xff]  }
 0x9b9   :  { %11315 = vmatprep.subr.bf16.mxu0 %v16180_v39  ;;  %v16264_v39 = vld [vmem:[%s21655_s10 + $0xd2c] ss:$16 sps:$4 sm:$0xff]  }
 0x9bc   :  { %11316 = vmatpush1.bf16.msra.mxu0 %v16178_v8  ;;  %v16262_v8 = vld [vmem:[%s21655_s10 + $0xd28] ss:$16 sps:$4 sm:$0xff]  }
 0x9bd   :  { %11317 = vmatprep.subr.bf16.mxu0 %v16183_v5  ;;  %v16267_v5 = vld [vmem:[%s21655_s10 + $0xd4c] ss:$16 sps:$4 sm:$0xff]  }
 0x9c0   :  { %11318 = vmatpush1.bf16.msra.mxu0 %v16181_v60  ;;  %v16270_v60 = vld [vmem:[%s21655_s10 + $0xd6c] ss:$16 sps:$4 sm:$0xff]  }
 0x9c1   :  { %11319 = vmatprep.subr.bf16.mxu0 %v16186_v24  ;;  %v16268_v24 = vld [vmem:[%s21655_s10 + $0xd68] ss:$16 sps:$4 sm:$0xff]  }
 0x9c4   :  { %11320 = vmatpush1.bf16.msra.mxu0 %v16184_v17  ;;  %v16273_v17 = vld [vmem:[%s21655_s10 + $0xd8c] ss:$16 sps:$4 sm:$0xff]  }
 0x9c5   :  { %11550 = vmatprep.subr.bf16.mxu0 %v16189_v45  ;;  %v16271_v45 = vld [vmem:[%s21655_s10 + $0xd88] ss:$16 sps:$4 sm:$0xff]  }
 0x9c7   :  { %11338 = vmatmul.mubr.bf16.vlgmr.msra.gmra.mrb[36].mxu0 %v11102_v22  ;;  %v16252_v22 = vld [vmem:[%s21655_s10 + $0xda4] ss:$16 sps:$4 sm:$0xff]  }
 0x9c8   :  { %11551 = vmatpush1.bf16.msra.mxu0 %v16187_v37  ;;  %11582 = vmatprep.mubr.bf16.mxu0 %v16449_v35  ;;  %v16276_v37 = vld [vmem:[%s21655_s10 + $0xdac] ss:$16 sps:$4 sm:$0xff]  }
 0x9c9   :  { %11552 = vmatprep.subr.bf16.mxu0 %v16192_v63  ;;  %v16274_v63 = vld [vmem:[%s21655_s10 + $0xda8] ss:$16 sps:$4 sm:$0xff]  }
 0x9cc   :  { %11553 = vmatpush1.bf16.msra.mxu0 %v16190_v34  ;;  %v16279_v34 = vld [vmem:[%s21655_s10 + $0xdcc] ss:$16 sps:$4 sm:$0xff]  }
 0x9cd   :  { %11554 = vmatprep.subr.bf16.mxu0 %v16195_v36  ;;  %v16277_v36 = vld [vmem:[%s21655_s10 + $0xdc8] ss:$16 sps:$4 sm:$0xff]  }
 0x9d0   :  { %11555 = vmatpush1.bf16.msra.mxu0 %v16193_v43  ;;  %v16282_v43 = vld [vmem:[%s21655_s10 + $0xdec] ss:$16 sps:$4 sm:$0xff]  }
 0x9d1   :  { %11556 = vmatprep.subr.bf16.mxu0 %v16198_v31  ;;  %v16280_v31 = vld [vmem:[%s21655_s10 + $0xde8] ss:$16 sps:$4 sm:$0xff]  }
 0x9d4   :  { %11557 = vmatpush1.bf16.msra.mxu0 %v16196_v30  ;;  %v16285_v30 = vld [vmem:[%s21655_s10 + $0xe04] ss:$16 sps:$4 sm:$0xff]  }
 0x9d5   :  { %11558 = vmatprep.subr.bf16.mxu0 %v16201_v57  ;;  %v16283_v57 = vld [vmem:[%s21655_s10 + $0xe00] ss:$16 sps:$4 sm:$0xff]  }
 0x9d8   :  { %11559 = vmatpush1.bf16.msra.mxu0 %v16199_v41  ;;  %v16288_v41 = vld [vmem:[%s21655_s10 + $0xe24] ss:$16 sps:$4 sm:$0xff]  }
 0x9d9   :  { %11560 = vmatprep.subr.bf16.mxu0 %v16204_v7  ;;  %v16379_v7 = vld [vmem:[%s21657_s12 + $0x40] sm:$0xff]  }
 0x9da   :  { %14209 = vmatprep.subr.bf16.mxu1 %v16379_v7  ;;  %v12236_v7 = vpack.c.b16 %v20022_v14, %v20022_v14  ;;  %v16361_v14 = vld [vmem:[%s21655_s10 + $0xf48] ss:$16 sps:$4 sm:$0xff]  }
 0x9dc   :  { %11561 = vmatpush1.bf16.msra.mxu0 %v16202_v1  ;;  %v16380_v1 = vld [vmem:[%s21657_s12] sm:$0xff]  }
 0x9dd   :  { %11562 = vmatprep.subr.bf16.mxu0 %v16207_v59  ;;  %v16381_v59 = vld [vmem:[%s21657_s12 + $0x48] sm:$0xff]   ;;  %14210 = vmatpush3.bf16.msra.mxu1 %v16380_v1 }
 0x9de   :  { %14211 = vmatprep.subr.bf16.mxu1 %v16381_v59  ;;  %v16360_v1 = vld [vmem:[%s21655_s10 + $0xf2c] ss:$16 sps:$4 sm:$0xff]   ;;  %v16358_v59 = vld [vmem:[%s21655_s10 + $0xf28] ss:$16 sps:$4 sm:$0xff]  }
 0x9e0   :  { %11563 = vmatpush1.bf16.msra.mxu0 %v16205_v33  ;;  %v16286_v33 = vld [vmem:[%s21655_s10 + $0xe20] ss:$16 sps:$4 sm:$0xff]  }
 0x9e1   :  { %11564 = vmatprep.subr.bf16.mxu0 %v16210_v51  ;;  %v16291_v51 = vld [vmem:[%s21655_s10 + $0xe44] ss:$16 sps:$4 sm:$0xff]   ;;  %14212 = vmatpush3.bf16.msra.mxu1 %v16382_v38  ;;  %v16369_v38 = vld [vmem:[%s21655_s10 + $0xf8c] ss:$16 sps:$4 sm:$0xff]  }
 0x9e4   :  { %11565 = vmatpush1.bf16.msra.mxu0 %v16208_v11  ;;  %v16383_v11 = vld [vmem:[%s21657_s12 + $0x50] sm:$0xff]  }
 0x9e5   :  { %11591 = vmatprep.subr.bf16.mxu0 %v16213_v46  ;;  %v16289_v46 = vld [vmem:[%s21655_s10 + $0xe40] ss:$16 sps:$4 sm:$0xff]   ;;  %14213 = vmatprep.subr.bf16.mxu1 %v16383_v11  ;;  %v16367_v11 = vld [vmem:[%s21655_s10 + $0xf88] ss:$16 sps:$4 sm:$0xff]  }
 0x9e7   :  { %11583 = vmatmul.mubr.bf16.vlgmr.msra.gmra.mrb[32].mxu0 %v11388_v2 }
 0x9e8   :  { %11592 = vmatpush1.bf16.msra.mxu0 %v16211_v29  ;;  %11623 = vmatprep.mubr.bf16.mxu0 %v16449_v35  ;;  %v16384_v29 = vld [vmem:[%s21657_s12 + $0x10] sm:$0xff]  }
 0x9e9   :  { %11593 = vmatprep.subr.bf16.mxu0 %v16216_v42  ;;  %v16292_v42 = vld [vmem:[%s21655_s10 + $0xe60] ss:$16 sps:$4 sm:$0xff]   ;;  %14214 = vmatpush3.bf16.msra.mxu1 %v16384_v29  ;;  %v16375_v29 = vld [vmem:[%s21655_s10 + $0xfcc] ss:$16 sps:$4 sm:$0xff]  }
 0x9ec   :  { %11594 = vmatpush1.bf16.msra.mxu0 %v16214_v23  ;;  %v16297_v23 = vld [vmem:[%s21655_s10 + $0xe84] ss:$16 sps:$4 sm:$0xff]  }
 0x9ed   :  { %11595 = vmatprep.subr.bf16.mxu0 %v16219_v20  ;;  %v16386_v20 = vld [vmem:[%s21657_s12 + $0x18] sm:$0xff]  }
 0x9f0   :  { %11596 = vmatpush1.bf16.msra.mxu0 %v16217_v48  ;;  %v16387_v48 = vld [vmem:[%s21657_s12 + $0x60] sm:$0xff]  }
 0x9f1   :  { %11597 = vmatprep.subr.bf16.mxu0 %v16222_v21  ;;  %v16295_v21 = vld [vmem:[%s21655_s10 + $0xe80] ss:$16 sps:$4 sm:$0xff]  }
 0x9f4   :  { %11598 = vmatpush1.bf16.msra.mxu0 %v16220_v9  ;;  %v16300_v9 = vld [vmem:[%s21655_s10 + $0xea4] ss:$16 sps:$4 sm:$0xff]  }
 0x9f5   :  { %11599 = vmatprep.subr.bf16.mxu0 %v16225_v6  ;;  %v16388_v6 = vld [vmem:[%s21657_s12 + $0x20] sm:$0xff]  }
 0x9f8   :  { %11600 = vmatpush1.bf16.msra.mxu0 %v16223_v3  ;;  %v16389_v3 = vld [vmem:[%s21657_s12 + $0x68] sm:$0xff]  }
 0x9f9   :  { %11601 = vmatprep.subr.bf16.mxu0 %v16228_v62  ;;  %v16298_v62 = vld [vmem:[%s21655_s10 + $0xea0] ss:$16 sps:$4 sm:$0xff]  }
 0x9fc   :  { %11602 = vmatpush1.bf16.msra.mxu0 %v16226_v15  ;;  %v16303_v15 = vld [vmem:[%s21655_s10 + $0xec4] ss:$16 sps:$4 sm:$0xff]  }
 0x9fd   :  { %11603 = vmatprep.subr.bf16.mxu0 %v16231_v56  ;;  %v16390_v56 = vld [vmem:[%s21657_s12 + $0x28] sm:$0xff]  }
 0xa00   :  { %11604 = vmatpush1.bf16.msra.mxu0 %v16229_v25  ;;  %v16391_v25 = vld [vmem:[%s21657_s12 + $0x70] sm:$0xff]  }
 0xa01   :  { %11605 = vmatprep.subr.bf16.mxu0 %v16234_v16  ;;  %v16301_v16 = vld [vmem:[%s21655_s10 + $0xec0] ss:$16 sps:$4 sm:$0xff]  }
 0xa04   :  { %11606 = vmatpush1.bf16.msra.mxu0 %v16232_v40  ;;  %v16306_v40 = vld [vmem:[%s21655_s10 + $0xee4] ss:$16 sps:$4 sm:$0xff]  }
 0xa05   :  { %11832 = vmatprep.subr.bf16.mxu0 %v16237_v32  ;;  %v16392_v32 = vld [vmem:[%s21657_s12 + $0x30] sm:$0xff]  }
 0xa07   :  { %11624 = vmatmul.mubr.bf16.vlgmr.msra.gmra.mrb[36].mxu0 %v11388_v2  ;;  %v16385_v2 = vld [vmem:[%s21657_s12 + $0x58] sm:$0xff]  }
 0xa08   :  { %11833 = vmatpush1.bf16.msra.mxu0 %v16235_v4  ;;  %11864 = vmatprep.mubr.bf16.mxu0 %v16449_v35  ;;  %v16304_v4 = vld [vmem:[%s21655_s10 + $0xee0] ss:$16 sps:$4 sm:$0xff]  }
 0xa09   :  { %11834 = vmatprep.subr.bf16.mxu0 %v16240_v44  ;;  %14215 = vmatprep.subr.bf16.mxu1 %v16385_v2  ;;  %v16309_v44 = vld [vmem:[%s21655_s10 + $0xe0c] ss:$16 sps:$4 sm:$0xff]   ;;  %v16373_v2 = vld [vmem:[%s21655_s10 + $0xfc8] ss:$16 sps:$4 sm:$0xff]  }
 0xa0a   :  { %14216 = vmatpush3.bf16.msra.mxu1 %v16386_v20  ;;  %v16393_v20 = vld [vmem:[%s21657_s12 + $0x78] sm:$0xff]  }
 0xa0b   :  { %14217 = vmatprep.subr.bf16.mxu1 %v16387_v48  ;;  %v16394_v48 = vld [vmem:[%s21657_s12 + $0x38] sm:$0xff]  }
 0xa0c   :  { %11835 = vmatpush1.bf16.msra.mxu0 %v16238_v12  ;;  %v16307_v12 = vld [vmem:[%s21655_s10 + $0xe08] ss:$16 sps:$4 sm:$0xff]  }
 0xa0d   :  { %11836 = vmatprep.subr.bf16.mxu0 %v16243_v10  ;;  %v11953_v10 = vpack.c.b16 %v20019_v13, %v20019_v13  ;;  %v16313_v13 = vld [vmem:[%s21655_s10 + $0xe48] ss:$16 sps:$4 sm:$0xff]  }
 0xa0e   :  { %14218 = vmatpush3.bf16.msra.mxu1 %v16388_v6 }
 0xa0f   :  { %14219 = vmatprep.subr.bf16.mxu1 %v16389_v3 }
 0xa10   :  { %11837 = vmatpush1.bf16.msra.mxu0 %v16241_v52  ;;  %v16312_v52 = vld [vmem:[%s21655_s10 + $0xe2c] ss:$16 sps:$4 sm:$0xff]  }
 0xa11   :  { %11838 = vmatprep.subr.bf16.mxu0 %v16246_v58  ;;  %v16310_v58 = vld [vmem:[%s21655_s10 + $0xe28] ss:$16 sps:$4 sm:$0xff]  }
 0xa12   :  { %14220 = vmatpush3.bf16.msra.mxu1 %v16390_v56 }
 0xa13   :  { %14221 = vmatprep.subr.bf16.mxu1 %v16391_v25 }
 0xa14   :  { %11839 = vmatpush1.bf16.msra.mxu0 %v16244_v53  ;;  %v16315_v53 = vld [vmem:[%s21655_s10 + $0xe4c] ss:$16 sps:$4 sm:$0xff]  }
 0xa15   :  { %11840 = vmatprep.subr.bf16.mxu0 %v16249_v27  ;;  %v16318_v27 = vld [vmem:[%s21655_s10 + $0xe6c] ss:$16 sps:$4 sm:$0xff]  }
 0xa16   :  { %14222 = vmatpush3.bf16.msra.mxu1 %v16392_v32 }
 0xa17   :  { %14223 = vmatprep.subr.bf16.mxu1 %v16393_v20 }
 0xa18   :  { %11841 = vmatpush1.bf16.msra.mxu0 %v16247_v55  ;;  %v16316_v55 = vld [vmem:[%s21655_s10 + $0xe68] ss:$16 sps:$4 sm:$0xff]  }
 0xa19   :  { %11842 = vmatprep.subr.bf16.mxu0 %v16252_v22  ;;  %v16321_v22 = vld [vmem:[%s21655_s10 + $0xe8c] ss:$16 sps:$4 sm:$0xff]  }
 0xa1a   :  { %14224 = vmatpush3.bf16.msra.mxu1 %v16394_v48 }
 0xa1c   :  { %11843 = vmatpush1.bf16.msra.mxu0 %v16250_v54  ;;  %v16319_v54 = vld [vmem:[%s21655_s10 + $0xe88] ss:$16 sps:$4 sm:$0xff]  }
 0xa1d   :  { %11844 = vmatprep.subr.bf16.mxu0 %v16255_v26  ;;  %v16324_v26 = vld [vmem:[%s21655_s10 + $0xeac] ss:$16 sps:$4 sm:$0xff]  }
 0xa20   :  { %11845 = vmatpush1.bf16.msra.mxu0 %v16253_v49  ;;  %v16322_v49 = vld [vmem:[%s21655_s10 + $0xea8] ss:$16 sps:$4 sm:$0xff]  }
 0xa21   :  { %11846 = vmatprep.subr.bf16.mxu0 %v16258_v47  ;;  %v16327_v47 = vld [vmem:[%s21655_s10 + $0xecc] ss:$16 sps:$4 sm:$0xff]  }
 0xa24   :  { %11847 = vmatpush1.bf16.msra.mxu0 %v16256_v28  ;;  %v16325_v28 = vld [vmem:[%s21655_s10 + $0xec8] ss:$16 sps:$4 sm:$0xff]  }
 0xa25   :  { %11873 = vmatprep.subr.bf16.mxu0 %v16261_v61  ;;  %v16330_v61 = vld [vmem:[%s21655_s10 + $0xeec] ss:$16 sps:$4 sm:$0xff]  }
 0xa27   :  { %11865 = vmatmul.mubr.bf16.vlgmr.msra.gmra.mrb[32].mxu0 %v11670_v18 }
 0xa28   :  { %11874 = vmatpush1.bf16.msra.mxu0 %v16259_v50  ;;  %11905 = vmatprep.mubr.bf16.mxu0 %v16449_v35  ;;  %v16328_v50 = vld [vmem:[%s21655_s10 + $0xee8] ss:$16 sps:$4 sm:$0xff]  }
 0xa29   :  { %11875 = vmatprep.subr.bf16.mxu0 %v16264_v39  ;;  %v16331_v39 = vld [vmem:[%s21655_s10 + $0xf00] ss:$16 sps:$4 sm:$0xff]  }
 0xa2c   :  { %11876 = vmatpush1.bf16.msra.mxu0 %v16262_v8  ;;  %v16336_v8 = vld [vmem:[%s21655_s10 + $0xf24] ss:$16 sps:$4 sm:$0xff]  }
 0xa2d   :  { %11877 = vmatprep.subr.bf16.mxu0 %v16267_v5  ;;  %v16334_v5 = vld [vmem:[%s21655_s10 + $0xf20] ss:$16 sps:$4 sm:$0xff]  }
 0xa30   :  { %11878 = vmatpush1.bf16.msra.mxu0 %v16265_v19  ;;  %v16339_v19 = vld [vmem:[%s21655_s10 + $0xf44] ss:$16 sps:$4 sm:$0xff]  }
 0xa31   :  { %11879 = vmatprep.subr.bf16.mxu0 %v16270_v60  ;;  %v16337_v60 = vld [vmem:[%s21655_s10 + $0xf40] ss:$16 sps:$4 sm:$0xff]  }
 0xa34   :  { %11880 = vmatpush1.bf16.msra.mxu0 %v16268_v24  ;;  %v16342_v24 = vld [vmem:[%s21655_s10 + $0xf64] ss:$16 sps:$4 sm:$0xff]  }
 0xa35   :  { %11881 = vmatprep.subr.bf16.mxu0 %v16273_v17  ;;  %v16340_v17 = vld [vmem:[%s21655_s10 + $0xf60] ss:$16 sps:$4 sm:$0xff]  }
 0xa38   :  { %11882 = vmatpush1.bf16.msra.mxu0 %v16271_v45  ;;  %v16345_v45 = vld [vmem:[%s21655_s10 + $0xf84] ss:$16 sps:$4 sm:$0xff]  }
 0xa39   :  { %11883 = vmatprep.subr.bf16.mxu0 %v16276_v37  ;;  %v16343_v37 = vld [vmem:[%s21655_s10 + $0xf80] ss:$16 sps:$4 sm:$0xff]  }
 0xa3c   :  { %11884 = vmatpush1.bf16.msra.mxu0 %v16274_v63  ;;  %v16348_v63 = vld [vmem:[%s21655_s10 + $0xfa4] ss:$16 sps:$4 sm:$0xff]  }
 0xa3d   :  { %11885 = vmatprep.subr.bf16.mxu0 %v16279_v34  ;;  %v16346_v34 = vld [vmem:[%s21655_s10 + $0xfa0] ss:$16 sps:$4 sm:$0xff]  }
 0xa40   :  { %11886 = vmatpush1.bf16.msra.mxu0 %v16277_v36  ;;  %v16351_v36 = vld [vmem:[%s21655_s10 + $0xfc4] ss:$16 sps:$4 sm:$0xff]  }
 0xa41   :  { %11887 = vmatprep.subr.bf16.mxu0 %v16282_v43  ;;  %v16349_v43 = vld [vmem:[%s21655_s10 + $0xfc0] ss:$16 sps:$4 sm:$0xff]  }
 0xa44   :  { %11888 = vmatpush1.bf16.msra.mxu0 %v16280_v31  ;;  %v16354_v31 = vld [vmem:[%s21655_s10 + $0xfe4] ss:$16 sps:$4 sm:$0xff]  }
 0xa45   :  { %12115 = vmatprep.subr.bf16.mxu0 %v16285_v30  ;;  %v16352_v30 = vld [vmem:[%s21655_s10 + $0xfe0] ss:$16 sps:$4 sm:$0xff]  }
 0xa47   :  { %11906 = vmatmul.mubr.bf16.vlgmr.msra.gmra.mrb[36].mxu0 %v11670_v18  ;;  %v16333_v18 = vld [vmem:[%s21655_s10 + $0xf04] ss:$16 sps:$4 sm:$0xff]  }
 0xa48   :  { %12116 = vmatpush1.bf16.msra.mxu0 %v16283_v57  ;;  %12147 = vmatprep.mubr.bf16.mxu0 %v16449_v35  ;;  %v16357_v57 = vld [vmem:[%s21655_s10 + $0xf0c] ss:$16 sps:$4 sm:$0xff]  }
 0xa49   :  { %12117 = vmatprep.subr.bf16.mxu0 %v16288_v41  ;;  %v16355_v41 = vld [vmem:[%s21655_s10 + $0xf08] ss:$16 sps:$4 sm:$0xff]  }
 0xa4c   :  { %12118 = vmatpush1.bf16.msra.mxu0 %v16286_v33  ;;  %v16363_v33 = vld [vmem:[%s21655_s10 + $0xf4c] ss:$16 sps:$4 sm:$0xff]  }
 0xa4d   :  { %12119 = vmatprep.subr.bf16.mxu0 %v16291_v51  ;;  %v16366_v51 = vld [vmem:[%s21655_s10 + $0xf6c] ss:$16 sps:$4 sm:$0xff]  }
 0xa50   :  { %12120 = vmatpush1.bf16.msra.mxu0 %v16289_v46  ;;  %v16372_v46 = vld [vmem:[%s21655_s10 + $0xfac] ss:$16 sps:$4 sm:$0xff]  }
 0xa51   :  { %12121 = vmatprep.subr.bf16.mxu0 %v16294_v0  ;;  %v16370_v0 = vld [vmem:[%s21655_s10 + $0xfa8] ss:$16 sps:$4 sm:$0xff]  }
 0xa54   :  { %12122 = vmatpush1.bf16.msra.mxu0 %v16292_v42  ;;  %v16378_v42 = vld [vmem:[%s21655_s10 + $0xfec] ss:$16 sps:$4 sm:$0xff]  }
 0xa55   :  { %12123 = vmatprep.subr.bf16.mxu0 %v16297_v23  ;;  %v16376_v23 = vld [vmem:[%s21655_s10 + $0xfe8] ss:$16 sps:$4 sm:$0xff]  }
 0xa58   :  { %12124 = vmatpush1.bf16.msra.mxu0 %v16295_v21  ;;  %v16395_v21 = vld [vmem:[%s21657_s12 + $0xc0] sm:$0xff]  }
 0xa59   :  { %12125 = vmatprep.subr.bf16.mxu0 %v16300_v9  ;;  %14231 = vmatprep.subr.bf16.mxu1 %v16395_v21  ;;  %v7923_v9 = vlaneseq }
 0xa5b   :  { %v7924_v6 = vshrl.u32 %v7923_v9, 7 }
 0xa5c   :  { %12126 = vmatpush1.bf16.msra.mxu0 %v16298_v62  ;;  %v7921_v62 = vld [vmem:[%s21656_s11] sm:$0xf] }
 0xa5d   :  { %12127 = vmatprep.subr.bf16.mxu0 %v16303_v15  ;;  %v7925_v3 = vsub.s32 0, %v7924_v6  ;;  %v7929_v15 = vsub.s32 1, %v7924_v6 }
 0xa5f   :  { %v7926_v56 = vrot.slane %v7921_v62, %v7925_v3  ;;  %v7930_v25 = vrot.slane %v7921_v62, %v7929_v15 }
 0xa60   :  { %12128 = vmatpush1.bf16.msra.mxu0 %v16301_v16 }
 0xa61   :  { %12129 = vmatprep.subr.bf16.mxu0 %v16306_v40 }
 0xa64   :  { %12130 = vmatpush1.bf16.msra.mxu0 %v16304_v4 }
 0xa65   :  { %12156 = vmatprep.subr.bf16.mxu0 %v16309_v44 }
 0xa67   :  { %12148 = vmatmul.mubr.bf16.vlgmr.msra.gmra.mrb[32].mxu0 %v11953_v10 }
 0xa68   :  { %12157 = vmatpush1.bf16.msra.mxu0 %v16307_v12  ;;  %12188 = vmatprep.mubr.bf16.mxu0 %v16449_v35 }
 0xa69   :  { %12158 = vmatprep.subr.bf16.mxu0 %v16312_v52 }
 0xa6c   :  { %12159 = vmatpush1.bf16.msra.mxu0 %v16310_v58 }
 0xa6d   :  { %12160 = vmatprep.subr.bf16.mxu0 %v16315_v53  ;;  %v16396_v53 = vld [vmem:[%s21657_s12 + $0x80] sm:$0xff]  }
 0xa70   :  { %12161 = vmatpush1.bf16.msra.mxu0 %v16313_v13 }
 0xa71   :  { %12162 = vmatprep.subr.bf16.mxu0 %v16318_v27  ;;  %v16397_v27 = vld [vmem:[%s21657_s12 + $0xc8] sm:$0xff]  }
 0xa74   :  { %12163 = vmatpush1.bf16.msra.mxu0 %v16316_v55  ;;  %v16398_v55 = vld [vmem:[%s21657_s12 + $0x88] sm:$0xff]  }
 0xa75   :  { %12164 = vmatprep.subr.bf16.mxu0 %v16321_v22  ;;  %v16399_v22 = vld [vmem:[%s21657_s12 + $0xd0] sm:$0xff]  }
 0xa78   :  { %12165 = vmatpush1.bf16.msra.mxu0 %v16319_v54  ;;  %v16400_v54 = vld [vmem:[%s21657_s12 + $0x90] sm:$0xff]  }
 0xa79   :  { %12166 = vmatprep.subr.bf16.mxu0 %v16324_v26  ;;  %v16401_v26 = vld [vmem:[%s21657_s12 + $0xd8] sm:$0xff]  }
 0xa7c   :  { %12167 = vmatpush1.bf16.msra.mxu0 %v16322_v49  ;;  %v16402_v49 = vld [vmem:[%s21657_s12 + $0x98] sm:$0xff]  }
 0xa7d   :  { %12168 = vmatprep.subr.bf16.mxu0 %v16327_v47  ;;  %v16403_v47 = vld [vmem:[%s21657_s12 + $0xe0] sm:$0xff]  }
 0xa80   :  { %12169 = vmatpush1.bf16.msra.mxu0 %v16325_v28  ;;  %v16404_v28 = vld [vmem:[%s21657_s12 + $0xa0] sm:$0xff]  }
 0xa81   :  { %12170 = vmatprep.subr.bf16.mxu0 %v16330_v61  ;;  %v16405_v61 = vld [vmem:[%s21657_s12 + $0xe8] sm:$0xff]  }
 0xa84   :  { %12171 = vmatpush1.bf16.msra.mxu0 %v16328_v50  ;;  %v7933_v50 = vsub.s32 2, %v7924_v6 }
 0xa85   :  { %12398 = vmatprep.subr.bf16.mxu0 %v16333_v18  ;;  %v16406_v18 = vld [vmem:[%s21657_s12 + $0xa8] sm:$0xff]  }
 0xa87   :  { %12189 = vmatmul.mubr.bf16.vlgmr.msra.gmra.mrb[36].mxu0 %v11953_v10 }
 0xa88   :  { %12399 = vmatpush1.bf16.msra.mxu0 %v16331_v39  ;;  %12430 = vmatprep.mubr.bf16.mxu0 %v16449_v35  ;;  %v7937_v39 = vsub.s32 3, %v7924_v6 }
 0xa89   :  { %12400 = vmatprep.subr.bf16.mxu0 %v16336_v8  ;;  %v16407_v8 = vld [vmem:[%s21657_s12 + $0xf0] sm:$0xff]  }
 0xa8c   :  { %12401 = vmatpush1.bf16.msra.mxu0 %v16334_v5  ;;  %v7934_v5 = vrot.slane %v7921_v62, %v7933_v50 }
 0xa8d   :  { %12402 = vmatprep.subr.bf16.mxu0 %v16339_v19  ;;  %v7938_v19 = vrot.slane %v7921_v62, %v7937_v39 }
 0xa90   :  { %12403 = vmatpush1.bf16.msra.mxu0 %v16337_v60  ;;  %v16408_v60 = vld [vmem:[%s21657_s12 + $0xb0] sm:$0xff]  }
 0xa91   :  { %12404 = vmatprep.subr.bf16.mxu0 %v16342_v24  ;;  %v16409_v24 = vld [vmem:[%s21657_s12 + $0xf8] sm:$0xff]  }
 0xa94   :  { %12405 = vmatpush1.bf16.msra.mxu0 %v16340_v17 }
 0xa95   :  { %12406 = vmatprep.subr.bf16.mxu0 %v16345_v45 }
 0xa98   :  { %12407 = vmatpush1.bf16.msra.mxu0 %v16343_v37 }
 0xa99   :  { %12408 = vmatprep.subr.bf16.mxu0 %v16348_v63 }
 0xa9c   :  { %12409 = vmatpush1.bf16.msra.mxu0 %v16346_v34 }
 0xa9d   :  { %12410 = vmatprep.subr.bf16.mxu0 %v16351_v36  ;;  %v16410_v36 = vld [vmem:[%s21657_s12 + $0xb8] sm:$0xff]   ;;  %s16450_s12 = smov [#allocation5]  }
 0xa9e   :  { %s12842_s11 = sshll.u32 %s16450_s12, 4  ;;  %s12843_s11 = int_to_ptr.vmem [resolvable:$true] %s12842_s11 }
 0xa9f   :  { %s16421_s19 = scalar_lea.vmem %s12843_s11, 32  ;;  %p16426_p1 = scmp.lt.s32.totalorder %s12843_s11, %s12843_s11 }
 0xaa0   :  { %12411 = vmatpush1.bf16.msra.mxu0 %v16349_v43  ;;  %p16422_p0 = scmp.ne.s32.totalorder %s12843_s11, %s16421_s19  ;;  %p16427_p2 = scmp.lt.s32.totalorder %s16421_s19, %s16421_s19 }
 0xaa1   :  { %12412 = vmatprep.subr.bf16.mxu0 %v16354_v31 }
 0xaa2   :  { %p16428_p3 = por %p16427_p2, %p16426_p1 }
 0xaa4   :  { %12413 = vmatpush1.bf16.msra.mxu0 %v16352_v30  ;;  %p16429_p4 = pnand %p16428_p3, %p16422_p0 }
 0xaa5   :  { %12439 = vmatprep.subr.bf16.mxu0 %v16357_v57 }
 0xaa7   :  { %12431 = vmatmul.mubr.bf16.vlgmr.msra.gmra.mrb[32].mxu0 %v12236_v7 }
 0xaa8   :  { %12440 = vmatpush1.bf16.msra.mxu0 %v16355_v41  ;;  %12471 = vmatprep.mubr.bf16.mxu0 %v16449_v35  ;;  %v16364_v35 = vld [vmem:[%s21655_s10 + $0xf68] ss:$16 sps:$4 sm:$0xff]  }
 0xaa9   :  { %12441 = vmatprep.subr.bf16.mxu0 %v16360_v1 }
 0xaac   :  { %12442 = vmatpush1.bf16.msra.mxu0 %v16358_v59 }
 0xaad   :  { %12443 = vmatprep.subr.bf16.mxu0 %v16363_v33 }
 0xab0   :  { %12444 = vmatpush1.bf16.msra.mxu0 %v16361_v14 }
 0xab1   :  { %12445 = vmatprep.subr.bf16.mxu0 %v16366_v51  ;;  %v13904_v51 = vld [vmem:[%s21658_s13] ss:$0 sm:$0xff] }
 0xab4   :  { %12446 = vmatpush1.bf16.msra.mxu0 %v16364_v35 }
 0xab5   :  { %12447 = vmatprep.subr.bf16.mxu0 %v16369_v38 }
 0xab8   :  { %12448 = vmatpush1.bf16.msra.mxu0 %v16367_v11 }
 0xab9   :  { %12449 = vmatprep.subr.bf16.mxu0 %v16372_v46 }
 0xabc   :  { %12450 = vmatpush1.bf16.msra.mxu0 %v16370_v0 }
 0xabd   :  { %12451 = vmatprep.subr.bf16.mxu0 %v16375_v29 }
 0xac0   :  { %12452 = vmatpush1.bf16.msra.mxu0 %v16373_v2 }
 0xac1   :  { %12453 = vmatprep.subr.bf16.mxu0 %v16378_v42 }
 0xac4   :  { %12454 = vmatpush1.bf16.msra.mxu0 %v16376_v23 }
 0xac7   :  { %12472 = vmatmul.mubr.bf16.vlgmr.msra.gmra.mrb[36].mxu0 %v12236_v7 }
 0xb7a   :  { %v12432_v16 = vpop.f32.mrb[32].mxu0 }
 0xb7b   :  { %v14745_v40 = vadd.f32 %v12432_v16, %v7926_v56  ;;  %v12434_v32 = vpop.f32.mrb[33].mxu0 }
 0xb7c   :  { %v14746_v4 = vadd.f32 %v12434_v32, %v7930_v25  ;;  %v12436_v44 = vpop.f32.mrb[34].mxu0 }
 0xb7d   :  { %v12484_v12 = vmax.f32 %v14745_v40, 0.0  ;;  %v12437_v10 = vpop.f32.mrb[35].mxu0 }
 0xb7e   :  { %v12485_v52 = vmax.f32 %v14746_v4, 0.0 }
 0xb7f   :  { %v12488_v13 = vpack.c.bf16 %v12484_v12, %v12484_v12 }
 0xb80   :  { %v12489_v58 = vpack.c.bf16 %v12485_v52, %v12485_v52 }
 0xb82   :  { %12787 = vmatprep.mubr.bf16.mxu1 %v12489_v58 }
 0xb83   :  { %12788 = vmatmul.mubr.bf16.vlgmr.msra.gmra.mrb[64].mxu1 %v12488_v13 }
 0xb84   :  { %14232 = vmatpush3.bf16.msra.mxu1 %v16396_v53 }
 0xb85   :  { %14233 = vmatprep.subr.bf16.mxu1 %v16397_v27 }
 0xb88   :  { %14234 = vmatpush3.bf16.msra.mxu1 %v16398_v55 }
 0xb89   :  { %14235 = vmatprep.subr.bf16.mxu1 %v16399_v22 }
 0xb8c   :  { %14236 = vmatpush3.bf16.msra.mxu1 %v16400_v54 }
 0xb8d   :  { %14237 = vmatprep.subr.bf16.mxu1 %v16401_v26 }
 0xb90   :  { %14238 = vmatpush3.bf16.msra.mxu1 %v16402_v49 }
 0xb91   :  { %14239 = vmatprep.subr.bf16.mxu1 %v16403_v47 }
 0xb94   :  { %14240 = vmatpush3.bf16.msra.mxu1 %v16404_v28 }
 0xb95   :  { %14241 = vmatprep.subr.bf16.mxu1 %v16405_v61 }
 0xb98   :  { %14242 = vmatpush3.bf16.msra.mxu1 %v16406_v18 }
 0xb99   :  { %14243 = vmatprep.subr.bf16.mxu1 %v16407_v8 }
 0xb9a   :  { %v12473_v17 = vpop.f32.mrb[36].mxu0 }
 0xb9b   :  { %v14747_v45 = vadd.f32 %v12473_v17, %v7934_v5  ;;  %v12475_v37 = vpop.f32.mrb[37].mxu0 }
 0xb9c   :  { %v14748_v63 = vadd.f32 %v12475_v37, %v7938_v19  ;;  %v12477_v34 = vpop.f32.mrb[38].mxu0  ;;  %14244 = vmatpush3.bf16.msra.mxu1 %v16408_v60 }
 0xb9d   :  { %v12486_v43 = vmax.f32 %v14747_v45, 0.0  ;;  %v12478_v31 = vpop.f32.mrb[39].mxu0  ;;  %14245 = vmatprep.subr.bf16.mxu1 %v16409_v24 }
 0xb9e   :  { %v12487_v30 = vmax.f32 %v14748_v63, 0.0 }
 0xb9f   :  { %v12490_v41 = vpack.c.bf16 %v12486_v43, %v12486_v43 }
 0xba0   :  { %v12491_v57 = vpack.c.bf16 %v12487_v30, %v12487_v30  ;;  %14246 = vmatpush3.bf16.msra.mxu1 %v16410_v36 }
 0xba2   :  { %12827 = vmatprep.mubr.bf16.mxu1 %v12491_v57 }
 0xba3   :  { %12828 = vmatmul.mubr.bf16.vlgmr.msra.gmra.mrb[68].mxu1 %v12490_v41 }
 0xc56   :  { %v14225_v7 = vpop.f32.mrb[64].mxu1 }
 0xc57   :  { %v14226_v1 = vpop.f32.mrb[65].mxu1 }
 0xc58   :  { %v14227_v59 = vadd.f32 %v14226_v1, %v14225_v7  ;;  %v14228_v33 = vpop.f32.mrb[66].mxu1 }
 0xc59   :  { %v14229_v14 = vpop.f32.mrb[67].mxu1 }
 0xc5a   :  { %v12790_v11 = vadd.f32 %v14227_v59, %v13904_v51 }
 0xc76   :  { %v14247_v35 = vpop.f32.mrb[68].mxu1 }
 0xc77   :  { %v14248_v38 = vpop.f32.mrb[69].mxu1 }
 0xc78   :  { %v14249_v46 = vadd.f32 %v14248_v38, %v14247_v35  ;;  %v14250_v0 = vpop.f32.mrb[70].mxu1 }
 0xc79   :  { %v14251_v29 = vpop.f32.mrb[71].mxu1 }
 0xc7a   :  { %v12830_v2 = vadd.f32 %v14249_v46, %v12790_v11 }
 0xc7c   :  { %12835 = vst [vmem:[#allocation5] sm:$0x3] %v12830_v2 }
 0xc7d   :  { %16432 = shalt.err (!%p16429_p4)
}
 0xc7e   :  { %s16433_s29 = scalar_lea.hbm %s21659_s14, 32 }
 0xc7f   :  { %p16434_p5 = scmp.ne.s32.totalorder %s21659_s14, %s16433_s29  ;;  %p16437_p6 = scmp.lt.u32.totalorder %s16433_s29, %s21659_s14 }
 0xc81   :  { %p16439_p7 = pnand %p16437_p6, %p16434_p5 }
 0xc83   :  { %16442 = shalt.err (!%p16439_p7)
}
 0xc84   :  { %12845 = dma.vmem_to_hbm [thread:$0]  %s12843_s11, 32, %s21659_s14, [#allocation6]  }
 0xc85   :  { %16443 = dma.done.wait [#allocation6], 32  }
 0xc86   :  { %16444 = vsyncadd [#allocation6], 4294967264 }
 0xc87   :  { %12849 = vsyncpa [#allocation6], 1 }

</bundles_post_ra>
